<compile_context>
chip_gen: v6e
topology: v6e:2x2x1
jax: 0.10.0
libtpu: 0.0.40
codegen_flags: <defaults>
</compile_context>

<pallas_src>
import numpy as np
import jax
import jax.numpy as jnp
from jax import lax
from jax.experimental import pallas as pl
from jax.experimental.pallas import tpu as pltpu

IMG = 28                 # input spatial size (28x28 MNIST)
SP = 896                 # padded per-image stride = 7*128 (lane aligned)
C1, C2, C3 = 8, 16, 32   # conv channel counts
NCLS = 10
NPAD = 128               # lane-dense padded class dim (output store / FC N)
GP = 16                  # per-channel class group width in the block-diag FC
_NEG = -1e30             # logit value for padded classes (exp -> 0)
_TAPS = [(dy, dx) for dy in (-1, 0, 1) for dx in (-1, 0, 1)]


# ----------------------------- fused Pallas kernel --------------------------

def _cnn_fused_kernel(x_ref, mask_ref, w1_ref, b1_ref, w2_ref, b2_ref,
                      w3_ref, b3_ref, wfc_ref, fcm_ref, fcr_ref, bfc_ref,
                      out_ref):
    n = x_ref.shape[1]               # BT * SP  (multiple of 128)
    bt = n // SP

    def tap_shift(act, off):
        # result[:, t] = act[:, (t + off) % n]; off is a static python int.
        if off % n == 0:
            return act
        return pltpu.roll(act, shift=(-off) % n, axis=1)

    def conv3x3_relu(act, w_ref, b_ref, dil, mask_base):
        """Dilated 3x3 conv as 9 accumulated per-tap matmuls (a-trous grid).

        Masks encode zero-padding semantics at each destination position;
        the center tap is masked too (keeps dead columns benign).
        """
        cin = w_ref.shape[2]
        acc = None
        for tap, (dy, dx) in enumerate(_TAPS):
            off = (dy * IMG + dx) * dil
            m = mask_ref[mask_base + tap:mask_base + tap + 1, :]      # (1, n)
            src = tap_shift(act, off) * m                             # (cin, n)
            if cin == 1:
                # K=1 "matmul" is just a broadcast multiply; keep it on the VPU.
                t = w_ref[tap] * src                                  # (cout, n)
            else:
                t = jnp.dot(w_ref[tap], src,
                            preferred_element_type=jnp.float32)       # (cout, n)
            acc = t if acc is None else acc + t
        return jnp.maximum(acc + b_ref[...], 0.0)

    def maxpool2x2(act, step):
        # Fused 2x2 / stride-2 max pool, a-trous style: results are valid at
        # grid positions that are multiples of 2*step; other columns are never
        # consumed downstream (masked taps / zero FC weight rows).
        m = jnp.maximum(act, tap_shift(act, step))
        return jnp.maximum(m, tap_shift(m, step * IMG))

    a = conv3x3_relu(x_ref[...], w1_ref, b1_ref, dil=1, mask_base=0)   # (8,  n)
    a = maxpool2x2(a, 1)                                               # valid @ 2k
    a = conv3x3_relu(a, w2_ref, b2_ref, dil=2, mask_base=9)            # (16, n)
    a = maxpool2x2(a, 2)                                               # valid @ 4k
    a = conv3x3_relu(a, w3_ref, b3_ref, dil=4, mask_base=18)           # (32, n)

    # ---- FC + softmax, no activation repack ---------------------------------
    # logits[b, k] = sum_{c,p} a[c, b*SP+p] * Wexp[p, c*GP+k]   (block diag in c)
    wfc = wfc_ref[...]            # (SP, C3*GP)  dense, lane-aligned
    fcm = fcm_ref[...]            # (C3, C3*GP)  block-diagonal 0/1 mask
    fcr = fcr_ref[...]            # (C3*GP, NPAD) group-sum reduction matrix
    bfc = bfc_ref[...]            # (1, NPAD)    real bias + _NEG padding
    rows = []
    for b in range(bt):
        a_img = a[:, b * SP:(b + 1) * SP]                              # (32, 896)
        p = jnp.dot(a_img, wfc, preferred_element_type=jnp.float32)    # (32, 512)
        col = jnp.sum(p * fcm, axis=0, keepdims=True)                  # (1, 512)
        rows.append(jnp.dot(col, fcr,
                            preferred_element_type=jnp.float32) + bfc)  # (1, 128)
    logits = rows[0] if bt == 1 else jnp.concatenate(rows, axis=0)      # (bt, 128)

    mx = jnp.max(logits, axis=-1, keepdims=True)
    e = jnp.exp(logits - mx)                          # padded classes -> exactly 0
    probs = e * pl.reciprocal(jnp.sum(e, axis=-1, keepdims=True), approx=True)
    out_ref[0] = probs


# ----------------------------- host-side prep (outside jit) -----------------

def prepare_params(params, bt=1):
    """One-time reshape/expansion of PyTorch-layout params for the kernel.

    `bt` is the batch-tile size (images per grid step); all prepared arrays
    are independent of the total batch size.
    """
    n = bt * SP
    prep = {}

    # Conv weights -> (9, Cout, Cin), taps ordered like _TAPS; biases (Cout,1).
    for name, cout in (('1', C1), ('2', C2), ('3', C3)):
        w = params['w' + name]                              # (cout, cin, 3, 3)
        cin = w.shape[1]
        prep['w' + name] = jnp.transpose(w, (2, 3, 0, 1)).reshape(9, cout, cin)
        prep['b' + name] = params['b' + name].reshape(cout, 1)

    # FC weight on the a-trous 28x28 grid, block-grouped per channel:
    #   Wexp[112*i + 4*j, c*GP + k] = wfc[k, c, i, j]   (k < 10), zero elsewhere.
    wfc = np.asarray(params['wfc'], np.float32).reshape(NCLS, C3, 7, 7)
    wexp = np.zeros((SP, C3, GP), np.float32)
    for i in range(7):
        for j in range(7):
            wexp[112 * i + 4 * j, :, :NCLS] = wfc[:, :, i, j].T
    prep['wfc'] = jnp.asarray(wexp.reshape(SP, C3 * GP))

    # Block-diagonal channel mask (keeps only c_act == c_weight terms).
    fcm = np.zeros((C3, C3 * GP), np.float32)
    for c in range(C3):
        fcm[c, c * GP:(c + 1) * GP] = 1.0
    prep['fcmask'] = jnp.asarray(fcm)

    # Group-sum reduction matrix: logits[k] = sum_c col[c*GP + k].
    fcr = np.zeros((C3 * GP, NPAD), np.float32)
    for c in range(C3):
        for k in range(NCLS):
            fcr[c * GP + k, k] = 1.0
    prep['fcreduce'] = jnp.asarray(fcr)

    # Bias padded to 128 classes; padded classes get a huge negative logit.
    bfc = np.full((1, NPAD), _NEG, np.float32)
    bfc[0, :NCLS] = np.asarray(params['bfc'], np.float32)
    prep['bfc'] = jnp.asarray(bfc)

    # Per-tap validity masks (zero-padding semantics) for dilations 1, 2, 4,
    # tiled to the batch-tile width (independent of total batch size).
    ys = np.repeat(np.arange(IMG), IMG)
    xs = np.tile(np.arange(IMG), IMG)
    pad = np.full(SP - IMG * IMG, -10 ** 6)                 # dead columns
    ys = np.tile(np.concatenate([ys, pad]), bt)
    xs = np.tile(np.concatenate([xs, pad]), bt)
    masks = np.zeros((27, n), np.float32)
    for di, dil in enumerate((1, 2, 4)):
        for t, (dy, dx) in enumerate(_TAPS):
            ok = ((ys + dy * dil >= 0) & (ys + dy * dil < IMG) &
                  (xs + dx * dil >= 0) & (xs + dx * dil < IMG))
            masks[di * 9 + t] = ok.astype(np.float32)
    prep['masks'] = jnp.asarray(masks)
    return prep


# ----------------------------- pallas_call wrapper ---------------------------

def _const_spec(shape):
    nd = len(shape)
    return pl.BlockSpec(shape, lambda i, _nd=nd: (0,) * _nd)


def cnn_forward_pallas(x_nchw, prep):
    B = x_nchw.shape[0]
    bt = prep['masks'].shape[1] // SP          # batch-tile size (images / step)
    num_tiles = -(-B // bt)
    bp = num_tiles * bt

    # (B,1,28,28) -> (1, bp*896): columns = b*896 + y*28 + x, zero dead zone.
    x2 = x_nchw.reshape(B, IMG * IMG)
    x2 = jnp.pad(x2, ((0, bp - B), (0, SP - IMG * IMG))).reshape(1, bp * SP)

    consts = (prep['masks'], prep['w1'], prep['b1'], prep['w2'], prep['b2'],
              prep['w3'], prep['b3'], prep['wfc'], prep['fcmask'],
              prep['fcreduce'], prep['bfc'])

    out = pl.pallas_call(
        _cnn_fused_kernel,
        out_shape=jax.ShapeDtypeStruct((num_tiles, bt, NPAD), jnp.float32),
        grid=(num_tiles,),
        in_specs=[pl.BlockSpec((1, bt * SP), lambda i: (0, i))] +
                 [_const_spec(a.shape) for a in consts],
        out_specs=pl.BlockSpec((1, bt, NPAD), lambda i: (i, 0, 0)),
        compiler_params=pltpu.CompilerParams(
            dimension_semantics=("parallel",),
            vmem_limit_bytes=32 * 1024 * 1024),
    )(x2, *consts)

    return out.reshape(bp, NPAD)[:B, :NCLS]


# ----------------------------- pure-JAX reference ---------------------------

def cnn_forward_reference(x_nchw, params):
    def conv(x, w, b):
        y = lax.conv_general_dilated(
            x, w, window_strides=(1, 1), padding=((1, 1), (1, 1)),
            dimension_numbers=('NCHW', 'OIHW', 'NCHW'))
        return jnp.maximum(y + b.reshape(1, -1, 1, 1), 0.0)

    def pool(x):
        B, C, H, W = x.shape
        return x.reshape(B, C, H // 2, 2, W // 2, 2).max(axis=(3, 5))

    x = pool(conv(x_nchw, params['w1'], params['b1']))
    x = pool(conv(x, params['w2'], params['b2']))
    x = conv(x, params['w3'], params['b3'])
    x = x.reshape(x.shape[0], -1)
    logits = x @ params['wfc'].T + params['bfc']
    return jax.nn.softmax(logits, axis=1)


# ----------------------------- main -----------------------------------------

if __name__ == "__main__":
    key = jax.random.PRNGKey(0)
    ks = jax.random.split(key, 9)
    B = 2
    x = jax.random.normal(ks[0], (B, 1, 28, 28), jnp.float32)

    # Deterministic synthetic parameters (PyTorch layouts: OIHW conv weights,
    # (out_features, in_features) linear weight).
    params = {
        'w1': 0.10 * jax.random.normal(ks[1], (C1, 1, 3, 3), jnp.float32),
        'b1': 0.05 * jax.random.normal(ks[2], (C1,), jnp.float32),
        'w2': 0.10 * jax.random.normal(ks[3], (C2, C1, 3, 3), jnp.float32),
        'b2': 0.05 * jax.random.normal(ks[4], (C2,), jnp.float32),
        'w3': 0.10 * jax.random.normal(ks[5], (C3, C2, 3, 3), jnp.float32),
        'b3': 0.05 * jax.random.normal(ks[6], (C3,), jnp.float32),
        'wfc': 0.05 * jax.random.normal(ks[7], (NCLS, C3 * 7 * 7), jnp.float32),
        'bfc': 0.05 * jax.random.normal(ks[8], (NCLS,), jnp.float32),
    }

    # bt=1 -> grid=(2,): exercises the batch-tiled, "parallel" grid path.
    prep = prepare_params(params, bt=1)        # one-time, outside the hot path
    fwd = jax.jit(cnn_forward_pallas)
    out = jax.block_until_ready(fwd(x, prep))

    ref = cnn_forward_reference(x, params)
    assert out.shape == (B, NCLS), out.shape
    assert jnp.allclose(jnp.sum(out, axis=1), 1.0, atol=5e-3)
    assert jnp.allclose(out, ref, atol=2e-3, rtol=2e-3), \
        f"max abs diff {jnp.max(jnp.abs(out - ref))}"

    print("KERNEL_OK")
</pallas_src>

<mosaic_0001>
module attributes {stable_mosaic.version = 11 : i64} {
  func.func @_cnn_fused_kernel(%arg0: i32, %arg1: memref<1x896xf32, #tpu.memory_space<vmem>>, %arg2: memref<27x896xf32, #tpu.memory_space<vmem>>, %arg3: memref<9x8x1xf32, #tpu.memory_space<vmem>>, %arg4: memref<8x1xf32, #tpu.memory_space<vmem>>, %arg5: memref<9x16x8xf32, #tpu.memory_space<vmem>>, %arg6: memref<16x1xf32, #tpu.memory_space<vmem>>, %arg7: memref<9x32x16xf32, #tpu.memory_space<vmem>>, %arg8: memref<32x1xf32, #tpu.memory_space<vmem>>, %arg9: memref<896x512xf32, #tpu.memory_space<vmem>>, %arg10: memref<32x512xf32, #tpu.memory_space<vmem>>, %arg11: memref<512x128xf32, #tpu.memory_space<vmem>>, %arg12: memref<1x128xf32, #tpu.memory_space<vmem>>, %arg13: memref<1x1x128xf32, #tpu.memory_space<vmem>>) attributes {dimension_semantics = [#tpu.dimension_semantics<parallel>], iteration_bounds = array<i64: 2>, scalar_prefetch = 0 : i64, scratch_operands = 0 : i64, tpu.core_type = #tpu.core_type<tc>, window_params = [{transform_indices = @transform_0, window_bounds = array<i64: 1, 896>}, {pipeline_mode = #tpu.pipeline_mode<synchronous>, transform_indices = @transform_1, window_bounds = array<i64: 27, 896>}, {pipeline_mode = #tpu.pipeline_mode<synchronous>, transform_indices = @transform_2, window_bounds = array<i64: 9, 8, 1>}, {pipeline_mode = #tpu.pipeline_mode<synchronous>, transform_indices = @transform_3, window_bounds = array<i64: 8, 1>}, {pipeline_mode = #tpu.pipeline_mode<synchronous>, transform_indices = @transform_4, window_bounds = array<i64: 9, 16, 8>}, {pipeline_mode = #tpu.pipeline_mode<synchronous>, transform_indices = @transform_5, window_bounds = array<i64: 16, 1>}, {pipeline_mode = #tpu.pipeline_mode<synchronous>, transform_indices = @transform_6, window_bounds = array<i64: 9, 32, 16>}, {pipeline_mode = #tpu.pipeline_mode<synchronous>, transform_indices = @transform_7, window_bounds = array<i64: 32, 1>}, {pipeline_mode = #tpu.pipeline_mode<synchronous>, transform_indices = @transform_8, window_bounds = array<i64: 896, 512>}, {pipeline_mode = #tpu.pipeline_mode<synchronous>, transform_indices = @transform_9, window_bounds = array<i64: 32, 512>}, {pipeline_mode = #tpu.pipeline_mode<synchronous>, transform_indices = @transform_10, window_bounds = array<i64: 512, 128>}, {pipeline_mode = #tpu.pipeline_mode<synchronous>, transform_indices = @transform_11, window_bounds = array<i64: 1, 128>}, {transform_indices = @transform_12, window_bounds = array<i64: 1, 1, 128>}]} {
    %c0 = arith.constant 0 : index
    %c0_0 = arith.constant 0 : index
    %0 = vector.load %arg1[%c0, %c0_0] : memref<1x896xf32, #tpu.memory_space<vmem>>, vector<1x896xf32>
    %c0_1 = arith.constant 0 : index
    %c0_2 = arith.constant 0 : index
    %1 = vector.load %arg2[%c0_1, %c0_2] : memref<27x896xf32, #tpu.memory_space<vmem>>, vector<1x896xf32>
    %c29_i32 = arith.constant 29 : i32
    %2 = tpu.dynamic_rotate %0 by %c29_i32 dim 1 : vector<1x896xf32>, i32 -> vector<1x896xf32>
    %3 = arith.mulf %2, %1 : vector<1x896xf32>
    %c0_3 = arith.constant 0 : index
    %c0_4 = arith.constant 0 : index
    %c0_5 = arith.constant 0 : index
    %4 = vector.load %arg3[%c0_3, %c0_4, %c0_5] : memref<9x8x1xf32, #tpu.memory_space<vmem>>, vector<1x8x1xf32>
    %5 = vector.shape_cast %4 : vector<1x8x1xf32> to vector<8x1xf32>
    %6 = vector.broadcast %5 : vector<8x1xf32> to vector<8x896xf32>
    %7 = vector.broadcast %3 : vector<1x896xf32> to vector<8x896xf32>
    %8 = arith.mulf %6, %7 : vector<8x896xf32>
    %c1 = arith.constant 1 : index
    %c0_6 = arith.constant 0 : index
    %9 = vector.load %arg2[%c1, %c0_6] : memref<27x896xf32, #tpu.memory_space<vmem>>, vector<1x896xf32>
    %c28_i32 = arith.constant 28 : i32
    %10 = tpu.dynamic_rotate %0 by %c28_i32 dim 1 : vector<1x896xf32>, i32 -> vector<1x896xf32>
    %11 = arith.mulf %10, %9 : vector<1x896xf32>
    %c1_7 = arith.constant 1 : index
    %c0_8 = arith.constant 0 : index
    %c0_9 = arith.constant 0 : index
    %12 = vector.load %arg3[%c1_7, %c0_8, %c0_9] : memref<9x8x1xf32, #tpu.memory_space<vmem>>, vector<1x8x1xf32>
    %13 = vector.shape_cast %12 : vector<1x8x1xf32> to vector<8x1xf32>
    %14 = vector.broadcast %13 : vector<8x1xf32> to vector<8x896xf32>
    %15 = vector.broadcast %11 : vector<1x896xf32> to vector<8x896xf32>
    %16 = arith.mulf %14, %15 : vector<8x896xf32>
    %17 = arith.addf %8, %16 : vector<8x896xf32>
    %c2 = arith.constant 2 : index
    %c0_10 = arith.constant 0 : index
    %18 = vector.load %arg2[%c2, %c0_10] : memref<27x896xf32, #tpu.memory_space<vmem>>, vector<1x896xf32>
    %c27_i32 = arith.constant 27 : i32
    %19 = tpu.dynamic_rotate %0 by %c27_i32 dim 1 : vector<1x896xf32>, i32 -> vector<1x896xf32>
    %20 = arith.mulf %19, %18 : vector<1x896xf32>
    %c2_11 = arith.constant 2 : index
    %c0_12 = arith.constant 0 : index
    %c0_13 = arith.constant 0 : index
    %21 = vector.load %arg3[%c2_11, %c0_12, %c0_13] : memref<9x8x1xf32, #tpu.memory_space<vmem>>, vector<1x8x1xf32>
    %22 = vector.shape_cast %21 : vector<1x8x1xf32> to vector<8x1xf32>
    %23 = vector.broadcast %22 : vector<8x1xf32> to vector<8x896xf32>
    %24 = vector.broadcast %20 : vector<1x896xf32> to vector<8x896xf32>
    %25 = arith.mulf %23, %24 : vector<8x896xf32>
    %26 = arith.addf %17, %25 : vector<8x896xf32>
    %c3 = arith.constant 3 : index
    %c0_14 = arith.constant 0 : index
    %27 = vector.load %arg2[%c3, %c0_14] : memref<27x896xf32, #tpu.memory_space<vmem>>, vector<1x896xf32>
    %c1_i32 = arith.constant 1 : i32
    %28 = tpu.dynamic_rotate %0 by %c1_i32 dim 1 : vector<1x896xf32>, i32 -> vector<1x896xf32>
    %29 = arith.mulf %28, %27 : vector<1x896xf32>
    %c3_15 = arith.constant 3 : index
    %c0_16 = arith.constant 0 : index
    %c0_17 = arith.constant 0 : index
    %30 = vector.load %arg3[%c3_15, %c0_16, %c0_17] : memref<9x8x1xf32, #tpu.memory_space<vmem>>, vector<1x8x1xf32>
    %31 = vector.shape_cast %30 : vector<1x8x1xf32> to vector<8x1xf32>
    %32 = vector.broadcast %31 : vector<8x1xf32> to vector<8x896xf32>
    %33 = vector.broadcast %29 : vector<1x896xf32> to vector<8x896xf32>
    %34 = arith.mulf %32, %33 : vector<8x896xf32>
    %35 = arith.addf %26, %34 : vector<8x896xf32>
    %c4 = arith.constant 4 : index
    %c0_18 = arith.constant 0 : index
    %36 = vector.load %arg2[%c4, %c0_18] : memref<27x896xf32, #tpu.memory_space<vmem>>, vector<1x896xf32>
    %37 = arith.mulf %0, %36 : vector<1x896xf32>
    %c4_19 = arith.constant 4 : index
    %c0_20 = arith.constant 0 : index
    %c0_21 = arith.constant 0 : index
    %38 = vector.load %arg3[%c4_19, %c0_20, %c0_21] : memref<9x8x1xf32, #tpu.memory_space<vmem>>, vector<1x8x1xf32>
    %39 = vector.shape_cast %38 : vector<1x8x1xf32> to vector<8x1xf32>
    %40 = vector.broadcast %39 : vector<8x1xf32> to vector<8x896xf32>
    %41 = vector.broadcast %37 : vector<1x896xf32> to vector<8x896xf32>
    %42 = arith.mulf %40, %41 : vector<8x896xf32>
    %43 = arith.addf %35, %42 : vector<8x896xf32>
    %c5 = arith.constant 5 : index
    %c0_22 = arith.constant 0 : index
    %44 = vector.load %arg2[%c5, %c0_22] : memref<27x896xf32, #tpu.memory_space<vmem>>, vector<1x896xf32>
    %c895_i32 = arith.constant 895 : i32
    %45 = tpu.dynamic_rotate %0 by %c895_i32 dim 1 : vector<1x896xf32>, i32 -> vector<1x896xf32>
    %46 = arith.mulf %45, %44 : vector<1x896xf32>
    %c5_23 = arith.constant 5 : index
    %c0_24 = arith.constant 0 : index
    %c0_25 = arith.constant 0 : index
    %47 = vector.load %arg3[%c5_23, %c0_24, %c0_25] : memref<9x8x1xf32, #tpu.memory_space<vmem>>, vector<1x8x1xf32>
    %48 = vector.shape_cast %47 : vector<1x8x1xf32> to vector<8x1xf32>
    %49 = vector.broadcast %48 : vector<8x1xf32> to vector<8x896xf32>
    %50 = vector.broadcast %46 : vector<1x896xf32> to vector<8x896xf32>
    %51 = arith.mulf %49, %50 : vector<8x896xf32>
    %52 = arith.addf %43, %51 : vector<8x896xf32>
    %c6 = arith.constant 6 : index
    %c0_26 = arith.constant 0 : index
    %53 = vector.load %arg2[%c6, %c0_26] : memref<27x896xf32, #tpu.memory_space<vmem>>, vector<1x896xf32>
    %c869_i32 = arith.constant 869 : i32
    %54 = tpu.dynamic_rotate %0 by %c869_i32 dim 1 : vector<1x896xf32>, i32 -> vector<1x896xf32>
    %55 = arith.mulf %54, %53 : vector<1x896xf32>
    %c6_27 = arith.constant 6 : index
    %c0_28 = arith.constant 0 : index
    %c0_29 = arith.constant 0 : index
    %56 = vector.load %arg3[%c6_27, %c0_28, %c0_29] : memref<9x8x1xf32, #tpu.memory_space<vmem>>, vector<1x8x1xf32>
    %57 = vector.shape_cast %56 : vector<1x8x1xf32> to vector<8x1xf32>
    %58 = vector.broadcast %57 : vector<8x1xf32> to vector<8x896xf32>
    %59 = vector.broadcast %55 : vector<1x896xf32> to vector<8x896xf32>
    %60 = arith.mulf %58, %59 : vector<8x896xf32>
    %61 = arith.addf %52, %60 : vector<8x896xf32>
    %c7 = arith.constant 7 : index
    %c0_30 = arith.constant 0 : index
    %62 = vector.load %arg2[%c7, %c0_30] : memref<27x896xf32, #tpu.memory_space<vmem>>, vector<1x896xf32>
    %c868_i32 = arith.constant 868 : i32
    %63 = tpu.dynamic_rotate %0 by %c868_i32 dim 1 : vector<1x896xf32>, i32 -> vector<1x896xf32>
    %64 = arith.mulf %63, %62 : vector<1x896xf32>
    %c7_31 = arith.constant 7 : index
    %c0_32 = arith.constant 0 : index
    %c0_33 = arith.constant 0 : index
    %65 = vector.load %arg3[%c7_31, %c0_32, %c0_33] : memref<9x8x1xf32, #tpu.memory_space<vmem>>, vector<1x8x1xf32>
    %66 = vector.shape_cast %65 : vector<1x8x1xf32> to vector<8x1xf32>
    %67 = vector.broadcast %66 : vector<8x1xf32> to vector<8x896xf32>
    %68 = vector.broadcast %64 : vector<1x896xf32> to vector<8x896xf32>
    %69 = arith.mulf %67, %68 : vector<8x896xf32>
    %70 = arith.addf %61, %69 : vector<8x896xf32>
    %c8 = arith.constant 8 : index
    %c0_34 = arith.constant 0 : index
    %71 = vector.load %arg2[%c8, %c0_34] : memref<27x896xf32, #tpu.memory_space<vmem>>, vector<1x896xf32>
    %c867_i32 = arith.constant 867 : i32
    %72 = tpu.dynamic_rotate %0 by %c867_i32 dim 1 : vector<1x896xf32>, i32 -> vector<1x896xf32>
    %73 = arith.mulf %72, %71 : vector<1x896xf32>
    %c8_35 = arith.constant 8 : index
    %c0_36 = arith.constant 0 : index
    %c0_37 = arith.constant 0 : index
    %74 = vector.load %arg3[%c8_35, %c0_36, %c0_37] : memref<9x8x1xf32, #tpu.memory_space<vmem>>, vector<1x8x1xf32>
    %75 = vector.shape_cast %74 : vector<1x8x1xf32> to vector<8x1xf32>
    %76 = vector.broadcast %75 : vector<8x1xf32> to vector<8x896xf32>
    %77 = vector.broadcast %73 : vector<1x896xf32> to vector<8x896xf32>
    %78 = arith.mulf %76, %77 : vector<8x896xf32>
    %79 = arith.addf %70, %78 : vector<8x896xf32>
    %c0_38 = arith.constant 0 : index
    %c0_39 = arith.constant 0 : index
    %80 = vector.load %arg4[%c0_38, %c0_39] : memref<8x1xf32, #tpu.memory_space<vmem>>, vector<8x1xf32>
    %81 = vector.broadcast %80 : vector<8x1xf32> to vector<8x896xf32>
    %82 = arith.addf %79, %81 : vector<8x896xf32>
    %cst = arith.constant 0.000000e+00 : f32
    %83 = vector.broadcast %cst : f32 to vector<8x896xf32>
    %84 = arith.maximumf %82, %83 : vector<8x896xf32>
    %c895_i32_40 = arith.constant 895 : i32
    %85 = tpu.dynamic_rotate %84 by %c895_i32_40 dim 1 : vector<8x896xf32>, i32 -> vector<8x896xf32>
    %86 = arith.maximumf %84, %85 : vector<8x896xf32>
    %c868_i32_41 = arith.constant 868 : i32
    %87 = tpu.dynamic_rotate %86 by %c868_i32_41 dim 1 : vector<8x896xf32>, i32 -> vector<8x896xf32>
    %88 = arith.maximumf %86, %87 : vector<8x896xf32>
    %c9 = arith.constant 9 : index
    %c0_42 = arith.constant 0 : index
    %89 = vector.load %arg2[%c9, %c0_42] : memref<27x896xf32, #tpu.memory_space<vmem>>, vector<1x896xf32>
    %c58_i32 = arith.constant 58 : i32
    %90 = tpu.dynamic_rotate %88 by %c58_i32 dim 1 : vector<8x896xf32>, i32 -> vector<8x896xf32>
    %91 = vector.broadcast %89 : vector<1x896xf32> to vector<8x896xf32>
    %92 = arith.mulf %90, %91 : vector<8x896xf32>
    %c0_43 = arith.constant 0 : index
    %c0_44 = arith.constant 0 : index
    %c0_45 = arith.constant 0 : index
    %93 = vector.load %arg5[%c0_43, %c0_44, %c0_45] : memref<9x16x8xf32, #tpu.memory_space<vmem>>, vector<1x16x8xf32>
    %94 = vector.shape_cast %93 : vector<1x16x8xf32> to vector<16x8xf32>
    %cst_46 = arith.constant dense<0.000000e+00> : vector<16x896xf32>
    %95 = tpu.matmul %94, %92, %cst_46 {dimension_numbers = #tpu.dot_dimension_numbers<[1], [0], [0], [1], [0, 0, 1, 1], [], []>} : vector<16x8xf32>, vector<8x896xf32>, vector<16x896xf32> -> vector<16x896xf32>
    %c10 = arith.constant 10 : index
    %c0_47 = arith.constant 0 : index
    %96 = vector.load %arg2[%c10, %c0_47] : memref<27x896xf32, #tpu.memory_space<vmem>>, vector<1x896xf32>
    %c56_i32 = arith.constant 56 : i32
    %97 = tpu.dynamic_rotate %88 by %c56_i32 dim 1 : vector<8x896xf32>, i32 -> vector<8x896xf32>
    %98 = vector.broadcast %96 : vector<1x896xf32> to vector<8x896xf32>
    %99 = arith.mulf %97, %98 : vector<8x896xf32>
    %c1_48 = arith.constant 1 : index
    %c0_49 = arith.constant 0 : index
    %c0_50 = arith.constant 0 : index
    %100 = vector.load %arg5[%c1_48, %c0_49, %c0_50] : memref<9x16x8xf32, #tpu.memory_space<vmem>>, vector<1x16x8xf32>
    %101 = vector.shape_cast %100 : vector<1x16x8xf32> to vector<16x8xf32>
    %cst_51 = arith.constant dense<0.000000e+00> : vector<16x896xf32>
    %102 = tpu.matmul %101, %99, %cst_51 {dimension_numbers = #tpu.dot_dimension_numbers<[1], [0], [0], [1], [0, 0, 1, 1], [], []>} : vector<16x8xf32>, vector<8x896xf32>, vector<16x896xf32> -> vector<16x896xf32>
    %103 = arith.addf %95, %102 : vector<16x896xf32>
    %c11 = arith.constant 11 : index
    %c0_52 = arith.constant 0 : index
    %104 = vector.load %arg2[%c11, %c0_52] : memref<27x896xf32, #tpu.memory_space<vmem>>, vector<1x896xf32>
    %c54_i32 = arith.constant 54 : i32
    %105 = tpu.dynamic_rotate %88 by %c54_i32 dim 1 : vector<8x896xf32>, i32 -> vector<8x896xf32>
    %106 = vector.broadcast %104 : vector<1x896xf32> to vector<8x896xf32>
    %107 = arith.mulf %105, %106 : vector<8x896xf32>
    %c2_53 = arith.constant 2 : index
    %c0_54 = arith.constant 0 : index
    %c0_55 = arith.constant 0 : index
    %108 = vector.load %arg5[%c2_53, %c0_54, %c0_55] : memref<9x16x8xf32, #tpu.memory_space<vmem>>, vector<1x16x8xf32>
    %109 = vector.shape_cast %108 : vector<1x16x8xf32> to vector<16x8xf32>
    %cst_56 = arith.constant dense<0.000000e+00> : vector<16x896xf32>
    %110 = tpu.matmul %109, %107, %cst_56 {dimension_numbers = #tpu.dot_dimension_numbers<[1], [0], [0], [1], [0, 0, 1, 1], [], []>} : vector<16x8xf32>, vector<8x896xf32>, vector<16x896xf32> -> vector<16x896xf32>
    %111 = arith.addf %103, %110 : vector<16x896xf32>
    %c12 = arith.constant 12 : index
    %c0_57 = arith.constant 0 : index
    %112 = vector.load %arg2[%c12, %c0_57] : memref<27x896xf32, #tpu.memory_space<vmem>>, vector<1x896xf32>
    %c2_i32 = arith.constant 2 : i32
    %113 = tpu.dynamic_rotate %88 by %c2_i32 dim 1 : vector<8x896xf32>, i32 -> vector<8x896xf32>
    %114 = vector.broadcast %112 : vector<1x896xf32> to vector<8x896xf32>
    %115 = arith.mulf %113, %114 : vector<8x896xf32>
    %c3_58 = arith.constant 3 : index
    %c0_59 = arith.constant 0 : index
    %c0_60 = arith.constant 0 : index
    %116 = vector.load %arg5[%c3_58, %c0_59, %c0_60] : memref<9x16x8xf32, #tpu.memory_space<vmem>>, vector<1x16x8xf32>
    %117 = vector.shape_cast %116 : vector<1x16x8xf32> to vector<16x8xf32>
    %cst_61 = arith.constant dense<0.000000e+00> : vector<16x896xf32>
    %118 = tpu.matmul %117, %115, %cst_61 {dimension_numbers = #tpu.dot_dimension_numbers<[1], [0], [0], [1], [0, 0, 1, 1], [], []>} : vector<16x8xf32>, vector<8x896xf32>, vector<16x896xf32> -> vector<16x896xf32>
    %119 = arith.addf %111, %118 : vector<16x896xf32>
    %c13 = arith.constant 13 : index
    %c0_62 = arith.constant 0 : index
    %120 = vector.load %arg2[%c13, %c0_62] : memref<27x896xf32, #tpu.memory_space<vmem>>, vector<1x896xf32>
    %121 = vector.broadcast %120 : vector<1x896xf32> to vector<8x896xf32>
    %122 = arith.mulf %88, %121 : vector<8x896xf32>
    %c4_63 = arith.constant 4 : index
    %c0_64 = arith.constant 0 : index
    %c0_65 = arith.constant 0 : index
    %123 = vector.load %arg5[%c4_63, %c0_64, %c0_65] : memref<9x16x8xf32, #tpu.memory_space<vmem>>, vector<1x16x8xf32>
    %124 = vector.shape_cast %123 : vector<1x16x8xf32> to vector<16x8xf32>
    %cst_66 = arith.constant dense<0.000000e+00> : vector<16x896xf32>
    %125 = tpu.matmul %124, %122, %cst_66 {dimension_numbers = #tpu.dot_dimension_numbers<[1], [0], [0], [1], [0, 0, 1, 1], [], []>} : vector<16x8xf32>, vector<8x896xf32>, vector<16x896xf32> -> vector<16x896xf32>
    %126 = arith.addf %119, %125 : vector<16x896xf32>
    %c14 = arith.constant 14 : index
    %c0_67 = arith.constant 0 : index
    %127 = vector.load %arg2[%c14, %c0_67] : memref<27x896xf32, #tpu.memory_space<vmem>>, vector<1x896xf32>
    %c894_i32 = arith.constant 894 : i32
    %128 = tpu.dynamic_rotate %88 by %c894_i32 dim 1 : vector<8x896xf32>, i32 -> vector<8x896xf32>
    %129 = vector.broadcast %127 : vector<1x896xf32> to vector<8x896xf32>
    %130 = arith.mulf %128, %129 : vector<8x896xf32>
    %c5_68 = arith.constant 5 : index
    %c0_69 = arith.constant 0 : index
    %c0_70 = arith.constant 0 : index
    %131 = vector.load %arg5[%c5_68, %c0_69, %c0_70] : memref<9x16x8xf32, #tpu.memory_space<vmem>>, vector<1x16x8xf32>
    %132 = vector.shape_cast %131 : vector<1x16x8xf32> to vector<16x8xf32>
    %cst_71 = arith.constant dense<0.000000e+00> : vector<16x896xf32>
    %133 = tpu.matmul %132, %130, %cst_71 {dimension_numbers = #tpu.dot_dimension_numbers<[1], [0], [0], [1], [0, 0, 1, 1], [], []>} : vector<16x8xf32>, vector<8x896xf32>, vector<16x896xf32> -> vector<16x896xf32>
    %134 = arith.addf %126, %133 : vector<16x896xf32>
    %c15 = arith.constant 15 : index
    %c0_72 = arith.constant 0 : index
    %135 = vector.load %arg2[%c15, %c0_72] : memref<27x896xf32, #tpu.memory_space<vmem>>, vector<1x896xf32>
    %c842_i32 = arith.constant 842 : i32
    %136 = tpu.dynamic_rotate %88 by %c842_i32 dim 1 : vector<8x896xf32>, i32 -> vector<8x896xf32>
    %137 = vector.broadcast %135 : vector<1x896xf32> to vector<8x896xf32>
    %138 = arith.mulf %136, %137 : vector<8x896xf32>
    %c6_73 = arith.constant 6 : index
    %c0_74 = arith.constant 0 : index
    %c0_75 = arith.constant 0 : index
    %139 = vector.load %arg5[%c6_73, %c0_74, %c0_75] : memref<9x16x8xf32, #tpu.memory_space<vmem>>, vector<1x16x8xf32>
    %140 = vector.shape_cast %139 : vector<1x16x8xf32> to vector<16x8xf32>
    %cst_76 = arith.constant dense<0.000000e+00> : vector<16x896xf32>
    %141 = tpu.matmul %140, %138, %cst_76 {dimension_numbers = #tpu.dot_dimension_numbers<[1], [0], [0], [1], [0, 0, 1, 1], [], []>} : vector<16x8xf32>, vector<8x896xf32>, vector<16x896xf32> -> vector<16x896xf32>
    %142 = arith.addf %134, %141 : vector<16x896xf32>
    %c16 = arith.constant 16 : index
    %c0_77 = arith.constant 0 : index
    %143 = vector.load %arg2[%c16, %c0_77] : memref<27x896xf32, #tpu.memory_space<vmem>>, vector<1x896xf32>
    %c840_i32 = arith.constant 840 : i32
    %144 = tpu.dynamic_rotate %88 by %c840_i32 dim 1 : vector<8x896xf32>, i32 -> vector<8x896xf32>
    %145 = vector.broadcast %143 : vector<1x896xf32> to vector<8x896xf32>
    %146 = arith.mulf %144, %145 : vector<8x896xf32>
    %c7_78 = arith.constant 7 : index
    %c0_79 = arith.constant 0 : index
    %c0_80 = arith.constant 0 : index
    %147 = vector.load %arg5[%c7_78, %c0_79, %c0_80] : memref<9x16x8xf32, #tpu.memory_space<vmem>>, vector<1x16x8xf32>
    %148 = vector.shape_cast %147 : vector<1x16x8xf32> to vector<16x8xf32>
    %cst_81 = arith.constant dense<0.000000e+00> : vector<16x896xf32>
    %149 = tpu.matmul %148, %146, %cst_81 {dimension_numbers = #tpu.dot_dimension_numbers<[1], [0], [0], [1], [0, 0, 1, 1], [], []>} : vector<16x8xf32>, vector<8x896xf32>, vector<16x896xf32> -> vector<16x896xf32>
    %150 = arith.addf %142, %149 : vector<16x896xf32>
    %c17 = arith.constant 17 : index
    %c0_82 = arith.constant 0 : index
    %151 = vector.load %arg2[%c17, %c0_82] : memref<27x896xf32, #tpu.memory_space<vmem>>, vector<1x896xf32>
    %c838_i32 = arith.constant 838 : i32
    %152 = tpu.dynamic_rotate %88 by %c838_i32 dim 1 : vector<8x896xf32>, i32 -> vector<8x896xf32>
    %153 = vector.broadcast %151 : vector<1x896xf32> to vector<8x896xf32>
    %154 = arith.mulf %152, %153 : vector<8x896xf32>
    %c8_83 = arith.constant 8 : index
    %c0_84 = arith.constant 0 : index
    %c0_85 = arith.constant 0 : index
    %155 = vector.load %arg5[%c8_83, %c0_84, %c0_85] : memref<9x16x8xf32, #tpu.memory_space<vmem>>, vector<1x16x8xf32>
    %156 = vector.shape_cast %155 : vector<1x16x8xf32> to vector<16x8xf32>
    %cst_86 = arith.constant dense<0.000000e+00> : vector<16x896xf32>
    %157 = tpu.matmul %156, %154, %cst_86 {dimension_numbers = #tpu.dot_dimension_numbers<[1], [0], [0], [1], [0, 0, 1, 1], [], []>} : vector<16x8xf32>, vector<8x896xf32>, vector<16x896xf32> -> vector<16x896xf32>
    %158 = arith.addf %150, %157 : vector<16x896xf32>
    %c0_87 = arith.constant 0 : index
    %c0_88 = arith.constant 0 : index
    %159 = vector.load %arg6[%c0_87, %c0_88] : memref<16x1xf32, #tpu.memory_space<vmem>>, vector<16x1xf32>
    %160 = vector.broadcast %159 : vector<16x1xf32> to vector<16x896xf32>
    %161 = arith.addf %158, %160 : vector<16x896xf32>
    %cst_89 = arith.constant 0.000000e+00 : f32
    %162 = vector.broadcast %cst_89 : f32 to vector<16x896xf32>
    %163 = arith.maximumf %161, %162 : vector<16x896xf32>
    %c894_i32_90 = arith.constant 894 : i32
    %164 = tpu.dynamic_rotate %163 by %c894_i32_90 dim 1 : vector<16x896xf32>, i32 -> vector<16x896xf32>
    %165 = arith.maximumf %163, %164 : vector<16x896xf32>
    %c840_i32_91 = arith.constant 840 : i32
    %166 = tpu.dynamic_rotate %165 by %c840_i32_91 dim 1 : vector<16x896xf32>, i32 -> vector<16x896xf32>
    %167 = arith.maximumf %165, %166 : vector<16x896xf32>
    %c18 = arith.constant 18 : index
    %c0_92 = arith.constant 0 : index
    %168 = vector.load %arg2[%c18, %c0_92] : memref<27x896xf32, #tpu.memory_space<vmem>>, vector<1x896xf32>
    %c116_i32 = arith.constant 116 : i32
    %169 = tpu.dynamic_rotate %167 by %c116_i32 dim 1 : vector<16x896xf32>, i32 -> vector<16x896xf32>
    %170 = vector.broadcast %168 : vector<1x896xf32> to vector<16x896xf32>
    %171 = arith.mulf %169, %170 : vector<16x896xf32>
    %c0_93 = arith.constant 0 : index
    %c0_94 = arith.constant 0 : index
    %c0_95 = arith.constant 0 : index
    %172 = vector.load %arg7[%c0_93, %c0_94, %c0_95] : memref<9x32x16xf32, #tpu.memory_space<vmem>>, vector<1x32x16xf32>
    %173 = vector.shape_cast %172 : vector<1x32x16xf32> to vector<32x16xf32>
    %cst_96 = arith.constant dense<0.000000e+00> : vector<32x896xf32>
    %174 = tpu.matmul %173, %171, %cst_96 {dimension_numbers = #tpu.dot_dimension_numbers<[1], [0], [0], [1], [0, 0, 1, 1], [], []>} : vector<32x16xf32>, vector<16x896xf32>, vector<32x896xf32> -> vector<32x896xf32>
    %c19 = arith.constant 19 : index
    %c0_97 = arith.constant 0 : index
    %175 = vector.load %arg2[%c19, %c0_97] : memref<27x896xf32, #tpu.memory_space<vmem>>, vector<1x896xf32>
    %c112_i32 = arith.constant 112 : i32
    %176 = tpu.dynamic_rotate %167 by %c112_i32 dim 1 : vector<16x896xf32>, i32 -> vector<16x896xf32>
    %177 = vector.broadcast %175 : vector<1x896xf32> to vector<16x896xf32>
    %178 = arith.mulf %176, %177 : vector<16x896xf32>
    %c1_98 = arith.constant 1 : index
    %c0_99 = arith.constant 0 : index
    %c0_100 = arith.constant 0 : index
    %179 = vector.load %arg7[%c1_98, %c0_99, %c0_100] : memref<9x32x16xf32, #tpu.memory_space<vmem>>, vector<1x32x16xf32>
    %180 = vector.shape_cast %179 : vector<1x32x16xf32> to vector<32x16xf32>
    %cst_101 = arith.constant dense<0.000000e+00> : vector<32x896xf32>
    %181 = tpu.matmul %180, %178, %cst_101 {dimension_numbers = #tpu.dot_dimension_numbers<[1], [0], [0], [1], [0, 0, 1, 1], [], []>} : vector<32x16xf32>, vector<16x896xf32>, vector<32x896xf32> -> vector<32x896xf32>
    %182 = arith.addf %174, %181 : vector<32x896xf32>
    %c20 = arith.constant 20 : index
    %c0_102 = arith.constant 0 : index
    %183 = vector.load %arg2[%c20, %c0_102] : memref<27x896xf32, #tpu.memory_space<vmem>>, vector<1x896xf32>
    %c108_i32 = arith.constant 108 : i32
    %184 = tpu.dynamic_rotate %167 by %c108_i32 dim 1 : vector<16x896xf32>, i32 -> vector<16x896xf32>
    %185 = vector.broadcast %183 : vector<1x896xf32> to vector<16x896xf32>
    %186 = arith.mulf %184, %185 : vector<16x896xf32>
    %c2_103 = arith.constant 2 : index
    %c0_104 = arith.constant 0 : index
    %c0_105 = arith.constant 0 : index
    %187 = vector.load %arg7[%c2_103, %c0_104, %c0_105] : memref<9x32x16xf32, #tpu.memory_space<vmem>>, vector<1x32x16xf32>
    %188 = vector.shape_cast %187 : vector<1x32x16xf32> to vector<32x16xf32>
    %cst_106 = arith.constant dense<0.000000e+00> : vector<32x896xf32>
    %189 = tpu.matmul %188, %186, %cst_106 {dimension_numbers = #tpu.dot_dimension_numbers<[1], [0], [0], [1], [0, 0, 1, 1], [], []>} : vector<32x16xf32>, vector<16x896xf32>, vector<32x896xf32> -> vector<32x896xf32>
    %190 = arith.addf %182, %189 : vector<32x896xf32>
    %c21 = arith.constant 21 : index
    %c0_107 = arith.constant 0 : index
    %191 = vector.load %arg2[%c21, %c0_107] : memref<27x896xf32, #tpu.memory_space<vmem>>, vector<1x896xf32>
    %c4_i32 = arith.constant 4 : i32
    %192 = tpu.dynamic_rotate %167 by %c4_i32 dim 1 : vector<16x896xf32>, i32 -> vector<16x896xf32>
    %193 = vector.broadcast %191 : vector<1x896xf32> to vector<16x896xf32>
    %194 = arith.mulf %192, %193 : vector<16x896xf32>
    %c3_108 = arith.constant 3 : index
    %c0_109 = arith.constant 0 : index
    %c0_110 = arith.constant 0 : index
    %195 = vector.load %arg7[%c3_108, %c0_109, %c0_110] : memref<9x32x16xf32, #tpu.memory_space<vmem>>, vector<1x32x16xf32>
    %196 = vector.shape_cast %195 : vector<1x32x16xf32> to vector<32x16xf32>
    %cst_111 = arith.constant dense<0.000000e+00> : vector<32x896xf32>
    %197 = tpu.matmul %196, %194, %cst_111 {dimension_numbers = #tpu.dot_dimension_numbers<[1], [0], [0], [1], [0, 0, 1, 1], [], []>} : vector<32x16xf32>, vector<16x896xf32>, vector<32x896xf32> -> vector<32x896xf32>
    %198 = arith.addf %190, %197 : vector<32x896xf32>
    %c22 = arith.constant 22 : index
    %c0_112 = arith.constant 0 : index
    %199 = vector.load %arg2[%c22, %c0_112] : memref<27x896xf32, #tpu.memory_space<vmem>>, vector<1x896xf32>
    %200 = vector.broadcast %199 : vector<1x896xf32> to vector<16x896xf32>
    %201 = arith.mulf %167, %200 : vector<16x896xf32>
    %c4_113 = arith.constant 4 : index
    %c0_114 = arith.constant 0 : index
    %c0_115 = arith.constant 0 : index
    %202 = vector.load %arg7[%c4_113, %c0_114, %c0_115] : memref<9x32x16xf32, #tpu.memory_space<vmem>>, vector<1x32x16xf32>
    %203 = vector.shape_cast %202 : vector<1x32x16xf32> to vector<32x16xf32>
    %cst_116 = arith.constant dense<0.000000e+00> : vector<32x896xf32>
    %204 = tpu.matmul %203, %201, %cst_116 {dimension_numbers = #tpu.dot_dimension_numbers<[1], [0], [0], [1], [0, 0, 1, 1], [], []>} : vector<32x16xf32>, vector<16x896xf32>, vector<32x896xf32> -> vector<32x896xf32>
    %205 = arith.addf %198, %204 : vector<32x896xf32>
    %c23 = arith.constant 23 : index
    %c0_117 = arith.constant 0 : index
    %206 = vector.load %arg2[%c23, %c0_117] : memref<27x896xf32, #tpu.memory_space<vmem>>, vector<1x896xf32>
    %c892_i32 = arith.constant 892 : i32
    %207 = tpu.dynamic_rotate %167 by %c892_i32 dim 1 : vector<16x896xf32>, i32 -> vector<16x896xf32>
    %208 = vector.broadcast %206 : vector<1x896xf32> to vector<16x896xf32>
    %209 = arith.mulf %207, %208 : vector<16x896xf32>
    %c5_118 = arith.constant 5 : index
    %c0_119 = arith.constant 0 : index
    %c0_120 = arith.constant 0 : index
    %210 = vector.load %arg7[%c5_118, %c0_119, %c0_120] : memref<9x32x16xf32, #tpu.memory_space<vmem>>, vector<1x32x16xf32>
    %211 = vector.shape_cast %210 : vector<1x32x16xf32> to vector<32x16xf32>
    %cst_121 = arith.constant dense<0.000000e+00> : vector<32x896xf32>
    %212 = tpu.matmul %211, %209, %cst_121 {dimension_numbers = #tpu.dot_dimension_numbers<[1], [0], [0], [1], [0, 0, 1, 1], [], []>} : vector<32x16xf32>, vector<16x896xf32>, vector<32x896xf32> -> vector<32x896xf32>
    %213 = arith.addf %205, %212 : vector<32x896xf32>
    %c24 = arith.constant 24 : index
    %c0_122 = arith.constant 0 : index
    %214 = vector.load %arg2[%c24, %c0_122] : memref<27x896xf32, #tpu.memory_space<vmem>>, vector<1x896xf32>
    %c788_i32 = arith.constant 788 : i32
    %215 = tpu.dynamic_rotate %167 by %c788_i32 dim 1 : vector<16x896xf32>, i32 -> vector<16x896xf32>
    %216 = vector.broadcast %214 : vector<1x896xf32> to vector<16x896xf32>
    %217 = arith.mulf %215, %216 : vector<16x896xf32>
    %c6_123 = arith.constant 6 : index
    %c0_124 = arith.constant 0 : index
    %c0_125 = arith.constant 0 : index
    %218 = vector.load %arg7[%c6_123, %c0_124, %c0_125] : memref<9x32x16xf32, #tpu.memory_space<vmem>>, vector<1x32x16xf32>
    %219 = vector.shape_cast %218 : vector<1x32x16xf32> to vector<32x16xf32>
    %cst_126 = arith.constant dense<0.000000e+00> : vector<32x896xf32>
    %220 = tpu.matmul %219, %217, %cst_126 {dimension_numbers = #tpu.dot_dimension_numbers<[1], [0], [0], [1], [0, 0, 1, 1], [], []>} : vector<32x16xf32>, vector<16x896xf32>, vector<32x896xf32> -> vector<32x896xf32>
    %221 = arith.addf %213, %220 : vector<32x896xf32>
    %c25 = arith.constant 25 : index
    %c0_127 = arith.constant 0 : index
    %222 = vector.load %arg2[%c25, %c0_127] : memref<27x896xf32, #tpu.memory_space<vmem>>, vector<1x896xf32>
    %c784_i32 = arith.constant 784 : i32
    %223 = tpu.dynamic_rotate %167 by %c784_i32 dim 1 : vector<16x896xf32>, i32 -> vector<16x896xf32>
    %224 = vector.broadcast %222 : vector<1x896xf32> to vector<16x896xf32>
    %225 = arith.mulf %223, %224 : vector<16x896xf32>
    %c7_128 = arith.constant 7 : index
    %c0_129 = arith.constant 0 : index
    %c0_130 = arith.constant 0 : index
    %226 = vector.load %arg7[%c7_128, %c0_129, %c0_130] : memref<9x32x16xf32, #tpu.memory_space<vmem>>, vector<1x32x16xf32>
    %227 = vector.shape_cast %226 : vector<1x32x16xf32> to vector<32x16xf32>
    %cst_131 = arith.constant dense<0.000000e+00> : vector<32x896xf32>
    %228 = tpu.matmul %227, %225, %cst_131 {dimension_numbers = #tpu.dot_dimension_numbers<[1], [0], [0], [1], [0, 0, 1, 1], [], []>} : vector<32x16xf32>, vector<16x896xf32>, vector<32x896xf32> -> vector<32x896xf32>
    %229 = arith.addf %221, %228 : vector<32x896xf32>
    %c26 = arith.constant 26 : index
    %c0_132 = arith.constant 0 : index
    %230 = vector.load %arg2[%c26, %c0_132] : memref<27x896xf32, #tpu.memory_space<vmem>>, vector<1x896xf32>
    %c780_i32 = arith.constant 780 : i32
    %231 = tpu.dynamic_rotate %167 by %c780_i32 dim 1 : vector<16x896xf32>, i32 -> vector<16x896xf32>
    %232 = vector.broadcast %230 : vector<1x896xf32> to vector<16x896xf32>
    %233 = arith.mulf %231, %232 : vector<16x896xf32>
    %c8_133 = arith.constant 8 : index
    %c0_134 = arith.constant 0 : index
    %c0_135 = arith.constant 0 : index
    %234 = vector.load %arg7[%c8_133, %c0_134, %c0_135] : memref<9x32x16xf32, #tpu.memory_space<vmem>>, vector<1x32x16xf32>
    %235 = vector.shape_cast %234 : vector<1x32x16xf32> to vector<32x16xf32>
    %cst_136 = arith.constant dense<0.000000e+00> : vector<32x896xf32>
    %236 = tpu.matmul %235, %233, %cst_136 {dimension_numbers = #tpu.dot_dimension_numbers<[1], [0], [0], [1], [0, 0, 1, 1], [], []>} : vector<32x16xf32>, vector<16x896xf32>, vector<32x896xf32> -> vector<32x896xf32>
    %237 = arith.addf %229, %236 : vector<32x896xf32>
    %c0_137 = arith.constant 0 : index
    %c0_138 = arith.constant 0 : index
    %238 = vector.load %arg8[%c0_137, %c0_138] : memref<32x1xf32, #tpu.memory_space<vmem>>, vector<32x1xf32>
    %239 = vector.broadcast %238 : vector<32x1xf32> to vector<32x896xf32>
    %240 = arith.addf %237, %239 : vector<32x896xf32>
    %cst_139 = arith.constant 0.000000e+00 : f32
    %241 = vector.broadcast %cst_139 : f32 to vector<32x896xf32>
    %242 = arith.maximumf %240, %241 : vector<32x896xf32>
    %c0_140 = arith.constant 0 : index
    %c0_141 = arith.constant 0 : index
    %243 = vector.load %arg9[%c0_140, %c0_141] : memref<896x512xf32, #tpu.memory_space<vmem>>, vector<896x512xf32>
    %c0_142 = arith.constant 0 : index
    %c0_143 = arith.constant 0 : index
    %244 = vector.load %arg10[%c0_142, %c0_143] : memref<32x512xf32, #tpu.memory_space<vmem>>, vector<32x512xf32>
    %c0_144 = arith.constant 0 : index
    %c0_145 = arith.constant 0 : index
    %245 = vector.load %arg11[%c0_144, %c0_145] : memref<512x128xf32, #tpu.memory_space<vmem>>, vector<512x128xf32>
    %c0_146 = arith.constant 0 : index
    %c0_147 = arith.constant 0 : index
    %246 = vector.load %arg12[%c0_146, %c0_147] : memref<1x128xf32, #tpu.memory_space<vmem>>, vector<1x128xf32>
    %cst_148 = arith.constant dense<0.000000e+00> : vector<32x512xf32>
    %247 = tpu.matmul %242, %243, %cst_148 {dimension_numbers = #tpu.dot_dimension_numbers<[1], [0], [0], [1], [0, 0, 1, 1], [], []>} : vector<32x896xf32>, vector<896x512xf32>, vector<32x512xf32> -> vector<32x512xf32>
    %248 = arith.mulf %247, %244 : vector<32x512xf32>
    %cst_149 = arith.constant dense<0.000000e+00> : vector<512xf32>
    %249 = vector.multi_reduction <add>, %248, %cst_149 [0] : vector<32x512xf32> to vector<512xf32>
    %250 = vector.shape_cast %249 : vector<512xf32> to vector<1x512xf32>
    %cst_150 = arith.constant dense<0.000000e+00> : vector<1x128xf32>
    %251 = tpu.matmul %250, %245, %cst_150 {dimension_numbers = #tpu.dot_dimension_numbers<[1], [0], [0], [1], [0, 0, 1, 1], [], []>} : vector<1x512xf32>, vector<512x128xf32>, vector<1x128xf32> -> vector<1x128xf32>
    %252 = arith.addf %251, %246 : vector<1x128xf32>
    %cst_151 = arith.constant dense<0xFF800000> : vector<1xf32>
    %253 = vector.multi_reduction <maximumf>, %252, %cst_151 [1] : vector<1x128xf32> to vector<1xf32>
    %254 = vector.shape_cast %253 : vector<1xf32> to vector<1x1xf32>
    %255 = vector.broadcast %254 : vector<1x1xf32> to vector<1x128xf32>
    %256 = arith.subf %252, %255 : vector<1x128xf32>
    %257 = math.exp %256 : vector<1x128xf32>
    %cst_152 = arith.constant dense<0.000000e+00> : vector<1xf32>
    %258 = vector.multi_reduction <add>, %257, %cst_152 [1] : vector<1x128xf32> to vector<1xf32>
    %259 = vector.shape_cast %258 : vector<1xf32> to vector<1x1xf32>
    %260 = tpu.reciprocal %259 {approx = true} : vector<1x1xf32> -> vector<1x1xf32>
    %261 = vector.broadcast %260 : vector<1x1xf32> to vector<1x128xf32>
    %262 = arith.mulf %257, %261 : vector<1x128xf32>
    %c0_153 = arith.constant 0 : index
    %c0_154 = arith.constant 0 : index
    %c0_155 = arith.constant 0 : index
    %263 = vector.load %arg13[%c0_153, %c0_154, %c0_155] : memref<1x1x128xf32, #tpu.memory_space<vmem>>, vector<1x1x128xf32>
    %264 = vector.shape_cast %263 : vector<1x1x128xf32> to vector<1x128xf32>
    %265 = vector.shape_cast %262 : vector<1x128xf32> to vector<1x1x128xf32>
    tpu.vector_store %arg13[%c0_153, %c0_154, %c0_155], %265 {strides = array<i32>} : memref<1x1x128xf32, #tpu.memory_space<vmem>>, vector<1x1x128xf32>,
    return
  }
  func.func @transform_0(%arg0: i32) -> (i32, i32) {
    %c0_i32 = arith.constant 0 : i32
    %c0_i32_0 = arith.constant 0 : i32
    return %c0_i32, %arg0 : i32, i32
  }
  func.func @transform_1(%arg0: i32) -> (i32, i32) {
    %c0_i32 = arith.constant 0 : i32
    %c0_i32_0 = arith.constant 0 : i32
    %c0_i32_1 = arith.constant 0 : i32
    return %c0_i32, %c0_i32_0 : i32, i32
  }
  func.func @transform_2(%arg0: i32) -> (i32, i32, i32) {
    %c0_i32 = arith.constant 0 : i32
    %c0_i32_0 = arith.constant 0 : i32
    %c0_i32_1 = arith.constant 0 : i32
    %c0_i32_2 = arith.constant 0 : i32
    return %c0_i32, %c0_i32_0, %c0_i32_1 : i32, i32, i32
  }
  func.func @transform_3(%arg0: i32) -> (i32, i32) {
    %c0_i32 = arith.constant 0 : i32
    %c0_i32_0 = arith.constant 0 : i32
    %c0_i32_1 = arith.constant 0 : i32
    return %c0_i32, %c0_i32_0 : i32, i32
  }
  func.func @transform_4(%arg0: i32) -> (i32, i32, i32) {
    %c0_i32 = arith.constant 0 : i32
    %c0_i32_0 = arith.constant 0 : i32
    %c0_i32_1 = arith.constant 0 : i32
    %c0_i32_2 = arith.constant 0 : i32
    return %c0_i32, %c0_i32_0, %c0_i32_1 : i32, i32, i32
  }
  func.func @transform_5(%arg0: i32) -> (i32, i32) {
    %c0_i32 = arith.constant 0 : i32
    %c0_i32_0 = arith.constant 0 : i32
    %c0_i32_1 = arith.constant 0 : i32
    return %c0_i32, %c0_i32_0 : i32, i32
  }
  func.func @transform_6(%arg0: i32) -> (i32, i32, i32) {
    %c0_i32 = arith.constant 0 : i32
    %c0_i32_0 = arith.constant 0 : i32
    %c0_i32_1 = arith.constant 0 : i32
    %c0_i32_2 = arith.constant 0 : i32
    return %c0_i32, %c0_i32_0, %c0_i32_1 : i32, i32, i32
  }
  func.func @transform_7(%arg0: i32) -> (i32, i32) {
    %c0_i32 = arith.constant 0 : i32
    %c0_i32_0 = arith.constant 0 : i32
    %c0_i32_1 = arith.constant 0 : i32
    return %c0_i32, %c0_i32_0 : i32, i32
  }
  func.func @transform_8(%arg0: i32) -> (i32, i32) {
    %c0_i32 = arith.constant 0 : i32
    %c0_i32_0 = arith.constant 0 : i32
    %c0_i32_1 = arith.constant 0 : i32
    return %c0_i32, %c0_i32_0 : i32, i32
  }
  func.func @transform_9(%arg0: i32) -> (i32, i32) {
    %c0_i32 = arith.constant 0 : i32
    %c0_i32_0 = arith.constant 0 : i32
    %c0_i32_1 = arith.constant 0 : i32
    return %c0_i32, %c0_i32_0 : i32, i32
  }
  func.func @transform_10(%arg0: i32) -> (i32, i32) {
    %c0_i32 = arith.constant 0 : i32
    %c0_i32_0 = arith.constant 0 : i32
    %c0_i32_1 = arith.constant 0 : i32
    return %c0_i32, %c0_i32_0 : i32, i32
  }
  func.func @transform_11(%arg0: i32) -> (i32, i32) {
    %c0_i32 = arith.constant 0 : i32
    %c0_i32_0 = arith.constant 0 : i32
    %c0_i32_1 = arith.constant 0 : i32
    return %c0_i32, %c0_i32_0 : i32, i32
  }
  func.func @transform_12(%arg0: i32) -> (i32, i32, i32) {
    %c0_i32 = arith.constant 0 : i32
    %c0_i32_0 = arith.constant 0 : i32
    %c0_i32_1 = arith.constant 0 : i32
    return %arg0, %c0_i32, %c0_i32_0 : i32, i32, i32
  }
}

</mosaic_0001>

<bundles_post_ra>
// kernel: cnn_forward_pallas.1
= control target key start
LH: loop header
LB: loop body
LE: loop exit
PB: predicated region body
PF: predicated region fallthrough
CT: control target
= control target key end

     0   :  { %17 = vsyncpa [#allocation3], 0  ;;  %s16707_s0 = inlined_call_operand.vmem [shape: f32[1,1792], index: 0, kind: input, shape index: {}]   ;;  %s16708_s1 = inlined_call_operand.hbm [shape: f32[27,896], index: 1, kind: input, shape index: {}]   ;;  %s16709_s2 = inlined_call_operand.vmem [shape: f32[9,8,1], index: 2, kind: input, shape index: {}]   ;;  %s16710_s3 = inlined_call_operand.vmem [shape: f32[8,1], index: 3, kind: input, shape index: {}]   ;;  %s16711_s4 = inlined_call_operand.vmem [shape: f32[9,16,8], index: 4, kind: input, shape index: {}]   ;;  %s16712_s5 = inlined_call_operand.vmem [shape: f32[16,1], index: 5, kind: input, shape index: {}]   ;;  %s16713_s6 = inlined_call_operand.vmem [shape: f32[9,32,16], index: 6, kind: input, shape index: {}]   ;;  %s16714_s7 = inlined_call_operand.vmem [shape: f32[32,1], index: 7, kind: input, shape index: {}]   ;;  %s16715_s8 = inlined_call_operand.hbm [shape: f32[896,512], index: 8, kind: input, shape index: {}]   ;;  %s16716_s9 = inlined_call_operand.hbm [shape: f32[32,512], index: 9, kind: input, shape index: {}]   ;;  %s16717_s10 = inlined_call_operand.hbm [shape: f32[512,128], index: 10, kind: input, shape index: {}]   ;;  %s16718_s11 = inlined_call_operand.hbm [shape: f32[1,128], index: 11, kind: input, shape index: {}]   ;;  %s16719_s12 = inlined_call_operand.hbm [shape: f32[2,1,128], index: 12, kind: output, shape index: {}]  }
   0x1   :  { %18 = vsyncpa [#allocation6], 0 }
   0x2   :  { %19 = vsyncpa [#allocation9], 0 }
   0x3   :  { %20 = vsyncpa [#allocation4], 0 }
   0x4   :  { %22 = vsyncpa [#allocation4 + $0x1], 0  ;;  %s12275_s21 = smov 0   ;;  %s12277_s22 = smov 0  }
   0x5   :  { %s12279_s23 = smov 0   ;;  %s12281_s24 = smov 0  }
   0x6 LB: > { %16767 = sst [smem:[#allocation16_spill]] %s12158_s21  ;;  %s12296_s25 = sadd.s32 4294967295, %s12170_s24   ;;  %s12170_s24 = sphi %s12281_s24, %s16991_s24   ;;  %s12166_s23 = sphi %s12279_s23, %s16993_s23   ;;  %s12162_s22 = sphi %s12277_s22, %s16995_s22   ;;  %s12158_s21 = sphi %s12275_s21, %s16994_s21  }
   0x7   : > { %16768 = sst [smem:[#allocation17_spill]] %s12166_s23  ;;  %s11265_s26 = sadd.s32 4294967294, %s12170_s24  }
   0x8   : > { %s12300_s27 = sadd.s32 1, %s12170_s24   ;;  %s292_s28 = sadd.s32 1, %s12166_s23 }
   0x9   : > { %16769 = sst [smem:[#allocation18_spill]] %s12300_s27  ;;  %s289_s29 = ssub.s32 %s12170_s24, %s12300_s27 }
   0xa   : > { %p302_p0 = scmp.ne.s32.totalorder %s12166_s23, %s12162_s22  ;;  %p290_p1 = scmp.eq.s32.totalorder %s289_s29, 0 }
   0xb   : > { %p303_p2 = scmp.eq.s32.totalorder %s12296_s25, 1  ;;  %p308_p3 = scmp.ne.s32.totalorder %s12162_s22, %s12158_s21 }
   0xc   : > { %p309_p4 = scmp.eq.s32.totalorder %s11265_s26, 1  ;;  %p11266_p7 = scmp.ge.s32.totalorder %s12170_s24, 1 }
   0xd   : > { %s12311_s30 = scalar_select %p290_p1, %s12166_s23, %s292_s28  }
   0xe   : > { %p12313_p5 = por %p303_p2, %p302_p0  ;;  %p12317_p6 = por %p309_p4, %p308_p3 }
   0xf   : > { %16770 = sst [smem:[#allocation19_spill]] %s12311_s30  ;;  %p316_p8 = scmp.lt.s32.totalorder %s12170_s24, 3 }
  0x10   : > { %s16772_s14 = scalar_select %p12317_p6, 1, 0 }
  0x11   : > { %p11882_p9 = scmp.eq.s32.totalorder %s12296_s25, 0  ;;  %p12324_p10 = pnand %p11266_p7, %p316_p8 }
  0x12   : > { %16773 = sst [smem:[#allocation20_spill]] %s16772_s14  ;;  %s12172_s16 = smov [#allocation5]  }
  0x13   : > { %s359_s17 = sshll.u32 %s12172_s16, 4  ;;  %p11862_p11 = pneg %p12324_p10  ;;  %s360_s17 = int_to_ptr.vmem [resolvable:$true] %s359_s17 }
  0x14   : > { %s12173_s19 = smov [#allocation8]   ;;  %s11979_s28 = scalar_lea.vmem %s360_s17, 57344 }
  0x15   : > { %p12332_p12 = pnand %p11882_p9, %p11862_p11  ;;  %s385_s20 = sshll.u32 %s12173_s19, 4  ;;  %s386_s20 = int_to_ptr.vmem [resolvable:$true] %s385_s20 }
  0x16   : > { %p11980_p0 = scmp.ne.s32.totalorder %s360_s17, %s11979_s28  ;;  %p11987_p3 = scmp.lt.s32.totalorder %s360_s17, %s360_s17 }
  0x17   : > { %p12338_p13 = pneg %p12332_p12  ;;  %p11988_p4 = scmp.lt.s32.totalorder %s11979_s28, %s11979_s28 }
  0x19   : > { %p11982_p1 = pnand %p11980_p0, %p12338_p13  ;;  %p11989_p7 = por %p11988_p4, %p11987_p3 }
  0x1b   : > { %p11983_p2 = pneg %p11982_p1 }
  0x1d   : > { %p11990_p8 = pnand %p11989_p7, %p11983_p2 }
  0x1f   : > { %11993 = shalt.err (!%p11990_p8)
}
  0x20   : > { %s16725_s29 = smov 512   ;;  %s16726_s16 = smov 32  }
  0x21   : > { %11868 = dma.hbm_to_vmem [thread:$0]  (!%p12332_p12), %s16715_s8, 57344, %s360_s17, [#allocation6], %s16725_s29, %s16725_s29, %s16726_s16  }
  0x22   : > { %s12005_s23 = scalar_lea.vmem %s386_s20, 8192  ;;  %p12013_p3 = scmp.lt.s32.totalorder %s386_s20, %s386_s20 }
  0x23   : > { %p12006_p11 = scmp.ne.s32.totalorder %s386_s20, %s12005_s23  ;;  %p12014_p2 = scmp.lt.s32.totalorder %s12005_s23, %s12005_s23 }
  0x25   : > { %p12008_p0 = pnand %p12006_p11, %p12338_p13  ;;  %p12015_p4 = por %p12014_p2, %p12013_p3 }
  0x27   : > { %p12009_p1 = pneg %p12008_p0 }
  0x29   : > { %p12016_p7 = pnand %p12015_p4, %p12009_p1 }
  0x2b   : > { %12019 = shalt.err (!%p12016_p7)
}
  0x2c   : > { %s12176_s28 = smov 128   ;;  %s12177_s27 = smov 8  }
  0x2d   : > { %11874 = dma.hbm_to_vmem [thread:$0]  (!%p12332_p12), %s16717_s10, 8192, %s386_s20, [#allocation9], %s12176_s28, %s12176_s28, %s12177_s27  }
  0x2e   : > { %s12178_s30 = smov [#allocation2]  }
  0x2f   : > { %s328_s17 = sshll.u32 %s12178_s30, 4  ;;  %s329_s17 = int_to_ptr.vmem [resolvable:$true] %s328_s17 }
  0x30   : > { %s12031_s19 = scalar_lea.vmem %s329_s17, 3584  ;;  %p12039_p3 = scmp.lt.s32.totalorder %s329_s17, %s329_s17 }
  0x31   : > { %p12032_p8 = scmp.ne.s32.totalorder %s329_s17, %s12031_s19  ;;  %p12040_p1 = scmp.lt.s32.totalorder %s12031_s19, %s12031_s19 }
  0x33   : > { %p12034_p11 = pnand %p12032_p8, %p12338_p13  ;;  %p12041_p2 = por %p12040_p1, %p12039_p3 }
  0x35   : > { %p12035_p0 = pneg %p12034_p11 }
  0x37   : > { %p12042_p4 = pnand %p12041_p2, %p12035_p0 }
  0x39   : > { %12045 = shalt.err (!%p12042_p4)
}
  0x3a   : > { %s12179_s23 = smov 896   ;;  %s12180_s29 = smov 56  }
  0x3b   : > { %11865 = dma.hbm_to_vmem [thread:$0]  (!%p12332_p12), %s16708_s1, 3584, %s329_s17, [#allocation3], %s12179_s23, %s12179_s23, %s12180_s29  }
  0x3c   : > { %s12181_s14 = smov [#allocation7]   ;;  %s12182_s28 = smov [#allocation10]  }
  0x3d   : > { %s372_s20 = sshll.u32 %s12181_s14, 4  ;;  %s399_s30 = sshll.u32 %s12182_s28, 4  ;;  %s373_s20 = int_to_ptr.vmem [resolvable:$true] %s372_s20  ;;  %s400_s30 = int_to_ptr.vmem [resolvable:$true] %s399_s30 }
  0x3e   : > { %s12057_s16 = scalar_lea.vmem %s373_s20, 2048  ;;  %p12065_p0 = scmp.lt.s32.totalorder %s373_s20, %s373_s20 }
  0x3f   : > { %p12058_p7 = scmp.ne.s32.totalorder %s373_s20, %s12057_s16  ;;  %p12066_p3 = scmp.lt.s32.totalorder %s12057_s16, %s12057_s16 }
  0x41   : > { %p12060_p8 = pnand %p12058_p7, %p12338_p13  ;;  %p12067_p1 = por %p12066_p3, %p12065_p0 }
  0x43   : > { %p12061_p11 = pneg %p12060_p8 }
  0x45   : > { %p12068_p2 = pnand %p12067_p1, %p12061_p11 }
  0x47   : > { %12071 = shalt.err (!%p12068_p2)
}
  0x48   : > { %s16777_s19 = smov 32   ;;  %s16778_s21 = smov 512  }
  0x49   : > { %11871 = dma.hbm_to_vmem [thread:$0]  (!%p12332_p12), %s16716_s9, 2048, %s373_s20, [#allocation6], %s16778_s21, %s16778_s21, %s16777_s19  }
  0x4a   : > { %s12083_s23 = scalar_lea.vmem %s400_s30, 16  ;;  %s12090_s16 = scalar_lea.vmem %s400_s30, 32 }
  0x4b   : > { %p12084_p4 = scmp.ne.s32.totalorder %s400_s30, %s12083_s23  ;;  %p12091_p0 = scmp.lt.s32.totalorder %s400_s30, %s400_s30 }
  0x4c   : > { %p12092_p11 = scmp.lt.s32.totalorder %s12090_s16, %s12083_s23 }
  0x4d   : > { %p12086_p7 = pnand %p12084_p4, %p12338_p13 }
  0x4e   : > { %p12093_p3 = por %p12092_p11, %p12091_p0 }
  0x4f   : > { %p12087_p8 = pneg %p12086_p7 }
  0x51   : > { %p12094_p1 = pnand %p12093_p3, %p12087_p8 }
  0x53   : > { %12097 = shalt.err (!%p12094_p1)
}
  0x54   : > { %11877 = dma.hbm_to_vmem [thread:$0]  (!%p12332_p12), %s16718_s11, 16, %s400_s30, [#allocation9]  }
  0x55   : > { %420 = sbr.rel (%p12324_p10) target bundleno = 2798 (0xaee), region = 68 }
  0x5a   : > { %12141 = dma.done.wait (%p11882_p9), [#allocation3], 3584  }
  0x5b   : > { %12143 = vsyncadd (%p11882_p9), [#allocation3], 4294963712 }
  0x5c   : > { %12145 = dma.done.wait (%p11882_p9), [#allocation6], 59392  }
  0x5d   : > { %12147 = vsyncadd (%p11882_p9), [#allocation6], 4294907904 }
  0x5e   : > { %12149 = dma.done.wait (%p11882_p9), [#allocation9], 8208  }
  0x5f   : > { %12151 = vsyncadd (%p11882_p9), [#allocation9], 4294959088  ;;  %s476_s15 = smul.u32 7, %s12296_s25  ;;  %v486_v0 = vlaneseq  ;;  %v12183_v1 = vmov 0   ;;  %v588_v6 = vld [vmem:[%s16709_s2] sm:$0xff]  ;;  %s12184_s19 = smov 29  }
  0x60   : > { %11962 = vset.pattern.permute.xlu1 %v12183_v1  ;;  %11963 = vset.pattern.permute.xlu0 %v12183_v1  ;;  %s12185_s21 = smov 28   ;;  %v11279_v16 = vld [vmem:[%s16709_s2 + $0x8] sm:$0xff]  ;;  %s12186_s23 = smov 27   ;;  %v11280_v18 = vld [vmem:[%s16709_s2 + $0x10] sm:$0xff]  ;;  %v11281_v20 = vld [vmem:[%s16709_s2 + $0x18] sm:$0xff]  ;;  %vm1736_vm9 = vcmask 64512  }
  0x61   : > { %p477_p10 = scmp.lt.s32.totalorder %s476_s15, 13  ;;  %v487_v2 = vshrl.u32 %v486_v0, 7  ;;  %591 = vperm.xlu1 %11962, %v588_v6   ;;  %s12187_s14 = smov 1   ;;  %v11282_v21 = vld [vmem:[%s16709_s2 + $0x20] sm:$0xff]  ;;  %v11283_v23 = vld [vmem:[%s16709_s2 + $0x28] sm:$0xff]  ;;  %v11284_v24 = vld [vmem:[%s16709_s2 + $0x30] sm:$0xff] }
  0x62   : > { %s12188_s28 = smov 127   ;;  %v11285_v25 = vld [vmem:[%s16709_s2 + $0x38] sm:$0xff]  ;;  %v11286_v26 = vld [vmem:[%s16709_s2 + $0x40] sm:$0xff]  ;;  %v12612_v48 = vand.u32 127, %v486_v0  ;;  %s12194_s30 = smov 58  }
  0x63   : > { %s16997_s15 = smov (!%p477_p10, %s476_s15), 13  ;;  %v12399_v3 = vsub.s32 0, %v487_v2  ;;  %v12401_v4 = vsub.s32 2, %v487_v2  ;;  %v12406_v5 = vsub.s32 1, %v487_v2  ;;  %v12421_v10 = vsub.s32 3, %v487_v2  ;;  %v1517_v30 = vld [vmem:[%s16710_s3] sm:$0xff] }
  0x64   : > { %s479_s20 = scalar_lea.vmem %s16707_s0, %s16997_s15  ;;  %v12429_v12 = vsub.s32 6, %v487_v2  ;;  %v12453_v15 = vsub.s32 5, %v487_v2  ;;  %v12495_v19 = vsub.s32 4, %v487_v2  ;;  %16787 = vst [vmem:[#allocation29_spill] sm:$0xff] %v12612_v48  ;;  %vm537_vm0 = vcmp.lt.s32.totalorder %v12612_v48, 29  ;;  %s12195_s29 = smov 54  }
  0x65   : > { %16779 = vst [vmem:[#allocation21_spill] sm:$0xff] %v12399_v3  ;;  %16780 = vst [vmem:[#allocation22_spill] sm:$0xff] %v12401_v4  ;;  %v12411_v7 = vld [vmem:[%s479_s20] sm:$0xff]  ;;  %vm647_vm1 = vcmp.lt.s32.totalorder %v12612_v48, 28  ;;  %vm765_vm2 = vcmp.lt.s32.totalorder %v12612_v48, 27  ;;  %vm883_vm3 = vcmp.lt.s32.totalorder %v12612_v48, 1 }
  0x66   : > { %16781 = vst [vmem:[#allocation23_spill] sm:$0xff] %v12406_v5  ;;  %v12415_v8 = vrot.slane %v12411_v7, %v12399_v3  ;;  %v12419_v9 = vrot.slane %v12411_v7, %v12401_v4  ;;  %16782 = vst [vmem:[#allocation24_spill] sm:$0xff] %v12421_v10  ;;  %v12427_v11 = vrot.slane %v12411_v7, %v12406_v5  ;;  %v482_v50 = vld [vmem:[#allocation2] ss:$8 sm:$0xf]  ;;  %vm1063_vm4 = vcmp.lt.s32.totalorder %v12612_v48, 127 }
  0x67   : > { %16783 = vst [vmem:[#allocation25_spill] sm:$0xff] %v12429_v12  ;;  %v12435_v13 = vrot.slane %v12411_v7, %v12421_v10  ;;  %v12441_v14 = vrot.slane %v12411_v7, %v12429_v12  ;;  %16784 = vst [vmem:[#allocation26_spill] sm:$0xff] %v12453_v15  ;;  %v12462_v17 = vrot.slane %v12411_v7, %v12453_v15  ;;  %v483_v51 = vld [vmem:[#allocation2] ss:$8 sm:$0xf0]  ;;  %vm1181_vm5 = vcmp.lt.s32.totalorder %v12612_v48, 101 }
  0x68   : > { %521 = vrot.lane.b32.xlu0 %v12415_v8, %s12184_s19  ;;  %525 = vrot.lane.b32.xlu1 %v12419_v9, %s12184_s19  ;;  %16785 = vst [vmem:[#allocation27_spill] sm:$0xff] %v12495_v19  ;;  %v505_v22 = vrot.slane %v12411_v7, %v12495_v19  ;;  %v630_v52 = vld [vmem:[#allocation2 + $0x1] ss:$8 sm:$0xf]  ;;  %v12618_v57 = vor.u32 %v483_v51, %v482_v50  ;;  %vm1299_vm6 = vcmp.lt.s32.totalorder %v12612_v48, 100  ;;  %vm1417_vm7 = vcmp.lt.s32.totalorder %v12612_v48, 99 }
  0x69   : > { %v631_v53 = vld [vmem:[#allocation2 + $0x1] ss:$8 sm:$0xf0]  ;;  %v984_v55 = vld [vmem:[#allocation2 + $0x4] ss:$8 sm:$0xf] }
  0x6a   : > { %v985_v56 = vld [vmem:[#allocation2 + $0x4] ss:$8 sm:$0xf0]  ;;  %v748_v58 = vld [vmem:[#allocation2 + $0x2] ss:$8 sm:$0xf]  ;;  %v12620_v60 = vor.u32 %v631_v53, %v630_v52  ;;  %v553_v6 = vrot.slane %v12618_v57, %v12406_v5 }
  0x6b   : > { %v749_v59 = vld [vmem:[#allocation2 + $0x2] ss:$8 sm:$0xf0]  ;;  %v866_v61 = vld [vmem:[#allocation2 + $0x3] ss:$8 sm:$0xf]  ;;  %v986_v1 = vor.u32 %v985_v56, %v984_v55 }
  0x6c   : > { %523 = vrot.lane.b32.xlu0 %v12427_v11, %s12184_s19  ;;  %527 = vrot.lane.b32.xlu1 %v12435_v13, %s12184_s19  ;;  %v867_v62 = vld [vmem:[#allocation2 + $0x3] ss:$8 sm:$0xf0]  ;;  %v12626_v2 = vor.u32 %v749_v59, %v748_v58  ;;  %v1164_v56 = vld [vmem:[#allocation2 + $0x6] ss:$8 sm:$0xf] }
  0x6d   : > { %v1165_v58 = vld [vmem:[#allocation2 + $0x6] ss:$8 sm:$0xf0]  ;;  %v1400_v51 = vld [vmem:[#allocation2 + $0x38] ss:$8 sm:$0xf] }
  0x6e   : > { %16788 = vst [vmem:[#allocation30_spill] sm:$0xff] %v12626_v2  ;;  %s12198_s17 = smov 74   ;;  %s12200_s16 = smov 70   ;;  %vm1682_vm8 = vcmp.lt.s32.totalorder %v12612_v48, 56  ;;  %vm1611_vm10 = vcmp.lt.s32.totalorder %v12612_v48, 58  ;;  %vm2379_vm11 = vcmp.lt.s32.totalorder %v12612_v48, 54 }
  0x6f   : > { %vm2777_vm12 = vcmp.lt.s32.totalorder %v12612_v48, 2  ;;  %vm3551_vm13 = vcmp.lt.s32.totalorder %v12612_v48, 126  ;;  %vm3949_vm14 = vcmp.lt.s32.totalorder %v12612_v48, 74  ;;  %vm4347_vm15 = vcmp.lt.s32.totalorder %v12612_v48, 72  ;;  %s12203_s26 = smov 108   ;;  %s12204_s20 = smov 4  }
  0x70   : > { %533 = vrot.lane.b32.xlu0 %v12441_v14, %s12184_s19  ;;  %635 = vrot.lane.b32.xlu1 %v12427_v11, %s12185_s21  ;;  %s12208_s18 = smov 12  }
  0x74   : > { %633 = vrot.lane.b32.xlu0 %v12415_v8, %s12185_s21  ;;  %639 = vrot.lane.b32.xlu1 %v12435_v13, %s12185_s21 }
  0x78   : > { %637 = vrot.lane.b32.xlu0 %v12419_v9, %s12185_s21  ;;  %702 = vperm.xlu1 %11962, %v11279_v16   ;;  %v667_v16 = vrot.slane %v12620_v60, %v12401_v4 }
  0x7c   : > { %645 = vrot.lane.b32.xlu0 %v12441_v14, %s12185_s21  ;;  %643 = vrot.lane.b32.xlu1 %v12462_v17, %s12185_s21 }
  0x80   : > { %531 = vrot.lane.b32.xlu0 %v12462_v17, %s12184_s19  ;;  %753 = vrot.lane.b32.xlu1 %v12427_v11, %s12186_s23 }
  0x84   : > { %751 = vrot.lane.b32.xlu0 %v12415_v8, %s12186_s23  ;;  %757 = vrot.lane.b32.xlu1 %v12435_v13, %s12186_s23 }
  0x88   : > { %755 = vrot.lane.b32.xlu0 %v12419_v9, %s12186_s23  ;;  %820 = vperm.xlu1 %11962, %v11280_v18   ;;  %v671_v18 = vrot.slane %v12620_v60, %v12421_v10 }
  0x8c   : > { %763 = vrot.lane.b32.xlu0 %v12441_v14, %s12186_s23  ;;  %869 = vrot.lane.b32.xlu1 %v12415_v8, %s12187_s14 }
  0x90   : > { %761 = vrot.lane.b32.xlu0 %v12462_v17, %s12186_s23  ;;  %873 = vrot.lane.b32.xlu1 %v12419_v9, %s12187_s14 }
  0x94   : > { %871 = vrot.lane.b32.xlu0 %v12427_v11, %s12187_s14  ;;  %881 = vrot.lane.b32.xlu1 %v12441_v14, %s12187_s14 }
  0x98   : > { %875 = vrot.lane.b32.xlu0 %v12435_v13, %s12187_s14  ;;  %879 = vrot.lane.b32.xlu1 %v12462_v17, %s12187_s14 }
  0x9c   : > { %938 = vperm.xlu0 %11963, %v11281_v20   ;;  %992 = vperm.xlu1 %11962, %v11282_v21  }
  0xa0   : > { %529 = vrot.lane.b32.xlu0 %v505_v22, %s12184_s19  ;;  %641 = vrot.lane.b32.xlu1 %v505_v22, %s12185_s21  ;;  %s12189_s19 = smov 101   ;;  %s12197_s21 = smov 126  }
  0xa4   : > { %1049 = vrot.lane.b32.xlu0 %v12415_v8, %s12188_s28  ;;  %1051 = vrot.lane.b32.xlu1 %v12427_v11, %s12188_s28 }
  0xa8   : > { %1053 = vrot.lane.b32.xlu0 %v12419_v9, %s12188_s28  ;;  %1055 = vrot.lane.b32.xlu1 %v12435_v13, %s12188_s28 }
  0xac   : > { %1057 = vrot.lane.b32.xlu0 %v505_v22, %s12188_s28  ;;  %1118 = vperm.xlu1 %11962, %v11283_v23   ;;  %v1047_v23 = vld [vmem:[#allocation2 + $0x5] ss:$8 sm:$0xf0] }
  0xb0   : > { %1061 = vrot.lane.b32.xlu0 %v12441_v14, %s12188_s28  ;;  %759 = vrot.lane.b32.xlu1 %v505_v22, %s12186_s23  ;;  %s12190_s23 = smov 100  }
  0xb4   : > { %1167 = vrot.lane.b32.xlu0 %v12415_v8, %s12189_s19  ;;  %1169 = vrot.lane.b32.xlu1 %v12427_v11, %s12189_s19 }
  0xb8   : > { %1171 = vrot.lane.b32.xlu0 %v12419_v9, %s12189_s19  ;;  %1173 = vrot.lane.b32.xlu1 %v12435_v13, %s12189_s19 }
  0xbc   : > { %1175 = vrot.lane.b32.xlu0 %v505_v22, %s12189_s19  ;;  %1236 = vperm.xlu1 %11962, %v11284_v24   ;;  %v12652_v24 = vmul.f32 %v986_v1, %v12411_v7 }
  0xc0   : > { %1179 = vrot.lane.b32.xlu0 %v12441_v14, %s12189_s19  ;;  %877 = vrot.lane.b32.xlu1 %v505_v22, %s12187_s14  ;;  %s12191_s14 = smov 99  }
  0xc4   : > { %1285 = vrot.lane.b32.xlu0 %v12415_v8, %s12190_s23  ;;  %1287 = vrot.lane.b32.xlu1 %v12427_v11, %s12190_s23 }
  0xc8   : > { %1289 = vrot.lane.b32.xlu0 %v12419_v9, %s12190_s23  ;;  %1291 = vrot.lane.b32.xlu1 %v12435_v13, %s12190_s23 }
  0xcc   : > { %1293 = vrot.lane.b32.xlu0 %v505_v22, %s12190_s23  ;;  %1354 = vperm.xlu1 %11962, %v11285_v25  }
  0xd0   : > { %1297 = vrot.lane.b32.xlu0 %v12441_v14, %s12190_s23  ;;  %1403 = vrot.lane.b32.xlu1 %v12415_v8, %s12191_s14  ;;  %v549_v8 = vrot.slane %v12618_v57, %v12399_v3 }
  0xd4   : > { %1405 = vrot.lane.b32.xlu0 %v12427_v11, %s12191_s14  ;;  %1407 = vrot.lane.b32.xlu1 %v12419_v9, %s12191_s14  ;;  %v12633_v9 = vor.u32 %v867_v62, %v866_v61  ;;  %v557_v11 = vrot.slane %v12618_v57, %v12401_v4  ;;  %v12691_v61 = vor.u32 %v1165_v58, %v1164_v56  ;;  %v1401_v56 = vld [vmem:[#allocation2 + $0x38] ss:$8 sm:$0xf0] }
  0xd5   : > { %v12750_v25 = vor.u32 %v1401_v56, %v1400_v51 }
  0xd6   : > { %16789 = vst [vmem:[#allocation31_spill] sm:$0xff] %v12633_v9  ;;  %16792 = vst [vmem:[#allocation34_spill] sm:$0xff] %v12691_v61 }
  0xd7   : > { %16794 = vst [vmem:[#allocation36_spill] sm:$0xff] %v12750_v25 }
  0xd8   : > { %1409 = vrot.lane.b32.xlu0 %v12435_v13, %s12191_s14  ;;  %1411 = vrot.lane.b32.xlu1 %v505_v22, %s12191_s14  ;;  %v561_v13 = vrot.slane %v12618_v57, %v12421_v10  ;;  %v1046_v22 = vld [vmem:[#allocation2 + $0x5] ss:$8 sm:$0xf] }
  0xd9   : > { %v12678_v1 = vor.u32 %v1047_v23, %v1046_v22  ;;  %v1282_v22 = vld [vmem:[#allocation2 + $0x7] ss:$8 sm:$0xf] }
  0xda   : > { %v12560_v27 = vpop.permute.xlu0 %521  ;;  %v1283_v23 = vld [vmem:[#allocation2 + $0x7] ss:$8 sm:$0xf0] }
  0xdc   : > { %1472 = vperm.xlu0 %11963, %v11286_v26   ;;  %1415 = vrot.lane.b32.xlu1 %v12441_v14, %s12191_s14  ;;  %v12567_v29 = vpop.permute.xlu1 %591  ;;  %v663_v14 = vrot.slane %v12620_v60, %v12406_v5  ;;  %v12727_v26 = vor.u32 %v1283_v23, %v1282_v22 }
  0xdd   : > { %16786 = vst [vmem:[#allocation28_spill] sm:$0xff] %v12567_v29 }
  0xde   : > { %v12562_v28 = vpop.permute.xlu0 %523  ;;  %16793 = vst [vmem:[#allocation35_spill] sm:$0xff] %v12727_v26 }
  0xdf   : > { %v543_v58 = vsel %vm537_vm0, %v12560_v27, %v12562_v28 }
  0xe0   : > { %1059 = vrot.lane.b32.xlu0 %v12462_v17, %s12188_s28  ;;  %1177 = vrot.lane.b32.xlu1 %v12462_v17, %s12189_s19  ;;  %v12576_v32 = vpop.permute.xlu1 %525  ;;  %v582_v20 = vmul.f32 %v553_v6, %v543_v58  ;;  %s12196_s19 = smov 2  }
  0xe1   : > { %v542_v22 = vsel %vm537_vm0, %v12562_v28, %v12576_v32 }
  0xe2   : > { %v12572_v31 = vpop.permute.xlu0 %533  ;;  %v583_v28 = vmul.f32 %v557_v11, %v542_v22  ;;  %v601_v22 = vrot.slane %v582_v20, %v12399_v3 }
  0xe3   : > { %v544_v50 = vsel %vm537_vm0, %v12572_v31, %v12560_v27 }
  0xe4   : > { %1520 = vperm.xlu0 %11963, %v1517_v30   ;;  %1295 = vrot.lane.b32.xlu1 %v12462_v17, %s12190_s23  ;;  %v12583_v34 = vpop.permute.xlu1 %527  ;;  %v581_v58 = vmul.f32 %v549_v8, %v544_v50  ;;  %v605_v11 = vrot.slane %v583_v28, %v12399_v3  ;;  %v16796_v28 = vrot.slane %v12620_v60, %v12429_v12 }
  0xe5   : > { %v541_v27 = vsel %vm537_vm0, %v12576_v32, %v12583_v34 }
  0xe6   : > { %v12578_v33 = vpop.permute.xlu0 %633  ;;  %v584_v6 = vmul.f32 %v561_v13, %v541_v27  ;;  %v597_v27 = vrot.slane %v581_v58, %v12399_v3 }
  0xe8   : > { %1413 = vrot.lane.b32.xlu0 %v12462_v17, %s12191_s14  ;;  %v12587_v36 = vpop.permute.xlu1 %635  ;;  %v659_v17 = vrot.slane %v12620_v60, %v12399_v3  ;;  %v609_v51 = vrot.slane %v584_v6, %v12399_v3  ;;  %s12206_s14 = smov 20  }
  0xe9   : > { %v653_v50 = vsel %vm647_vm1, %v12578_v33, %v12587_v36 }
  0xea   : > { %v12585_v35 = vpop.permute.xlu0 %637 }
  0xeb   : > { %v652_v8 = vsel %vm647_vm1, %v12587_v36, %v12585_v35 }
  0xec   : > { %v12591_v38 = vpop.permute.xlu1 %639  ;;  %v693_v6 = vmul.f32 %v667_v16, %v652_v8  ;;  %v624_v8 = vmul.f32 %v605_v11, %v12567_v29 }
  0xed   : > { %v651_v36 = vsel %vm647_vm1, %v12585_v35, %v12591_v38  ;;  %v692_v35 = vmul.f32 %v663_v14, %v653_v50 }
  0xee   : > { %v12589_v37 = vpop.permute.xlu0 %645 }
  0xef   : > { %v654_v7 = vsel %vm647_vm1, %v12589_v37, %v12578_v33  ;;  %v12836_v33 = vmul.f32 %v601_v22, %v12567_v29  ;;  %v694_v22 = vmul.f32 %v671_v18, %v651_v36  ;;  %v712_v18 = vrot.slane %v692_v35, %v12399_v3 }
  0xf0   : > { %v691_v58 = vmul.f32 %v659_v17, %v654_v7  ;;  %v12871_v7 = vmul.f32 %v609_v51, %v12567_v29  ;;  %v716_v51 = vrot.slane %v693_v6, %v12399_v3  ;;  %v16797_v6 = vrot.slane %v12626_v2, %v12406_v5 }
  0xf1   : > { %v720_v25 = vrot.slane %v694_v22, %v12399_v3 }
  0xf2   : > { %v12593_v39 = vpop.permute.xlu0 %531  ;;  %v708_v59 = vrot.slane %v691_v58, %v12399_v3 }
  0xf3   : > { %v12595_v40 = vpop.permute.xlu1 %702  ;;  %v538_v13 = vsel %vm537_vm0, %v12593_v39, %v12572_v31  ;;  %v622_v31 = vmul.f32 %v597_v27, %v12567_v29 }
  0xf4   : > { %v733_v22 = vmul.f32 %v708_v59, %v12595_v40 }
  0xf6   : > { %v12597_v41 = vpop.permute.xlu0 %751 }
  0xf7   : > { %v12599_v42 = vpop.permute.xlu1 %643 }
  0xf8   : > { %v648_v14 = vsel %vm647_vm1, %v12599_v42, %v12589_v37  ;;  %v16795_v37 = vrot.slane %v12618_v57, %v12429_v12 }
  0xfa   : > { %v12601_v43 = vpop.permute.xlu0 %755  ;;  %v587_v36 = vmul.f32 %v16795_v37, %v538_v13  ;;  %v697_v13 = vmul.f32 %v16796_v28, %v648_v14  ;;  %v16799_v28 = vrot.slane %v12626_v2, %v12421_v10 }
  0xfb   : > { %v12603_v44 = vpop.permute.xlu1 %753 }
  0xfc   : > { %v771_v17 = vsel %vm765_vm2, %v12597_v41, %v12603_v44  ;;  %v770_v35 = vsel %vm765_vm2, %v12603_v44, %v12601_v43  ;;  %v621_v44 = vrot.slane %v587_v36, %v12399_v3  ;;  %v16803_v36 = vrot.slane %v12633_v9, %v12406_v5 }
  0xfd   : > { %v810_v26 = vmul.f32 %v16797_v6, %v771_v17  ;;  %v734_v17 = vmul.f32 %v712_v18, %v12595_v40  ;;  %v735_v18 = vmul.f32 %v716_v51, %v12595_v40 }
  0xfe   : > { %v12605_v45 = vpop.permute.xlu0 %763 }
  0xff   : > { %v12607_v46 = vpop.permute.xlu1 %757  ;;  %v772_v37 = vsel %vm765_vm2, %v12605_v45, %v12597_v41  ;;  %v16800_v41 = vrot.slane %v12626_v2, %v12429_v12 }
 0x100   : > { %v769_v11 = vsel %vm765_vm2, %v12601_v43, %v12607_v46 }
 0x101   : > { %v812_v14 = vmul.f32 %v16799_v28, %v769_v11  ;;  %v16801_v11 = vrot.slane %v12626_v2, %v12399_v3  ;;  %v732_v28 = vrot.slane %v697_v13, %v12399_v3 }
 0x102   : > { %v12614_v49 = vpop.permute.xlu0 %761 }
 0x103   : > { %v12609_v47 = vpop.permute.xlu1 %820  ;;  %v766_v27 = vsel %vm765_vm2, %v12614_v49, %v12605_v45  ;;  %v838_v51 = vrot.slane %v812_v14, %v12399_v3 }
 0x104   : > { %v815_v45 = vmul.f32 %v16800_v41, %v766_v27  ;;  %v809_v27 = vmul.f32 %v16801_v11, %v772_v37  ;;  %v16802_v41 = vrot.slane %v12626_v2, %v12401_v4  ;;  %v740_v2 = vadd.f32 %v733_v22, %v622_v31 }
 0x106   : > { %v12622_v63 = vpop.permute.xlu0 %871 }
 0x107   : > { %v12616_v54 = vpop.permute.xlu1 %869 }
 0x108   : > { %v889_v58 = vsel %vm883_vm3, %v12616_v54, %v12622_v63 }
 0x109   : > { %v928_v13 = vmul.f32 %v16803_v36, %v889_v58  ;;  %v628_v58 = vmul.f32 %v621_v44, %v12567_v29  ;;  %v826_v36 = vrot.slane %v809_v27, %v12399_v3  ;;  %v16808_v44 = vrot.slane %v12633_v9, %v12401_v4 }
 0x10a   : > { %v12668_v53 = vpop.permute.xlu0 %875 }
 0x10b   : > { %v12624_v0 = vpop.permute.xlu1 %873  ;;  %16790 = vst [vmem:[#allocation32_spill] sm:$0xff] %v12668_v53 }
 0x10c   : > { %v888_v37 = vsel %vm883_vm3, %v12622_v63, %v12624_v0  ;;  %v16805_v63 = vrot.slane %v12633_v9, %v12421_v10 }
 0x10d   : > { %v929_v27 = vmul.f32 %v16808_v44, %v888_v37 }
 0x10f   : > { %v12649_v21 = vpop.permute.xlu1 %881  ;;  %v952_v29 = vrot.slane %v929_v27, %v12399_v3 }
 0x110   : > { %v890_v43 = vsel %vm883_vm3, %v12649_v21, %v12616_v54  ;;  %v887_v54 = vsel %vm883_vm3, %v12624_v0, %v12668_v53  ;;  %v736_v53 = vmul.f32 %v720_v25, %v12595_v40 }
 0x111   : > { %v930_v0 = vmul.f32 %v16805_v63, %v887_v54  ;;  %v851_v54 = vmul.f32 %v826_v36, %v12609_v47  ;;  %v948_v63 = vrot.slane %v928_v13, %v12399_v3 }
 0x113   : > { %v12680_v30 = vpop.permute.xlu1 %879  ;;  %v858_v22 = vadd.f32 %v851_v54, %v740_v2  ;;  %v16812_v54 = vrot.slane %v12652_v24, %v12421_v10 }
 0x114   : > { %16791 = vst [vmem:[#allocation33_spill] sm:$0xff] %v12680_v30  ;;  %v884_v59 = vsel %vm883_vm3, %v12680_v30, %v12649_v21  ;;  %v830_v21 = vrot.slane %v810_v26, %v12399_v3  ;;  %v850_v30 = vrot.slane %v815_v45, %v12399_v3  ;;  %v739_v26 = vmul.f32 %v732_v28, %v12595_v40 }
 0x116   : > { %v852_v45 = vmul.f32 %v830_v21, %v12609_v47  ;;  %v857_v21 = vmul.f32 %v850_v30, %v12609_v47  ;;  %v746_v44 = vadd.f32 %v739_v26, %v628_v58 }
 0x117   : > { %v12699_v52 = vpop.permute.xlu0 %938  ;;  %v12721_v62 = vpop.permute.xlu1 %992 }
 0x118   : > { %v970_v13 = vmul.f32 %v948_v63, %v12699_v52  ;;  %v971_v58 = vmul.f32 %v952_v29, %v12699_v52  ;;  %v1034_v63 = vmul.f32 %v16812_v54, %v12721_v62 }
 0x11b   : > { %v12746_v23 = vpop.permute.xlu0 %529  ;;  %v12763_v55 = vpop.permute.xlu1 %641 }
 0x11c   : > { %v650_v30 = vsel %vm647_vm1, %v12591_v38, %v12763_v55  ;;  %v540_v38 = vsel %vm537_vm0, %v12583_v34, %v12746_v23  ;;  %v649_v29 = vsel %vm647_vm1, %v12763_v55, %v12599_v42  ;;  %v16810_v34 = vrot.slane %v12652_v24, %v12406_v5 }
 0x11d   : > { %v16811_v42 = vrot.slane %v12652_v24, %v12399_v3 }
 0x11f   : > { %v12787_v32 = vpop.permute.xlu0 %1049  ;;  %v12810_v20 = vpop.permute.xlu1 %1051  ;;  %v1031_v55 = vmul.f32 %v16811_v42, %v12721_v62 }
 0x123   : > { %v12827_v56 = vpop.permute.xlu0 %1053  ;;  %v12858_v50 = vpop.permute.xlu1 %1055 }
 0x127   : > { %v12884_v16 = vpop.permute.xlu0 %1057  ;;  %v12904_v61 = vpop.permute.xlu1 %1118 }
 0x128   : > { %16798 = vst [vmem:[#allocation37_spill] sm:$0xff] %v12904_v61  ;;  %v811_v61 = vmul.f32 %v16802_v41, %v770_v35  ;;  %v16804_v35 = vrot.slane %v12633_v9, %v12399_v3 }
 0x12a   : > { %v927_v11 = vmul.f32 %v16804_v35, %v890_v43  ;;  %v16806_v43 = vrot.slane %v12633_v9, %v12429_v12  ;;  %v834_v14 = vrot.slane %v811_v61, %v12399_v3  ;;  %v854_v61 = vmul.f32 %v838_v51, %v12609_v47 }
 0x12b   : > { %v12926_v6 = vpop.permute.xlu0 %1061  ;;  %v12951_v41 = vpop.permute.xlu1 %759  ;;  %v956_v9 = vrot.slane %v930_v0, %v12399_v3 }
 0x12c   : > { %v933_v35 = vmul.f32 %v16806_v43, %v884_v59  ;;  %v944_v59 = vrot.slane %v927_v11, %v12399_v3  ;;  %v853_v28 = vmul.f32 %v834_v14, %v12609_v47  ;;  %v742_v11 = vadd.f32 %v735_v18, %v624_v8 }
 0x12d   : > { %v972_v0 = vmul.f32 %v956_v9, %v12699_v52 }
 0x12e   : > { %v968_v37 = vrot.slane %v933_v35, %v12399_v3  ;;  %v969_v51 = vmul.f32 %v944_v59, %v12699_v52  ;;  %v864_v35 = vadd.f32 %v857_v21, %v746_v44  ;;  %v860_v18 = vadd.f32 %v853_v28, %v742_v11 }
 0x12f   : > { %v12966_v25 = vpop.permute.xlu0 %1167  ;;  %v12977_v43 = vpop.permute.xlu1 %1169  ;;  %v16813_v59 = vrot.slane %v12618_v57, %v12495_v19  ;;  %v16815_v11 = vrot.slane %v12620_v60, %v12453_v15 }
 0x130   : > { %16807 = vst [vmem:[#allocation38_spill] sm:$0xff] %v12966_v25  ;;  %v741_v25 = vadd.f32 %v734_v17, %v12836_v33  ;;  %v743_v17 = vadd.f32 %v736_v53, %v12871_v7  ;;  %v539_v53 = vsel %vm537_vm0, %v12746_v23, %v12593_v39  ;;  %v975_v2 = vmul.f32 %v968_v37, %v12699_v52 }
 0x131   : > { %v1068_v39 = vsel %vm1063_vm4, %v12810_v20, %v12827_v56  ;;  %v1032_v23 = vmul.f32 %v16810_v34, %v12721_v62  ;;  %v585_v28 = vmul.f32 %v16813_v59, %v540_v38  ;;  %v1069_v37 = vsel %vm1063_vm4, %v12787_v32, %v12810_v20 }
 0x132   : > { %v859_v33 = vadd.f32 %v852_v45, %v741_v25  ;;  %v861_v8 = vadd.f32 %v854_v61, %v743_v17  ;;  %v16809_v25 = vrot.slane %v12620_v60, %v12495_v19  ;;  %v976_v45 = vadd.f32 %v969_v51, %v858_v22 }
 0x133   : > { %v12985_v36 = vpop.permute.xlu0 %1171  ;;  %v12994_v31 = vpop.permute.xlu1 %1173  ;;  %v16814_v61 = vrot.slane %v12618_v57, %v12453_v15  ;;  %v696_v44 = vmul.f32 %v16815_v11, %v649_v29  ;;  %v16817_v57 = vrot.slane %v12652_v24, %v12429_v12  ;;  %v16818_v20 = vrot.slane %v12652_v24, %v12495_v19 }
 0x134   : > { %v977_v9 = vadd.f32 %v970_v13, %v859_v33  ;;  %v695_v26 = vmul.f32 %v16809_v25, %v650_v30  ;;  %v979_v27 = vadd.f32 %v972_v0, %v861_v8  ;;  %v1067_v13 = vsel %vm1063_vm4, %v12827_v56, %v12858_v50 }
 0x135   : > { %v586_v21 = vmul.f32 %v16814_v61, %v539_v53  ;;  %v16816_v33 = vrot.slane %v12678_v1, %v12406_v5  ;;  %v1037_v30 = vmul.f32 %v16817_v57, %v12721_v62  ;;  %v13066_v56 = vmul.f32 %v16818_v20, %v12721_v62 }
 0x136   : > { %v724_v60 = vrot.slane %v695_v26, %v12399_v3  ;;  %v982_v51 = vadd.f32 %v975_v2, %v864_v35  ;;  %v16819_v0 = vrot.slane %v12652_v24, %v12453_v15  ;;  %v1039_v53 = vadd.f32 %v1032_v23, %v977_v9 }
 0x137   : > { %v13008_v7 = vpop.permute.xlu0 %1175  ;;  %v13026_v14 = vpop.permute.xlu1 %1236  ;;  %v1108_v17 = vmul.f32 %v16816_v33, %v1068_v39  ;;  %v16820_v38 = vrot.slane %v12678_v1, %v12399_v3  ;;  %v16821_v25 = vrot.slane %v12678_v1, %v12401_v4  ;;  %v1066_v35 = vsel %vm1063_vm4, %v12858_v50, %v12884_v16  ;;  %v16826_v33 = vld [vmem:[#allocation30_spill] sm:$0xff] }
 0x138   : > { %v13073_v8 = vmul.f32 %v16819_v0, %v12721_v62  ;;  %v1038_v26 = vadd.f32 %v1031_v55, %v976_v45  ;;  %v613_v34 = vrot.slane %v585_v28, %v12399_v3  ;;  %v617_v42 = vrot.slane %v586_v21, %v12399_v3 }
 0x139   : > { %v1107_v29 = vmul.f32 %v16820_v38, %v1069_v37  ;;  %v1109_v39 = vmul.f32 %v16821_v25, %v1067_v13  ;;  %v1070_v9 = vsel %vm1063_vm4, %v12926_v6, %v12787_v32  ;;  %v13091_v23 = vadd.f32 %v1034_v63, %v979_v27  ;;  %v16829_v38 = vld [vmem:[#allocation37_spill] sm:$0xff] }
 0x13a   : > { %v728_v54 = vrot.slane %v696_v44, %v12399_v3  ;;  %v1128_v59 = vrot.slane %v1108_v17, %v12399_v3  ;;  %v767_v50 = vsel %vm765_vm2, %v12951_v41, %v12614_v49  ;;  %v768_v45 = vsel %vm765_vm2, %v12607_v46, %v12951_v41 }
 0x13b   : > { %v13060_v22 = vpop.permute.xlu0 %1179  ;;  %v878_v2 = vpop.permute.xlu1 %877  ;;  %v737_v32 = vmul.f32 %v724_v60, %v12595_v40  ;;  %v16822_v27 = vrot.slane %v12678_v1, %v12421_v10  ;;  %v978_v28 = vadd.f32 %v971_v58, %v860_v18  ;;  %v16823_v61 = vrot.slane %v12652_v24, %v12401_v4  ;;  %v16825_v18 = vld [vmem:[#allocation28_spill] sm:$0xff] }
 0x13c   : > { %v1124_v49 = vrot.slane %v1107_v29, %v12399_v3  ;;  %v1132_v37 = vrot.slane %v1109_v39, %v12399_v3  ;;  %v16824_v46 = vrot.slane %v12678_v1, %v12429_v12  ;;  %v1186_v13 = vsel %vm1181_vm5, %v12977_v43, %v12985_v36 }
 0x13d   : > { %v1110_v63 = vmul.f32 %v16822_v27, %v1066_v35  ;;  %v1033_v21 = vmul.f32 %v16823_v61, %v12721_v62  ;;  %v626_v58 = vmul.f32 %v613_v34, %v16825_v18  ;;  %v1044_v44 = vadd.f32 %v1037_v30, %v982_v51  ;;  %v16830_v51 = vld [vmem:[#allocation38_spill] sm:$0xff] }
 0x13e   : > { %v1113_v41 = vmul.f32 %v16824_v46, %v1070_v9  ;;  %v16827_v24 = vrot.slane %v16826_v33, %v12495_v19  ;;  %v16828_v17 = vrot.slane %v16826_v33, %v12453_v15  ;;  %v627_v20 = vmul.f32 %v617_v42, %v16825_v18  ;;  %v16831_v35 = vld [vmem:[#allocation34_spill] sm:$0xff] }
 0x13f   : > { %v13103_v55 = vpop.permute.xlu0 %1285  ;;  %v1288_v11 = vpop.permute.xlu1 %1287  ;;  %v738_v60 = vmul.f32 %v728_v54, %v12595_v40  ;;  %v1150_v29 = vmul.f32 %v1128_v59, %v16829_v38  ;;  %v1149_v25 = vmul.f32 %v1124_v49, %v16829_v38  ;;  %v1136_v30 = vrot.slane %v1110_v63, %v12399_v3  ;;  %v16833_v63 = vld [vmem:[#allocation33_spill] sm:$0xff]  ;;  %v16834_v49 = vld [vmem:[#allocation32_spill] sm:$0xff] }
 0x140   : > { %v813_v62 = vmul.f32 %v16827_v24, %v768_v45  ;;  %v814_v57 = vmul.f32 %v16828_v17, %v767_v50  ;;  %v1187_v39 = vsel %vm1181_vm5, %v16830_v51, %v12977_v43  ;;  %v16832_v34 = vrot.slane %v16831_v35, %v12406_v5 }
 0x141   : > { %v1185_v40 = vsel %vm1181_vm5, %v12985_v36, %v12994_v31  ;;  %v744_v42 = vadd.f32 %v737_v32, %v626_v58  ;;  %v1148_v54 = vrot.slane %v1113_v41, %v12399_v3  ;;  %v1040_v50 = vadd.f32 %v1033_v21, %v978_v28 }
 0x142   : > { %v1226_v9 = vmul.f32 %v16832_v34, %v1186_v13  ;;  %v1151_v45 = vmul.f32 %v1132_v37, %v16829_v38  ;;  %v842_v43 = vrot.slane %v813_v62, %v12399_v3  ;;  %v846_v27 = vrot.slane %v814_v57, %v12399_v3  ;;  %v16837_v62 = vld [vmem:[#allocation31_spill] sm:$0xff] }
 0x143   : > { %v1290_v0 = vpop.permute.xlu0 %1289  ;;  %v1292_v59 = vpop.permute.xlu1 %1291  ;;  %v885_v61 = vsel %vm883_vm3, %v878_v2, %v16833_v63  ;;  %v886_v36 = vsel %vm883_vm3, %v16834_v49, %v878_v2  ;;  %v745_v32 = vadd.f32 %v738_v60, %v627_v20  ;;  %v16835_v46 = vrot.slane %v16831_v35, %v12399_v3 }
 0x144   : > { %v16836_v28 = vrot.slane %v16831_v35, %v12401_v4  ;;  %v1184_v37 = vsel %vm1181_vm5, %v12994_v31, %v13008_v7  ;;  %v1246_v18 = vrot.slane %v1226_v9, %v12399_v3  ;;  %v1157_v58 = vadd.f32 %v1150_v29, %v1039_v53 }
 0x145   : > { %v1225_v41 = vmul.f32 %v16835_v46, %v1187_v39  ;;  %v1156_v2 = vadd.f32 %v1149_v25, %v1038_v26  ;;  %v1152_v33 = vmul.f32 %v1136_v30, %v16829_v38  ;;  %v1188_v24 = vsel %vm1181_vm5, %v13060_v22, %v16830_v51 }
 0x146   : > { %v1227_v21 = vmul.f32 %v16836_v28, %v1185_v40  ;;  %v16838_v17 = vrot.slane %v16837_v62, %v12495_v19  ;;  %v16839_v31 = vrot.slane %v16837_v62, %v12453_v15  ;;  %v1158_v39 = vadd.f32 %v1151_v45, %v1040_v50  ;;  %v16842_v28 = vld [vmem:[#allocation35_spill] sm:$0xff] }
 0x147   : > { %v13167_v13 = vpop.permute.xlu0 %1293  ;;  %v13181_v60 = vpop.permute.xlu1 %1354  ;;  %v1155_v53 = vmul.f32 %v1148_v54, %v16829_v38  ;;  %v855_v26 = vmul.f32 %v842_v43, %v12609_v47  ;;  %v856_v29 = vmul.f32 %v846_v27, %v12609_v47  ;;  %v16840_v25 = vrot.slane %v16831_v35, %v12421_v10 }
 0x148   : > { %v931_v57 = vmul.f32 %v16838_v17, %v886_v36  ;;  %v932_v20 = vmul.f32 %v16839_v31, %v885_v61  ;;  %v1242_v51 = vrot.slane %v1225_v41, %v12399_v3  ;;  %v1250_v34 = vrot.slane %v1227_v21, %v12399_v3 }
 0x149   : > { %v1228_v30 = vmul.f32 %v16840_v25, %v1184_v37  ;;  %v1304_v9 = vsel %vm1299_vm6, %v1288_v11, %v1290_v0  ;;  %v1303_v40 = vsel %vm1299_vm6, %v1290_v0, %v1292_v59  ;;  %v16841_v54 = vrot.slane %v16831_v35, %v12429_v12 }
 0x14a   : > { %v1302_v45 = vsel %vm1299_vm6, %v1292_v59, %v13167_v13  ;;  %v1268_v43 = vmul.f32 %v1246_v18, %v13026_v14  ;;  %v1159_v27 = vadd.f32 %v1152_v33, %v13091_v23  ;;  %v960_v63 = vrot.slane %v931_v57, %v12399_v3 }
 0x14b   : > { %v13195_v50 = vpop.permute.xlu0 %1297  ;;  %v1231_v47 = vmul.f32 %v16841_v54, %v1188_v24  ;;  %v964_v61 = vrot.slane %v932_v20, %v12399_v3  ;;  %v1305_v0 = vsel %vm1299_vm6, %v13103_v55, %v1288_v11  ;;  %v1404_v49 = vpop.permute.xlu1 %1403  ;;  %v1267_v36 = vmul.f32 %v1242_v51, %v13026_v14 }
 0x14c   : > { %v1162_v46 = vadd.f32 %v1155_v53, %v1044_v44  ;;  %v1254_v41 = vrot.slane %v1228_v30, %v12399_v3  ;;  %v16843_v59 = vrot.slane %v16842_v28, %v12406_v5  ;;  %v16844_v23 = vrot.slane %v16842_v28, %v12401_v4 }
 0x14d   : > { %v862_v18 = vadd.f32 %v855_v26, %v744_v42  ;;  %v863_v33 = vadd.f32 %v856_v29, %v745_v32  ;;  %v16845_v24 = vrot.slane %v16842_v28, %v12421_v10  ;;  %v1269_v17 = vmul.f32 %v1250_v34, %v13026_v14 }
 0x14e   : > { %v1344_v21 = vmul.f32 %v16843_v59, %v1304_v9  ;;  %v1345_v37 = vmul.f32 %v16844_v23, %v1303_v40  ;;  %v1266_v44 = vrot.slane %v1231_v47, %v12399_v3  ;;  %v16846_v57 = vrot.slane %v16842_v28, %v12399_v3  ;;  %v16847_v40 = vld [vmem:[#allocation36_spill] sm:$0xff] }
 0x14f   : > { %v1346_v11 = vmul.f32 %v16845_v24, %v1302_v45  ;;  %v1406_v62 = vpop.permute.xlu0 %1405  ;;  %v1275_v53 = vadd.f32 %v1268_v43, %v1157_v58  ;;  %v973_v42 = vmul.f32 %v960_v63, %v12699_v52  ;;  %v974_v32 = vmul.f32 %v964_v61, %v12699_v52  ;;  %v1408_v29 = vpop.permute.xlu1 %1407 }
 0x150   : > { %v1343_v31 = vmul.f32 %v16846_v57, %v1305_v0  ;;  %v1423_v20 = vsel %vm1417_vm7, %v1404_v49, %v1406_v62  ;;  %v1306_v26 = vsel %vm1299_vm6, %v13195_v50, %v13103_v55  ;;  %v1274_v25 = vadd.f32 %v1267_v36, %v1156_v2 }
 0x151   : > { %v1364_v30 = vrot.slane %v1344_v21, %v12399_v3  ;;  %v1368_v51 = vrot.slane %v1345_v37, %v12399_v3  ;;  %v1422_v34 = vsel %vm1417_vm7, %v1406_v62, %v1408_v29  ;;  %v1270_v58 = vmul.f32 %v1254_v41, %v13026_v14 }
 0x152   : > { %v1372_v9 = vrot.slane %v1346_v11, %v12399_v3  ;;  %v16848_v52 = vrot.slane %v16847_v40, %v12399_v3  ;;  %v16849_v55 = vrot.slane %v16847_v40, %v12406_v5  ;;  %v1276_v45 = vadd.f32 %v1269_v17, %v1158_v39 }
 0x153   : > { %v1410_v2 = vpop.permute.xlu0 %1409  ;;  %v1273_v43 = vmul.f32 %v1266_v44, %v13026_v14  ;;  %v1360_v63 = vrot.slane %v1343_v31, %v12399_v3  ;;  %v16850_v61 = vrot.slane %v16842_v28, %v12429_v12  ;;  %v980_v41 = vadd.f32 %v973_v42, %v862_v18  ;;  %v13257_v39 = vpop.permute.xlu1 %1411 }
 0x154   : > { %v1461_v54 = vmul.f32 %v16848_v52, %v1423_v20  ;;  %v1462_v47 = vmul.f32 %v16849_v55, %v1422_v34  ;;  %v1421_v36 = vsel %vm1417_vm7, %v1408_v29, %v1410_v2  ;;  %v981_v59 = vadd.f32 %v974_v32, %v863_v33 }
 0x155   : > { %v1349_v0 = vmul.f32 %v16850_v61, %v1306_v26  ;;  %v16851_v23 = vrot.slane %v16847_v40, %v12401_v4  ;;  %v1420_v24 = vsel %vm1417_vm7, %v1410_v2, %v13257_v39  ;;  %v1386_v11 = vmul.f32 %v1364_v30, %v13181_v60 }
 0x156   : > { %v1482_v21 = vrot.slane %v1462_v47, %v12399_v3  ;;  %v1385_v62 = vmul.f32 %v1360_v63, %v13181_v60  ;;  %v1387_v17 = vmul.f32 %v1368_v51, %v13181_v60  ;;  %v1478_v18 = vrot.slane %v1461_v54, %v12399_v3 }
 0x157   : > { %v1463_v37 = vmul.f32 %v16851_v23, %v1421_v36  ;;  %v16852_v44 = vrot.slane %v16847_v40, %v12421_v10  ;;  %v13270_v31 = vpop.permute.xlu0 %1472  ;;  %v1388_v20 = vmul.f32 %v1372_v9, %v13181_v60  ;;  %v1384_v42 = vrot.slane %v1349_v0, %v12399_v3  ;;  %v1416_v51 = vpop.permute.xlu1 %1415 }
 0x158   : > { %v1504_v32 = vmul.f32 %v1482_v21, %v13270_v31  ;;  %v1277_v26 = vadd.f32 %v1270_v58, %v1159_v27  ;;  %v1280_v29 = vadd.f32 %v1273_v43, %v1162_v46  ;;  %v1042_v34 = vadd.f32 %v13066_v56, %v980_v41 }
 0x159   : > { %v1486_v33 = vrot.slane %v1463_v37, %v12399_v3  ;;  %v1464_v57 = vmul.f32 %v16852_v44, %v1420_v24  ;;  %v1043_v52 = vadd.f32 %v13073_v8, %v981_v59  ;;  %v1503_v54 = vmul.f32 %v1478_v18, %v13270_v31 }
 0x15a   : > { %v1424_v55 = vsel %vm1417_vm7, %v1416_v51, %v1404_v49  ;;  %v1393_v47 = vadd.f32 %v1386_v11, %v1275_v53  ;;  %v1392_v9 = vadd.f32 %v1385_v62, %v1274_v25  ;;  %v16853_v27 = vrot.slane %v16847_v40, %v12429_v12 }
 0x15b   : > { %v1490_v30 = vrot.slane %v1464_v57, %v12399_v3  ;;  %v1505_v2 = vmul.f32 %v1486_v33, %v13270_v31  ;;  %v1060_v58 = vpop.permute.xlu0 %1059  ;;  %v1395_v43 = vadd.f32 %v1388_v20, %v1277_v26  ;;  %v1394_v56 = vadd.f32 %v1387_v17, %v1276_v45  ;;  %v1178_v45 = vpop.permute.xlu1 %1177 }
 0x15c   : > { %v1467_v46 = vmul.f32 %v16853_v27, %v1424_v55  ;;  %v1391_v8 = vmul.f32 %v1384_v42, %v13181_v60  ;;  %v1064_v61 = vsel %vm1063_vm4, %v1060_v58, %v12926_v6  ;;  %v1065_v49 = vsel %vm1063_vm4, %v12884_v16, %v1060_v58 }
 0x15d   : > { %v1506_v63 = vmul.f32 %v1490_v30, %v13270_v31  ;;  %v1511_v53 = vadd.f32 %v1504_v32, %v1393_v47  ;;  %v16854_v25 = vrot.slane %v12678_v1, %v12495_v19  ;;  %v16855_v36 = vrot.slane %v12678_v1, %v12453_v15 }
 0x15e   : > { %v1510_v59 = vadd.f32 %v1503_v54, %v1392_v9  ;;  %v1502_v23 = vrot.slane %v1467_v46, %v12399_v3  ;;  %v1182_v6 = vsel %vm1181_vm5, %v1178_v45, %v13060_v22  ;;  %v1183_v16 = vsel %vm1181_vm5, %v13008_v7, %v1178_v45 }
 0x15f   : > { %v1111_v0 = vmul.f32 %v16854_v25, %v1065_v49  ;;  %v1112_v41 = vmul.f32 %v16855_v36, %v1064_v61  ;;  %v1513_v21 = vadd.f32 %v1506_v63, %v1395_v43  ;;  %v1512_v37 = vadd.f32 %v1505_v2, %v1394_v56  ;;  %v1521_v33 = vpop.permute.xlu0 %1520  ;;  %v1296_v30 = vpop.permute.xlu1 %1295 }
 0x160   : > { %v16856_v1 = vrot.slane %v16831_v35, %v12495_v19  ;;  %v16857_v17 = vrot.slane %v16831_v35, %v12453_v15  ;;  %v13314_v44 = vadd.f32 %v1521_v33, %v1511_v53  ;;  %v1523_v22 = vadd.f32 %v1521_v33, %v1510_v59 }
 0x161   : > { %v1140_v24 = vrot.slane %v1111_v0, %v12399_v3  ;;  %v1144_v11 = vrot.slane %v1112_v41, %v12399_v3  ;;  %v13316_v57 = vadd.f32 %v1521_v33, %v1513_v21  ;;  %v13318_v7 = vadd.f32 %v1521_v33, %v1512_v37 }
 0x162   : > { %v1229_v62 = vmul.f32 %v16856_v1, %v1183_v16  ;;  %v1230_v18 = vmul.f32 %v16857_v17, %v1182_v6  ;;  %v1300_v35 = vsel %vm1299_vm6, %v1296_v30, %v13195_v50  ;;  %v1301_v54 = vsel %vm1299_vm6, %v13167_v13, %v1296_v30 }
 0x163   : > { %v1153_v20 = vmul.f32 %v1140_v24, %v16829_v38  ;;  %v1154_v42 = vmul.f32 %v1144_v11, %v16829_v38  ;;  %v1531_v55 = vmax.f32 %v13314_v44, 0.0  ;;  %v1530_v47 = vmax.f32 %v1523_v22, 0.0  ;;  %v1414_v46 = vpop.permute.xlu0 %1413 }
 0x164   : > { %v1258_v32 = vrot.slane %v1229_v62, %v12399_v3  ;;  %v1262_v26 = vrot.slane %v1230_v18, %v12399_v3  ;;  %v16858_v58 = vrot.slane %v16842_v28, %v12495_v19  ;;  %v16859_v50 = vrot.slane %v16842_v28, %v12453_v15 }
 0x165   : > { %v1160_v9 = vadd.f32 %v1153_v20, %v1042_v34  ;;  %v1161_v2 = vadd.f32 %v1154_v42, %v1043_v52  ;;  %v1418_v13 = vsel %vm1417_vm7, %v1414_v46, %v1416_v51  ;;  %v1419_v34 = vsel %vm1417_vm7, %v13257_v39, %v1414_v46  ;;  %1539 = vrot.lane.b32.xlu0 %v1531_v55, %s12188_s28 }
 0x166   : > { %v1271_v38 = vmul.f32 %v1258_v32, %v13026_v14  ;;  %v1272_v27 = vmul.f32 %v1262_v26, %v13026_v14  ;;  %v1347_v43 = vmul.f32 %v16858_v58, %v1301_v54  ;;  %v1348_v63 = vmul.f32 %v16859_v50, %v1300_v35  ;;  %1537 = vrot.lane.b32.xlu1 %v1530_v47, %s12188_s28 }
 0x167   : > { %v16860_v14 = vrot.slane %v16847_v40, %v12495_v19  ;;  %v16861_v56 = vrot.slane %v16847_v40, %v12453_v15  ;;  %v1398_v28 = vadd.f32 %v1391_v8, %v1280_v29  ;;  %v1533_v53 = vmax.f32 %v13316_v57, 0.0 }
 0x168   : > { %v1376_v49 = vrot.slane %v1347_v43, %v12399_v3  ;;  %v1380_v51 = vrot.slane %v1348_v63, %v12399_v3  ;;  %v1509_v39 = vmul.f32 %v1502_v23, %v13270_v31  ;;  %v1532_v36 = vmax.f32 %v13318_v7, 0.0 }
 0x169   : > { %v1465_v52 = vmul.f32 %v16860_v14, %v1419_v34  ;;  %v1466_v61 = vmul.f32 %v16861_v56, %v1418_v13  ;;  %v1278_v41 = vadd.f32 %v1271_v38, %v1160_v9  ;;  %1543 = vrot.lane.b32.xlu0 %v1533_v53, %s12188_s28  ;;  %v1279_v8 = vadd.f32 %v1272_v27, %v1161_v2 }
 0x16a   : > { %v1389_v40 = vmul.f32 %v1376_v49, %v13181_v60  ;;  %v1390_v45 = vmul.f32 %v1380_v51, %v13181_v60  ;;  %v1516_v29 = vadd.f32 %v1509_v39, %v1398_v28  ;;  %1541 = vrot.lane.b32.xlu1 %v1532_v36, %s12188_s28  ;;  %v16743_v63 = vmov 0.0  }
 0x16b   : > { %v1494_v25 = vrot.slane %v1465_v52, %v12399_v3  ;;  %v1498_v0 = vrot.slane %v1466_v61, %v12399_v3  ;;  %1807 = vmatprep.mubr.f32.mxu0 %v16743_v63  ;;  %1884 = vmatprep.mubr.f32.mxu1 %v16743_v63  ;;  %vm4745_vm0 = vcmp.lt.s32.totalorder %v12612_v48, 70  ;;  %vm5480_vm2 = vcmask 130048  }
 0x16c   : > { %v1529_v23 = vadd.f32 %v1521_v33, %v1516_v29  ;;  %v1396_v6 = vadd.f32 %v1389_v40, %v1278_v41  ;;  %v1397_v16 = vadd.f32 %v1390_v45, %v1279_v8  ;;  %v1665_v8 = vld [vmem:[#allocation2 + $0x3a] ss:$8 sm:$0xf] }
 0x16d   : > { %v1507_v59 = vmul.f32 %v1494_v25, %v13270_v31  ;;  %v1508_v21 = vmul.f32 %v1498_v0, %v13270_v31 }
 0x16e   : > { %v1536_v37 = vmax.f32 %v1529_v23, 0.0  ;;  %v5126_v23 = vld [vmem:[%s16712_s5 + $0x8] sm:$0xff] }
 0x16f   : > { %v1514_v24 = vadd.f32 %v1507_v59, %v1396_v6  ;;  %v1515_v11 = vadd.f32 %v1508_v21, %v1397_v16  ;;  %v1666_v59 = vld [vmem:[#allocation2 + $0x3a] ss:$8 sm:$0xf0] }
 0x170   : > { %1549 = vrot.lane.b32.xlu1 %v1536_v37, %s12188_s28  ;;  %v1667_v21 = vor.u32 %v1666_v59, %v1665_v8 }
 0x171   : > { %v1527_v1 = vadd.f32 %v1521_v33, %v1514_v24  ;;  %v1528_v60 = vadd.f32 %v1521_v33, %v1515_v11  ;;  %v5125_v24 = vld [vmem:[%s16712_s5] sm:$0xff] }
 0x172   : > { %v1698_v6 = vrot.slane %v1667_v21, %v12406_v5 }
 0x173   : > { %v1534_v62 = vmax.f32 %v1527_v1, 0.0  ;;  %v1535_v17 = vmax.f32 %v1528_v60, 0.0  ;;  %v1694_v60 = vrot.slane %v1667_v21, %v12399_v3 }
 0x175   : > { %1545 = vrot.lane.b32.xlu0 %v1534_v62, %s12188_s28  ;;  %1547 = vrot.lane.b32.xlu1 %v1535_v17, %s12188_s28  ;;  %s12193_s28 = smov 56  }
 0x1d7   : > { %v1540_v18 = vpop.permute.xlu0 %1539 }
 0x1d8   : > { %v1538_v44 = vpop.permute.xlu1 %1537 }
 0x1d9   : > { %v1556_v31 = vsel %vm1063_vm4, %v1538_v44, %v1540_v18 }
 0x1da   : > { %v1558_v22 = vmax.f32 %v1530_v47, %v1556_v31 }
 0x1db   : > { %v1544_v57 = vpop.permute.xlu0 %1543 }
 0x1dc   : > { %v1542_v7 = vpop.permute.xlu1 %1541  ;;  %1565 = vrot.lane.b32.xlu0 %v1558_v22, %s12190_s23 }
 0x1dd   : > { %v1555_v20 = vsel %vm1063_vm4, %v1540_v18, %v1542_v7  ;;  %v1554_v33 = vsel %vm1063_vm4, %v1542_v7, %v1544_v57  ;;  %v1594_v18 = vld [vmem:[#allocation2 + $0x39] ss:$8 sm:$0xf]  ;;  %v1702_v7 = vrot.slane %v1667_v21, %v12401_v4 }
 0x1de   : > { %v1559_v42 = vmax.f32 %v1531_v55, %v1555_v20  ;;  %v1560_v32 = vmax.f32 %v1532_v36, %v1554_v33 }
 0x1e0   : > { %1567 = vrot.lane.b32.xlu1 %v1559_v42, %s12190_s23  ;;  %1569 = vrot.lane.b32.xlu0 %v1560_v32, %s12190_s23 }
 0x1e2   : > { %v1550_v26 = vpop.permute.xlu1 %1549 }
 0x1e3   : > { %v1557_v30 = vsel %vm1063_vm4, %v1550_v26, %v1538_v44  ;;  %v1595_v44 = vld [vmem:[#allocation2 + $0x39] ss:$8 sm:$0xf0] }
 0x1e4   : > { %v1564_v35 = vmax.f32 %v1536_v37, %v1557_v30 }
 0x1e6   : > { %1577 = vrot.lane.b32.xlu1 %v1564_v35, %s12190_s23 }
 0x1e7   : > { %v1548_v54 = vpop.permute.xlu1 %1547  ;;  %v1546_v47 = vpop.permute.xlu0 %1545 }
 0x1e8   : > { %v1552_v9 = vsel %vm1063_vm4, %v1546_v47, %v1548_v54  ;;  %v1553_v55 = vsel %vm1063_vm4, %v1544_v57, %v1546_v47  ;;  %v1551_v27 = vsel %vm1063_vm4, %v1548_v54, %v1550_v26  ;;  %v1706_v57 = vrot.slane %v1667_v21, %v12421_v10  ;;  %v11288_v47 = vld [vmem:[%s16711_s4 + $0x18] sm:$0xff] }
 0x1e9   : > { %v1561_v2 = vmax.f32 %v1533_v53, %v1553_v55  ;;  %v1562_v38 = vmax.f32 %v1534_v62, %v1552_v9  ;;  %v1563_v46 = vmax.f32 %v1535_v17, %v1551_v27  ;;  %v1710_v26 = vrot.slane %v1667_v21, %v12495_v19 }
 0x1ea   : > { %v1714_v9 = vrot.slane %v1667_v21, %v12453_v15  ;;  %v1718_v55 = vrot.slane %v1667_v21, %v12429_v12 }
 0x1eb   : > { %1571 = vrot.lane.b32.xlu0 %v1561_v2, %s12190_s23  ;;  %1573 = vrot.lane.b32.xlu1 %v1562_v38, %s12190_s23 }
 0x1ef   : > { %1575 = vrot.lane.b32.xlu0 %v1563_v46, %s12190_s23  ;;  %s12199_s23 = smov 72  }
 0x24e   : > { %v1566_v58 = vpop.permute.xlu0 %1565 }
 0x252   : > { %v1568_v43 = vpop.permute.xlu1 %1567  ;;  %v1570_v50 = vpop.permute.xlu0 %1569 }
 0x253   : > { %v1584_v13 = vsel %vm1299_vm6, %v1566_v58, %v1568_v43  ;;  %v1583_v34 = vsel %vm1299_vm6, %v1568_v43, %v1570_v50 }
 0x254   : > { %v13395_v14 = vmax.f32 %v1558_v22, %v1584_v13  ;;  %v13397_v52 = vmax.f32 %v1559_v42, %v1583_v34  ;;  %v11287_v22 = vld [vmem:[%s16711_s4 + $0x10] sm:$0xff]  ;;  %v13507_v42 = vor.u32 %v1595_v44, %v1594_v18 }
 0x256   : > { %1668 = vrot.lane.b32.xlu1 %v13395_v14, %s12193_s28  ;;  %1670 = vrot.lane.b32.xlu0 %v13397_v52, %s12193_s28  ;;  %v1635_v27 = vrot.slane %v13507_v42, %v12421_v10  ;;  %v1623_v59 = vrot.slane %v13507_v42, %v12399_v3 }
 0x258   : > { %v1578_v56 = vpop.permute.xlu1 %1577 }
 0x259   : > { %v1585_v61 = vsel %vm1299_vm6, %v1578_v56, %v1566_v58 }
 0x25a   : > { %v13403_v28 = vmax.f32 %v1564_v35, %v1585_v61 }
 0x25c   : > { %1680 = vrot.lane.b32.xlu1 %v13403_v28, %s12193_s28 }
 0x25d   : > { %v1574_v49 = vpop.permute.xlu1 %1573  ;;  %v1572_v51 = vpop.permute.xlu0 %1571 }
 0x25e   : > { %v1581_v53 = vsel %vm1299_vm6, %v1572_v51, %v1574_v49  ;;  %v1582_v39 = vsel %vm1299_vm6, %v1570_v50, %v1572_v51 }
 0x25f   : > { %v13410_v25 = vmax.f32 %v1560_v32, %v1582_v39  ;;  %v13412_v0 = vmax.f32 %v1561_v2, %v1581_v53  ;;  %v1631_v53 = vrot.slane %v13507_v42, %v12401_v4  ;;  %v1627_v39 = vrot.slane %v13507_v42, %v12406_v5 }
 0x261   : > { %1672 = vrot.lane.b32.xlu0 %v13410_v25, %s12193_s28  ;;  %1674 = vrot.lane.b32.xlu1 %v13412_v0, %s12193_s28  ;;  %v1576_v36 = vpop.permute.xlu0 %1575 }
 0x262   : > { %v1579_v41 = vsel %vm1299_vm6, %v1576_v36, %v1578_v56  ;;  %v1580_v40 = vsel %vm1299_vm6, %v1574_v49, %v1576_v36 }
 0x263   : > { %v13420_v45 = vmax.f32 %v1562_v38, %v1580_v40  ;;  %v13422_v29 = vmax.f32 %v1563_v46, %v1579_v41 }
 0x265   : > { %1676 = vrot.lane.b32.xlu0 %v13420_v45, %s12193_s28  ;;  %1678 = vrot.lane.b32.xlu1 %v13422_v29, %s12193_s28  ;;  %s12205_s28 = smov 124  }
 0x269   : > { %1601 = vrot.lane.b32.xlu0 %v13410_v25, %s12194_s30  ;;  %1603 = vrot.lane.b32.xlu1 %v13412_v0, %s12194_s30 }
 0x26d   : > { %1599 = vrot.lane.b32.xlu0 %v13397_v52, %s12194_s30  ;;  %1597 = vrot.lane.b32.xlu1 %v13395_v14, %s12194_s30 }
 0x271   : > { %1609 = vrot.lane.b32.xlu0 %v13403_v28, %s12194_s30  ;;  %1607 = vrot.lane.b32.xlu1 %v13422_v29, %s12194_s30 }
 0x275   : > { %1605 = vrot.lane.b32.xlu0 %v13420_v45, %s12194_s30  ;;  %2365 = vrot.lane.b32.xlu1 %v13395_v14, %s12195_s29  ;;  %s11551_s30 = sshll.u32 %s12296_s25, 4 }
 0x276   : > { %s11161_s27 = scalar_lea.hbm %s16719_s12, %s11551_s30 }
 0x279   : > { %2367 = vrot.lane.b32.xlu0 %v13397_v52, %s12195_s29  ;;  %2377 = vrot.lane.b32.xlu1 %v13403_v28, %s12195_s29 }
 0x27d   : > { %2369 = vrot.lane.b32.xlu0 %v13410_v25, %s12195_s29  ;;  %2371 = vrot.lane.b32.xlu1 %v13412_v0, %s12195_s29 }
 0x281   : > { %2373 = vrot.lane.b32.xlu0 %v13420_v45, %s12195_s29  ;;  %2375 = vrot.lane.b32.xlu1 %v13422_v29, %s12195_s29  ;;  %s12207_s29 = smov 16  }
 0x285   : > { %2767 = vrot.lane.b32.xlu0 %v13410_v25, %s12196_s19  ;;  %2769 = vrot.lane.b32.xlu1 %v13412_v0, %s12196_s19 }
 0x289   : > { %2765 = vrot.lane.b32.xlu0 %v13397_v52, %s12196_s19  ;;  %2763 = vrot.lane.b32.xlu1 %v13395_v14, %s12196_s19 }
 0x28d   : > { %2775 = vrot.lane.b32.xlu0 %v13403_v28, %s12196_s19  ;;  %2773 = vrot.lane.b32.xlu1 %v13422_v29, %s12196_s19 }
 0x291   : > { %2771 = vrot.lane.b32.xlu0 %v13420_v45, %s12196_s19  ;;  %3543 = vrot.lane.b32.xlu1 %v13412_v0, %s12197_s21 }
 0x295   : > { %3545 = vrot.lane.b32.xlu0 %v13420_v45, %s12197_s21  ;;  %3541 = vrot.lane.b32.xlu1 %v13410_v25, %s12197_s21 }
 0x299   : > { %3539 = vrot.lane.b32.xlu0 %v13397_v52, %s12197_s21  ;;  %3537 = vrot.lane.b32.xlu1 %v13395_v14, %s12197_s21 }
 0x29d   : > { %3549 = vrot.lane.b32.xlu0 %v13403_v28, %s12197_s21  ;;  %3547 = vrot.lane.b32.xlu1 %v13422_v29, %s12197_s21 }
 0x2a1   : > { %3937 = vrot.lane.b32.xlu0 %v13397_v52, %s12198_s17  ;;  %3939 = vrot.lane.b32.xlu1 %v13410_v25, %s12198_s17 }
 0x2a5   : > { %3935 = vrot.lane.b32.xlu0 %v13395_v14, %s12198_s17  ;;  %3941 = vrot.lane.b32.xlu1 %v13412_v0, %s12198_s17 }
 0x2a9   : > { %3943 = vrot.lane.b32.xlu0 %v13420_v45, %s12198_s17  ;;  %3945 = vrot.lane.b32.xlu1 %v13422_v29, %s12198_s17 }
 0x2ad   : > { %3947 = vrot.lane.b32.xlu0 %v13403_v28, %s12198_s17  ;;  %4339 = vrot.lane.b32.xlu1 %v13412_v0, %s12199_s23 }
 0x2b1   : > { %4341 = vrot.lane.b32.xlu0 %v13420_v45, %s12199_s23  ;;  %4337 = vrot.lane.b32.xlu1 %v13410_v25, %s12199_s23 }
 0x2b5   : > { %4335 = vrot.lane.b32.xlu0 %v13397_v52, %s12199_s23  ;;  %4333 = vrot.lane.b32.xlu1 %v13395_v14, %s12199_s23 }
 0x2b9   : > { %4345 = vrot.lane.b32.xlu0 %v13403_v28, %s12199_s23  ;;  %4343 = vrot.lane.b32.xlu1 %v13422_v29, %s12199_s23 }
 0x2bd   : > { %4733 = vrot.lane.b32.xlu0 %v13397_v52, %s12200_s16  ;;  %4735 = vrot.lane.b32.xlu1 %v13410_v25, %s12200_s16 }
 0x2c1   : > { %4731 = vrot.lane.b32.xlu0 %v13395_v14, %s12200_s16  ;;  %4737 = vrot.lane.b32.xlu1 %v13412_v0, %s12200_s16 }
 0x2c5   : > { %4739 = vrot.lane.b32.xlu0 %v13420_v45, %s12200_s16  ;;  %4741 = vrot.lane.b32.xlu1 %v13422_v29, %s12200_s16 }
 0x2c8   : > { %v1669_v16 = vpop.permute.xlu1 %1668  ;;  %v1671_v37 = vpop.permute.xlu0 %1670 }
 0x2c9   : > { %4743 = vrot.lane.b32.xlu0 %v13403_v28, %s12200_s16  ;;  %5134 = vperm.xlu1 %11962, %v5126_v23   ;;  %v1688_v11 = vsel %vm1682_vm8, %v1669_v16, %v1671_v37 }
 0x2ca   : > { %v1727_v1 = vmul.f32 %v1698_v6, %v1688_v11  ;;  %v1647_v6 = vrot.slane %v13507_v42, %v12429_v12 }
 0x2cc   : > { %1773 = vmatprep.subr.mxu0 %v1727_v1 }
 0x2cd   : > { %5129 = vperm.xlu0 %11963, %v5125_v24   ;;  %v1662_v24 = vld [vmem:[%s16711_s4] sm:$0xff] }
 0x2ce   : > { %v1681_v62 = vpop.permute.xlu1 %1680 }
 0x2cf   : > { %v1689_v17 = vsel %vm1682_vm8, %v1681_v62, %v1669_v16  ;;  %v2362_v16 = vld [vmem:[#allocation2 + $0x3b] ss:$8 sm:$0xf] }
 0x2d0   : > { %v1726_v31 = vmul.f32 %v1694_v60, %v1689_v17 }
 0x2d2   : > { %1774 = vmatpush1.msra.mxu0 %v1726_v31  ;;  %v1639_v31 = vrot.slane %v13507_v42, %v12495_v19 }
 0x2d3   : > { %v1675_v20 = vpop.permute.xlu1 %1674  ;;  %v1673_v33 = vpop.permute.xlu0 %1672  ;;  %11289 = vmatmul.mubr.msk.f32.vlgmr.msra.gmra.mxu0 %vm1736_vm9, %v11287_v22 }
 0x2d4   : > { %v1686_v32 = vsel %vm1682_vm8, %v1673_v33, %v1675_v20  ;;  %v1687_v30 = vsel %vm1682_vm8, %v1671_v37, %v1673_v33  ;;  %1813 = vmatprep.mubr.f32.mxu0 %v16743_v63  ;;  %v2363_v37 = vld [vmem:[#allocation2 + $0x3b] ss:$8 sm:$0xf0] }
 0x2d5   : > { %v1729_v35 = vmul.f32 %v1706_v57, %v1686_v32  ;;  %v1728_v54 = vmul.f32 %v1702_v7, %v1687_v30  ;;  %v13563_v17 = vor.u32 %v2363_v37, %v2362_v16  ;;  %v1663_v57 = vld [vmem:[%s16711_s4 + $0x8] sm:$0xff] }
 0x2d7   : > { %v1679_v2 = vpop.permute.xlu1 %1678  ;;  %1850 = vmatprep.subr.mxu1 %v1729_v35  ;;  %v1677_v38 = vpop.permute.xlu0 %1676  ;;  %11290 = vmatmul.mubr.msk.f32.gmra.mxu0 %vm1736_vm9, %v11288_v47  ;;  %v2395_v35 = vrot.slane %v13563_v17, %v12406_v5 }
 0x2d8   : > { %v1683_v46 = vsel %vm1682_vm8, %v1679_v2, %v1681_v62  ;;  %v1684_v58 = vsel %vm1682_vm8, %v1677_v38, %v1679_v2  ;;  %v1685_v43 = vsel %vm1682_vm8, %v1675_v20, %v1677_v38  ;;  %1851 = vmatpush1.msra.mxu1 %v1728_v54  ;;  %1961 = vmatprep.mubr.f32.mxu0 %v16743_v63 }
 0x2d9   : > { %v1730_v50 = vmul.f32 %v1710_v26, %v1685_v43  ;;  %11291 = vmatmul.mubr.msk.f32.vlgmr.msra.gmra.mxu1 %vm1736_vm9, %v11287_v22  ;;  %v1731_v13 = vmul.f32 %v1714_v9, %v1684_v58  ;;  %v1732_v34 = vmul.f32 %v1718_v55, %v1683_v46  ;;  %v2399_v2 = vrot.slane %v13563_v17, %v12401_v4  ;;  %v2760_v58 = vld [vmem:[#allocation2 + $0x3c] ss:$8 sm:$0xf] }
 0x2da   : > { %1890 = vmatprep.mubr.f32.mxu1 %v16743_v63  ;;  %v2403_v46 = vrot.slane %v13563_v17, %v12421_v10  ;;  %v2761_v43 = vld [vmem:[#allocation2 + $0x3c] ss:$8 sm:$0xf0] }
 0x2db   : > { %v1604_v56 = vpop.permute.xlu1 %1603  ;;  %1927 = vmatprep.subr.mxu0 %v1731_v13  ;;  %11705 = vmatprep.subr.mxu1 %v1732_v34  ;;  %v1602_v61 = vpop.permute.xlu0 %1601 }
 0x2dc   : > { %v1615_v49 = vsel %vm1611_vm10, %v1602_v61, %v1604_v56  ;;  %1928 = vmatpush1.msra.mxu0 %v1730_v50  ;;  %11706 = vmatpush3.msra.mxu1 %v1732_v34  ;;  %v11305_v50 = vld [vmem:[%s16711_s4 + $0x20] sm:$0xff] }
 0x2dd   : > { %11293 = vmatmul.mubr.msk.f32.vlgmr.msra.gmra.mxu0 %vm1736_vm9, %v11287_v22  ;;  %11292 = vmatmul.mubr.msk.f32.gmra.mxu1 %vm1736_vm9, %v11288_v47  ;;  %v1658_v51 = vmul.f32 %v1635_v27, %v1615_v49 }
 0x2de   : > { %1967 = vmatprep.mubr.f32.mxu0 %v16743_v63  ;;  %11707 = vmatprep.mubr.msk.f32.mxu1 %vm1736_vm9, %v11287_v22  ;;  %v1643_v22 = vrot.slane %v13507_v42, %v12453_v15  ;;  %v2391_v42 = vrot.slane %v13563_v17, %v12399_v3 }
 0x2df   : > { %v1598_v36 = vpop.permute.xlu1 %1597  ;;  %2162 = vmatprep.subr.mxu0 %v1658_v51  ;;  %v1600_v41 = vpop.permute.xlu0 %1599 }
 0x2e0   : > { %v1616_v40 = vsel %vm1611_vm10, %v1600_v41, %v1602_v61  ;;  %v1617_v8 = vsel %vm1611_vm10, %v1598_v36, %v1600_v41  ;;  %v2411_v61 = vrot.slane %v13563_v17, %v12453_v15  ;;  %v2415_v41 = vrot.slane %v13563_v17, %v12429_v12 }
 0x2e1   : > { %v1657_v21 = vmul.f32 %v1631_v53, %v1616_v40  ;;  %11294 = vmatmul.mubr.msk.f32.gmra.mxu0 %vm1736_vm9, %v11288_v47  ;;  %11708 = vmatmul.mubr.msk.f32.vlgmr.msra.gmra.mxu1 %vm1736_vm9, %v11288_v47  ;;  %v1656_v23 = vmul.f32 %v1627_v39, %v1617_v8  ;;  %v13611_v53 = vor.u32 %v2761_v43, %v2760_v58  ;;  %v11306_v40 = vld [vmem:[%s16711_s4 + $0x28] sm:$0xff]  ;;  %v11316_v43 = vld [vmem:[%s16711_s4 + $0x38] sm:$0xff] }
 0x2e2   : > { %2196 = vmatprep.mubr.f32.mxu0 %v16743_v63  ;;  %2119 = vmatprep.mubr.f32.mxu1 %v16743_v63 }
 0x2e3   : > { %v1608_v11 = vpop.permute.xlu1 %1607  ;;  %2085 = vmatprep.subr.mxu1 %v1656_v23  ;;  %2163 = vmatpush1.msra.mxu0 %v1657_v21  ;;  %v1610_v1 = vpop.permute.xlu0 %1609  ;;  %v2801_v16 = vrot.slane %v13611_v53, %v12421_v10 }
 0x2e4   : > { %v1612_v60 = vsel %vm1611_vm10, %v1608_v11, %v1610_v1  ;;  %v1618_v62 = vsel %vm1611_vm10, %v1610_v1, %v1598_v36 }
 0x2e5   : > { %v1655_v18 = vmul.f32 %v1623_v59, %v1618_v62  ;;  %11299 = vmatmul.mubr.msk.f32.vlgmr.msra.gmra.mxu0 %vm1736_vm9, %v1662_v24  ;;  %v1661_v44 = vmul.f32 %v1647_v6, %v1612_v60 }
 0x2e6   : > { %2202 = vmatprep.mubr.f32.mxu0 %v16743_v63 }
 0x2e7   : > { %v2366_v7 = vpop.permute.xlu1 %2365  ;;  %2086 = vmatpush1.msra.mxu1 %v1655_v18  ;;  %11710 = vmatprep.subr.mxu0 %v1661_v44  ;;  %v1606_v20 = vpop.permute.xlu0 %1605  ;;  %v3159_v18 = vld [vmem:[#allocation2 + $0x3d] ss:$8 sm:$0xf0] }
 0x2e8   : > { %v1613_v33 = vsel %vm1611_vm10, %v1606_v20, %v1608_v11  ;;  %v1614_v32 = vsel %vm1611_vm10, %v1604_v56, %v1606_v20  ;;  %11297 = vmatmul.mubr.msk.f32.vlgmr.msra.gmra.mxu1 %vm1736_vm9, %v1662_v24  ;;  %11711 = vmatpush3.msra.mxu0 %v1661_v44  ;;  %v2407_v56 = vrot.slane %v13563_v17, %v12495_v19  ;;  %v3158_v17 = vld [vmem:[#allocation2 + $0x3d] ss:$8 sm:$0xf]  ;;  %vm11137_vm10 = vcmask 1040384  }
 0x2e9   : > { %v1659_v26 = vmul.f32 %v1639_v31, %v1614_v32  ;;  %11300 = vmatmul.mubr.msk.f32.gmra.mxu0 %vm1736_vm9, %v1663_v57  ;;  %2125 = vmatprep.mubr.f32.mxu1 %v16743_v63  ;;  %v1660_v30 = vmul.f32 %v1643_v22, %v1613_v33  ;;  %v2797_v31 = vrot.slane %v13611_v53, %v12401_v4 }
 0x2ea   : > { %11712 = vmatprep.mubr.msk.f32.mxu0 %vm1736_vm9, %v1662_v24  ;;  %v2793_v22 = vrot.slane %v13611_v53, %v12406_v5  ;;  %v13644_v20 = vor.u32 %v3159_v18, %v3158_v17 }
 0x2eb   : > { %v2378_v54 = vpop.permute.xlu1 %2377  ;;  %2239 = vmatprep.subr.mxu1 %v1660_v30  ;;  %v2368_v47 = vpop.permute.xlu0 %2367 }
 0x2ec   : > { %v2386_v9 = vsel %vm2379_vm11, %v2378_v54, %v2366_v7  ;;  %v2385_v55 = vsel %vm2379_vm11, %v2366_v7, %v2368_v47  ;;  %11298 = vmatmul.mubr.msk.f32.gmra.mxu1 %vm1736_vm9, %v1663_v57 }
 0x2ed   : > { %v2423_v38 = vmul.f32 %v2391_v42, %v2386_v9  ;;  %2240 = vmatpush1.msra.mxu1 %v1659_v26  ;;  %11713 = vmatmul.mubr.msk.f32.vlgmr.msra.gmra.mxu0 %vm1736_vm9, %v1663_v57  ;;  %v2424_v27 = vmul.f32 %v2395_v35, %v2385_v55  ;;  %v2789_v42 = vrot.slane %v13611_v53, %v12399_v3 }
 0x2ee   : > { %2273 = vmatprep.mubr.f32.mxu1 %v16743_v63  ;;  %2503 = vmatprep.mubr.f32.mxu0 %v16743_v63  ;;  %v2813_v35 = vrot.slane %v13611_v53, %v12429_v12  ;;  %v3169_v55 = vrot.slane %v13644_v20, %v12406_v5 }
 0x2ef   : > { %v2372_v13 = vpop.permute.xlu1 %2371  ;;  %2469 = vmatprep.subr.mxu0 %v2424_v27  ;;  %v2370_v34 = vpop.permute.xlu0 %2369  ;;  %v2805_v27 = vrot.slane %v13611_v53, %v12495_v19 }
 0x2f0   : > { %v2383_v49 = vsel %vm2379_vm11, %v2370_v34, %v2372_v13  ;;  %v2384_v51 = vsel %vm2379_vm11, %v2368_v47, %v2370_v34  ;;  %11301 = vmatmul.mubr.msk.f32.vlgmr.msra.gmra.mxu1 %vm1736_vm9, %v1662_v24  ;;  %2470 = vmatpush1.msra.mxu0 %v2423_v38  ;;  %v3535_v34 = vld [vmem:[#allocation2 + $0x3e] ss:$8 sm:$0xf0] }
 0x2f1   : > { %v2425_v39 = vmul.f32 %v2399_v2, %v2384_v51  ;;  %11307 = vmatmul.mubr.msk.f32.vlgmr.msra.gmra.mxu0 %vm1736_vm9, %v11305_v50  ;;  %2279 = vmatprep.mubr.f32.mxu1 %v16743_v63  ;;  %v2426_v36 = vmul.f32 %v2403_v46, %v2383_v49  ;;  %v3198_v49 = vmul.f32 %v3169_v55, %v13397_v52 }
 0x2f2   : > { %2509 = vmatprep.mubr.f32.mxu0 %v16743_v63  ;;  %v3165_v51 = vrot.slane %v13644_v20, %v12399_v3 }
 0x2f3   : > { %v2376_v8 = vpop.permute.xlu1 %2375  ;;  %2546 = vmatprep.subr.mxu1 %v2426_v36  ;;  %v2374_v59 = vpop.permute.xlu0 %2373 }
 0x2f4   : > { %v2380_v21 = vsel %vm2379_vm11, %v2376_v8, %v2378_v54  ;;  %v2381_v23 = vsel %vm2379_vm11, %v2374_v59, %v2376_v8  ;;  %v2382_v6 = vsel %vm2379_vm11, %v2372_v13, %v2374_v59  ;;  %11302 = vmatmul.mubr.msk.f32.gmra.mxu1 %vm1736_vm9, %v1663_v57  ;;  %v11315_v54 = vld [vmem:[%s16711_s4 + $0x30] sm:$0xff] }
 0x2f5   : > { %v2427_v37 = vmul.f32 %v2407_v56, %v2382_v6  ;;  %2547 = vmatpush1.msra.mxu1 %v2425_v39  ;;  %11308 = vmatmul.mubr.msk.f32.gmra.mxu0 %vm1736_vm9, %v11306_v40  ;;  %v2428_v24 = vmul.f32 %v2411_v61, %v2381_v23  ;;  %v2429_v11 = vmul.f32 %v2415_v41, %v2380_v21  ;;  %v3534_v13 = vld [vmem:[#allocation2 + $0x3e] ss:$8 sm:$0xf] }
 0x2f6   : > { %2580 = vmatprep.mubr.f32.mxu1 %v16743_v63  ;;  %2657 = vmatprep.mubr.f32.mxu0 %v16743_v63  ;;  %v3177_v39 = vrot.slane %v13644_v20, %v12421_v10  ;;  %v3185_v41 = vrot.slane %v13644_v20, %v12453_v15  ;;  %v13691_v52 = vor.u32 %v3535_v34, %v3534_v13  ;;  %v11335_v13 = vld [vmem:[%s16711_s4 + $0x50] sm:$0xff] }
 0x2f7   : > { %v2770_v1 = vpop.permute.xlu1 %2769  ;;  %2623 = vmatprep.subr.mxu0 %v2428_v24  ;;  %11715 = vmatprep.subr.mxu1 %v2429_v11  ;;  %v2768_v60 = vpop.permute.xlu0 %2767  ;;  %v3173_v23 = vrot.slane %v13644_v20, %v12401_v4  ;;  %v3197_v6 = vmul.f32 %v3165_v51, %v13395_v14  ;;  %v3189_v24 = vrot.slane %v13644_v20, %v12429_v12 }
 0x2f8   : > { %v2781_v62 = vsel %vm2777_vm12, %v2768_v60, %v2770_v1  ;;  %11309 = vmatmul.mubr.msk.f32.vlgmr.msra.gmra.mxu1 %vm1736_vm9, %v11305_v50  ;;  %2624 = vmatpush1.msra.mxu0 %v2427_v37  ;;  %v3181_v37 = vrot.slane %v13644_v20, %v12495_v19  ;;  %v3587_v20 = vrot.slane %v13691_v52, %v12429_v12 }
 0x2f9   : > { %11716 = vmatpush3.msra.mxu1 %v2429_v11  ;;  %11311 = vmatmul.mubr.msk.f32.vlgmr.msra.gmra.mxu0 %vm1736_vm9, %v11305_v50  ;;  %v2824_v44 = vmul.f32 %v2801_v16, %v2781_v62  ;;  %v3200_v16 = vmul.f32 %v3177_v39, %v13412_v0  ;;  %v3202_v11 = vmul.f32 %v3185_v41, %v13422_v29  ;;  %v11325_v0 = vld [vmem:[%s16711_s4 + $0x40] sm:$0xff] }
 0x2fa   : > { %2586 = vmatprep.mubr.f32.mxu1 %v16743_v63  ;;  %2663 = vmatprep.mubr.f32.mxu0 %v16743_v63  ;;  %v3199_v29 = vmul.f32 %v3173_v23, %v13410_v25  ;;  %v3201_v17 = vmul.f32 %v3181_v37, %v13420_v45  ;;  %v3203_v18 = vmul.f32 %v3189_v24, %v13403_v28 }
 0x2fb   : > { %v2764_v57 = vpop.permute.xlu1 %2763  ;;  %2944 = vmatprep.subr.mxu0 %v2824_v44  ;;  %v2766_v7 = vpop.permute.xlu0 %2765  ;;  %v3571_v45 = vrot.slane %v13691_v52, %v12401_v4  ;;  %v3567_v28 = vrot.slane %v13691_v52, %v12406_v5  ;;  %v3563_v55 = vrot.slane %v13691_v52, %v12399_v3 }
 0x2fc   : > { %v2782_v33 = vsel %vm2777_vm12, %v2766_v7, %v2768_v60  ;;  %v2783_v32 = vsel %vm2777_vm12, %v2764_v57, %v2766_v7  ;;  %11310 = vmatmul.mubr.msk.f32.gmra.mxu1 %vm1736_vm9, %v11306_v40 }
 0x2fd   : > { %v2823_v26 = vmul.f32 %v2797_v31, %v2782_v33  ;;  %11312 = vmatmul.mubr.msk.f32.gmra.mxu0 %vm1736_vm9, %v11306_v40  ;;  %11717 = vmatprep.mubr.msk.f32.mxu1 %vm1736_vm9, %v11305_v50  ;;  %v2822_v30 = vmul.f32 %v2793_v22, %v2783_v32  ;;  %v2809_v50 = vrot.slane %v13611_v53, %v12453_v15  ;;  %v11326_v31 = vld [vmem:[%s16711_s4 + $0x48] sm:$0xff] }
 0x2fe   : > { %2978 = vmatprep.mubr.f32.mxu0 %v16743_v63  ;;  %v3932_v32 = vld [vmem:[#allocation2 + $0x3f] ss:$8 sm:$0xf] }
 0x2ff   : > { %v2774_v47 = vpop.permute.xlu1 %2773  ;;  %2867 = vmatprep.subr.mxu1 %v2822_v30  ;;  %2945 = vmatpush1.msra.mxu0 %v2823_v26  ;;  %v2776_v9 = vpop.permute.xlu0 %2775 }
 0x300   : > { %v2778_v2 = vsel %vm2777_vm12, %v2774_v47, %v2776_v9  ;;  %v2784_v38 = vsel %vm2777_vm12, %v2776_v9, %v2764_v57  ;;  %11718 = vmatmul.mubr.msk.f32.vlgmr.msra.gmra.mxu1 %vm1736_vm9, %v11306_v40 }
 0x301   : > { %v2821_v46 = vmul.f32 %v2789_v42, %v2784_v38  ;;  %11319 = vmatmul.mubr.msk.f32.vlgmr.msra.gmra.mxu0 %vm1736_vm9, %v11315_v54  ;;  %2901 = vmatprep.mubr.f32.mxu1 %v16743_v63  ;;  %v2827_v58 = vmul.f32 %v2813_v35, %v2778_v2  ;;  %v3933_v42 = vld [vmem:[#allocation2 + $0x3f] ss:$8 sm:$0xf0] }
 0x302   : > { %2984 = vmatprep.mubr.f32.mxu0 %v16743_v63  ;;  %v13749_v9 = vor.u32 %v3933_v42, %v3932_v32 }
 0x303   : > { %v3544_v56 = vpop.permute.xlu1 %3543  ;;  %2868 = vmatpush1.msra.mxu1 %v2821_v46  ;;  %11720 = vmatprep.subr.mxu0 %v2827_v58  ;;  %v2772_v61 = vpop.permute.xlu0 %2771  ;;  %v3583_v46 = vrot.slane %v13691_v52, %v12453_v15 }
 0x304   : > { %v2779_v36 = vsel %vm2777_vm12, %v2772_v61, %v2774_v47  ;;  %v2780_v53 = vsel %vm2777_vm12, %v2770_v1, %v2772_v61  ;;  %11317 = vmatmul.mubr.msk.f32.vlgmr.msra.gmra.mxu1 %vm1736_vm9, %v11315_v54  ;;  %11721 = vmatpush3.msra.mxu0 %v2827_v58  ;;  %v3575_v1 = vrot.slane %v13691_v52, %v12421_v10 }
 0x305   : > { %v2825_v40 = vmul.f32 %v2805_v27, %v2780_v53  ;;  %11320 = vmatmul.mubr.msk.f32.gmra.mxu0 %vm1736_vm9, %v11316_v43  ;;  %3243 = vmatprep.subr.mxu0 %v3198_v49  ;;  %v2826_v8 = vmul.f32 %v2809_v50, %v2779_v36  ;;  %v3973_v36 = vrot.slane %v13749_v9, %v12421_v10 }
 0x306   : > { %2907 = vmatprep.mubr.f32.mxu1 %v16743_v63  ;;  %11722 = vmatprep.mubr.msk.f32.mxu0 %vm1736_vm9, %v11315_v54 }
 0x307   : > { %v3542_v59 = vpop.permute.xlu1 %3541  ;;  %3021 = vmatprep.subr.mxu1 %v2826_v8  ;;  %v13696_v21 = vpop.permute.xlu0 %3545  ;;  %v11336_v8 = vld [vmem:[%s16711_s4 + $0x58] sm:$0xff] }
 0x308   : > { %11318 = vmatmul.mubr.msk.f32.gmra.mxu1 %vm1736_vm9, %v11316_v43  ;;  %v3554_v14 = vsel %vm3551_vm13, %v3544_v56, %v13696_v21  ;;  %v3555_v57 = vsel %vm3551_vm13, %v3542_v59, %v3544_v56  ;;  %v3579_v56 = vrot.slane %v13691_v52, %v12495_v19  ;;  %v4331_v52 = vld [vmem:[#allocation2 + $0x70] ss:$8 sm:$0xf0] }
 0x309   : > { %3022 = vmatpush1.msra.mxu1 %v2825_v40  ;;  %11723 = vmatmul.mubr.msk.f32.vlgmr.msra.gmra.mxu0 %vm1736_vm9, %v11316_v43  ;;  %v3598_v44 = vmul.f32 %v3575_v1, %v3554_v14  ;;  %v3597_v35 = vmul.f32 %v3571_v45, %v3555_v57  ;;  %v4330_v40 = vld [vmem:[#allocation2 + $0x70] ss:$8 sm:$0xf]  ;;  %v3969_v14 = vrot.slane %v13749_v9, %v12401_v4 }
 0x30a   : > { %3244 = vmatpush1.msra.mxu0 %v3197_v6  ;;  %3320 = vmatprep.subr.mxu1 %v3200_v16  ;;  %v3961_v6 = vrot.slane %v13749_v9, %v12399_v3  ;;  %v13793_v37 = vor.u32 %v4331_v52, %v4330_v40  ;;  %v11355_v40 = vld [vmem:[%s16711_s4 + $0x70] sm:$0xff] }
 0x30b   : > { %3397 = vmatprep.subr.mxu0 %v3202_v11  ;;  %v3538_v60 = vpop.permute.xlu1 %3537  ;;  %3055 = vmatprep.mubr.f32.mxu1 %v16743_v63  ;;  %v3540_v62 = vpop.permute.xlu0 %3539  ;;  %v3981_v11 = vrot.slane %v13749_v9, %v12453_v15 }
 0x30c   : > { %11321 = vmatmul.mubr.msk.f32.vlgmr.msra.gmra.mxu1 %vm1736_vm9, %v11315_v54  ;;  %3277 = vmatprep.mubr.f32.mxu0 %v16743_v63  ;;  %v3556_v7 = vsel %vm3551_vm13, %v3540_v62, %v3542_v59  ;;  %v3557_v27 = vsel %vm3551_vm13, %v3538_v60, %v3540_v62 }
 0x30d   : > { %3321 = vmatpush1.msra.mxu1 %v3199_v29  ;;  %11327 = vmatmul.mubr.msk.f32.vlgmr.msra.gmra.mxu0 %vm1736_vm9, %v11325_v0  ;;  %v3596_v54 = vmul.f32 %v3567_v28, %v3556_v7  ;;  %v3595_v34 = vmul.f32 %v3563_v55, %v3557_v27  ;;  %v11345_v28 = vld [vmem:[%s16711_s4 + $0x60] sm:$0xff] }
 0x30e   : > { %3398 = vmatpush1.msra.mxu0 %v3201_v17  ;;  %11725 = vmatprep.subr.mxu1 %v3203_v18  ;;  %v4728_v27 = vld [vmem:[#allocation2 + $0x71] ss:$8 sm:$0xf] }
 0x30f   : > { %3718 = vmatprep.subr.mxu0 %v3598_v44  ;;  %v3548_v25 = vpop.permute.xlu1 %3547  ;;  %3061 = vmatprep.mubr.f32.mxu1 %v16743_v63  ;;  %v3550_v22 = vpop.permute.xlu0 %3549  ;;  %v4371_v44 = vrot.slane %v13793_v37, %v12421_v10 }
 0x310   : > { %11322 = vmatmul.mubr.msk.f32.gmra.mxu1 %vm1736_vm9, %v11316_v43  ;;  %3283 = vmatprep.mubr.f32.mxu0 %v16743_v63  ;;  %v3558_v33 = vsel %vm3551_vm13, %v3550_v22, %v3538_v60  ;;  %v3552_v58 = vsel %vm3551_vm13, %v3548_v25, %v3550_v22  ;;  %v3965_v43 = vrot.slane %v13749_v9, %v12406_v5 }
 0x311   : > { %11328 = vmatmul.mubr.msk.f32.gmra.mxu0 %vm1736_vm9, %v11326_v31  ;;  %3354 = vmatprep.mubr.f32.mxu1 %v16743_v63  ;;  %v3601_v47 = vmul.f32 %v3587_v20, %v3558_v33  ;;  %v3553_v51 = vsel %vm3551_vm13, %v13696_v21, %v3548_v25  ;;  %v3600_v39 = vmul.f32 %v3583_v46, %v3552_v58  ;;  %v4729_v46 = vld [vmem:[#allocation2 + $0x71] ss:$8 sm:$0xf0] }
 0x312   : > { %3431 = vmatprep.mubr.f32.mxu0 %v16743_v63  ;;  %v3599_v59 = vmul.f32 %v3579_v56, %v3553_v51  ;;  %v13857_v56 = vor.u32 %v4729_v46, %v4728_v27 }
 0x313   : > { %v13745_v26 = vpop.permute.xlu1 %3939  ;;  %v3938_v30 = vpop.permute.xlu0 %3937 }
 0x314   : > { %11329 = vmatmul.mubr.msk.f32.vlgmr.msra.gmra.mxu1 %vm1736_vm9, %v11325_v0  ;;  %v3954_v50 = vsel %vm3949_vm14, %v3938_v30, %v13745_v26 }
 0x315   : > { %11726 = vmatpush3.msra.mxu1 %v3203_v18  ;;  %11331 = vmatmul.mubr.msk.f32.vlgmr.msra.gmra.mxu0 %vm1736_vm9, %v11325_v0  ;;  %v3994_v41 = vmul.f32 %v3965_v43, %v3954_v50  ;;  %v3985_v18 = vrot.slane %v13749_v9, %v12429_v12 }
 0x316   : > { %3641 = vmatprep.subr.mxu1 %v3596_v54  ;;  %3719 = vmatpush1.msra.mxu0 %v3597_v35  ;;  %v4367_v54 = vrot.slane %v13793_v37, %v12401_v4 }
 0x317   : > { %11730 = vmatprep.subr.mxu0 %v3601_v47  ;;  %v3942_v2 = vpop.permute.xlu1 %3941  ;;  %3360 = vmatprep.mubr.f32.mxu1 %v16743_v63  ;;  %v3936_v38 = vpop.permute.xlu0 %3935 }
 0x318   : > { %11330 = vmatmul.mubr.msk.f32.gmra.mxu1 %vm1736_vm9, %v11326_v31  ;;  %3437 = vmatprep.mubr.f32.mxu0 %v16743_v63  ;;  %v3955_v24 = vsel %vm3949_vm14, %v3936_v38, %v3938_v30  ;;  %v3953_v29 = vsel %vm3949_vm14, %v13745_v26, %v3942_v2  ;;  %v11346_v26 = vld [vmem:[%s16711_s4 + $0x68] sm:$0xff] }
 0x319   : > { %11332 = vmatmul.mubr.msk.f32.gmra.mxu0 %vm1736_vm9, %v11326_v31  ;;  %11727 = vmatprep.mubr.msk.f32.mxu1 %vm1736_vm9, %v11325_v0  ;;  %v3977_v0 = vrot.slane %v13749_v9, %v12495_v19  ;;  %v3993_v17 = vmul.f32 %v3961_v6, %v3955_v24  ;;  %v3995_v57 = vmul.f32 %v3969_v14, %v3953_v29 }
 0x31a   : > { %3752 = vmatprep.mubr.f32.mxu0 %v16743_v63 }
 0x31b   : > { %v3946_v61 = vpop.permute.xlu1 %3945  ;;  %v3944_v49 = vpop.permute.xlu0 %3943 }
 0x31c   : > { %11728 = vmatmul.mubr.msk.f32.vlgmr.msra.gmra.mxu1 %vm1736_vm9, %v11326_v31  ;;  %v3952_v53 = vsel %vm3949_vm14, %v3942_v2, %v3944_v49  ;;  %v3951_v31 = vsel %vm3949_vm14, %v3944_v49, %v3946_v61  ;;  %v4383_v2 = vrot.slane %v13793_v37, %v12429_v12 }
 0x31d   : > { %3642 = vmatpush1.msra.mxu1 %v3595_v34  ;;  %11339 = vmatmul.mubr.msk.f32.vlgmr.msra.gmra.mxu0 %vm1736_vm9, %v11335_v13  ;;  %v3996_v16 = vmul.f32 %v3973_v36, %v3952_v53  ;;  %v3997_v33 = vmul.f32 %v3977_v0, %v3951_v31  ;;  %v4761_v53 = vrot.slane %v13857_v56, %v12406_v5 }
 0x31e   : > { %3795 = vmatprep.subr.mxu1 %v3600_v39  ;;  %11731 = vmatpush3.msra.mxu0 %v3601_v47  ;;  %v4363_v47 = vrot.slane %v13793_v37, %v12406_v5  ;;  %v4379_v39 = vrot.slane %v13793_v37, %v12453_v15  ;;  %v4757_v0 = vrot.slane %v13857_v56, %v12399_v3 }
 0x31f   : > { %4039 = vmatprep.subr.mxu0 %v3994_v41  ;;  %v4340_v21 = vpop.permute.xlu1 %4339  ;;  %3675 = vmatprep.mubr.f32.mxu1 %v16743_v63  ;;  %v3948_v23 = vpop.permute.xlu0 %3947 }
 0x320   : > { %11337 = vmatmul.mubr.msk.f32.vlgmr.msra.gmra.mxu1 %vm1736_vm9, %v11335_v13  ;;  %3758 = vmatprep.mubr.f32.mxu0 %v16743_v63  ;;  %v3950_v1 = vsel %vm3949_vm14, %v3946_v61, %v3948_v23  ;;  %v3956_v25 = vsel %vm3949_vm14, %v3948_v23, %v3936_v38  ;;  %v4359_v61 = vrot.slane %v13793_v37, %v12399_v3 }
 0x321   : > { %3796 = vmatpush1.msra.mxu1 %v3599_v59  ;;  %11340 = vmatmul.mubr.msk.f32.gmra.mxu0 %vm1736_vm9, %v11336_v8  ;;  %v3998_v22 = vmul.f32 %v3981_v11, %v3950_v1  ;;  %v3999_v32 = vmul.f32 %v3985_v18, %v3956_v25 }
 0x322   : > { %4116 = vmatprep.subr.mxu1 %v3996_v16  ;;  %3681 = vmatprep.mubr.f32.mxu1 %v16743_v63  ;;  %v4769_v16 = vrot.slane %v13857_v56, %v12421_v10 }
 0x323   : > { %v4338_v60 = vpop.permute.xlu1 %4337  ;;  %v13808_v62 = vpop.permute.xlu0 %4341  ;;  %11732 = vmatprep.mubr.msk.f32.mxu0 %vm1736_vm9, %v11335_v13 }
 0x324   : > { %11338 = vmatmul.mubr.msk.f32.gmra.mxu1 %vm1736_vm9, %v11336_v8  ;;  %v4350_v45 = vsel %vm4347_vm15, %v4340_v21, %v13808_v62  ;;  %v4351_v9 = vsel %vm4347_vm15, %v4338_v60, %v4340_v21 }
 0x325   : > { %11733 = vmatmul.mubr.msk.f32.vlgmr.msra.gmra.mxu0 %vm1736_vm9, %v11336_v8  ;;  %3829 = vmatprep.mubr.f32.mxu1 %v16743_v63  ;;  %v4394_v42 = vmul.f32 %v4371_v44, %v4350_v45  ;;  %v4393_v43 = vmul.f32 %v4367_v54, %v4351_v9  ;;  %v4765_v44 = vrot.slane %v13857_v56, %v12401_v4 }
 0x326   : > { %4040 = vmatpush1.msra.mxu0 %v3993_v17  ;;  %4073 = vmatprep.mubr.f32.mxu0 %v16743_v63  ;;  %v4777_v17 = vrot.slane %v13857_v56, %v12453_v15  ;;  %v4781_v45 = vrot.slane %v13857_v56, %v12429_v12 }
 0x327   : > { %4193 = vmatprep.subr.mxu0 %v3998_v22  ;;  %v4334_v7 = vpop.permute.xlu1 %4333  ;;  %v4336_v20 = vpop.permute.xlu0 %4335  ;;  %v4773_v22 = vrot.slane %v13857_v56, %v12495_v19 }
 0x328   : > { %11341 = vmatmul.mubr.msk.f32.vlgmr.msra.gmra.mxu1 %vm1736_vm9, %v11335_v13  ;;  %v4352_v55 = vsel %vm4347_vm15, %v4336_v20, %v4338_v60  ;;  %v4353_v51 = vsel %vm4347_vm15, %v4334_v7, %v4336_v20  ;;  %v11365_v20 = vld [vmem:[%s16711_s4 + $0x80] sm:$0xff] }
 0x329   : > { %4117 = vmatpush1.msra.mxu1 %v3995_v57  ;;  %11347 = vmatmul.mubr.msk.f32.vlgmr.msra.gmra.mxu0 %vm1736_vm9, %v11345_v28  ;;  %v4392_v50 = vmul.f32 %v4363_v47, %v4352_v55  ;;  %v4391_v52 = vmul.f32 %v4359_v61, %v4353_v51 }
 0x32a   : > { %4194 = vmatpush1.msra.mxu0 %v3997_v33  ;;  %11735 = vmatprep.subr.mxu1 %v3999_v32 }
 0x32b   : > { %4514 = vmatprep.subr.mxu0 %v4394_v42  ;;  %v4344_v30 = vpop.permute.xlu1 %4343  ;;  %3835 = vmatprep.mubr.f32.mxu1 %v16743_v63  ;;  %v4346_v35 = vpop.permute.xlu0 %4345 }
 0x32c   : > { %11342 = vmatmul.mubr.msk.f32.gmra.mxu1 %vm1736_vm9, %v11336_v8  ;;  %4079 = vmatprep.mubr.f32.mxu0 %v16743_v63  ;;  %v4354_v38 = vsel %vm4347_vm15, %v4346_v35, %v4334_v7  ;;  %v4348_v36 = vsel %vm4347_vm15, %v4344_v30, %v4346_v35  ;;  %v4375_v8 = vrot.slane %v13793_v37, %v12495_v19  ;;  %v11356_v37 = vld [vmem:[%s16711_s4 + $0x78] sm:$0xff] }
 0x32d   : > { %11348 = vmatmul.mubr.msk.f32.gmra.mxu0 %vm1736_vm9, %v11346_v26  ;;  %4150 = vmatprep.mubr.f32.mxu1 %v16743_v63  ;;  %v4397_v34 = vmul.f32 %v4383_v2, %v4354_v38  ;;  %v4349_v23 = vsel %vm4347_vm15, %v13808_v62, %v4344_v30  ;;  %v4396_v6 = vmul.f32 %v4379_v39, %v4348_v36 }
 0x32e   : > { %4227 = vmatprep.mubr.f32.mxu0 %v16743_v63  ;;  %v4395_v1 = vmul.f32 %v4375_v8, %v4349_v23 }
 0x32f   : > { %v4734_v58 = vpop.permute.xlu0 %4733  ;;  %v4736_v13 = vpop.permute.xlu1 %4735 }
 0x330   : > { %11349 = vmatmul.mubr.msk.f32.vlgmr.msra.gmra.mxu1 %vm1736_vm9, %v11345_v28  ;;  %v4750_v41 = vsel %vm4745_vm0, %v4734_v58, %v4736_v13 }
 0x331   : > { %11736 = vmatpush3.msra.mxu1 %v3999_v32  ;;  %11351 = vmatmul.mubr.msk.f32.vlgmr.msra.gmra.mxu0 %vm1736_vm9, %v11345_v28  ;;  %v4790_v11 = vmul.f32 %v4761_v53, %v4750_v41 }
 0x332   : > { %4437 = vmatprep.subr.mxu1 %v4392_v50  ;;  %4515 = vmatpush1.msra.mxu0 %v4393_v43 }
 0x333   : > { %11740 = vmatprep.subr.mxu0 %v4397_v34  ;;  %4156 = vmatprep.mubr.f32.mxu1 %v16743_v63  ;;  %v4732_v49 = vpop.permute.xlu0 %4731  ;;  %v4738_v59 = vpop.permute.xlu1 %4737 }
 0x334   : > { %11350 = vmatmul.mubr.msk.f32.gmra.mxu1 %vm1736_vm9, %v11346_v26  ;;  %4233 = vmatprep.mubr.f32.mxu0 %v16743_v63  ;;  %v4751_v62 = vsel %vm4745_vm0, %v4732_v49, %v4734_v58  ;;  %v4749_v31 = vsel %vm4745_vm0, %v4736_v13, %v4738_v59 }
 0x335   : > { %11352 = vmatmul.mubr.msk.f32.gmra.mxu0 %vm1736_vm9, %v11346_v26  ;;  %11737 = vmatprep.mubr.msk.f32.mxu1 %vm1736_vm9, %v11345_v28  ;;  %v4789_v25 = vmul.f32 %v4757_v0, %v4751_v62  ;;  %v4791_v33 = vmul.f32 %v4765_v44, %v4749_v31 }
 0x336   : > { %4548 = vmatprep.mubr.f32.mxu0 %v16743_v63 }
 0x337   : > { %v4740_v21 = vpop.permute.xlu0 %4739  ;;  %v4742_v29 = vpop.permute.xlu1 %4741 }
 0x338   : > { %11738 = vmatmul.mubr.msk.f32.vlgmr.msra.gmra.mxu1 %vm1736_vm9, %v11346_v26  ;;  %v4748_v24 = vsel %vm4745_vm0, %v4738_v59, %v4740_v21  ;;  %v4747_v28 = vsel %vm4745_vm0, %v4740_v21, %v4742_v29  ;;  %v11366_v26 = vld [vmem:[%s16711_s4 + $0x88] sm:$0xff] }
 0x339   : > { %4438 = vmatpush1.msra.mxu1 %v4391_v52  ;;  %11359 = vmatmul.mubr.msk.f32.vlgmr.msra.gmra.mxu0 %vm1736_vm9, %v11355_v40  ;;  %v4792_v60 = vmul.f32 %v4769_v16, %v4748_v24  ;;  %v4793_v32 = vmul.f32 %v4773_v22, %v4747_v28 }
 0x33a   : > { %4591 = vmatprep.subr.mxu1 %v4396_v6  ;;  %11741 = vmatpush3.msra.mxu0 %v4397_v34 }
 0x33b   : > { %4835 = vmatprep.subr.mxu0 %v4790_v11  ;;  %4471 = vmatprep.mubr.f32.mxu1 %v16743_v63  ;;  %v4744_v14 = vpop.permute.xlu0 %4743 }
 0x33c   : > { %11357 = vmatmul.mubr.msk.f32.vlgmr.msra.gmra.mxu1 %vm1736_vm9, %v11355_v40  ;;  %4554 = vmatprep.mubr.f32.mxu0 %v16743_v63  ;;  %v4746_v18 = vsel %vm4745_vm0, %v4742_v29, %v4744_v14  ;;  %v4752_v57 = vsel %vm4745_vm0, %v4744_v14, %v4732_v49 }
 0x33d   : > { %4592 = vmatpush1.msra.mxu1 %v4395_v1  ;;  %11360 = vmatmul.mubr.msk.f32.gmra.mxu0 %vm1736_vm9, %v11356_v37  ;;  %v4794_v7 = vmul.f32 %v4777_v17, %v4746_v18  ;;  %v4795_v42 = vmul.f32 %v4781_v45, %v4752_v57 }
 0x33e   : > { %4912 = vmatprep.subr.mxu1 %v4792_v60  ;;  %4477 = vmatprep.mubr.f32.mxu1 %v16743_v63 }
 0x33f   : > { %11742 = vmatprep.mubr.msk.f32.mxu0 %vm1736_vm9, %v11355_v40 }
 0x340   : > { %11358 = vmatmul.mubr.msk.f32.gmra.mxu1 %vm1736_vm9, %v11356_v37 }
 0x341   : > { %11743 = vmatmul.mubr.msk.f32.vlgmr.msra.gmra.mxu0 %vm1736_vm9, %v11356_v37  ;;  %4625 = vmatprep.mubr.f32.mxu1 %v16743_v63 }
 0x342   : > { %4836 = vmatpush1.msra.mxu0 %v4789_v25  ;;  %4869 = vmatprep.mubr.f32.mxu0 %v16743_v63 }
 0x343   : > { %4989 = vmatprep.subr.mxu0 %v4794_v7 }
 0x344   : > { %11361 = vmatmul.mubr.msk.f32.vlgmr.msra.gmra.mxu1 %vm1736_vm9, %v11355_v40 }
 0x345   : > { %4913 = vmatpush1.msra.mxu1 %v4791_v33  ;;  %11367 = vmatmul.mubr.msk.f32.vlgmr.msra.gmra.mxu0 %vm1736_vm9, %v11365_v20 }
 0x346   : > { %4990 = vmatpush1.msra.mxu0 %v4793_v32  ;;  %11745 = vmatprep.subr.mxu1 %v4795_v42 }
 0x347   : > { %4631 = vmatprep.mubr.f32.mxu1 %v16743_v63  ;;  %4875 = vmatprep.mubr.f32.mxu0 %v16743_v63 }
 0x348   : > { %11362 = vmatmul.mubr.msk.f32.gmra.mxu1 %vm1736_vm9, %v11356_v37 }
 0x349   : > { %11368 = vmatmul.mubr.msk.f32.gmra.mxu0 %vm1736_vm9, %v11366_v26  ;;  %4946 = vmatprep.mubr.f32.mxu1 %v16743_v63 }
 0x34a   : > { %5023 = vmatprep.mubr.f32.mxu0 %v16743_v63 }
 0x34c   : > { %11369 = vmatmul.mubr.msk.f32.vlgmr.msra.gmra.mxu1 %vm1736_vm9, %v11365_v20 }
 0x34d   : > { %11746 = vmatpush3.msra.mxu1 %v4795_v42  ;;  %11371 = vmatmul.mubr.msk.f32.vlgmr.msra.gmra.mxu0 %vm1736_vm9, %v11365_v20 }
 0x34e   : > { %4952 = vmatprep.mubr.f32.mxu1 %v16743_v63  ;;  %5029 = vmatprep.mubr.f32.mxu0 %v16743_v63 }
 0x350   : > { %11370 = vmatmul.mubr.msk.f32.gmra.mxu1 %vm1736_vm9, %v11366_v26 }
 0x351   : > { %11372 = vmatmul.mubr.msk.f32.gmra.mxu0 %vm1736_vm9, %v11366_v26  ;;  %11747 = vmatprep.mubr.msk.f32.mxu1 %vm1736_vm9, %v11365_v20 }
 0x352   : > { %5646 = vmatprep.mubr.f32.mxu0 %v16743_v63 }
 0x354   : > { %11748 = vmatmul.mubr.msk.f32.vlgmr.msra.gmra.mxu1 %vm1736_vm9, %v11366_v26 }
 0x355   : > { %5557 = vmatprep.mubr.f32.mxu1 %v16743_v63 }
 0x393   : > { %v1809_v30 = vpop.f32.mrf.mxu0 }
 0x395   : > { %v13949_v35 = vpop.f32.mrf.mxu0 }
 0x397   : > { %v1815_v54 = vpop.f32.mrf.mxu0 }
 0x399   : > { %v1886_v47 = vpop.f32.mrf.mxu1  ;;  %v13951_v9 = vpop.f32.mrf.mxu0 }
 0x39b   : > { %v13953_v55 = vpop.f32.mrf.mxu1 }
 0x39d   : > { %v1963_v2 = vpop.f32.mrf.mxu0  ;;  %v1892_v38 = vpop.f32.mrf.mxu1 }
 0x39f   : > { %v13955_v27 = vpop.f32.mrf.mxu0  ;;  %v13957_v46 = vpop.f32.mrf.mxu1 }
 0x3a1   : > { %v1969_v58 = vpop.f32.mrf.mxu0  ;;  %v11709_v43 = vpop.f32.mrf.mxu1 }
 0x3a3   : > { %v13959_v50 = vpop.f32.mrf.mxu0  ;;  %v13961_v34 = vpop.f32.mrf.mxu1 }
 0x3a4   : > { %16862 = vst [vmem:[#allocation28_spill] sm:$0xff] %v13961_v34 }
 0x3a5   : > { %v2198_v13 = vpop.f32.mrf.mxu0 }
 0x3a6   : > { %v2199_v56 = vadd.f32 %v2198_v13, %v1886_v47 }
 0x3a7   : > { %v13963_v61 = vpop.f32.mrf.mxu0 }
 0x3a8   : > { %v2121_v49 = vpop.f32.mrf.mxu1 }
 0x3a9   : > { %v2122_v51 = vadd.f32 %v2121_v49, %v1809_v30  ;;  %v2204_v39 = vpop.f32.mrf.mxu0 }
 0x3aa   : > { %v2205_v36 = vadd.f32 %v2204_v39, %v1892_v38  ;;  %v13965_v53 = vpop.f32.mrf.mxu1 }
 0x3ab   : > { %v13967_v41 = vpop.f32.mrf.mxu0 }
 0x3ac   : > { %v2127_v40 = vpop.f32.mrf.mxu1 }
 0x3ad   : > { %v2128_v52 = vadd.f32 %v2127_v40, %v1815_v54  ;;  %v11714_v8 = vpop.f32.mrf.mxu0 }
 0x3ae   : > { %v2358_v59 = vadd.f32 %v11714_v8, %v11709_v43  ;;  %v13969_v21 = vpop.f32.mrf.mxu1 }
 0x3af   : > { %v13971_v23 = vpop.f32.mrf.mxu0 }
 0x3b0   : > { %16863 = vst [vmem:[#allocation30_spill] sm:$0xff] %v13971_v23  ;;  %v2275_v6 = vpop.f32.mrf.mxu1 }
 0x3b1   : > { %v2276_v16 = vadd.f32 %v2275_v6, %v1963_v2  ;;  %v2505_v24 = vpop.f32.mrf.mxu0 }
 0x3b2   : > { %v2745_v11 = vadd.f32 %v2505_v24, %v2122_v51  ;;  %v13973_v37 = vpop.f32.mrf.mxu1 }
 0x3b3   : > { %v13975_v1 = vpop.f32.mrf.mxu0 }
 0x3b4   : > { %v2281_v14 = vpop.f32.mrf.mxu1 }
 0x3b5   : > { %v2282_v0 = vadd.f32 %v2281_v14, %v1969_v58  ;;  %v2511_v60 = vpop.f32.mrf.mxu0 }
 0x3b6   : > { %v2752_v62 = vadd.f32 %v2511_v60, %v2128_v52  ;;  %v13977_v29 = vpop.f32.mrf.mxu1 }
 0x3b7   : > { %v13979_v17 = vpop.f32.mrf.mxu0 }
 0x3b8   : > { %v2582_v18 = vpop.f32.mrf.mxu1 }
 0x3b9   : > { %v13981_v44 = vadd.f32 %v2582_v18, %v2199_v56  ;;  %v2659_v31 = vpop.f32.mrf.mxu0 }
 0x3ba   : > { %v2749_v25 = vadd.f32 %v2659_v31, %v2276_v16  ;;  %v13983_v22 = vpop.f32.mrf.mxu1 }
 0x3bb   : > { %v13985_v45 = vpop.f32.mrf.mxu0 }
 0x3bc   : > { %v2588_v28 = vpop.f32.mrf.mxu1 }
 0x3bd   : > { %v13987_v57 = vadd.f32 %v2588_v28, %v2205_v36  ;;  %v2665_v7 = vpop.f32.mrf.mxu0 }
 0x3be   : > { %v2756_v20 = vadd.f32 %v2665_v7, %v2282_v0  ;;  %v13989_v33 = vpop.f32.mrf.mxu1 }
 0x3bf   : > { %v13991_v32 = vpop.f32.mrf.mxu0 }
 0x3c0   : > { %v11719_v42 = vpop.f32.mrf.mxu1 }
 0x3c1   : > { %v2758_v26 = vadd.f32 %v11719_v42, %v2358_v59  ;;  %v13993_v30 = vpop.f32.mrf.mxu0 }
 0x3c2   : > { %v13995_v54 = vpop.f32.mrf.mxu1 }
 0x3c3   : > { %16864 = vst [vmem:[#allocation37_spill] sm:$0xff] %v13995_v54  ;;  %v13997_v47 = vpop.f32.mrf.mxu0 }
 0x3c4   : > { %v2903_v2 = vpop.f32.mrf.mxu1 }
 0x3c5   : > { %v3143_v38 = vadd.f32 %v2903_v2, %v2745_v11  ;;  %v13999_v58 = vpop.f32.mrf.mxu0 }
 0x3c6   : > { %v14001_v43 = vpop.f32.mrf.mxu1 }
 0x3c7   : > { %v14003_v13 = vpop.f32.mrf.mxu0 }
 0x3c8   : > { %v2909_v56 = vpop.f32.mrf.mxu1 }
 0x3c9   : > { %v14005_v49 = vadd.f32 %v2909_v56, %v2752_v62  ;;  %v11724_v51 = vpop.f32.mrf.mxu0 }
 0x3ca   : > { %v14007_v39 = vadd.f32 %v11724_v51, %v2758_v26  ;;  %v14009_v36 = vpop.f32.mrf.mxu1 }
 0x3cb   : > { %v14011_v40 = vpop.f32.mrf.mxu0 }
 0x3cc   : > { %16865 = vst [vmem:[#allocation38_spill] sm:$0xff] %v14007_v39  ;;  %16866 = vst [vmem:[#allocation34_spill] sm:$0xff] %v14011_v40  ;;  %v3057_v52 = vpop.f32.mrf.mxu1 }
 0x3cd   : > { %v14013_v8 = vadd.f32 %v3057_v52, %v2749_v25  ;;  %v3279_v59 = vpop.f32.mrf.mxu0 }
 0x3ce   : > { %v14015_v6 = vadd.f32 %v3279_v59, %v3143_v38  ;;  %v14017_v16 = vpop.f32.mrf.mxu1 }
 0x3cf   : > { %16867 = vst [vmem:[#allocation33_spill] sm:$0xff] %v14013_v8  ;;  %v14019_v24 = vpop.f32.mrf.mxu0 }
 0x3d0   : > { %16868 = vst [vmem:[#allocation32_spill] sm:$0xff] %v14015_v6  ;;  %v3063_v11 = vpop.f32.mrf.mxu1 }
 0x3d1   : > { %v14021_v14 = vadd.f32 %v3063_v11, %v2756_v20  ;;  %v14023_v0 = vpop.f32.mrf.mxu0 }
 0x3d2   : > { %v14025_v60 = vpop.f32.mrf.mxu1 }
 0x3d3   : > { %16869 = vst [vmem:[#allocation31_spill] sm:$0xff] %v14021_v14  ;;  %v14027_v62 = vpop.f32.mrf.mxu0 }
 0x3d4   : > { %v3356_v18 = vpop.f32.mrf.mxu1 }
 0x3d5   : > { %v14029_v31 = vpop.f32.mrf.mxu0 }
 0x3d6   : > { %16870 = vst [vmem:[#allocation35_spill] sm:$0xff] %v14029_v31  ;;  %v14031_v25 = vpop.f32.mrf.mxu1  ;;  %v3145_v31 = vadd.f32 %v13993_v30, %v13981_v44  ;;  %v2284_v44 = vadd.f32 %v13977_v29, %v13959_v50 }
 0x3d7   : > { %v14033_v28 = vpop.f32.mrf.mxu0 }
 0x3d8   : > { %v14035_v7 = vpop.f32.mrf.mxu1 }
 0x3d9   : > { %v14037_v42 = vpop.f32.mrf.mxu0 }
 0x3da   : > { %16871 = vst [vmem:[#allocation36_spill] sm:$0xff] %v14037_v42  ;;  %v14039_v26 = vpop.f32.mrf.mxu1 }
 0x3db   : > { %v14041_v20 = vpop.f32.mrf.mxu0 }
 0x3dc   : > { %16872 = vst [vmem:[#allocation39_spill] sm:$0xff] %v14041_v20  ;;  %v14043_v2 = vpop.f32.mrf.mxu1 }
 0x3dd   : > { %16873 = vst [vmem:[#allocation40_spill] sm:$0xff] %v14043_v2  ;;  %v3754_v38 = vpop.f32.mrf.mxu0 }
 0x3de   : > { %v14045_v56 = vpop.f32.mrf.mxu1 }
 0x3df   : > { %16874 = vst [vmem:[#allocation41_spill] sm:$0xff] %v14045_v56  ;;  %v14047_v51 = vpop.f32.mrf.mxu0 }
 0x3e0   : > { %v14049_v52 = vpop.f32.mrf.mxu1 }
 0x3e1   : > { %16875 = vst [vmem:[#allocation42_spill] sm:$0xff] %v14049_v52  ;;  %v14051_v59 = vpop.f32.mrf.mxu0 }
 0x3e2   : > { %v3679_v11 = vpop.f32.mrf.mxu1 }
 0x3e3   : > { %v14053_v63 = vpop.f32.mrf.mxu0 }
 0x3e4   : > { %v3683_v15 = vpop.f32.mrf.mxu1 }
 0x3e5   : > { %v14055_v19 = vpop.f32.mrf.mxu0 }
 0x3e6   : > { %16876 = vst [vmem:[#allocation43_spill] sm:$0xff] %v14055_v19  ;;  %v14057_v12 = vpop.f32.mrf.mxu1 }
 0x3e7   : > { %v14059_v3 = vpop.f32.mrf.mxu0 }
 0x3e8   : > { %16877 = vst [vmem:[#allocation44_spill] sm:$0xff] %v14059_v3  ;;  %v14061_v10 = vpop.f32.mrf.mxu1 }
 0x3e9   : > { %16878 = vst [vmem:[#allocation45_spill] sm:$0xff] %v14061_v10  ;;  %v14063_v4 = vpop.f32.mrf.mxu0 }
 0x3ea   : > { %16879 = vst [vmem:[#allocation46_spill] sm:$0xff] %v14063_v4  ;;  %v14065_v5 = vpop.f32.mrf.mxu1 }
 0x3eb   : > { %16880 = vst [vmem:[#allocation47_spill] sm:$0xff] %v14065_v5  ;;  %v4077_v48 = vpop.f32.mrf.mxu0 }
 0x3ec   : > { %v14067_v52 = vpop.f32.mrf.mxu1 }
 0x3ed   : > { %16881 = vst [vmem:[#allocation48_spill] sm:$0xff] %v14067_v52  ;;  %v4081_v6 = vpop.f32.mrf.mxu0 }
 0x3ee   : > { %v14069_v56 = vpop.f32.mrf.mxu1 }
 0x3ef   : > { %16882 = vst [vmem:[#allocation49_spill] sm:$0xff] %v14069_v56  ;;  %v14071_v40 = vpop.f32.mrf.mxu0 }
 0x3f0   : > { %16883 = vst [vmem:[#allocation50_spill] sm:$0xff] %v14071_v40  ;;  %v4152_v2 = vpop.f32.mrf.mxu1 }
 0x3f1   : > { %v14073_v19 = vpop.f32.mrf.mxu0 }
 0x3f2   : > { %16884 = vst [vmem:[#allocation51_spill] sm:$0xff] %v14073_v19  ;;  %v4154_v39 = vpop.f32.mrf.mxu1 }
 0x3f3   : > { %v14075_v54 = vpop.f32.mrf.mxu0 }
 0x3f4   : > { %16885 = vst [vmem:[#allocation52_spill] sm:$0xff] %v14075_v54  ;;  %v4158_v3 = vpop.f32.mrf.mxu1  ;;  %v2124_v54 = vadd.f32 %v13965_v53, %v13949_v35  ;;  %v2207_v53 = vadd.f32 %v13967_v41, %v13957_v46  ;;  %v3152_v41 = vadd.f32 %v13999_v58, %v13987_v57 }
 0x3f5   : > { %v14077_v42 = vpop.f32.mrf.mxu0 }
 0x3f6   : > { %16886 = vst [vmem:[#allocation53_spill] sm:$0xff] %v14077_v42  ;;  %v14079_v4 = vpop.f32.mrf.mxu1  ;;  %v2755_v46 = vadd.f32 %v13989_v33, %v2207_v53  ;;  %v3528_v29 = vadd.f32 %v14035_v7, %v3152_v41 }
 0x3f7   : > { %v14081_v14 = vpop.f32.mrf.mxu0 }
 0x3f8   : > { %16887 = vst [vmem:[#allocation54_spill] sm:$0xff] %v14081_v14  ;;  %v14083_v23 = vpop.f32.mrf.mxu1  ;;  %v2201_v14 = vadd.f32 %v13963_v61, %v13953_v55  ;;  %v2130_v55 = vadd.f32 %v13969_v21, %v13951_v9  ;;  %v3153_v50 = vadd.f32 %v14003_v13, %v2755_v46 }
 0x3f9   : > { %16888 = vst [vmem:[#allocation55_spill] sm:$0xff] %v14083_v23  ;;  %v4550_v52 = vpop.f32.mrf.mxu0  ;;  %v2746_v23 = vadd.f32 %v13975_v1, %v2124_v54 }
 0x3fa   : > { %v14085_v34 = vpop.f32.mrf.mxu1 }
 0x3fb   : > { %16889 = vst [vmem:[#allocation56_spill] sm:$0xff] %v14085_v34  ;;  %v4552_v56 = vpop.f32.mrf.mxu0  ;;  %v3144_v8 = vadd.f32 %v14001_v43, %v2746_v23  ;;  %v2278_v23 = vadd.f32 %v13973_v37, %v13955_v27  ;;  %v2753_v27 = vadd.f32 %v13979_v17, %v2130_v55  ;;  %v3529_v17 = vadd.f32 %v14039_v26, %v3153_v50  ;;  %v14146_v55 = vpop.permute.xlu0 %5129  ;;  %v16899_v50 = vld [vmem:[#allocation52_spill] sm:$0xff] }
 0x3fc   : > { %v14087_v10 = vpop.f32.mrf.mxu1 }
 0x3fd   : > { %16890 = vst [vmem:[#allocation57_spill] sm:$0xff] %v14087_v10  ;;  %v14089_v20 = vpop.f32.mrf.mxu0  ;;  %v2748_v10 = vadd.f32 %v13983_v22, %v2201_v14  ;;  %v3520_v1 = vadd.f32 %v14019_v24, %v3144_v8  ;;  %v3521_v22 = vadd.f32 %v3356_v18, %v3145_v31  ;;  %v2750_v37 = vadd.f32 %v13985_v45, %v2278_v23 }
 0x3fe   : > { %v4475_v19 = vpop.f32.mrf.mxu1  ;;  %v2757_v14 = vadd.f32 %v13991_v32, %v2284_v44  ;;  %v3926_v45 = vadd.f32 %v14051_v59, %v3528_v29 }
 0x3ff   : > { %v14093_v40 = vpop.f32.mrf.mxu0  ;;  %v3146_v61 = vadd.f32 %v13997_v47, %v2748_v10  ;;  %v3526_v10 = vadd.f32 %v14023_v0, %v14005_v49  ;;  %v3919_v21 = vadd.f32 %v3754_v38, %v3521_v22  ;;  %v3918_v47 = vadd.f32 %v3679_v11, %v3520_v1  ;;  %v16894_v22 = vld [vmem:[#allocation47_spill] sm:$0xff] }
 0x400   : > { %16891 = vst [vmem:[#allocation58_spill] sm:$0xff] %v14093_v40  ;;  %v4479_v42 = vpop.f32.mrf.mxu1  ;;  %v3151_v0 = vadd.f32 %v14009_v36, %v2753_v27  ;;  %v4324_v32 = vadd.f32 %v4158_v3, %v3926_v45  ;;  %v16898_v27 = vld [vmem:[#allocation45_spill] sm:$0xff]  ;;  %v16902_v45 = vld [vmem:[#allocation31_spill] sm:$0xff] }
 0x401   : > { %v14098_v5 = vpop.f32.mrf.mxu0  ;;  %v3522_v9 = vadd.f32 %v14031_v25, %v3146_v61  ;;  %v3924_v58 = vadd.f32 %v3683_v15, %v3526_v10  ;;  %v4316_v8 = vadd.f32 %v4077_v48, %v3918_v47  ;;  %v4317_v49 = vadd.f32 %v4152_v2, %v3919_v21  ;;  %v16893_v61 = vld [vmem:[#allocation35_spill] sm:$0xff]  ;;  %v14168_v21 = vpop.permute.xlu1 %5134 }
 0x402   : > { %v14100_v34 = vpop.f32.mrf.mxu1  ;;  %v3148_v15 = vadd.f32 %v14017_v16, %v2750_v37  ;;  %v3527_v48 = vadd.f32 %v14027_v62, %v3151_v0  ;;  %v3927_v2 = vadd.f32 %v14053_v63, %v3529_v17  ;;  %v4722_v63 = vadd.f32 %v14089_v20, %v4324_v32  ;;  %v16897_v47 = vld [vmem:[#allocation39_spill] sm:$0xff]  ;;  %v16901_v0 = vld [vmem:[#allocation30_spill] sm:$0xff] }
 0x403   : > { %v14106_v35 = vpop.f32.mrf.mxu0  ;;  %v3920_v57 = vadd.f32 %v14047_v51, %v3522_v9  ;;  %v4322_v13 = vadd.f32 %v4081_v6, %v3924_v58  ;;  %v4715_v25 = vadd.f32 %v4550_v52, %v4317_v49  ;;  %v4714_v7 = vadd.f32 %v4475_v19, %v4316_v8  ;;  %v16892_v52 = vld [vmem:[#allocation33_spill] sm:$0xff] }
 0x404   : > { %v14110_v40 = vpop.f32.mrf.mxu1  ;;  %v3524_v19 = vadd.f32 %v14033_v28, %v3148_v15  ;;  %v3925_v6 = vadd.f32 %v14057_v12, %v3527_v48  ;;  %v4325_v16 = vadd.f32 %v14079_v4, %v3927_v2  ;;  %v3523_v1 = vadd.f32 %v16893_v61, %v16892_v52  ;;  %v16905_v15 = vld [vmem:[#allocation51_spill] sm:$0xff]  ;;  %v16911_v52 = vld [vmem:[#allocation34_spill] sm:$0xff] }
 0x405   : > { %v14116_v54 = vpop.f32.mrf.mxu0  ;;  %v4318_v31 = vadd.f32 %v4154_v39, %v3920_v57  ;;  %v4720_v11 = vadd.f32 %v4479_v42, %v4322_v13  ;;  %v3155_v39 = vadd.f32 %v14025_v60, %v2757_v14  ;;  %v16895_v60 = vld [vmem:[#allocation50_spill] sm:$0xff]  ;;  %v16900_v14 = vld [vmem:[#allocation28_spill] sm:$0xff] }
 0x406   : > { %v14125_v30 = vpop.f32.mrf.mxu1  ;;  %v3922_v23 = vadd.f32 %v16894_v22, %v3524_v19  ;;  %v4323_v44 = vadd.f32 %v16895_v60, %v3925_v6  ;;  %v3921_v37 = vadd.f32 %v16898_v27, %v3523_v1  ;;  %v2353_v17 = vadd.f32 %v16901_v0, %v16900_v14  ;;  %v16903_v13 = vld [vmem:[#allocation36_spill] sm:$0xff]  ;;  %v16912_v1 = vld [vmem:[#allocation43_spill] sm:$0xff]  ;;  %v16919_v14 = vld [vmem:[#allocation46_spill] sm:$0xff] }
 0x407   : > { %v4873_v43 = vpop.f32.mrf.mxu0  ;;  %v4716_v36 = vadd.f32 %v4552_v56, %v4318_v31  ;;  %v16896_v28 = vld [vmem:[#allocation58_spill] sm:$0xff]  ;;  %v3530_v31 = vadd.f32 %v16903_v13, %v16902_v45  ;;  %v16909_v6 = vld [vmem:[#allocation48_spill] sm:$0xff] }
 0x408   : > { %v14134_v33 = vpop.f32.mrf.mxu1  ;;  %v5112_v26 = vadd.f32 %v4873_v43, %v4714_v7  ;;  %v4723_v46 = vadd.f32 %v16896_v28, %v4325_v16  ;;  %v3531_v43 = vadd.f32 %v16897_v47, %v3155_v39  ;;  %v4320_v29 = vadd.f32 %v16899_v50, %v3922_v23  ;;  %v16908_v39 = vld [vmem:[#allocation40_spill] sm:$0xff]  ;;  %v16913_v23 = vld [vmem:[#allocation53_spill] sm:$0xff] }
 0x409   : > { %v4877_v24 = vpop.f32.mrf.mxu0  ;;  %v4721_v58 = vadd.f32 %v14100_v34, %v4323_v44  ;;  %v4319_v34 = vadd.f32 %v16905_v15, %v3921_v37  ;;  %v3928_v16 = vadd.f32 %v16909_v6, %v3530_v31  ;;  %v16915_v47 = vld [vmem:[#allocation32_spill] sm:$0xff]  ;;  %v16917_v37 = vld [vmem:[#allocation55_spill] sm:$0xff]  ;;  %v16921_v15 = vld [vmem:[#allocation57_spill] sm:$0xff] }
 0x40a   : > { %v14141_v18 = vpop.f32.mrf.mxu1  ;;  %v5118_v3 = vadd.f32 %v4877_v24, %v4720_v11  ;;  %v14162_v4 = vadd.f32 %v14146_v55, %v5112_v26  ;;  %v4718_v2 = vadd.f32 %v14125_v30, %v4320_v29  ;;  %v16906_v11 = vld [vmem:[#allocation37_spill] sm:$0xff] }
 0x40b   : > { %v4879_v38 = vpop.f32.mrf.mxu0  ;;  %v2751_v26 = vadd.f32 %v16906_v11, %v2353_v17  ;;  %v4717_v30 = vadd.f32 %v14110_v40, %v4319_v34  ;;  %v4326_v60 = vadd.f32 %v16913_v23, %v3928_v16 }
 0x40c   : > { %v4948_v51 = vpop.f32.mrf.mxu1  ;;  %v14175_v8 = vadd.f32 %v14168_v21, %v5118_v3  ;;  %v5152_v32 = vmax.f32 %v14162_v4, 0.0 }
 0x40d   : > { %v5113_v53 = vadd.f32 %v4948_v51, %v4715_v25  ;;  %v5025_v59 = vpop.f32.mrf.mxu0  ;;  %v16904_v25 = vld [vmem:[#allocation49_spill] sm:$0xff]  ;;  %v5119_v51 = vadd.f32 %v4879_v38, %v4721_v58  ;;  %v3149_v61 = vadd.f32 %v16911_v52, %v2751_v26  ;;  %v4724_v29 = vadd.f32 %v14134_v33, %v4326_v60  ;;  %v16918_v58 = vld [vmem:[#allocation44_spill] sm:$0xff] }
 0x40e   : > { %v4950_v62 = vpop.f32.mrf.mxu1  ;;  %v3929_v7 = vadd.f32 %v16904_v25, %v3531_v43  ;;  %v5158_v38 = vmax.f32 %v14175_v8, 0.0  ;;  %v16916_v43 = vld [vmem:[#allocation42_spill] sm:$0xff]  ;;  %v16920_v25 = vld [vmem:[#allocation56_spill] sm:$0xff]  ;;  %v16922_v52 = vld [vmem:[#allocation29_spill] sm:$0xff] }
 0x40f   : > { %v14154_v56 = vadd.f32 %v14146_v55, %v5113_v53  ;;  %v5114_v42 = vadd.f32 %v4950_v62, %v4716_v36  ;;  %v5027_v12 = vpop.f32.mrf.mxu0  ;;  %v16907_v53 = vld [vmem:[#allocation38_spill] sm:$0xff]  ;;  %v14213_v40 = vadd.f32 %v14168_v21, %v5119_v51  ;;  %v3917_v27 = vadd.f32 %v16916_v43, %v16915_v47 }
 0x410   : > { %v4954_v41 = vpop.f32.mrf.mxu1  ;;  %v3532_v19 = vadd.f32 %v16908_v39, %v16907_v53  ;;  %v16910_v62 = vld [vmem:[#allocation54_spill] sm:$0xff]  ;;  %v5116_v3 = vadd.f32 %v5027_v12, %v4718_v2  ;;  %vm5410_vm1 = vcmp.lt.s32.totalorder %v16922_v52, 112  ;;  %vm5309_vm3 = vcmp.lt.s32.totalorder %v16922_v52, 116 }
 0x411   : > { %v5153_v20 = vmax.f32 %v14154_v56, 0.0  ;;  %v14166_v10 = vadd.f32 %v14146_v55, %v5114_v42  ;;  %v5120_v9 = vadd.f32 %v4954_v41, %v4722_v63  ;;  %v5031_v48 = vpop.f32.mrf.mxu0  ;;  %v4327_v63 = vadd.f32 %v16910_v62, %v3929_v7  ;;  %v16914_v41 = vld [vmem:[#allocation41_spill] sm:$0xff] }
 0x412   : > { %v4956_v57 = vpop.f32.mrf.mxu1  ;;  %v3930_v22 = vadd.f32 %v16912_v1, %v3532_v19  ;;  %v4315_v0 = vadd.f32 %v16919_v14, %v3917_v27  ;;  %v5159_v13 = vmax.f32 %v14213_v40, 0.0  ;;  %v5122_v33 = vadd.f32 %v5031_v48, %v4724_v29 }
 0x413   : > { %v5154_v49 = vmax.f32 %v14166_v10, 0.0  ;;  %v5121_v24 = vadd.f32 %v4956_v57, %v4723_v46  ;;  %5173 = vrot.lane.b32.xlu1 %v5153_v20, %s12197_s21  ;;  %v14190_v36 = vadd.f32 %v14168_v21, %v5120_v9  ;;  %v5033_v44 = vpop.f32.mrf.mxu0  ;;  %v4725_v28 = vadd.f32 %v14141_v18, %v4327_v63 }
 0x414   : > { %v5115_v46 = vadd.f32 %v5025_v59, %v4717_v30  ;;  %v3525_v9 = vadd.f32 %v16914_v41, %v3149_v61  ;;  %v4328_v50 = vadd.f32 %v16917_v37, %v3930_v22  ;;  %v14225_v18 = vadd.f32 %v14146_v55, %v5116_v3  ;;  %v11749_v17 = vpop.f32.mrf.mxu1 }
 0x415   : > { %5177 = vrot.lane.b32.xlu0 %v5154_v49, %s12197_s21  ;;  %v14203_v42 = vadd.f32 %v14168_v21, %v5121_v24  ;;  %v5160_v12 = vmax.f32 %v14190_v36, 0.0  ;;  %v5123_v57 = vadd.f32 %v5033_v44, %v4725_v28  ;;  %v4713_v34 = vadd.f32 %v16921_v15, %v4315_v0 }
 0x416   : > { %v3923_v24 = vadd.f32 %v16918_v58, %v3525_v9  ;;  %v4726_v45 = vadd.f32 %v14098_v5, %v4328_v50  ;;  %v5141_v31 = vadd.f32 %v14146_v55, %v5115_v46  ;;  %v5156_v2 = vmax.f32 %v14225_v18, 0.0  ;;  %v5102_v5 = vpop.f32.mrf.mxu1 }
 0x417   : > { %5169 = vrot.lane.b32.xlu1 %v5152_v32, %s12197_s21  ;;  %v5161_v59 = vmax.f32 %v14203_v42, 0.0  ;;  %v14241_v51 = vadd.f32 %v14168_v21, %v5123_v57  ;;  %v5111_v48 = vadd.f32 %v14116_v54, %v4713_v34  ;;  %v5148_v53 = vadd.f32 %v14168_v21, %v5122_v33 }
 0x418   : > { %v4321_v7 = vadd.f32 %v16920_v25, %v3923_v24  ;;  %v5124_v36 = vadd.f32 %v11749_v17, %v4726_v45  ;;  %v5155_v26 = vmax.f32 %v5141_v31, 0.0  ;;  %vm6241_vm4 = vcmp.lt.s32.totalorder %v16922_v52, 108 }
 0x419   : > { %5167 = vrot.lane.b32.xlu0 %v5158_v38, %s12197_s21  ;;  %v5163_v39 = vmax.f32 %v14241_v51, 0.0  ;;  %v5137_v16 = vadd.f32 %v14146_v55, %v5111_v48  ;;  %v5162_v62 = vmax.f32 %v5148_v53, 0.0  ;;  %vm6735_vm5 = vcmp.lt.s32.totalorder %v16922_v52, 4 }
 0x41a   : > { %v4719_v11 = vadd.f32 %v14106_v35, %v4321_v7  ;;  %v5150_v19 = vadd.f32 %v14168_v21, %v5124_v36  ;;  %vm7680_vm6 = vcmp.lt.s32.totalorder %v16922_v52, 124  ;;  %vm8174_vm7 = vcmp.lt.s32.totalorder %v16922_v52, 20 }
 0x41b   : > { %5175 = vrot.lane.b32.xlu1 %v5160_v12, %s12197_s21  ;;  %v5151_v63 = vmax.f32 %v5137_v16, 0.0  ;;  %vm8668_vm8 = vcmp.lt.s32.totalorder %v16922_v52, 16  ;;  %vm9162_vm9 = vcmp.lt.s32.totalorder %v16922_v52, 12 }
 0x41c   : > { %v5117_v6 = vadd.f32 %v5102_v5, %v4719_v11  ;;  %v5164_v35 = vmax.f32 %v5150_v19, 0.0 }
 0x41d   : > { %5179 = vrot.lane.b32.xlu0 %v5161_v59, %s12197_s21 }
 0x41e   : > { %v5143_v54 = vadd.f32 %v14146_v55, %v5117_v6 }
 0x41f   : > { %5171 = vrot.lane.b32.xlu1 %v5159_v13, %s12197_s21 }
 0x420   : > { %v5157_v30 = vmax.f32 %v5143_v54, 0.0 }
 0x421   : > { %5185 = vrot.lane.b32.xlu0 %v5156_v2, %s12197_s21 }
 0x423   : > { %5181 = vrot.lane.b32.xlu1 %v5155_v26, %s12197_s21 }
 0x425   : > { %5187 = vrot.lane.b32.xlu0 %v5163_v39, %s12197_s21 }
 0x427   : > { %5183 = vrot.lane.b32.xlu1 %v5162_v62, %s12197_s21 }
 0x429   : > { %5191 = vrot.lane.b32.xlu0 %v5164_v35, %s12197_s21 }
 0x42b   : > { %5165 = vrot.lane.b32.xlu1 %v5151_v63, %s12197_s21 }
 0x42d   : > { %5189 = vrot.lane.b32.xlu0 %v5157_v30, %s12197_s21  ;;  %s12201_s21 = smov 112  }
 0x485   : > { %v5174_v21 = vpop.permute.xlu1 %5173 }
 0x487   : > { %v5178_v3 = vpop.permute.xlu0 %5177 }
 0x488   : > { %v5199_v61 = vsel %vm3551_vm13, %v5174_v21, %v5178_v3 }
 0x489   : > { %v14266_v1 = vmax.f32 %v5153_v20, %v5199_v61  ;;  %v5170_v55 = vpop.permute.xlu1 %5169 }
 0x48a   : > { %v5201_v22 = vsel %vm3551_vm13, %v5170_v55, %v5174_v21 }
 0x48b   : > { %v5208_v23 = vmax.f32 %v5152_v32, %v5201_v22  ;;  %v5168_v60 = vpop.permute.xlu0 %5167  ;;  %5229 = vrot.lane.b32.xlu0 %v14266_v1, %s12199_s23 }
 0x48d   : > { %v5176_v44 = vpop.permute.xlu1 %5175  ;;  %5225 = vrot.lane.b32.xlu1 %v5208_v23, %s12199_s23 }
 0x48f   : > { %v5180_v28 = vpop.permute.xlu0 %5179 }
 0x490   : > { %v5200_v56 = vsel %vm3551_vm13, %v5176_v44, %v5180_v28 }
 0x491   : > { %v14277_v20 = vmax.f32 %v5160_v12, %v5200_v56  ;;  %v5172_v40 = vpop.permute.xlu1 %5171 }
 0x492   : > { %v5202_v46 = vsel %vm3551_vm13, %v5172_v40, %v5176_v44  ;;  %v5204_v4 = vsel %vm3551_vm13, %v5168_v60, %v5172_v40 }
 0x493   : > { %v5215_v32 = vmax.f32 %v5159_v13, %v5202_v46  ;;  %v5186_v41 = vpop.permute.xlu0 %5185  ;;  %5231 = vrot.lane.b32.xlu1 %v14277_v20, %s12199_s23  ;;  %v5214_v9 = vmax.f32 %v5158_v38, %v5204_v4 }
 0x495   : > { %5227 = vrot.lane.b32.xlu0 %v5215_v32, %s12199_s23  ;;  %v5182_v47 = vpop.permute.xlu1 %5181 }
 0x496   : > { %v5195_v12 = vsel %vm3551_vm13, %v5182_v47, %v5186_v41  ;;  %v5197_v43 = vsel %vm3551_vm13, %v5178_v3, %v5182_v47 }
 0x497   : > { %v14292_v27 = vmax.f32 %v5155_v26, %v5195_v12  ;;  %v5188_v37 = vpop.permute.xlu0 %5187  ;;  %5223 = vrot.lane.b32.xlu1 %v5214_v9, %s12199_s23  ;;  %v5210_v50 = vmax.f32 %v5154_v49, %v5197_v43 }
 0x499   : > { %5237 = vrot.lane.b32.xlu0 %v14292_v27, %s12199_s23  ;;  %v5184_v8 = vpop.permute.xlu1 %5183 }
 0x49a   : > { %v5196_v38 = vsel %vm3551_vm13, %v5184_v8, %v5188_v37  ;;  %v5198_v29 = vsel %vm3551_vm13, %v5180_v28, %v5184_v8 }
 0x49b   : > { %v5217_v57 = vmax.f32 %v5161_v59, %v5198_v29  ;;  %v5192_v58 = vpop.permute.xlu0 %5191  ;;  %5233 = vrot.lane.b32.xlu1 %v5210_v50, %s12199_s23  ;;  %v14308_v49 = vmax.f32 %v5162_v62, %v5196_v38  ;;  %v16923_v38 = vld [vmem:[#allocation23_spill] sm:$0xff] }
 0x49c   : > { %v5206_v10 = vsel %vm3551_vm13, %v5192_v58, %v5168_v60  ;;  %v5194_v45 = vsel %vm3551_vm13, %v5188_v37, %v5192_v58  ;;  %v5380_v37 = vld [vmem:[#allocation2 + $0x73] ss:$8 sm:$0xf0] }
 0x49d   : > { %5235 = vrot.lane.b32.xlu0 %v5217_v57, %s12199_s23  ;;  %v5166_v24 = vpop.permute.xlu1 %5165  ;;  %v5220_v0 = vmax.f32 %v5164_v35, %v5206_v10  ;;  %v5219_v33 = vmax.f32 %v5163_v39, %v5194_v45  ;;  %v16925_v45 = vld [vmem:[#allocation24_spill] sm:$0xff] }
 0x49e   : > { %v5203_v14 = vsel %vm3551_vm13, %v5166_v24, %v5170_v55 }
 0x49f   : > { %v5190_v17 = vpop.permute.xlu0 %5189  ;;  %5239 = vrot.lane.b32.xlu1 %v14308_v49, %s12199_s23  ;;  %v5207_v59 = vmax.f32 %v5151_v63, %v5203_v14 }
 0x4a0   : > { %v5205_v42 = vsel %vm3551_vm13, %v5190_v17, %v5166_v24  ;;  %v5193_v31 = vsel %vm3551_vm13, %v5186_v41, %v5190_v17 }
 0x4a1   : > { %5247 = vrot.lane.b32.xlu0 %v5220_v0, %s12199_s23  ;;  %v5213_v13 = vmax.f32 %v5157_v30, %v5205_v42  ;;  %v5212_v25 = vmax.f32 %v5156_v2, %v5193_v31 }
 0x4a3   : > { %5221 = vrot.lane.b32.xlu1 %v5207_v59, %s12199_s23 }
 0x4a5   : > { %5245 = vrot.lane.b32.xlu0 %v5213_v13, %s12199_s23 }
 0x4a7   : > { %5243 = vrot.lane.b32.xlu1 %v5219_v33, %s12199_s23 }
 0x4a9   : > { %5241 = vrot.lane.b32.xlu0 %v5212_v25, %s12199_s23  ;;  %s12202_s23 = smov 116  }
 0x4fd   : > { %v5230_v7 = vpop.permute.xlu0 %5229 }
 0x4ff   : > { %v5226_v15 = vpop.permute.xlu1 %5225 }
 0x500   : > { %v5257_v34 = vsel %vm4347_vm15, %v5226_v15, %v5230_v7 }
 0x501   : > { %v14332_v36 = vmax.f32 %v5208_v23, %v5257_v34  ;;  %v16926_v34 = vld [vmem:[#allocation21_spill] sm:$0xff] }
 0x503   : > { %5386 = vrot.lane.b32.xlu1 %v14332_v36, %s12201_s21 }
 0x505   : > { %v5232_v51 = vpop.permute.xlu1 %5231 }
 0x507   : > { %v5228_v5 = vpop.permute.xlu0 %5227 }
 0x508   : > { %v5258_v18 = vsel %vm4347_vm15, %v5228_v5, %v5232_v51 }
 0x509   : > { %v14338_v2 = vmax.f32 %v5215_v32, %v5258_v18  ;;  %v5224_v11 = vpop.permute.xlu1 %5223 }
 0x50a   : > { %v5260_v48 = vsel %vm4347_vm15, %v5224_v11, %v5228_v5 }
 0x50b   : > { %v14342_v26 = vmax.f32 %v5214_v9, %v5260_v48  ;;  %v5238_v53 = vpop.permute.xlu0 %5237  ;;  %5388 = vrot.lane.b32.xlu1 %v14338_v2, %s12201_s21 }
 0x50d   : > { %5384 = vrot.lane.b32.xlu0 %v14342_v26, %s12201_s21  ;;  %v5234_v39 = vpop.permute.xlu1 %5233 }
 0x50e   : > { %v5253_v19 = vsel %vm4347_vm15, %v5234_v39, %v5238_v53  ;;  %v5255_v6 = vsel %vm4347_vm15, %v5230_v7, %v5234_v39 }
 0x50f   : > { %v14353_v16 = vmax.f32 %v14266_v1, %v5255_v6  ;;  %v14355_v62 = vmax.f32 %v5210_v50, %v5253_v19  ;;  %v5236_v35 = vpop.permute.xlu0 %5235 }
 0x510   : > { %v5256_v54 = vsel %vm4347_vm15, %v5232_v51, %v5236_v35 }
 0x511   : > { %5390 = vrot.lane.b32.xlu1 %v14353_v16, %s12201_s21  ;;  %5394 = vrot.lane.b32.xlu0 %v14355_v62, %s12201_s21  ;;  %v5240_v63 = vpop.permute.xlu1 %5239  ;;  %v14366_v21 = vmax.f32 %v14277_v20, %v5256_v54  ;;  %v14514_v54 = vld [vmem:[%s16713_s6 + $0x20] sm:$0xff] }
 0x512   : > { %v5254_v30 = vsel %vm4347_vm15, %v5236_v35, %v5240_v63 }
 0x513   : > { %v14368_v3 = vmax.f32 %v5217_v57, %v5254_v30  ;;  %v5248_v61 = vpop.permute.xlu0 %5247 }
 0x514   : > { %v5262_v1 = vsel %vm4347_vm15, %v5248_v61, %v5224_v11 }
 0x515   : > { %5392 = vrot.lane.b32.xlu1 %v14366_v21, %s12201_s21  ;;  %5396 = vrot.lane.b32.xlu0 %v14368_v3, %s12201_s21  ;;  %v5222_v55 = vpop.permute.xlu1 %5221  ;;  %v14378_v23 = vmax.f32 %v5220_v0, %v5262_v1  ;;  %v16924_v0 = vld [vmem:[#allocation22_spill] sm:$0xff] }
 0x516   : > { %v5259_v22 = vsel %vm4347_vm15, %v5222_v55, %v5226_v15 }
 0x517   : > { %v14380_v60 = vmax.f32 %v5207_v59, %v5259_v22  ;;  %v5246_v44 = vpop.permute.xlu0 %5245  ;;  %v14528_v22 = vld [vmem:[%s16713_s6 + $0x28] sm:$0xff] }
 0x518   : > { %v5261_v28 = vsel %vm4347_vm15, %v5246_v44, %v5222_v55  ;;  %v16927_v55 = vmov 0.0  }
 0x519   : > { %5408 = vrot.lane.b32.xlu0 %v14378_v23, %s12201_s21  ;;  %5382 = vrot.lane.b32.xlu1 %v14380_v60, %s12201_s21  ;;  %v14388_v56 = vmax.f32 %v5213_v13, %v5261_v28  ;;  %v5244_v32 = vpop.permute.xlu1 %5243 }
 0x51a   : > { %v5250_v9 = vsel %vm4347_vm15, %v5244_v32, %v5248_v61  ;;  %v5252_v47 = vsel %vm4347_vm15, %v5240_v63, %v5244_v32 }
 0x51b   : > { %v5242_v20 = vpop.permute.xlu0 %5241  ;;  %v14410_v12 = vmax.f32 %v5219_v33, %v5250_v9  ;;  %v14414_v43 = vmax.f32 %v14308_v49, %v5252_v47  ;;  %v14559_v47 = vld [vmem:[%s16713_s6 + $0x38] sm:$0xff] }
 0x51c   : > { %v5249_v40 = vsel %vm4347_vm15, %v5242_v20, %v5246_v44  ;;  %v5251_v46 = vsel %vm4347_vm15, %v5238_v53, %v5242_v20  ;;  %v14542_v20 = vld [vmem:[%s16713_s6 + $0x30] sm:$0xff] }
 0x51d   : > { %v14394_v4 = vmax.f32 %v5212_v25, %v5249_v40  ;;  %5406 = vrot.lane.b32.xlu0 %v14388_v56, %s12201_s21  ;;  %v14399_v41 = vmax.f32 %v14292_v27, %v5251_v46  ;;  %v5379_v27 = vld [vmem:[#allocation2 + $0x73] ss:$8 sm:$0xf]  ;;  %v5278_v40 = vld [vmem:[#allocation2 + $0x72] ss:$8 sm:$0xf] }
 0x51e   : > { %v14460_v50 = vor.u32 %v5380_v37, %v5379_v27  ;;  %v5279_v46 = vld [vmem:[#allocation2 + $0x72] ss:$8 sm:$0xf0] }
 0x51f   : > { %5402 = vrot.lane.b32.xlu1 %v14394_v4, %s12201_s21  ;;  %v16928_v27 = vld [vmem:[#allocation25_spill] sm:$0xff] }
 0x520   : > { %v5433_v29 = vrot.slane %v14460_v50, %v16923_v38  ;;  %v5437_v17 = vrot.slane %v14460_v50, %v16924_v0  ;;  %v5441_v13 = vrot.slane %v14460_v50, %v16925_v45  ;;  %v5429_v51 = vrot.slane %v14460_v50, %v16926_v34 }
 0x521   : > { %5398 = vrot.lane.b32.xlu0 %v14399_v41, %s12201_s21  ;;  %v5453_v37 = vrot.slane %v14460_v50, %v16928_v27 }
 0x523   : > { %5283 = vrot.lane.b32.xlu1 %v14342_v26, %s12202_s23 }
 0x525   : > { %5287 = vrot.lane.b32.xlu0 %v14338_v2, %s12202_s23 }
 0x527   : > { %5404 = vrot.lane.b32.xlu1 %v14410_v12, %s12201_s21 }
 0x529   : > { %5400 = vrot.lane.b32.xlu0 %v14414_v43, %s12201_s21 }
 0x52b   : > { %5307 = vrot.lane.b32.xlu1 %v14378_v23, %s12202_s23 }
 0x52d   : > { %5281 = vrot.lane.b32.xlu0 %v14380_v60, %s12202_s23 }
 0x52f   : > { %5285 = vrot.lane.b32.xlu1 %v14332_v36, %s12202_s23 }
 0x531   : > { %5305 = vrot.lane.b32.xlu0 %v14388_v56, %s12202_s23 }
 0x533   : > { %5291 = vrot.lane.b32.xlu1 %v14366_v21, %s12202_s23 }
 0x535   : > { %5293 = vrot.lane.b32.xlu0 %v14355_v62, %s12202_s23 }
 0x537   : > { %5289 = vrot.lane.b32.xlu1 %v14353_v16, %s12202_s23 }
 0x539   : > { %5295 = vrot.lane.b32.xlu0 %v14368_v3, %s12202_s23 }
 0x53b   : > { %5297 = vrot.lane.b32.xlu1 %v14399_v41, %s12202_s23 }
 0x53d   : > { %5303 = vrot.lane.b32.xlu0 %v14410_v12, %s12202_s23 }
 0x53f   : > { %5299 = vrot.lane.b32.xlu1 %v14414_v43, %s12202_s23 }
 0x541   : > { %5301 = vrot.lane.b32.xlu0 %v14394_v4, %s12202_s23 }
 0x543   : > { %6223 = vrot.lane.b32.xlu1 %v14366_v21, %s12203_s26 }
 0x545   : > { %6215 = vrot.lane.b32.xlu0 %v14342_v26, %s12203_s26 }
 0x547   : > { %6219 = vrot.lane.b32.xlu1 %v14338_v2, %s12203_s26 }
 0x549   : > { %6225 = vrot.lane.b32.xlu0 %v14355_v62, %s12203_s26 }
 0x54b   : > { %6221 = vrot.lane.b32.xlu1 %v14353_v16, %s12203_s26 }
 0x54d   : > { %6227 = vrot.lane.b32.xlu0 %v14368_v3, %s12203_s26 }
 0x54f   : > { %6217 = vrot.lane.b32.xlu1 %v14332_v36, %s12203_s26 }
 0x551   : > { %6239 = vrot.lane.b32.xlu0 %v14378_v23, %s12203_s26 }
 0x553   : > { %6213 = vrot.lane.b32.xlu1 %v14380_v60, %s12203_s26 }
 0x555   : > { %6237 = vrot.lane.b32.xlu0 %v14388_v56, %s12203_s26 }
 0x557   : > { %6233 = vrot.lane.b32.xlu1 %v14394_v4, %s12203_s26 }
 0x559   : > { %6229 = vrot.lane.b32.xlu0 %v14399_v41, %s12203_s26 }
 0x55b   : > { %6235 = vrot.lane.b32.xlu1 %v14410_v12, %s12203_s26 }
 0x55d   : > { %6713 = vrot.lane.b32.xlu0 %v14338_v2, %s12204_s20 }
 0x55f   : > { %6709 = vrot.lane.b32.xlu1 %v14342_v26, %s12204_s20 }
 0x561   : > { %6231 = vrot.lane.b32.xlu0 %v14414_v43, %s12203_s26 }
 0x563   : > { %6733 = vrot.lane.b32.xlu1 %v14378_v23, %s12204_s20 }
 0x565   : > { %6707 = vrot.lane.b32.xlu0 %v14380_v60, %s12204_s20 }
 0x567   : > { %6711 = vrot.lane.b32.xlu1 %v14332_v36, %s12204_s20 }
 0x569   : > { %6731 = vrot.lane.b32.xlu0 %v14388_v56, %s12204_s20 }
 0x56b   : > { %6717 = vrot.lane.b32.xlu1 %v14366_v21, %s12204_s20 }
 0x56d   : > { %6719 = vrot.lane.b32.xlu0 %v14355_v62, %s12204_s20 }
 0x56f   : > { %6715 = vrot.lane.b32.xlu1 %v14353_v16, %s12204_s20 }
 0x571   : > { %6721 = vrot.lane.b32.xlu0 %v14368_v3, %s12204_s20 }
 0x573   : > { %6725 = vrot.lane.b32.xlu1 %v14414_v43, %s12204_s20 }
 0x575   : > { %6729 = vrot.lane.b32.xlu0 %v14410_v12, %s12204_s20  ;;  %v5387_v8 = vpop.permute.xlu1 %5386 }
 0x577   : > { %6723 = vrot.lane.b32.xlu1 %v14399_v41, %s12204_s20 }
 0x579   : > { %6727 = vrot.lane.b32.xlu0 %v14394_v4, %s12204_s20 }
 0x57b   : > { %7658 = vrot.lane.b32.xlu1 %v14338_v2, %s12205_s28 }
 0x57d   : > { %7662 = vrot.lane.b32.xlu0 %v14366_v21, %s12205_s28  ;;  %v5389_v57 = vpop.permute.xlu1 %5388 }
 0x57f   : > { %v5385_v58 = vpop.permute.xlu0 %5384  ;;  %7654 = vrot.lane.b32.xlu1 %v14342_v26, %s12205_s28 }
 0x580   : > { %v5422_v10 = vsel %vm5410_vm1, %v5385_v58, %v5389_v57 }
 0x581   : > { %7656 = vrot.lane.b32.xlu0 %v14332_v36, %s12205_s28  ;;  %v5469_v49 = vmul.f32 %v5433_v29, %v5422_v10 }
 0x583   : > { %v14475_v24 = vpop.permute.xlu0 %5394  ;;  %7660 = vrot.lane.b32.xlu1 %v14353_v16, %s12205_s28  ;;  %5521 = vmatprep.subr.mxu1 %v5469_v49  ;;  %v5391_v14 = vpop.permute.xlu1 %5390 }
 0x584   : > { %v5417_v31 = vsel %vm5410_vm1, %v5391_v14, %v14475_v24  ;;  %v5419_v7 = vsel %vm5410_vm1, %v5387_v8, %v5391_v14 }
 0x585   : > { %7652 = vrot.lane.b32.xlu0 %v14380_v60, %s12205_s28  ;;  %v5464_v48 = vmul.f32 %v5441_v13, %v5417_v31  ;;  %v5463_v53 = vmul.f32 %v5437_v17, %v5419_v7 }
 0x587   : > { %v14483_v42 = vpop.permute.xlu0 %5396  ;;  %7664 = vrot.lane.b32.xlu1 %v14355_v62, %s12205_s28  ;;  %v5393_v59 = vpop.permute.xlu1 %5392 }
 0x588   : > { %v5418_v33 = vsel %vm5410_vm1, %v5393_v59, %v14483_v42  ;;  %v5420_v25 = vsel %vm5410_vm1, %v5389_v57, %v5393_v59 }
 0x589   : > { %v5470_v15 = vmul.f32 %v5437_v17, %v5420_v25  ;;  %7668 = vrot.lane.b32.xlu0 %v14399_v41, %s12205_s28  ;;  %v5471_v5 = vmul.f32 %v5441_v13, %v5418_v33  ;;  %v16930_v17 = vld [vmem:[#allocation26_spill] sm:$0xff] }
 0x58a   : > { %v5449_v59 = vrot.slane %v14460_v50, %v16930_v17 }
 0x58b   : > { %v5409_v18 = vpop.permute.xlu0 %5408  ;;  %7666 = vrot.lane.b32.xlu1 %v14368_v3, %s12205_s28  ;;  %5610 = vmatprep.subr.mxu0 %v5471_v5  ;;  %v5383_v11 = vpop.permute.xlu1 %5382 }
 0x58c   : > { %v5424_v39 = vsel %vm5410_vm1, %v5409_v18, %v5385_v58  ;;  %v5421_v19 = vsel %vm5410_vm1, %v5383_v11, %v5387_v8  ;;  %5611 = vmatpush1.msra.mxu0 %v5470_v15  ;;  %v14563_v8 = vor.u32 %v5279_v46, %v5278_v40  ;;  %v16929_v58 = vld [vmem:[#allocation27_spill] sm:$0xff]  ;;  %v14642_v40 = vld [vmem:[%s16713_s6] sm:$0xff] }
 0x58d   : > { %v5468_v6 = vmul.f32 %v5429_v51, %v5424_v39  ;;  %7670 = vrot.lane.b32.xlu0 %v14414_v43, %s12205_s28  ;;  %5612 = vmatprep.subr.mxu0 %v5464_v48  ;;  %v5462_v35 = vmul.f32 %v5433_v29, %v5421_v19  ;;  %v5445_v10 = vrot.slane %v14460_v50, %v16929_v58 }
 0x58e   : > { %5613 = vmatpush1.msra.mxu0 %v5463_v53  ;;  %v5328_v33 = vrot.slane %v14563_v8, %v16926_v34  ;;  %v5340_v46 = vrot.slane %v14563_v8, %v16925_v45 }
 0x58f   : > { %v5407_v63 = vpop.permute.xlu0 %5406  ;;  %7672 = vrot.lane.b32.xlu1 %v14394_v4, %s12205_s28  ;;  %5522 = vmatpush1.msra.mxu1 %v5468_v6 }
 0x590   : > { %v5423_v30 = vsel %vm5410_vm1, %v5407_v63, %v5383_v11  ;;  %5523 = vmatprep.subr.mxu1 %v5462_v35  ;;  %11383 = vmatmul.mubr.msk.f32.vlgmr.msra.gmra.mxu0 %vm5480_vm2, %v14514_v54 }
 0x591   : > { %v5461_v61 = vmul.f32 %v5429_v51, %v5423_v30  ;;  %7678 = vrot.lane.b32.xlu0 %v14378_v23, %s12205_s28  ;;  %v5403_v1 = vpop.permute.xlu1 %5402  ;;  %5652 = vmatprep.mubr.f32.mxu0 %v16927_v55 }
 0x592   : > { %v5411_v57 = vsel %vm5410_vm1, %v5403_v1, %v5407_v63 }
 0x593   : > { %v5399_v44 = vpop.permute.xlu0 %5398  ;;  %7674 = vrot.lane.b32.xlu1 %v14410_v12, %s12205_s28  ;;  %5524 = vmatpush1.msra.mxu1 %v5461_v61  ;;  %v5467_v5 = vmul.f32 %v5453_v37, %v5411_v57 }
 0x594   : > { %11379 = vmatmul.mubr.msk.f32.vlgmr.msra.gmra.mxu1 %vm5480_vm2, %v14514_v54  ;;  %11384 = vmatmul.mubr.msk.f32.gmra.mxu0 %vm5480_vm2, %v14528_v22  ;;  %v5413_v15 = vsel %vm5410_vm1, %v5399_v44, %v5403_v1 }
 0x595   : > { %7676 = vrot.lane.b32.xlu0 %v14388_v56, %s12205_s28  ;;  %v5284_v28 = vpop.permute.xlu1 %5283  ;;  %5563 = vmatprep.mubr.f32.mxu1 %v16927_v55  ;;  %v5466_v39 = vmul.f32 %v5449_v59, %v5413_v15  ;;  %s474_s28 = sand.u32 1, %s12162_s22  }
 0x596   : > { %5658 = vmatprep.mubr.f32.mxu0 %v16927_v55 }
 0x597   : > { %v14545_v32 = vpop.permute.xlu0 %5287  ;;  %8156 = vrot.lane.b32.xlu1 %v14366_v21, %s12206_s14 }
 0x598   : > { %11380 = vmatmul.mubr.msk.f32.gmra.mxu1 %vm5480_vm2, %v14528_v22  ;;  %11385 = vmatmul.mubr.msk.f32.gmra.mxu0 %vm5480_vm2, %v14542_v20  ;;  %v5321_v11 = vsel %vm5309_vm3, %v5284_v28, %v14545_v32 }
 0x599   : > { %8152 = vrot.lane.b32.xlu0 %v14338_v2, %s12206_s14  ;;  %v5405_v9 = vpop.permute.xlu1 %5404  ;;  %5569 = vmatprep.mubr.f32.mxu1 %v16927_v55 }
 0x59a   : > { %v5412_v29 = vsel %vm5410_vm1, %v5405_v9, %v5409_v18  ;;  %5664 = vmatprep.mubr.f32.mxu0 %v16927_v55  ;;  %v5415_v18 = vsel %vm5410_vm1, %v14475_v24, %v5399_v44 }
 0x59b   : > { %v5401_v49 = vpop.permute.xlu0 %5400  ;;  %8158 = vrot.lane.b32.xlu1 %v14355_v62, %s12206_s14  ;;  %v5474_v14 = vmul.f32 %v5453_v37, %v5412_v29  ;;  %v5465_v6 = vmul.f32 %v5445_v10, %v5415_v18  ;;  %v5336_v37 = vrot.slane %v14563_v8, %v16924_v0 }
 0x59c   : > { %v5414_v13 = vsel %vm5410_vm1, %v5401_v49, %v5405_v9  ;;  %v5416_v31 = vsel %vm5410_vm1, %v14483_v42, %v5401_v49  ;;  %11381 = vmatmul.mubr.msk.f32.gmra.mxu1 %vm5480_vm2, %v14542_v20  ;;  %11386 = vmatmul.mubr.msk.f32.gmra.mxu0 %vm5480_vm2, %v14559_v47  ;;  %v5332_v42 = vrot.slane %v14563_v8, %v16923_v38 }
 0x59d   : > { %v5472_v25 = vmul.f32 %v5445_v10, %v5416_v31  ;;  %8162 = vrot.lane.b32.xlu0 %v14399_v41, %s12206_s14  ;;  %11750 = vmatprep.subr.mxu0 %v5474_v14  ;;  %v14590_v50 = vpop.permute.xlu1 %5307  ;;  %v5473_v7 = vmul.f32 %v5449_v59, %v5414_v13  ;;  %v14667_v10 = vld [vmem:[%s16713_s6 + $0x8] sm:$0xff] }
 0x59e   : > { %v5323_v51 = vsel %vm5309_vm3, %v14590_v50, %v5284_v28  ;;  %11751 = vmatpush3.msra.mxu0 %v5474_v14  ;;  %5575 = vmatprep.mubr.f32.mxu1 %v16927_v55  ;;  %v5368_v24 = vmul.f32 %v5332_v42, %v5321_v11  ;;  %v5352_v14 = vrot.slane %v14563_v8, %v16928_v27 }
 0x59f   : > { %v5282_v48 = vpop.permute.xlu0 %5281  ;;  %8148 = vrot.lane.b32.xlu1 %v14342_v26, %s12206_s14  ;;  %5699 = vmatprep.subr.mxu1 %v5473_v7  ;;  %v5367_v53 = vmul.f32 %v5328_v33, %v5323_v51  ;;  %v6210_v51 = vld [vmem:[#allocation2 + $0x74] ss:$8 sm:$0xf] }
 0x5a0   : > { %11752 = vmatprep.subr.mxu0 %v5467_v5  ;;  %11382 = vmatmul.mubr.msk.f32.gmra.mxu1 %vm5480_vm2, %v14559_v47 }
 0x5a1   : > { %5700 = vmatpush1.msra.mxu1 %v5472_v25  ;;  %11753 = vmatpush3.msra.mxu0 %v5467_v5  ;;  %v5286_v19 = vpop.permute.xlu1 %5285  ;;  %v5348_v25 = vrot.slane %v14563_v8, %v16930_v17  ;;  %v6211_v5 = vld [vmem:[#allocation2 + $0x74] ss:$8 sm:$0xf0] }
 0x5a2   : > { %11754 = vmatprep.mubr.msk.f32.mxu0 %vm5480_vm2, %v14514_v54  ;;  %8164 = vrot.lane.b32.xlu0 %v14414_v43, %s12206_s14  ;;  %v5320_v35 = vsel %vm5309_vm3, %v5282_v48, %v5286_v19 }
 0x5a3   : > { %5701 = vmatprep.subr.mxu1 %v5466_v39  ;;  %11755 = vmatmul.mubr.msk.f32.vlgmr.msra.gmra.mxu0 %vm5480_vm2, %v14528_v22  ;;  %v14618_v63 = vpop.permute.xlu0 %5305  ;;  %v5361_v61 = vmul.f32 %v5332_v42, %v5320_v35  ;;  %v14721_v35 = vld [vmem:[%s16713_s6 + $0x18] sm:$0xff] }
 0x5a4   : > { %5885 = vmatprep.subr.mxu0 %v5368_v24  ;;  %5702 = vmatpush1.msra.mxu1 %v5465_v6  ;;  %v5322_v30 = vsel %vm5309_vm3, %v14618_v63, %v5282_v48  ;;  %v14715_v24 = vor.u32 %v6211_v5, %v6210_v51 }
 0x5a5   : > { %5886 = vmatpush1.msra.mxu0 %v5367_v53  ;;  %8160 = vrot.lane.b32.xlu1 %v14368_v3, %s12206_s14  ;;  %v5292_v1 = vpop.permute.xlu1 %5291  ;;  %v5360_v44 = vmul.f32 %v5328_v33, %v5322_v30  ;;  %v5344_v53 = vrot.slane %v14563_v8, %v16929_v58 }
 0x5a6   : > { %5735 = vmatprep.mubr.f32.mxu1 %v16927_v55  ;;  %11757 = vmatprep.mubr.msk.f32.mxu0 %vm5480_vm2, %v14542_v20 }
 0x5a7   : > { %11387 = vmatmul.mubr.msk.f32.vlgmr.msra.gmra.mxu1 %vm5480_vm2, %v14514_v54  ;;  %8154 = vrot.lane.b32.xlu0 %v14353_v16, %s12206_s14  ;;  %v14632_v28 = vpop.permute.xlu0 %5293 }
 0x5a8   : > { %11758 = vmatmul.mubr.msk.f32.gmra.mxu0 %vm5480_vm2, %v14559_v47  ;;  %5887 = vmatprep.subr.mxu0 %v5361_v61 }
 0x5a9   : > { %8150 = vrot.lane.b32.xlu1 %v14332_v36, %s12206_s14  ;;  %5741 = vmatprep.mubr.f32.mxu1 %v16927_v55  ;;  %v5290_v54 = vpop.permute.xlu1 %5289 }
 0x5aa   : > { %5888 = vmatpush1.msra.mxu0 %v5360_v44  ;;  %5921 = vmatprep.mubr.f32.mxu0 %v16927_v55  ;;  %v5316_v59 = vsel %vm5309_vm3, %v5290_v54, %v14632_v28  ;;  %v5318_v31 = vsel %vm5309_vm3, %v5286_v19, %v5290_v54  ;;  %v6264_v44 = vrot.slane %v14715_v24, %v16923_v38 }
 0x5ab   : > { %11388 = vmatmul.mubr.msk.f32.gmra.mxu1 %vm5480_vm2, %v14528_v22  ;;  %8146 = vrot.lane.b32.xlu0 %v14380_v60, %s12206_s14  ;;  %v5296_v9 = vpop.permute.xlu0 %5295  ;;  %v5319_v22 = vsel %vm5309_vm3, %v14545_v32, %v5292_v1  ;;  %v5363_v42 = vmul.f32 %v5340_v46, %v5316_v59  ;;  %v5362_v18 = vmul.f32 %v5336_v37, %v5318_v31 }
 0x5ac   : > { %11395 = vmatmul.mubr.msk.f32.vlgmr.msra.gmra.mxu0 %vm5480_vm2, %v14642_v40  ;;  %v5317_v29 = vsel %vm5309_vm3, %v5292_v1, %v5296_v9  ;;  %5747 = vmatprep.mubr.f32.mxu1 %v16927_v55  ;;  %v5369_v13 = vmul.f32 %v5336_v37, %v5319_v22  ;;  %v6268_v22 = vrot.slane %v14715_v24, %v16924_v0 }
 0x5ad   : > { %v5370_v57 = vmul.f32 %v5340_v46, %v5317_v29  ;;  %8172 = vrot.lane.b32.xlu1 %v14378_v23, %s12206_s14  ;;  %5927 = vmatprep.mubr.f32.mxu0 %v16927_v55  ;;  %v5298_v49 = vpop.permute.xlu1 %5297 }
 0x5ae   : > { %v5314_v61 = vsel %vm5309_vm3, %v14632_v28, %v5298_v49 }
 0x5af   : > { %11389 = vmatmul.mubr.msk.f32.gmra.mxu1 %vm5480_vm2, %v14542_v20  ;;  %8166 = vrot.lane.b32.xlu0 %v14394_v4, %s12206_s14  ;;  %v5304_v32 = vpop.permute.xlu0 %5303  ;;  %v14691_v20 = vld [vmem:[%s16713_s6 + $0x10] sm:$0xff]  ;;  %v5364_v46 = vmul.f32 %v5344_v53, %v5314_v61 }
 0x5b0   : > { %11396 = vmatmul.mubr.msk.f32.gmra.mxu0 %vm5480_vm2, %v14667_v10  ;;  %v5311_v33 = vsel %vm5309_vm3, %v5304_v32, %v14590_v50  ;;  %5753 = vmatprep.mubr.f32.mxu1 %v16927_v55 }
 0x5b1   : > { %8170 = vrot.lane.b32.xlu1 %v14388_v56, %s12206_s14  ;;  %5974 = vmatprep.subr.mxu1 %v5370_v57  ;;  %v5300_v7 = vpop.permute.xlu1 %5299  ;;  %v5373_v15 = vmul.f32 %v5352_v14, %v5311_v33  ;;  %v6272_v57 = vrot.slane %v14715_v24, %v16925_v45 }
 0x5b2   : > { %5933 = vmatprep.mubr.f32.mxu0 %v16927_v55  ;;  %5975 = vmatpush1.msra.mxu1 %v5369_v13  ;;  %v5313_v50 = vsel %vm5309_vm3, %v5300_v7, %v5304_v32  ;;  %v5315_v11 = vsel %vm5309_vm3, %v5296_v9, %v5300_v7 }
 0x5b3   : > { %11390 = vmatmul.mubr.msk.f32.gmra.mxu1 %vm5480_vm2, %v14559_v47  ;;  %8650 = vrot.lane.b32.xlu0 %v14366_v21, %s12207_s29  ;;  %v5302_v48 = vpop.permute.xlu0 %5301  ;;  %v5372_v19 = vmul.f32 %v5348_v25, %v5313_v50  ;;  %v5371_v8 = vmul.f32 %v5344_v53, %v5315_v11 }
 0x5b4   : > { %11397 = vmatmul.mubr.msk.f32.gmra.mxu0 %vm5480_vm2, %v14691_v20  ;;  %5976 = vmatprep.subr.mxu1 %v5363_v42  ;;  %v5312_v39 = vsel %vm5309_vm3, %v5298_v49, %v5302_v48  ;;  %v5310_v47 = vsel %vm5309_vm3, %v5302_v48, %v14618_v63  ;;  %v6260_v42 = vrot.slane %v14715_v24, %v16926_v34 }
 0x5b5   : > { %5977 = vmatpush1.msra.mxu1 %v5362_v18  ;;  %8646 = vrot.lane.b32.xlu1 %v14338_v2, %s12207_s29  ;;  %v6224_v6 = vpop.permute.xlu1 %6223  ;;  %v5365_v30 = vmul.f32 %v5348_v25, %v5312_v39  ;;  %v5366_v1 = vmul.f32 %v5352_v14, %v5310_v47  ;;  %v6704_v47 = vld [vmem:[#allocation2 + $0x75] ss:$8 sm:$0xf] }
 0x5b6   : > { %6010 = vmatprep.mubr.f32.mxu1 %v16927_v55  ;;  %11760 = vmatprep.subr.mxu1 %v5373_v15 }
 0x5b7   : > { %5939 = vmatprep.mubr.f32.mxu0 %v16927_v55  ;;  %11399 = vmatmul.mubr.msk.f32.vlgmr.msra.gmra.mxu1 %vm5480_vm2, %v14642_v40  ;;  %v6216_v63 = vpop.permute.xlu0 %6215 }
 0x5b8   : > { %11761 = vmatpush3.msra.mxu1 %v5373_v15  ;;  %8168 = vrot.lane.b32.xlu0 %v14410_v12, %s12206_s14  ;;  %s11151_s14 = scalar_lea.sflag [#allocation4], %s474_s28 }
 0x5b9   : > { %11398 = vmatmul.mubr.msk.f32.gmra.mxu0 %vm5480_vm2, %v14721_v35  ;;  %6063 = vmatprep.subr.mxu0 %v5372_v19  ;;  %v6220_v54 = vpop.permute.xlu1 %6219 }
 0x5ba   : > { %6064 = vmatpush1.msra.mxu0 %v5371_v8  ;;  %8642 = vrot.lane.b32.xlu1 %v14342_v26, %s12207_s29  ;;  %v6253_v28 = vsel %vm6241_vm4, %v6216_v63, %v6220_v54  ;;  %v6251_v14 = vsel %vm6241_vm4, %v6220_v54, %v6224_v6  ;;  %v14817_v8 = vld [vmem:[%s16713_s6 + $0x40] sm:$0xff]  ;;  %v14844_v54 = vld [vmem:[%s16713_s6 + $0x48] sm:$0xff] }
 0x5bb   : > { %6016 = vmatprep.mubr.f32.mxu1 %v16927_v55  ;;  %6065 = vmatprep.subr.mxu0 %v5365_v30  ;;  %v14741_v9 = vpop.permute.xlu0 %6225  ;;  %v6300_v37 = vmul.f32 %v6264_v44, %v6253_v28  ;;  %v6301_v33 = vmul.f32 %v6268_v22, %v6251_v14 }
 0x5bc   : > { %11762 = vmatprep.subr.mxu1 %v5366_v1  ;;  %11400 = vmatmul.mubr.msk.f32.gmra.mxu1 %vm5480_vm2, %v14667_v10 }
 0x5bd   : > { %6066 = vmatpush1.msra.mxu0 %v5364_v46  ;;  %6099 = vmatprep.mubr.f32.mxu0 %v16927_v55  ;;  %v6222_v29 = vpop.permute.xlu1 %6221 }
 0x5be   : > { %11763 = vmatpush3.msra.mxu1 %v5366_v1  ;;  %8644 = vrot.lane.b32.xlu0 %v14332_v36, %s12207_s29  ;;  %v6248_v25 = vsel %vm6241_vm4, %v6222_v29, %v14741_v9 }
 0x5bf   : > { %11403 = vmatmul.mubr.msk.f32.vlgmr.msra.gmra.mxu0 %vm5480_vm2, %v14642_v40  ;;  %8648 = vrot.lane.b32.xlu1 %v14353_v16, %s12207_s29  ;;  %v14756_v49 = vpop.permute.xlu0 %6227  ;;  %v6295_v5 = vmul.f32 %v6272_v57, %v6248_v25  ;;  %v6276_v25 = vrot.slane %v14715_v24, %v16929_v58 }
 0x5c0   : > { %6022 = vmatprep.mubr.f32.mxu1 %v16927_v55  ;;  %6105 = vmatprep.mubr.f32.mxu0 %v16927_v55  ;;  %v6249_v59 = vsel %vm6241_vm4, %v6224_v6, %v14756_v49  ;;  %v6705_v6 = vld [vmem:[#allocation2 + $0x75] ss:$8 sm:$0xf0] }
 0x5c1   : > { %11401 = vmatmul.mubr.msk.f32.gmra.mxu1 %vm5480_vm2, %v14691_v20  ;;  %6351 = vmatprep.subr.mxu1 %v6300_v37  ;;  %v6302_v32 = vmul.f32 %v6272_v57, %v6249_v59  ;;  %v6218_v13 = vpop.permute.xlu1 %6217  ;;  %v14864_v57 = vld [vmem:[%s16713_s6 + $0x50] sm:$0xff] }
 0x5c2   : > { %8640 = vrot.lane.b32.xlu0 %v14380_v60, %s12207_s29  ;;  %6028 = vmatprep.mubr.f32.mxu1 %v16927_v55  ;;  %v6250_v31 = vsel %vm6241_vm4, %v6218_v13, %v6222_v29 }
 0x5c3   : > { %11404 = vmatmul.mubr.msk.f32.gmra.mxu0 %vm5480_vm2, %v14667_v10  ;;  %8652 = vrot.lane.b32.xlu1 %v14355_v62, %s12207_s29  ;;  %v6240_v7 = vpop.permute.xlu0 %6239  ;;  %v6294_v15 = vmul.f32 %v6268_v22, %v6250_v31 }
 0x5c4   : > { %6111 = vmatprep.mubr.f32.mxu0 %v16927_v55  ;;  %6440 = vmatprep.subr.mxu0 %v6302_v32  ;;  %v6255_v50 = vsel %vm6241_vm4, %v6240_v7, %v6216_v63  ;;  %v14823_v63 = vor.u32 %v6705_v6, %v6704_v47 }
 0x5c5   : > { %11402 = vmatmul.mubr.msk.f32.gmra.mxu1 %vm5480_vm2, %v14721_v35  ;;  %6441 = vmatpush1.msra.mxu0 %v6301_v33  ;;  %v6214_v51 = vpop.permute.xlu1 %6213  ;;  %v6299_v48 = vmul.f32 %v6260_v42, %v6255_v50 }
 0x5c6   : > { %8656 = vrot.lane.b32.xlu0 %v14399_v41, %s12207_s29  ;;  %11764 = vmatprep.mubr.msk.f32.mxu1 %vm5480_vm2, %v14642_v40  ;;  %v6252_v18 = vsel %vm6241_vm4, %v6214_v51, %v6218_v13  ;;  %v6758_v28 = vrot.slane %v14823_v63, %v16923_v38  ;;  %v6280_v13 = vrot.slane %v14715_v24, %v16930_v17 }
 0x5c7   : > { %11405 = vmatmul.mubr.msk.f32.gmra.mxu0 %vm5480_vm2, %v14691_v20  ;;  %8654 = vrot.lane.b32.xlu1 %v14368_v3, %s12207_s29  ;;  %v6238_v11 = vpop.permute.xlu0 %6237  ;;  %v6293_v40 = vmul.f32 %v6264_v44, %v6252_v18 }
 0x5c8   : > { %6117 = vmatprep.mubr.f32.mxu0 %v16927_v55  ;;  %6442 = vmatprep.subr.mxu0 %v6295_v5  ;;  %v6254_v53 = vsel %vm6241_vm4, %v6238_v11, %v6214_v51 }
 0x5c9   : > { %11765 = vmatmul.mubr.msk.f32.vlgmr.msra.gmra.mxu1 %vm5480_vm2, %v14667_v10  ;;  %6443 = vmatpush1.msra.mxu0 %v6294_v15  ;;  %v14801_v39 = vpop.permute.xlu1 %6233  ;;  %v6292_v19 = vmul.f32 %v6260_v42, %v6254_v53  ;;  %v14890_v42 = vld [vmem:[%s16713_s6 + $0x58] sm:$0xff]  ;;  %v6754_v15 = vrot.slane %v14823_v63, %v16926_v34 }
 0x5ca   : > { %8658 = vrot.lane.b32.xlu0 %v14414_v43, %s12207_s29  ;;  %11767 = vmatprep.mubr.msk.f32.mxu1 %vm5480_vm2, %v14691_v20  ;;  %v6284_v20 = vrot.slane %v14715_v24, %v16928_v27  ;;  %v6242_v44 = vsel %vm6241_vm4, %v14801_v39, %v6238_v11 }
 0x5cb   : > { %11406 = vmatmul.mubr.msk.f32.gmra.mxu0 %vm5480_vm2, %v14721_v35  ;;  %8660 = vrot.lane.b32.xlu1 %v14394_v4, %s12207_s29  ;;  %v14811_v10 = vpop.permute.xlu0 %6229 }
 0x5cc   : > { %6352 = vmatpush1.msra.mxu1 %v6299_v48  ;;  %6476 = vmatprep.mubr.f32.mxu0 %v16927_v55  ;;  %v6298_v29 = vmul.f32 %v6284_v20, %v6242_v44  ;;  %v6244_v50 = vsel %vm6241_vm4, %v14811_v10, %v14801_v39  ;;  %v6246_v5 = vsel %vm6241_vm4, %v14741_v9, %v14811_v10 }
 0x5cd   : > { %11768 = vmatmul.mubr.msk.f32.gmra.mxu1 %vm5480_vm2, %v14721_v35  ;;  %6353 = vmatprep.subr.mxu1 %v6293_v40  ;;  %v6236_v30 = vpop.permute.xlu1 %6235  ;;  %v6297_v48 = vmul.f32 %v6280_v13, %v6244_v50  ;;  %v6296_v40 = vmul.f32 %v6276_v25, %v6246_v5 }
 0x5ce   : > { %8666 = vrot.lane.b32.xlu0 %v14378_v23, %s12207_s29  ;;  %6354 = vmatpush1.msra.mxu1 %v6292_v19  ;;  %v6243_v61 = vsel %vm6241_vm4, %v6236_v30, %v6240_v7 }
 0x5cf   : > { %11419 = vmatmul.mubr.msk.f32.vlgmr.msra.gmra.mxu0 %vm5480_vm2, %v14817_v8  ;;  %8662 = vrot.lane.b32.xlu1 %v14410_v12, %s12207_s29  ;;  %v6305_v35 = vmul.f32 %v6284_v20, %v6243_v61  ;;  %v14833_v1 = vpop.permute.xlu0 %6713  ;;  %v6766_v20 = vrot.slane %v14823_v63, %v16925_v45 }
 0x5d0   : > { %6387 = vmatprep.mubr.f32.mxu1 %v16927_v55  ;;  %6482 = vmatprep.mubr.f32.mxu0 %v16927_v55 }
 0x5d1   : > { %11415 = vmatmul.mubr.msk.f32.vlgmr.msra.gmra.mxu1 %vm5480_vm2, %v14817_v8  ;;  %11770 = vmatprep.subr.mxu0 %v6305_v35  ;;  %v6710_v46 = vpop.permute.xlu1 %6709 }
 0x5d2   : > { %8664 = vrot.lane.b32.xlu0 %v14388_v56, %s12207_s29  ;;  %6393 = vmatprep.mubr.f32.mxu1 %v16927_v55  ;;  %v6747_v37 = vsel %vm6735_vm5, %v6710_v46, %v14833_v1  ;;  %s475_s29 = scalar_lea.vmem [#allocation11], %s474_s28 }
 0x5d3   : > { %11420 = vmatmul.mubr.msk.f32.gmra.mxu0 %vm5480_vm2, %v14844_v54  ;;  %9144 = vrot.lane.b32.xlu1 %v14366_v21, %s12208_s18  ;;  %v6232_v22 = vpop.permute.xlu0 %6231  ;;  %v6794_v14 = vmul.f32 %v6758_v28, %v6747_v37  ;;  %s11163_s19 = sshll.u32 %s475_s29, 4  ;;  %s11164_s19 = int_to_ptr.vmem [resolvable:$true] %s11163_s19 }
 0x5d4   : > { %6488 = vmatprep.mubr.f32.mxu0 %v16927_v55  ;;  %11771 = vmatpush3.msra.mxu0 %v6305_v35  ;;  %v6245_v59 = vsel %vm6241_vm4, %v6232_v22, %v6236_v30  ;;  %v6247_v31 = vsel %vm6241_vm4, %v14756_v49, %v6232_v22  ;;  %v6774_v22 = vrot.slane %v14823_v63, %v16930_v17  ;;  %s12098_s15 = scalar_lea.vmem %s11164_s19, 16 }
 0x5d5   : > { %11416 = vmatmul.mubr.msk.f32.gmra.mxu1 %vm5480_vm2, %v14844_v54  ;;  %11772 = vmatprep.subr.mxu0 %v6298_v29  ;;  %v14870_v32 = vpop.permute.xlu1 %6733  ;;  %v6304_v7 = vmul.f32 %v6280_v13, %v6245_v59  ;;  %v6303_v51 = vmul.f32 %v6276_v25, %v6247_v31  ;;  %p12099_p9 = scmp.ne.s32.totalorder %s11164_s19, %s12098_s15 }
 0x5d6   : > { %9140 = vrot.lane.b32.xlu0 %v14338_v2, %s12208_s18  ;;  %6399 = vmatprep.mubr.f32.mxu1 %v16927_v55  ;;  %v6749_v24 = vsel %vm6735_vm5, %v14870_v32, %v6710_v46 }
 0x5d7   : > { %11421 = vmatmul.mubr.msk.f32.gmra.mxu0 %vm5480_vm2, %v14864_v57  ;;  %9146 = vrot.lane.b32.xlu1 %v14355_v62, %s12208_s18  ;;  %v6708_v33 = vpop.permute.xlu0 %6707  ;;  %v6793_v11 = vmul.f32 %v6754_v15, %v6749_v24  ;;  %p12100_p12 = pnand %p12099_p9, %p12313_p5 }
 0x5d8   : > { %6494 = vmatprep.mubr.f32.mxu0 %v16927_v55  ;;  %11773 = vmatpush3.msra.mxu0 %v6298_v29 }
 0x5d9   : > { %11417 = vmatmul.mubr.msk.f32.gmra.mxu1 %vm5480_vm2, %v14864_v57  ;;  %6845 = vmatprep.subr.mxu0 %v6794_v14  ;;  %v14899_v49 = vpop.permute.xlu1 %6711  ;;  %v6778_v14 = vrot.slane %v14823_v63, %v16928_v27  ;;  %p12101_p13 = pneg %p12100_p12 }
 0x5da   : > { %9150 = vrot.lane.b32.xlu0 %v14399_v41, %s12208_s18  ;;  %6405 = vmatprep.mubr.f32.mxu1 %v16927_v55  ;;  %v6746_v9 = vsel %vm6735_vm5, %v6708_v33, %v14899_v49 }
 0x5db   : > { %11422 = vmatmul.mubr.msk.f32.gmra.mxu0 %vm5480_vm2, %v14890_v42  ;;  %9136 = vrot.lane.b32.xlu1 %v14342_v26, %s12208_s18  ;;  %v14916_v18 = vpop.permute.xlu0 %6731  ;;  %v6787_v47 = vmul.f32 %v6758_v28, %v6746_v9  ;;  %v6762_v28 = vrot.slane %v14823_v63, %v16924_v0  ;;  %v7199_v9 = vld [vmem:[#allocation2 + $0x76] ss:$8 sm:$0xf0] }
 0x5dc   : > { %6529 = vmatprep.subr.mxu1 %v6304_v7  ;;  %11774 = vmatprep.mubr.msk.f32.mxu0 %vm5480_vm2, %v14817_v8  ;;  %v6748_v39 = vsel %vm6735_vm5, %v14916_v18, %v6708_v33  ;;  %v15004_v7 = vld [vmem:[%s16713_s6 + $0x70] sm:$0xff] }
 0x5dd   : > { %11418 = vmatmul.mubr.msk.f32.gmra.mxu1 %vm5480_vm2, %v14890_v42  ;;  %v6718_v53 = vpop.permute.xlu1 %6717  ;;  %v6786_v6 = vmul.f32 %v6754_v15, %v6748_v39  ;;  %v6770_v15 = vrot.slane %v14823_v63, %v16929_v58  ;;  %v9624_v63 = vld [vmem:[%s16714_s7] sm:$0xff] }
 0x5de   : > { %6530 = vmatpush1.msra.mxu1 %v6303_v51  ;;  %9152 = vrot.lane.b32.xlu0 %v14414_v43, %s12208_s18  ;;  %v6745_v37 = vsel %vm6735_vm5, %v14833_v1, %v6718_v53 }
 0x5df   : > { %6531 = vmatprep.subr.mxu1 %v6297_v48  ;;  %11775 = vmatmul.mubr.msk.f32.vlgmr.msra.gmra.mxu0 %vm5480_vm2, %v14844_v54  ;;  %v14932_v19 = vpop.permute.xlu0 %6719  ;;  %v6795_v13 = vmul.f32 %v6762_v28, %v6745_v37  ;;  %v7198_v48 = vld [vmem:[#allocation2 + $0x76] ss:$8 sm:$0xf] }
 0x5e0   : > { %6846 = vmatpush1.msra.mxu0 %v6793_v11  ;;  %6532 = vmatpush1.msra.mxu1 %v6296_v40  ;;  %v9625_v40 = vld [vmem:[%s16714_s7 + $0x8] sm:$0xff] }
 0x5e1   : > { %9148 = vrot.lane.b32.xlu1 %v14368_v3, %s12208_s18  ;;  %6565 = vmatprep.mubr.f32.mxu1 %v16927_v55  ;;  %v6716_v10 = vpop.permute.xlu1 %6715 }
 0x5e2   : > { %11423 = vmatmul.mubr.msk.f32.vlgmr.msra.gmra.mxu1 %vm5480_vm2, %v14817_v8  ;;  %11777 = vmatprep.mubr.msk.f32.mxu0 %vm5480_vm2, %v14864_v57  ;;  %v14951_v8 = vld [vmem:[%s16713_s6 + $0x60] sm:$0xff]  ;;  %v6742_v29 = vsel %vm6735_vm5, %v6716_v10, %v14932_v19  ;;  %v6744_v31 = vsel %vm6735_vm5, %v14899_v49, %v6716_v10  ;;  %v15045_v10 = vor.u32 %v7199_v9, %v7198_v48 }
 0x5e3   : > { %9142 = vrot.lane.b32.xlu0 %v14353_v16, %s12208_s18  ;;  %11778 = vmatmul.mubr.msk.f32.gmra.mxu0 %vm5480_vm2, %v14890_v42  ;;  %v6722_v30 = vpop.permute.xlu0 %6721  ;;  %v6789_v25 = vmul.f32 %v6766_v20, %v6742_v29  ;;  %v6788_v49 = vmul.f32 %v6762_v28, %v6744_v31 }
 0x5e4   : > { %6847 = vmatprep.subr.mxu0 %v6787_v47  ;;  %6571 = vmatprep.mubr.f32.mxu1 %v16927_v55  ;;  %v6743_v61 = vsel %vm6735_vm5, %v6718_v53, %v6722_v30  ;;  %v7209_v28 = vrot.slane %v15045_v10, %v16923_v38 }
 0x5e5   : > { %9138 = vrot.lane.b32.xlu1 %v14332_v36, %s12208_s18  ;;  %6848 = vmatpush1.msra.mxu0 %v6786_v6  ;;  %v6796_v35 = vmul.f32 %v6766_v20, %v6743_v61  ;;  %v6726_v44 = vpop.permute.xlu1 %6725  ;;  %v15040_v6 = vld [vmem:[%s16713_s6 + $0x78] sm:$0xff] }
 0x5e6   : > { %11424 = vmatmul.mubr.msk.f32.gmra.mxu1 %vm5480_vm2, %v14844_v54  ;;  %6881 = vmatprep.mubr.f32.mxu0 %v16927_v55  ;;  %v14974_v54 = vld [vmem:[%s16713_s6 + $0x68] sm:$0xff]  ;;  %v6741_v50 = vsel %vm6735_vm5, %v6722_v30, %v6726_v44  ;;  %v7245_v29 = vmul.f32 %v7209_v28, %v14338_v2 }
 0x5e7   : > { %9134 = vrot.lane.b32.xlu0 %v14380_v60, %s12208_s18  ;;  %11435 = vmatmul.mubr.msk.f32.vlgmr.msra.gmra.mxu0 %vm5480_vm2, %v14951_v8  ;;  %v6730_v46 = vpop.permute.xlu0 %6729  ;;  %v6797_v53 = vmul.f32 %v6770_v15, %v6741_v50 }
 0x5e8   : > { %6577 = vmatprep.mubr.f32.mxu1 %v16927_v55  ;;  %6887 = vmatprep.mubr.f32.mxu0 %v16927_v55  ;;  %v6739_v59 = vsel %vm6735_vm5, %v6726_v44, %v6730_v46 }
 0x5e9   : > { %9160 = vrot.lane.b32.xlu1 %v14378_v23, %s12208_s18  ;;  %6934 = vmatprep.subr.mxu1 %v6796_v35  ;;  %v6724_v1 = vpop.permute.xlu1 %6723  ;;  %v6798_v24 = vmul.f32 %v6774_v22, %v6739_v59 }
 0x5ea   : > { %11425 = vmatmul.mubr.msk.f32.gmra.mxu1 %vm5480_vm2, %v14864_v57  ;;  %v6737_v57 = vsel %vm6735_vm5, %v6730_v46, %v14870_v32  ;;  %v6740_v20 = vsel %vm6735_vm5, %v14932_v19, %v6724_v1  ;;  %v9627_v19 = vld [vmem:[%s16714_s7 + $0x18] sm:$0xff]  ;;  %v7217_v46 = vrot.slane %v15045_v10, %v16925_v45 }
 0x5eb   : > { %9158 = vrot.lane.b32.xlu0 %v14388_v56, %s12208_s18  ;;  %11436 = vmatmul.mubr.msk.f32.gmra.mxu0 %vm5480_vm2, %v14974_v54  ;;  %v6728_v33 = vpop.permute.xlu0 %6727  ;;  %v6799_v51 = vmul.f32 %v6778_v14, %v6737_v57  ;;  %v6790_v44 = vmul.f32 %v6770_v15, %v6740_v20  ;;  %v7225_v15 = vrot.slane %v15045_v10, %v16930_v17 }
 0x5ec   : > { %6583 = vmatprep.mubr.f32.mxu1 %v16927_v55  ;;  %6893 = vmatprep.mubr.f32.mxu0 %v16927_v55  ;;  %v6738_v5 = vsel %vm6735_vm5, %v6724_v1, %v6728_v33  ;;  %v7247_v1 = vmul.f32 %v7217_v46, %v14368_v3  ;;  %v7240_v2 = vmul.f32 %v7217_v46, %v14355_v62 }
 0x5ed   : > { %9156 = vrot.lane.b32.xlu1 %v14410_v12, %s12208_s18  ;;  %6935 = vmatpush1.msra.mxu1 %v6795_v13  ;;  %v15010_v32 = vpop.permute.xlu1 %7658  ;;  %v6791_v47 = vmul.f32 %v6774_v22, %v6738_v5  ;;  %v7213_v22 = vrot.slane %v15045_v10, %v16924_v0  ;;  %v7205_v62 = vrot.slane %v15045_v10, %v16926_v34 }
 0x5ee   : > { %11426 = vmatmul.mubr.msk.f32.gmra.mxu1 %vm5480_vm2, %v14890_v42  ;;  %6936 = vmatprep.subr.mxu1 %v6789_v25  ;;  %v6736_v42 = vsel %vm6735_vm5, %v6728_v33, %v14916_v18  ;;  %v9626_v18 = vld [vmem:[%s16714_s7 + $0x10] sm:$0xff] }
 0x5ef   : > { %9154 = vrot.lane.b32.xlu0 %v14394_v4, %s12208_s18  ;;  %11437 = vmatmul.mubr.msk.f32.gmra.mxu0 %vm5480_vm2, %v15004_v7  ;;  %v15025_v11 = vpop.permute.xlu0 %7662  ;;  %v6792_v30 = vmul.f32 %v6778_v14, %v6736_v42  ;;  %v7229_v14 = vrot.slane %v15045_v10, %v16928_v27  ;;  %v7246_v13 = vmul.f32 %v7213_v22, %v14366_v21  ;;  %v7650_v25 = vld [vmem:[#allocation2 + $0x77] ss:$8 sm:$0xf0]  ;;  %s12209_s18 = smov [#allocation11]  }
 0x5f0   : > { %6937 = vmatpush1.msra.mxu1 %v6788_v49  ;;  %6970 = vmatprep.mubr.f32.mxu1 %v16927_v55  ;;  %v7239_v3 = vmul.f32 %v7213_v22, %v14353_v16  ;;  %v7690_v5 = vsel %vm7680_vm6, %v15010_v32, %v15025_v11  ;;  %s12102_s21 = sshll.u32 %s12209_s18, 4  ;;  %s12103_s21 = int_to_ptr.vmem [resolvable:$false] %s12102_s21 }
 0x5f1   : > { %9630 = vperm.xlu1 %11962, %v9624_v63   ;;  %7023 = vmatprep.subr.mxu0 %v6798_v24  ;;  %v15034_v39 = vpop.permute.xlu1 %7654  ;;  %v7250_v57 = vmul.f32 %v7229_v14, %v14378_v23  ;;  %v7649_v23 = vld [vmem:[#allocation2 + $0x77] ss:$8 sm:$0xf]  ;;  %v7244_v24 = vmul.f32 %v7205_v62, %v14342_v26  ;;  %v7249_v26 = vmul.f32 %v7225_v15, %v14410_v12  ;;  %s12104_s25 = scalar_lea.vmem %s12103_s21, 32  ;;  %p12105_p2 = scmp.lt.s32.totalorder %s11164_s19, %s12103_s21 }
 0x5f2   : > { %11780 = vmatprep.subr.mxu1 %v6799_v51  ;;  %6899 = vmatprep.mubr.f32.mxu0 %v16927_v55  ;;  %v15118_v50 = vor.u32 %v7650_v25, %v7649_v23  ;;  %v7221_v12 = vrot.slane %v15045_v10, %v16929_v58  ;;  %v7243_v48 = vmul.f32 %v7229_v14, %v14388_v56  ;;  %p12106_p4 = scmp.lt.s32.totalorder %s12104_s25, %s12098_s15 }
 0x5f3   : > { %11439 = vmatmul.mubr.msk.f32.vlgmr.msra.gmra.mxu1 %vm5480_vm2, %v14951_v8  ;;  %7024 = vmatpush1.msra.mxu0 %v6797_v53  ;;  %v15052_v61 = vpop.permute.xlu0 %7656  ;;  %v15161_v53 = vld [vmem:[%s16713_s6 + $0x88] sm:$0xff] }
 0x5f4   : > { %11781 = vmatpush3.msra.mxu1 %v6799_v51  ;;  %9635 = vperm.xlu0 %11963, %v9625_v40   ;;  %v7237_v51 = vmul.f32 %v7205_v62, %v14380_v60  ;;  %v15136_v60 = vld [vmem:[%s16713_s6 + $0x80] sm:$0xff]  ;;  %v7248_v42 = vmul.f32 %v7221_v12, %v14414_v43  ;;  %v7242_v43 = vmul.f32 %v7225_v15, %v14394_v4  ;;  %p12107_p7 = por %p12106_p4, %p12105_p2 }
 0x5f5   : > { %11438 = vmatmul.mubr.msk.f32.gmra.mxu0 %vm5480_vm2, %v15040_v6  ;;  %9640 = vperm.xlu1 %11962, %v9626_v18   ;;  %v15056_v35 = vpop.permute.xlu1 %7660  ;;  %v7241_v18 = vmul.f32 %v7221_v12, %v14399_v41  ;;  %v15196_v41 = vld [vmem:[%s16713_s6 + $0x98] sm:$0xff]  ;;  %v7719_v22 = vrot.slane %v15118_v50, %v16930_v17  ;;  %v15254_v23 = vrot.slane %v15118_v50, %v16928_v27 }
 0x5f6   : > { %6976 = vmatprep.mubr.f32.mxu1 %v16927_v55  ;;  %7025 = vmatprep.subr.mxu0 %v6791_v47  ;;  %p12108_p8 = pnand %p12107_p7, %p12101_p13 }
 0x5f7   : > { %11782 = vmatprep.subr.mxu1 %v6792_v30  ;;  %11440 = vmatmul.mubr.msk.f32.gmra.mxu1 %vm5480_vm2, %v14974_v54  ;;  %v15068_v37 = vpop.permute.xlu0 %7652 }
 0x5f8   : > { %7026 = vmatpush1.msra.mxu0 %v6790_v44  ;;  %7059 = vmatprep.mubr.f32.mxu0 %v16927_v55 }
 0x5f9   : > { %11783 = vmatpush3.msra.mxu1 %v6792_v30  ;;  %9645 = vperm.xlu0 %11963, %v9627_v19   ;;  %v15077_v59 = vpop.permute.xlu1 %7664  ;;  %v15182_v30 = vld [vmem:[%s16713_s6 + $0x90] sm:$0xff]  ;;  %v7699_v19 = vrot.slane %v15118_v50, %v16926_v34 }
 0x5fa   : > { %11443 = vmatmul.mubr.msk.f32.vlgmr.msra.gmra.mxu0 %vm5480_vm2, %v14951_v8  ;;  %7296 = vmatprep.subr.mxu1 %v7245_v29  ;;  %v7689_v29 = vsel %vm7680_vm6, %v15052_v61, %v15056_v35  ;;  %v7687_v62 = vsel %vm7680_vm6, %v15056_v35, %v15077_v59 }
 0x5fb   : > { %7385 = vmatprep.subr.mxu0 %v7247_v1  ;;  %6982 = vmatprep.mubr.f32.mxu1 %v16927_v55  ;;  %v15084_v31 = vpop.permute.xlu0 %7668 }
 0x5fc   : > { %7386 = vmatpush1.msra.mxu0 %v7246_v13  ;;  %11441 = vmatmul.mubr.msk.f32.gmra.mxu1 %vm5480_vm2, %v15004_v7 }
 0x5fd   : > { %7387 = vmatprep.subr.mxu0 %v7240_v2  ;;  %7065 = vmatprep.mubr.f32.mxu0 %v16927_v55  ;;  %v15091_v33 = vpop.permute.xlu1 %7666 }
 0x5fe   : > { %7388 = vmatpush1.msra.mxu0 %v7239_v3  ;;  %6988 = vmatprep.mubr.f32.mxu1 %v16927_v55  ;;  %v7688_v13 = vsel %vm7680_vm6, %v15025_v11, %v15091_v33  ;;  %v7707_v3 = vrot.slane %v15118_v50, %v16924_v0 }
 0x5ff   : > { %11444 = vmatmul.mubr.msk.f32.gmra.mxu0 %vm5480_vm2, %v14974_v54  ;;  %11790 = vmatprep.subr.mxu0 %v7250_v57  ;;  %v15098_v21 = vpop.permute.xlu0 %7670 }
 0x600   : > { %11442 = vmatmul.mubr.msk.f32.gmra.mxu1 %vm5480_vm2, %v15040_v6  ;;  %7071 = vmatprep.mubr.f32.mxu0 %v16927_v55  ;;  %v7686_v47 = vsel %vm7680_vm6, %v15091_v33, %v15098_v21  ;;  %v7740_v25 = vmul.f32 %v7707_v3, %v7688_v13  ;;  %v7733_v35 = vmul.f32 %v7707_v3, %v7687_v62 }
 0x601   : > { %11784 = vmatprep.mubr.msk.f32.mxu1 %vm5480_vm2, %v14951_v8  ;;  %v15105_v16 = vpop.permute.xlu1 %7672  ;;  %v7238_v8 = vmul.f32 %v7209_v28, %v14332_v36  ;;  %v7692_v28 = vsel %vm7680_vm6, %v15034_v39, %v15010_v32  ;;  %v7691_v32 = vsel %vm7680_vm6, %v15068_v37, %v15052_v61 }
 0x602   : > { %v7738_v14 = vmul.f32 %v7699_v19, %v7692_v28  ;;  %v7731_v33 = vmul.f32 %v7699_v19, %v7691_v32 }
 0x603   : > { %11445 = vmatmul.mubr.msk.f32.gmra.mxu0 %vm5480_vm2, %v15004_v7  ;;  %v15112_v49 = vpop.permute.xlu0 %7678 }
 0x604   : > { %7077 = vmatprep.mubr.f32.mxu0 %v16927_v55  ;;  %11785 = vmatmul.mubr.msk.f32.vlgmr.msra.gmra.mxu1 %vm5480_vm2, %v14974_v54  ;;  %v7703_v54 = vrot.slane %v15118_v50, %v16923_v38  ;;  %v7694_v15 = vsel %vm7680_vm6, %v15112_v49, %v15034_v39 }
 0x605   : > { %7297 = vmatpush1.msra.mxu1 %v7244_v24  ;;  %11787 = vmatprep.mubr.msk.f32.mxu1 %vm5480_vm2, %v15004_v7  ;;  %v15123_v63 = vpop.permute.xlu1 %7674 }
 0x606   : > { %7298 = vmatprep.subr.mxu1 %v7238_v8  ;;  %v7739_v40 = vmul.f32 %v7703_v54, %v7690_v5  ;;  %v7682_v2 = vsel %vm7680_vm6, %v15123_v63, %v15112_v49  ;;  %v7732_v61 = vmul.f32 %v7703_v54, %v7689_v29  ;;  %v7744_v54 = vmul.f32 %v15254_v23, %v7694_v15  ;;  %v15285_v5 = vld [vmem:[%s16713_s6 + $0xa0] sm:$0xff] }
 0x607   : > { %11446 = vmatmul.mubr.msk.f32.gmra.mxu0 %vm5480_vm2, %v15040_v6  ;;  %7299 = vmatpush1.msra.mxu1 %v7237_v51  ;;  %v15129_v36 = vpop.permute.xlu0 %7676  ;;  %v7743_v24 = vmul.f32 %v7719_v22, %v7682_v2  ;;  %v7684_v39 = vsel %vm7680_vm6, %v15098_v21, %v15123_v63  ;;  %v7715_v49 = vrot.slane %v15118_v50, %v16929_v58 }
 0x608   : > { %7474 = vmatprep.subr.mxu1 %v7249_v26  ;;  %11788 = vmatmul.mubr.msk.f32.gmra.mxu1 %vm5480_vm2, %v15040_v6  ;;  %v7711_v6 = vrot.slane %v15118_v50, %v16925_v45  ;;  %v8144_v26 = vld [vmem:[#allocation2 + $0xa8] ss:$8 sm:$0xf0]  ;;  %v7683_v50 = vsel %vm7680_vm6, %v15084_v31, %v15105_v16  ;;  %v7693_v19 = vsel %vm7680_vm6, %v15129_v36, %v15068_v37 }
 0x609   : > { %7421 = vmatprep.mubr.f32.mxu0 %v16927_v55  ;;  %7332 = vmatprep.mubr.f32.mxu1 %v16927_v55  ;;  %v15144_v7 = vpop.permute.xlu1 %8156  ;;  %v15354_v37 = vld [vmem:[%s16713_s6 + $0xb8] sm:$0xff] }
 0x60a   : > { %v7741_v20 = vmul.f32 %v7711_v6, %v7686_v47  ;;  %v15314_v47 = vld [vmem:[%s16713_s6 + $0xa8] sm:$0xff] }
 0x60b   : > { %11459 = vmatmul.mubr.msk.f32.vlgmr.msra.gmra.mxu0 %vm5480_vm2, %v15136_v60  ;;  %v15153_v9 = vpop.permute.xlu0 %8152 }
 0x60c   : > { %11791 = vmatpush3.msra.mxu0 %v7250_v57  ;;  %11455 = vmatmul.mubr.msk.f32.vlgmr.msra.gmra.mxu1 %vm5480_vm2, %v15136_v60  ;;  %v7685_v57 = vsel %vm7680_vm6, %v15077_v59, %v15084_v31  ;;  %v8143_v59 = vld [vmem:[#allocation2 + $0xa8] ss:$8 sm:$0xf] }
 0x60d   : > { %11792 = vmatprep.subr.mxu0 %v7243_v48  ;;  %7427 = vmatprep.mubr.f32.mxu0 %v16927_v55  ;;  %v15168_v56 = vpop.permute.xlu1 %8158  ;;  %v7734_v51 = vmul.f32 %v7711_v6, %v7685_v57  ;;  %v15293_v63 = vor.u32 %v8144_v26, %v8143_v59  ;;  %v8637_v26 = vld [vmem:[#allocation2 + $0xa9] ss:$8 sm:$0xf] }
 0x60e   : > { %11793 = vmatpush3.msra.mxu0 %v7243_v48  ;;  %7475 = vmatpush1.msra.mxu1 %v7248_v42  ;;  %v7742_v48 = vmul.f32 %v7715_v49, %v7684_v39 }
 0x60f   : > { %7790 = vmatprep.subr.mxu0 %v7739_v40  ;;  %11460 = vmatmul.mubr.msk.f32.gmra.mxu0 %vm5480_vm2, %v15161_v53  ;;  %v15176_v10 = vpop.permute.xlu0 %8162  ;;  %v8197_v28 = vrot.slane %v15293_v63, %v16923_v38  ;;  %v8201_v32 = vrot.slane %v15293_v63, %v16924_v0 }
 0x610   : > { %7476 = vmatprep.subr.mxu1 %v7242_v43  ;;  %7338 = vmatprep.mubr.f32.mxu1 %v16927_v55  ;;  %v8179_v2 = vsel %vm8174_vm7, %v15168_v56, %v15176_v10 }
 0x611   : > { %7477 = vmatpush1.msra.mxu1 %v7241_v18  ;;  %7433 = vmatprep.mubr.f32.mxu0 %v16927_v55  ;;  %v15185_v4 = vpop.permute.xlu1 %8148 }
 0x612   : > { %7879 = vmatprep.subr.mxu1 %v7741_v20  ;;  %11456 = vmatmul.mubr.msk.f32.gmra.mxu1 %vm5480_vm2, %v15161_v53  ;;  %v15329_v20 = vld [vmem:[%s16713_s6 + $0xb0] sm:$0xff] }
 0x613   : > { %11461 = vmatmul.mubr.msk.f32.gmra.mxu0 %vm5480_vm2, %v15182_v30  ;;  %7344 = vmatprep.mubr.f32.mxu1 %v16927_v55 }
 0x614   : > { %7439 = vmatprep.mubr.f32.mxu0 %v16927_v55  ;;  %v15198_v44 = vpop.permute.xlu0 %8164 }
 0x616   : > { %11457 = vmatmul.mubr.msk.f32.gmra.mxu1 %vm5480_vm2, %v15182_v30 }
 0x617   : > { %11462 = vmatmul.mubr.msk.f32.gmra.mxu0 %vm5480_vm2, %v15196_v41  ;;  %7350 = vmatprep.mubr.f32.mxu1 %v16927_v55  ;;  %v15211_v46 = vpop.permute.xlu1 %8160 }
 0x618   : > { %11794 = vmatprep.mubr.msk.f32.mxu0 %vm5480_vm2, %v15136_v60  ;;  %v8180_v42 = vsel %vm8174_vm7, %v15211_v46, %v15198_v44 }
 0x619   : > { %v15225_v1 = vpop.permute.xlu0 %8154 }
 0x61a   : > { %11458 = vmatmul.mubr.msk.f32.gmra.mxu1 %vm5480_vm2, %v15196_v41 }
 0x61b   : > { %11795 = vmatmul.mubr.msk.f32.vlgmr.msra.gmra.mxu0 %vm5480_vm2, %v15161_v53  ;;  %7510 = vmatprep.mubr.f32.mxu1 %v16927_v55  ;;  %v15246_v11 = vpop.permute.xlu1 %8150 }
 0x61c   : > { %7791 = vmatpush1.msra.mxu0 %v7738_v14  ;;  %11797 = vmatprep.mubr.msk.f32.mxu0 %vm5480_vm2, %v15182_v30  ;;  %v8182_v14 = vsel %vm8174_vm7, %v15144_v7, %v15211_v46  ;;  %v15383_v46 = vrot.slane %v15293_v63, %v16928_v27  ;;  %v8183_v59 = vsel %vm8174_vm7, %v15246_v11, %v15225_v1 }
 0x61d   : > { %7792 = vmatprep.subr.mxu0 %v7732_v61  ;;  %v15262_v8 = vpop.permute.xlu0 %8146  ;;  %v8234_v3 = vmul.f32 %v8201_v32, %v8182_v14  ;;  %v15526_v14 = vld [vmem:[%s16713_s6 + $0xd8] sm:$0xff] }
 0x61e   : > { %7793 = vmatpush1.msra.mxu0 %v7731_v33  ;;  %11463 = vmatmul.mubr.msk.f32.vlgmr.msra.gmra.mxu1 %vm5480_vm2, %v15136_v60  ;;  %v7681_v60 = vsel %vm7680_vm6, %v15105_v16, %v15129_v36  ;;  %v8205_v16 = vrot.slane %v15293_v63, %v16925_v45  ;;  %v7737_v36 = vmul.f32 %v15254_v23, %v7693_v19  ;;  %v15494_v19 = vld [vmem:[%s16713_s6 + $0xc8] sm:$0xff] }
 0x61f   : > { %7880 = vmatpush1.msra.mxu1 %v7740_v25  ;;  %7968 = vmatprep.subr.mxu0 %v7743_v24  ;;  %v15266_v12 = vpop.permute.xlu1 %8172  ;;  %v7736_v31 = vmul.f32 %v7719_v22, %v7681_v60  ;;  %v8193_v24 = vrot.slane %v15293_v63, %v16926_v34  ;;  %v8185_v39 = vsel %vm8174_vm7, %v15262_v8, %v15246_v11 }
 0x620   : > { %11798 = vmatmul.mubr.msk.f32.gmra.mxu0 %vm5480_vm2, %v15196_v41  ;;  %7881 = vmatprep.subr.mxu1 %v7734_v51  ;;  %v8235_v43 = vmul.f32 %v8205_v16, %v8180_v42  ;;  %v8188_v57 = vsel %vm8174_vm7, %v15266_v12, %v15185_v4  ;;  %v8228_v33 = vmul.f32 %v8205_v16, %v8179_v2  ;;  %v15458_v42 = vld [vmem:[%s16713_s6 + $0xc0] sm:$0xff] }
 0x621   : > { %7882 = vmatpush1.msra.mxu1 %v7733_v35  ;;  %7516 = vmatprep.mubr.f32.mxu1 %v16927_v55  ;;  %v15287_v21 = vpop.permute.xlu0 %8166  ;;  %v8238_v25 = vmul.f32 %v15383_v46, %v8188_v57  ;;  %v8186_v35 = vsel %vm8174_vm7, %v15185_v4, %v15153_v9  ;;  %v8226_v60 = vmul.f32 %v8197_v28, %v8183_v59 }
 0x622   : > { %11800 = vmatprep.subr.mxu1 %v7744_v54  ;;  %11464 = vmatmul.mubr.msk.f32.gmra.mxu1 %vm5480_vm2, %v15161_v53  ;;  %v7735_v53 = vmul.f32 %v7715_v49, %v7683_v50  ;;  %v8225_v50 = vmul.f32 %v8193_v24, %v8185_v39 }
 0x623   : > { %7826 = vmatprep.mubr.f32.mxu0 %v16927_v55  ;;  %7522 = vmatprep.mubr.f32.mxu1 %v16927_v55  ;;  %v15304_v40 = vpop.permute.xlu1 %8170 }
 0x624   : > { %11475 = vmatmul.mubr.msk.f32.vlgmr.msra.gmra.mxu0 %vm5480_vm2, %v15285_v5 }
 0x625   : > { %7969 = vmatpush1.msra.mxu0 %v7742_v48  ;;  %7832 = vmatprep.mubr.f32.mxu0 %v16927_v55  ;;  %v15316_v6 = vpop.permute.xlu0 %8650  ;;  %v8187_v48 = vsel %vm8174_vm7, %v15304_v40, %v15262_v8  ;;  %v8209_v8 = vrot.slane %v15293_v63, %v16929_v58 }
 0x626   : > { %7970 = vmatprep.subr.mxu0 %v7736_v31  ;;  %11465 = vmatmul.mubr.msk.f32.gmra.mxu1 %vm5480_vm2, %v15182_v30 }
 0x627   : > { %7971 = vmatpush1.msra.mxu0 %v7735_v53  ;;  %7528 = vmatprep.mubr.f32.mxu1 %v16927_v55  ;;  %v15321_v18 = vpop.permute.xlu1 %8646 }
 0x628   : > { %8373 = vmatprep.subr.mxu0 %v8235_v43  ;;  %11476 = vmatmul.mubr.msk.f32.gmra.mxu0 %vm5480_vm2, %v15314_v47 }
 0x629   : > { %7838 = vmatprep.mubr.f32.mxu0 %v16927_v55 }
 0x62a   : > { %11466 = vmatmul.mubr.msk.f32.gmra.mxu1 %vm5480_vm2, %v15196_v41  ;;  %v15333_v30 = vpop.permute.xlu0 %8168  ;;  %v8184_v41 = vsel %vm8174_vm7, %v15153_v9, %v15144_v7  ;;  %v8181_v7 = vsel %vm8174_vm7, %v15225_v1, %v15168_v56  ;;  %v8232_v9 = vmul.f32 %v8193_v24, %v8186_v35 }
 0x62b   : > { %7915 = vmatprep.mubr.f32.mxu1 %v16927_v55  ;;  %v8233_v22 = vmul.f32 %v8197_v28, %v8184_v41  ;;  %v8227_v62 = vmul.f32 %v8201_v32, %v8181_v7  ;;  %v8176_v4 = vsel %vm8174_vm7, %v15333_v30, %v15266_v12  ;;  %v8178_v53 = vsel %vm8174_vm7, %v15198_v44, %v15333_v30 }
 0x62c   : > { %11477 = vmatmul.mubr.msk.f32.gmra.mxu0 %vm5480_vm2, %v15329_v20  ;;  %v15344_v29 = vpop.permute.xlu1 %8642  ;;  %v8175_v44 = vsel %vm8174_vm7, %v15287_v21, %v15304_v40  ;;  %v8236_v30 = vmul.f32 %v8209_v8, %v8178_v53 }
 0x62d   : > { %7844 = vmatprep.mubr.f32.mxu0 %v16927_v55 }
 0x62e   : > { %11479 = vmatmul.mubr.msk.f32.vlgmr.msra.gmra.mxu1 %vm5480_vm2, %v15285_v5 }
 0x62f   : > { %11801 = vmatpush3.msra.mxu1 %v7744_v54  ;;  %7921 = vmatprep.mubr.f32.mxu1 %v16927_v55  ;;  %v8638_v54 = vld [vmem:[#allocation2 + $0xa9] ss:$8 sm:$0xf0] }
 0x630   : > { %11478 = vmatmul.mubr.msk.f32.gmra.mxu0 %vm5480_vm2, %v15354_v37  ;;  %11802 = vmatprep.subr.mxu1 %v7737_v36  ;;  %v15368_v13 = vpop.permute.xlu0 %8644  ;;  %v15441_v11 = vor.u32 %v8638_v54, %v8637_v26 }
 0x631   : > { %11803 = vmatpush3.msra.mxu1 %v7737_v36  ;;  %8004 = vmatprep.mubr.f32.mxu0 %v16927_v55  ;;  %v15375_v61 = vpop.permute.xlu1 %8648 }
 0x632   : > { %8284 = vmatprep.subr.mxu1 %v8233_v22  ;;  %11480 = vmatmul.mubr.msk.f32.gmra.mxu1 %vm5480_vm2, %v15314_v47  ;;  %v8691_v16 = vrot.slane %v15441_v11, %v16923_v38  ;;  %v15514_v22 = vld [vmem:[%s16713_s6 + $0xd0] sm:$0xff]  ;;  %v8687_v7 = vrot.slane %v15441_v11, %v16926_v34  ;;  %v8695_v54 = vrot.slane %v15441_v11, %v16924_v0 }
 0x633   : > { %7927 = vmatprep.mubr.f32.mxu1 %v16927_v55 }
 0x634   : > { %11483 = vmatmul.mubr.msk.f32.vlgmr.msra.gmra.mxu0 %vm5480_vm2, %v15285_v5  ;;  %v15394_v56 = vpop.permute.xlu0 %8640 }
 0x635   : > { %8374 = vmatpush1.msra.mxu0 %v8234_v3  ;;  %8010 = vmatprep.mubr.f32.mxu0 %v16927_v55  ;;  %v15397_v23 = vpop.permute.xlu1 %8652  ;;  %v8680_v3 = vsel %vm8668_vm8, %v15344_v29, %v15321_v18 }
 0x636   : > { %8375 = vmatprep.subr.mxu0 %v8228_v33  ;;  %11481 = vmatmul.mubr.msk.f32.gmra.mxu1 %vm5480_vm2, %v15329_v20  ;;  %v8677_v33 = vsel %vm8668_vm8, %v15368_v13, %v15375_v61  ;;  %v8726_v24 = vmul.f32 %v8687_v7, %v8680_v3  ;;  %v15661_v3 = vld [vmem:[%s16713_s6 + $0xe8] sm:$0xff] }
 0x637   : > { %8376 = vmatpush1.msra.mxu0 %v8227_v62  ;;  %7933 = vmatprep.mubr.f32.mxu1 %v16927_v55  ;;  %v8707_v62 = vrot.slane %v15441_v11, %v16930_v17  ;;  %v8720_v26 = vmul.f32 %v8691_v16, %v8677_v33 }
 0x638   : > { %11810 = vmatprep.subr.mxu0 %v8238_v25  ;;  %11484 = vmatmul.mubr.msk.f32.gmra.mxu0 %vm5480_vm2, %v15314_v47  ;;  %v15405_v15 = vpop.permute.xlu0 %8656 }
 0x639   : > { %8016 = vmatprep.mubr.f32.mxu0 %v16927_v55  ;;  %v15410_v51 = vpop.permute.xlu1 %8654  ;;  %v8673_v39 = vsel %vm8668_vm8, %v15397_v23, %v15405_v15 }
 0x63a   : > { %11482 = vmatmul.mubr.msk.f32.gmra.mxu1 %vm5480_vm2, %v15354_v37  ;;  %v8676_v35 = vsel %vm8668_vm8, %v15316_v6, %v15410_v51 }
 0x63b   : > { %11804 = vmatprep.mubr.msk.f32.mxu1 %vm5480_vm2, %v15285_v5  ;;  %v8213_v5 = vrot.slane %v15293_v63, %v16930_v17  ;;  %v8177_v63 = vsel %vm8174_vm7, %v15176_v10, %v15287_v21  ;;  %v8699_v21 = vrot.slane %v15441_v11, %v16925_v45 }
 0x63c   : > { %11485 = vmatmul.mubr.msk.f32.gmra.mxu0 %vm5480_vm2, %v15329_v20  ;;  %v15435_v1 = vpop.permute.xlu0 %8658 }
 0x63d   : > { %8022 = vmatprep.mubr.f32.mxu0 %v16927_v55  ;;  %v15437_v49 = vpop.permute.xlu1 %8660  ;;  %v8237_v12 = vmul.f32 %v8213_v5, %v8176_v4  ;;  %v8674_v28 = vsel %vm8668_vm8, %v15410_v51, %v15435_v1  ;;  %v8230_v10 = vmul.f32 %v8213_v5, %v8175_v44  ;;  %v8675_v4 = vsel %vm8668_vm8, %v15375_v61, %v15397_v23 }
 0x63e   : > { %11805 = vmatmul.mubr.msk.f32.vlgmr.msra.gmra.mxu1 %vm5480_vm2, %v15314_v47  ;;  %v8678_v47 = vsel %vm8668_vm8, %v15321_v18, %v15316_v6  ;;  %v8729_v36 = vmul.f32 %v8699_v21, %v8674_v28  ;;  %v8679_v18 = vsel %vm8668_vm8, %v15394_v56, %v15368_v13  ;;  %v8722_v23 = vmul.f32 %v8699_v21, %v8673_v39 }
 0x63f   : > { %8285 = vmatpush1.msra.mxu1 %v8232_v9  ;;  %11807 = vmatprep.mubr.msk.f32.mxu1 %vm5480_vm2, %v15329_v20  ;;  %v8231_v20 = vmul.f32 %v15383_v46, %v8187_v48  ;;  %v8727_v40 = vmul.f32 %v8691_v16, %v8678_v47  ;;  %v8719_v9 = vmul.f32 %v8687_v7, %v8679_v18  ;;  %v9132_v47 = vld [vmem:[#allocation2 + $0xaa] ss:$8 sm:$0xf0] }
 0x640   : > { %11486 = vmatmul.mubr.msk.f32.gmra.mxu0 %vm5480_vm2, %v15354_v37  ;;  %8286 = vmatprep.subr.mxu1 %v8226_v60  ;;  %v15476_v43 = vpop.permute.xlu0 %8666  ;;  %v15590_v60 = vrot.slane %v15441_v11, %v16928_v27  ;;  %v8721_v53 = vmul.f32 %v8695_v54, %v8675_v4 }
 0x641   : > { %8287 = vmatpush1.msra.mxu1 %v8225_v50  ;;  %8409 = vmatprep.mubr.f32.mxu0 %v16927_v55  ;;  %v15460_v31 = vpop.permute.xlu1 %8662  ;;  %v8728_v50 = vmul.f32 %v8695_v54, %v8676_v35  ;;  %v15680_v35 = vld [vmem:[%s16713_s6 + $0xf0] sm:$0xff] }
 0x642   : > { %8462 = vmatprep.subr.mxu1 %v8237_v12  ;;  %11808 = vmatmul.mubr.msk.f32.gmra.mxu1 %vm5480_vm2, %v15354_v37  ;;  %v8229_v37 = vmul.f32 %v8209_v8, %v8177_v63  ;;  %v8670_v59 = vsel %vm8668_vm8, %v15460_v31, %v15476_v43  ;;  %v8682_v12 = vsel %vm8668_vm8, %v15476_v43, %v15344_v29  ;;  %v9131_v8 = vld [vmem:[#allocation2 + $0xaa] ss:$8 sm:$0xf] }
 0x643   : > { %8320 = vmatprep.mubr.f32.mxu1 %v16927_v55  ;;  %v8731_v48 = vmul.f32 %v8707_v62, %v8670_v59  ;;  %v8732_v29 = vmul.f32 %v15590_v60, %v8682_v12  ;;  %v8672_v43 = vsel %vm8668_vm8, %v15435_v1, %v15460_v31  ;;  %v8703_v63 = vrot.slane %v15441_v11, %v16929_v58  ;;  %v15627_v1 = vld [vmem:[%s16713_s6 + $0xe0] sm:$0xff] }
 0x644   : > { %11499 = vmatmul.mubr.msk.f32.vlgmr.msra.gmra.mxu0 %vm5480_vm2, %v15458_v42  ;;  %v15508_v32 = vpop.permute.xlu0 %8664  ;;  %v8671_v11 = vsel %vm8668_vm8, %v15405_v15, %v15437_v49  ;;  %v15637_v28 = vor.u32 %v9132_v47, %v9131_v8 }
 0x645   : > { %11811 = vmatpush3.msra.mxu0 %v8238_v25  ;;  %8415 = vmatprep.mubr.f32.mxu0 %v16927_v55  ;;  %v15504_v41 = vpop.permute.xlu1 %9144  ;;  %v8730_v21 = vmul.f32 %v8703_v63, %v8672_v43 }
 0x646   : > { %11812 = vmatprep.subr.mxu0 %v8231_v20  ;;  %11495 = vmatmul.mubr.msk.f32.vlgmr.msra.gmra.mxu1 %vm5480_vm2, %v15458_v42  ;;  %v9193_v7 = vrot.slane %v15637_v28, %v16925_v45  ;;  %v15695_v54 = vrot.slane %v15637_v28, %v16923_v38  ;;  %v9189_v4 = vrot.slane %v15637_v28, %v16924_v0 }
 0x647   : > { %11813 = vmatpush3.msra.mxu0 %v8231_v20  ;;  %8463 = vmatpush1.msra.mxu1 %v8236_v30  ;;  %v8669_v30 = vsel %vm8668_vm8, %v15437_v49, %v15508_v32  ;;  %v15741_v8 = vrot.slane %v15637_v28, %v16928_v27 }
 0x648   : > { %8778 = vmatprep.subr.mxu0 %v8727_v40  ;;  %11500 = vmatmul.mubr.msk.f32.gmra.mxu0 %vm5480_vm2, %v15494_v19  ;;  %v15532_v46 = vpop.permute.xlu0 %9140 }
 0x649   : > { %8464 = vmatprep.subr.mxu1 %v8230_v10  ;;  %8326 = vmatprep.mubr.f32.mxu1 %v16927_v55  ;;  %v15528_v2 = vpop.permute.xlu1 %9146 }
 0x64a   : > { %8465 = vmatpush1.msra.mxu1 %v8229_v37  ;;  %8421 = vmatprep.mubr.f32.mxu0 %v16927_v55 }
 0x64b   : > { %8867 = vmatprep.subr.mxu1 %v8729_v36  ;;  %11496 = vmatmul.mubr.msk.f32.gmra.mxu1 %vm5480_vm2, %v15494_v19  ;;  %v8724_v36 = vmul.f32 %v8707_v62, %v8669_v30 }
 0x64c   : > { %11501 = vmatmul.mubr.msk.f32.gmra.mxu0 %vm5480_vm2, %v15514_v22  ;;  %8332 = vmatprep.mubr.f32.mxu1 %v16927_v55  ;;  %v15592_v5 = vpop.permute.xlu0 %9150 }
 0x64d   : > { %8427 = vmatprep.mubr.f32.mxu0 %v16927_v55  ;;  %v15569_v13 = vpop.permute.xlu1 %9136  ;;  %v9167_v0 = vsel %vm9162_vm9, %v15528_v2, %v15592_v5 }
 0x64f   : > { %11497 = vmatmul.mubr.msk.f32.gmra.mxu1 %vm5480_vm2, %v15514_v22 }
 0x650   : > { %11502 = vmatmul.mubr.msk.f32.gmra.mxu0 %vm5480_vm2, %v15526_v14  ;;  %8338 = vmatprep.mubr.f32.mxu1 %v16927_v55  ;;  %v15543_v57 = vpop.f32.mrf.mxu0  ;;  %v15640_v10 = vpop.permute.xlu0 %9152 }
 0x651   : > { %11814 = vmatprep.mubr.msk.f32.mxu0 %vm5480_vm2, %v15458_v42 }
 0x652   : > { %v15557_v25 = vpop.f32.mrf.mxu0 }
 0x653   : > { %11498 = vmatmul.mubr.msk.f32.gmra.mxu1 %vm5480_vm2, %v15526_v14 }
 0x654   : > { %11815 = vmatmul.mubr.msk.f32.vlgmr.msra.gmra.mxu0 %vm5480_vm2, %v15494_v19  ;;  %8498 = vmatprep.mubr.f32.mxu1 %v16927_v55  ;;  %v15580_v6 = vpop.f32.mrf.mxu1  ;;  %v15582_v51 = vpop.f32.mrf.mxu0 }
 0x655   : > { %8779 = vmatpush1.msra.mxu0 %v8726_v24  ;;  %11817 = vmatprep.mubr.msk.f32.mxu0 %vm5480_vm2, %v15514_v22 }
 0x656   : > { %8780 = vmatprep.subr.mxu0 %v8720_v26  ;;  %v15600_v16 = vpop.f32.mrf.mxu1  ;;  %v15602_v61 = vpop.f32.mrf.mxu0  ;;  %v8681_v26 = vsel %vm8668_vm8, %v15508_v32, %v15394_v56  ;;  %v15709_v56 = vld [vmem:[%s16713_s6 + $0xf8] sm:$0xff] }
 0x657   : > { %8781 = vmatpush1.msra.mxu0 %v8719_v9  ;;  %11503 = vmatmul.mubr.msk.f32.vlgmr.msra.gmra.mxu1 %vm5480_vm2, %v15458_v42  ;;  %v9149_v42 = vpop.permute.xlu1 %9148  ;;  %v9143_v9 = vpop.permute.xlu0 %9142  ;;  %v8725_v38 = vmul.f32 %v15590_v60, %v8681_v26 }
 0x658   : > { %8868 = vmatpush1.msra.mxu1 %v8728_v50  ;;  %8956 = vmatprep.subr.mxu0 %v8731_v48  ;;  %v15606_v44 = vpop.f32.mrf.mxu1  ;;  %v15608_v20 = vpop.f32.mrf.mxu0  ;;  %v9168_v37 = vsel %vm9162_vm9, %v9149_v42, %v15640_v10  ;;  %v9170_v48 = vsel %vm9162_vm9, %v15504_v41, %v9149_v42 }
 0x659   : > { %11818 = vmatmul.mubr.msk.f32.gmra.mxu0 %vm5480_vm2, %v15526_v14  ;;  %8869 = vmatprep.subr.mxu1 %v8722_v23  ;;  %v9223_v18 = vmul.f32 %v9193_v7, %v9168_v37 }
 0x65a   : > { %8870 = vmatpush1.msra.mxu1 %v8721_v53  ;;  %8504 = vmatprep.mubr.f32.mxu1 %v16927_v55  ;;  %v15629_v31 = vpop.f32.mrf.mxu1  ;;  %v15631_v40 = vpop.f32.mrf.mxu0 }
 0x65b   : > { %16931 = vst [vmem:[#allocation33_spill] sm:$0xff] %v15629_v31  ;;  %16932 = vst [vmem:[#allocation35_spill] sm:$0xff] %v15631_v40  ;;  %11820 = vmatprep.subr.mxu1 %v8732_v29  ;;  %11504 = vmatmul.mubr.msk.f32.gmra.mxu1 %vm5480_vm2, %v15494_v19  ;;  %v8723_v19 = vmul.f32 %v8703_v63, %v8671_v11  ;;  %v15674_v24 = vpop.permute.xlu1 %9138  ;;  %v9135_v43 = vpop.permute.xlu0 %9134 }
 0x65c   : > { %8814 = vmatprep.mubr.f32.mxu0 %v16927_v55  ;;  %8510 = vmatprep.mubr.f32.mxu1 %v16927_v55  ;;  %v15649_v15 = vpop.f32.mrf.mxu1  ;;  %v15651_v49 = vpop.f32.mrf.mxu0 }
 0x65d   : > { %11515 = vmatmul.mubr.msk.f32.vlgmr.msra.gmra.mxu0 %vm5480_vm2, %v15627_v1 }
 0x65e   : > { %8957 = vmatpush1.msra.mxu0 %v8730_v21  ;;  %8820 = vmatprep.mubr.f32.mxu0 %v16927_v55  ;;  %v15663_v33 = vpop.f32.mrf.mxu1  ;;  %v15667_v45 = vpop.f32.mrf.mxu0 }
 0x65f   : > { %16933 = vst [vmem:[#allocation47_spill] sm:$0xff] %v15663_v33  ;;  %8958 = vmatprep.subr.mxu0 %v8724_v36  ;;  %11505 = vmatmul.mubr.msk.f32.gmra.mxu1 %vm5480_vm2, %v15514_v22  ;;  %v9161_v60 = vpop.permute.xlu1 %9160  ;;  %v9159_v26 = vpop.permute.xlu0 %9158 }
 0x660   : > { %8959 = vmatpush1.msra.mxu0 %v8723_v19  ;;  %8516 = vmatprep.mubr.f32.mxu1 %v16927_v55  ;;  %v15670_v62 = vpop.f32.mrf.mxu1  ;;  %v9176_v42 = vsel %vm9162_vm9, %v9161_v60, %v15569_v13 }
 0x661   : > { %9361 = vmatprep.subr.mxu0 %v9223_v18  ;;  %11516 = vmatmul.mubr.msk.f32.gmra.mxu0 %vm5480_vm2, %v15661_v3  ;;  %v9226_v37 = vmul.f32 %v15741_v8, %v9176_v42  ;;  %v9181_v18 = vrot.slane %v15637_v28, %v16926_v34  ;;  %v9171_v34 = vsel %vm9162_vm9, %v15674_v24, %v9143_v9 }
 0x662   : > { %8826 = vmatprep.mubr.f32.mxu0 %v16927_v55  ;;  %v15686_v59 = vpop.f32.mrf.mxu1 }
 0x663   : > { %11506 = vmatmul.mubr.msk.f32.gmra.mxu1 %vm5480_vm2, %v15526_v14  ;;  %v15684_v22 = vpop.f32.mrf.mxu0  ;;  %v9172_v14 = vsel %vm9162_vm9, %v15532_v46, %v15504_v41  ;;  %v9169_v41 = vsel %vm9162_vm9, %v9143_v9, %v15528_v2  ;;  %v9216_v2 = vmul.f32 %v9193_v7, %v9167_v0  ;;  %v9155_v42 = vpop.permute.xlu0 %9154 }
 0x664   : > { %8903 = vmatprep.mubr.f32.mxu1 %v16927_v55  ;;  %v9221_v12 = vmul.f32 %v15695_v54, %v9172_v14  ;;  %v9215_v11 = vmul.f32 %v9189_v4, %v9169_v41 }
 0x665   : > { %11517 = vmatmul.mubr.msk.f32.gmra.mxu0 %vm5480_vm2, %v15680_v35  ;;  %v15699_v39 = vpop.f32.mrf.mxu0 }
 0x666   : > { %8832 = vmatprep.mubr.f32.mxu0 %v16927_v55 }
 0x667   : > { %11519 = vmatmul.mubr.msk.f32.vlgmr.msra.gmra.mxu1 %vm5480_vm2, %v15627_v1  ;;  %v15714_v32 = vpop.f32.mrf.mxu1 }
 0x668   : > { %11821 = vmatpush3.msra.mxu1 %v8732_v29  ;;  %8909 = vmatprep.mubr.f32.mxu1 %v16927_v55  ;;  %v15719_v50 = vpop.f32.mrf.mxu0  ;;  %v9222_v29 = vmul.f32 %v9189_v4, %v9170_v48  ;;  %v9157_v4 = vpop.permute.xlu1 %9156  ;;  %v9173_v48 = vsel %vm9162_vm9, %v9135_v43, %v15674_v24  ;;  %v9214_v24 = vmul.f32 %v15695_v54, %v9171_v34 }
 0x669   : > { %11518 = vmatmul.mubr.msk.f32.gmra.mxu0 %vm5480_vm2, %v15709_v56  ;;  %11822 = vmatprep.subr.mxu1 %v8725_v38  ;;  %v15727_v23 = vpop.f32.mrf.mxu1 }
 0x66a   : > { %11823 = vmatpush3.msra.mxu1 %v8725_v38  ;;  %8992 = vmatprep.mubr.f32.mxu0 %v16927_v55  ;;  %v15734_v53 = vpop.f32.mrf.mxu0  ;;  %v9174_v38 = vsel %vm9162_vm9, %v15569_v13, %v15532_v46  ;;  %v9201_v46 = vrot.slane %v15637_v28, %v16930_v17 }
 0x66b   : > { %9272 = vmatprep.subr.mxu1 %v9221_v12  ;;  %11520 = vmatmul.mubr.msk.f32.gmra.mxu1 %vm5480_vm2, %v15661_v3  ;;  %v15745_v47 = vpop.f32.mrf.mxu1  ;;  %v9220_v9 = vmul.f32 %v9181_v18, %v9174_v38 }
 0x66c   : > { %8915 = vmatprep.mubr.f32.mxu1 %v16927_v55  ;;  %v5923_v63 = vpop.f32.mrf.mxu0 }
 0x66d   : > { %11523 = vmatmul.mubr.msk.f32.vlgmr.msra.gmra.mxu0 %vm5480_vm2, %v15627_v1  ;;  %v15754_v27 = vadd.f32 %v5923_v63, %v15580_v6  ;;  %v15756_v30 = vpop.f32.mrf.mxu1 }
 0x66e   : > { %9362 = vmatpush1.msra.mxu0 %v9222_v29  ;;  %8998 = vmatprep.mubr.f32.mxu0 %v16927_v55  ;;  %v15759_v21 = vpop.f32.mrf.mxu0  ;;  %v9213_v29 = vmul.f32 %v9181_v18, %v9173_v48  ;;  %v15857_v18 = vld [vmem:[%s16713_s6 + $0x108] sm:$0xff] }
 0x66f   : > { %9363 = vmatprep.subr.mxu0 %v9216_v2  ;;  %11521 = vmatmul.mubr.msk.f32.gmra.mxu1 %vm5480_vm2, %v15680_v35  ;;  %v15764_v36 = vpop.f32.mrf.mxu1  ;;  %v9197_v2 = vrot.slane %v15637_v28, %v16929_v58  ;;  %v9163_v28 = vsel %vm9162_vm9, %v9155_v42, %v9159_v26 }
 0x670   : > { %9364 = vmatpush1.msra.mxu0 %v9215_v11  ;;  %8921 = vmatprep.mubr.f32.mxu1 %v16927_v55  ;;  %v5929_v6 = vpop.f32.mrf.mxu0  ;;  %v9166_v11 = vsel %vm9162_vm9, %v15640_v10, %v9157_v4 }
 0x671   : > { %11830 = vmatprep.subr.mxu0 %v9226_v37  ;;  %11524 = vmatmul.mubr.msk.f32.gmra.mxu0 %vm5480_vm2, %v15661_v3  ;;  %v15770_v7 = vadd.f32 %v5929_v6, %v15606_v44  ;;  %v15772_v19 = vpop.f32.mrf.mxu1 }
 0x672   : > { %9004 = vmatprep.mubr.f32.mxu0 %v16927_v55  ;;  %v15777_v14 = vpop.f32.mrf.mxu0 }
 0x673   : > { %16934 = vst [vmem:[#allocation50_spill] sm:$0xff] %v15777_v14  ;;  %11522 = vmatmul.mubr.msk.f32.gmra.mxu1 %vm5480_vm2, %v15709_v56  ;;  %v15785_v44 = vpop.f32.mrf.mxu1 }
 0x674   : > { %11824 = vmatprep.mubr.msk.f32.mxu1 %vm5480_vm2, %v15627_v1  ;;  %v5935_v12 = vpop.f32.mrf.mxu0  ;;  %v9164_v1 = vsel %vm9162_vm9, %v9157_v4, %v9161_v60  ;;  %v15874_v4 = vld [vmem:[%s16713_s6 + $0x110] sm:$0xff] }
 0x675   : > { %11525 = vmatmul.mubr.msk.f32.gmra.mxu0 %vm5480_vm2, %v15680_v35  ;;  %v15800_v13 = vadd.f32 %v5935_v12, %v15649_v15  ;;  %v15802_v0 = vpop.f32.mrf.mxu1  ;;  %v9225_v60 = vmul.f32 %v9201_v46, %v9164_v1  ;;  %v15896_v1 = vld [vmem:[%s16713_s6 + $0x118] sm:$0xff] }
 0x676   : > { %9010 = vmatprep.mubr.f32.mxu0 %v16927_v55  ;;  %v15807_v41 = vpop.f32.mrf.mxu0 }
 0x677   : > { %16935 = vst [vmem:[#allocation58_spill] sm:$0xff] %v15807_v41  ;;  %11825 = vmatmul.mubr.msk.f32.vlgmr.msra.gmra.mxu1 %vm5480_vm2, %v15661_v3  ;;  %v6012_v17 = vpop.f32.mrf.mxu1  ;;  %v9175_v3 = vsel %vm9162_vm9, %v9159_v26, %v9135_v43  ;;  %v9218_v26 = vmul.f32 %v9201_v46, %v9163_v28  ;;  %v9889_v28 = vld [vmem:[#allocation5 + $0x5c8] sm:$0xff] }
 0x678   : > { %9273 = vmatpush1.msra.mxu1 %v9220_v9  ;;  %11827 = vmatprep.mubr.msk.f32.mxu1 %vm5480_vm2, %v15680_v35  ;;  %v15815_v15 = vadd.f32 %v6012_v17, %v15543_v57  ;;  %v15829_v57 = vld [vmem:[%s16713_s6 + $0x100] sm:$0xff]  ;;  %v9219_v6 = vmul.f32 %v15741_v8, %v9175_v3  ;;  %v9893_v9 = vld [vmem:[#allocation5 + $0x5e8] sm:$0xff] }
 0x679   : > { %11526 = vmatmul.mubr.msk.f32.gmra.mxu0 %vm5480_vm2, %v15709_v56  ;;  %9274 = vmatprep.subr.mxu1 %v9214_v24  ;;  %v5941_v63 = vpop.f32.mrf.mxu0  ;;  %v15819_v54 = vpop.f32.mrf.mxu1 }
 0x67a   : > { %9275 = vmatpush1.msra.mxu1 %v9213_v29  ;;  %9397 = vmatprep.mubr.f32.mxu0 %v16927_v55  ;;  %v15832_v35 = vadd.f32 %v5941_v63, %v15670_v62  ;;  %v9165_v62 = vsel %vm9162_vm9, %v15592_v5, %v9155_v42 }
 0x67b   : > { %9450 = vmatprep.subr.mxu1 %v9225_v60  ;;  %11828 = vmatmul.mubr.msk.f32.gmra.mxu1 %vm5480_vm2, %v15709_v56  ;;  %v15839_v58 = vpop.f32.mrf.mxu0  ;;  %v9224_v56 = vmul.f32 %v9197_v2, %v9166_v11  ;;  %v9217_v5 = vmul.f32 %v9197_v2, %v9165_v62  ;;  %v9892_v2 = vld [vmem:[#allocation5 + $0x5e0] sm:$0xff] }
 0x67c   : > { %9308 = vmatprep.mubr.f32.mxu1 %v16927_v55  ;;  %v6018_v43 = vpop.f32.mrf.mxu1 }
 0x67d   : > { %11539 = vmatmul.mubr.msk.f32.vlgmr.msra.gmra.mxu0 %vm5480_vm2, %v15829_v57  ;;  %v15851_v10 = vadd.f32 %v6018_v43, %v15582_v51 }
 0x67e   : > { %11831 = vmatpush3.msra.mxu0 %v9226_v37  ;;  %9403 = vmatprep.mubr.f32.mxu0 %v16927_v55  ;;  %v15859_v8 = vpop.f32.mrf.mxu1 }
 0x67f   : > { %11832 = vmatprep.subr.mxu0 %v9219_v6  ;;  %11535 = vmatmul.mubr.msk.f32.vlgmr.msra.gmra.mxu1 %vm5480_vm2, %v15829_v57  ;;  %v6101_v52 = vpop.f32.mrf.mxu0 }
 0x680   : > { %11833 = vmatpush3.msra.mxu0 %v9219_v6  ;;  %9451 = vmatpush1.msra.mxu1 %v9224_v56  ;;  %v15864_v51 = vadd.f32 %v6101_v52, %v15714_v32  ;;  %v9888_v6 = vld [vmem:[#allocation5 + $0x5c0] sm:$0xff]  ;;  %v9885_v52 = vld [vmem:[#allocation5 + $0x5a8] sm:$0xff] }
 0x681   : > { %11540 = vmatmul.mubr.msk.f32.gmra.mxu0 %vm5480_vm2, %v15857_v18  ;;  %9452 = vmatprep.subr.mxu1 %v9218_v26  ;;  %v15868_v37 = vpop.f32.mrf.mxu0  ;;  %v6024_v38 = vpop.f32.mrf.mxu1  ;;  %v9764_v56 = vld [vmem:[#allocation5 + $0x1e0] sm:$0xff] }
 0x682   : > { %9453 = vmatpush1.msra.mxu1 %v9217_v5  ;;  %9314 = vmatprep.mubr.f32.mxu1 %v16927_v55  ;;  %v15877_v34 = vadd.f32 %v6024_v38, %v15608_v20  ;;  %v9761_v5 = vld [vmem:[#allocation5 + $0x1c8] sm:$0xff] }
 0x683   : > { %11536 = vmatmul.mubr.msk.f32.gmra.mxu1 %vm5480_vm2, %v15857_v18  ;;  %9409 = vmatprep.mubr.f32.mxu0 %v16927_v55  ;;  %v6107_v32 = vpop.f32.mrf.mxu0  ;;  %v15882_v12 = vpop.f32.mrf.mxu1 }
 0x684   : > { %16936 = vst [vmem:[#allocation39_spill] sm:$0xff] %v15882_v12  ;;  %9320 = vmatprep.mubr.f32.mxu1 %v16927_v55  ;;  %v15886_v48 = vadd.f32 %v6107_v32, %v15745_v47  ;;  %10322 = vmatprep.subr.mxu0 %v9893_v9  ;;  %v9884_v32 = vld [vmem:[#allocation5 + $0x5a0] sm:$0xff] }
 0x685   : > { %11541 = vmatmul.mubr.msk.f32.gmra.mxu0 %vm5480_vm2, %v15874_v4  ;;  %v15890_v46 = vpop.f32.mrf.mxu0  ;;  %v6030_v20 = vpop.f32.mrf.mxu1 }
 0x686   : > { %9415 = vmatprep.mubr.f32.mxu0 %v16927_v55  ;;  %v15899_v24 = vadd.f32 %v6030_v20, %v15651_v49  ;;  %v9765_v49 = vld [vmem:[#allocation5 + $0x1e8] sm:$0xff] }
 0x687   : > { %11537 = vmatmul.mubr.msk.f32.gmra.mxu1 %vm5480_vm2, %v15874_v4  ;;  %v6113_v47 = vpop.f32.mrf.mxu0  ;;  %v15903_v17 = vpop.f32.mrf.mxu1  ;;  %10233 = vmatprep.subr.mxu1 %v9765_v49 }
 0x688   : > { %9326 = vmatprep.mubr.f32.mxu1 %v16927_v55  ;;  %v15907_v29 = vadd.f32 %v6113_v47, %v15764_v36  ;;  %v9881_v47 = vld [vmem:[#allocation5 + $0x588] sm:$0xff] }
 0x689   : > { %11542 = vmatmul.mubr.msk.f32.gmra.mxu0 %vm5480_vm2, %v15896_v1  ;;  %v15911_v42 = vpop.f32.mrf.mxu0  ;;  %v11766_v60 = vpop.f32.mrf.mxu1 }
 0x68a   : > { %11834 = vmatprep.mubr.msk.f32.mxu0 %vm5480_vm2, %v15829_v57  ;;  %v15916_v63 = vadd.f32 %v11766_v60, %v15684_v22  ;;  %v9757_v60 = vld [vmem:[#allocation5 + $0x1a8] sm:$0xff] }
 0x68b   : > { %11538 = vmatmul.mubr.msk.f32.gmra.mxu1 %vm5480_vm2, %v15896_v1  ;;  %v6119_v3 = vpop.f32.mrf.mxu0  ;;  %v15920_v36 = vpop.f32.mrf.mxu1 }
 0x68c   : > { %9486 = vmatprep.mubr.f32.mxu1 %v16927_v55  ;;  %v15924_v11 = vadd.f32 %v6119_v3, %v15785_v44  ;;  %v9880_v3 = vld [vmem:[#allocation5 + $0x580] sm:$0xff] }
 0x68d   : > { %11835 = vmatmul.mubr.msk.f32.vlgmr.msra.gmra.mxu0 %vm5480_vm2, %v15857_v18  ;;  %v15928_v43 = vpop.f32.mrf.mxu0  ;;  %v11769_v22 = vpop.f32.mrf.mxu1 }
 0x68e   : > { %11837 = vmatprep.mubr.msk.f32.mxu0 %vm5480_vm2, %v15874_v4  ;;  %v15933_v62 = vadd.f32 %v11769_v22, %v15719_v50  ;;  %10323 = vmatpush1.msra.mxu0 %v9892_v2  ;;  %v9756_v2 = vld [vmem:[#allocation5 + $0x1a0] sm:$0xff] }
 0x68f   : > { %11543 = vmatmul.mubr.msk.f32.vlgmr.msra.gmra.mxu1 %vm5480_vm2, %v15829_v57  ;;  %v6478_v44 = vpop.f32.mrf.mxu0  ;;  %v15937_v26 = vpop.f32.mrf.mxu1  ;;  %10324 = vmatprep.subr.mxu0 %v9889_v28  ;;  %v9760_v57 = vld [vmem:[#allocation5 + $0x1c0] sm:$0xff] }
 0x690   : > { %9492 = vmatprep.mubr.f32.mxu1 %v16927_v55  ;;  %v15941_v38 = vadd.f32 %v6478_v44, %v15815_v15  ;;  %10325 = vmatpush1.msra.mxu0 %v9888_v6  ;;  %v9876_v44 = vld [vmem:[#allocation5 + $0x560] sm:$0xff] }
 0x691   : > { %11838 = vmatmul.mubr.msk.f32.gmra.mxu0 %vm5480_vm2, %v15896_v1  ;;  %v15945_v50 = vpop.f32.mrf.mxu0  ;;  %v6389_v20 = vpop.f32.mrf.mxu1  ;;  %10234 = vmatpush1.msra.mxu1 %v9764_v56  ;;  %v9753_v56 = vld [vmem:[#allocation5 + $0x188] sm:$0xff] }
 0x692   : > { %v15948_v9 = vadd.f32 %v6389_v20, %v15754_v27  ;;  %10326 = vmatprep.subr.mxu0 %v9885_v52  ;;  %10235 = vmatprep.subr.mxu1 %v9761_v5  ;;  %v9877_v27 = vld [vmem:[#allocation5 + $0x568] sm:$0xff]  ;;  %v9752_v52 = vld [vmem:[#allocation5 + $0x180] sm:$0xff] }
 0x693   : > { %11544 = vmatmul.mubr.msk.f32.gmra.mxu1 %vm5480_vm2, %v15857_v18  ;;  %v6484_v15 = vpop.f32.mrf.mxu0  ;;  %v15952_v49 = vpop.f32.mrf.mxu1  ;;  %10327 = vmatpush1.msra.mxu0 %v9884_v32  ;;  %v9873_v32 = vld [vmem:[#allocation5 + $0x548] sm:$0xff] }
 0x694   : > { %9498 = vmatprep.mubr.f32.mxu1 %v16927_v55  ;;  %v15956_v28 = vadd.f32 %v6484_v15, %v15851_v10  ;;  %10236 = vmatpush1.msra.mxu1 %v9760_v57  ;;  %v9749_v20 = vld [vmem:[#allocation5 + $0x168] sm:$0xff]  ;;  %v9748_v15 = vld [vmem:[#allocation5 + $0x160] sm:$0xff] }
 0x695   : > { %v15958_v22 = vpop.f32.mrf.mxu0  ;;  %v6395_v6 = vpop.f32.mrf.mxu1  ;;  %10328 = vmatprep.subr.mxu0 %v9881_v47  ;;  %10237 = vmatprep.subr.mxu1 %v9757_v60 }
 0x696   : > { %v15961_v18 = vadd.f32 %v6395_v6, %v15770_v7  ;;  %10329 = vmatpush1.msra.mxu0 %v9880_v3  ;;  %10238 = vmatpush1.msra.mxu1 %v9756_v2  ;;  %v9872_v7 = vld [vmem:[#allocation5 + $0x540] sm:$0xff]  ;;  %v9745_v2 = vld [vmem:[#allocation5 + $0x148] sm:$0xff] }
 0x697   : > { %11545 = vmatmul.mubr.msk.f32.gmra.mxu1 %vm5480_vm2, %v15874_v4  ;;  %v6490_v10 = vpop.f32.mrf.mxu0  ;;  %v15965_v5 = vpop.f32.mrf.mxu1  ;;  %10330 = vmatprep.subr.mxu0 %v9877_v27  ;;  %v9869_v4 = vld [vmem:[#allocation5 + $0x528] sm:$0xff]  ;;  %v9868_v27 = vld [vmem:[#allocation5 + $0x520] sm:$0xff] }
 0x698   : > { %16937 = vst [vmem:[#allocation45_spill] sm:$0xff] %v15965_v5  ;;  %9504 = vmatprep.mubr.f32.mxu1 %v16927_v55  ;;  %v15969_v57 = vadd.f32 %v6490_v10, %v15877_v34  ;;  %10239 = vmatprep.subr.mxu1 %v9753_v56  ;;  %v9744_v56 = vld [vmem:[#allocation5 + $0x140] sm:$0xff]  ;;  %v9865_v10 = vld [vmem:[#allocation5 + $0x508] sm:$0xff] }
 0x699   : > { %v15971_v47 = vpop.f32.mrf.mxu0  ;;  %v6401_v60 = vpop.f32.mrf.mxu1  ;;  %10331 = vmatpush1.msra.mxu0 %v9876_v44  ;;  %10240 = vmatpush1.msra.mxu1 %v9752_v52  ;;  %v9864_v52 = vld [vmem:[#allocation5 + $0x500] sm:$0xff] }
 0x69a   : > { %16938 = vst [vmem:[#allocation52_spill] sm:$0xff] %v15971_v47  ;;  %v15974_v3 = vadd.f32 %v6401_v60, %v15800_v13  ;;  %10332 = vmatprep.subr.mxu0 %v9873_v32  ;;  %10241 = vmatprep.subr.mxu1 %v9749_v20  ;;  %v9741_v13 = vld [vmem:[#allocation5 + $0x128] sm:$0xff]  ;;  %v9740_v60 = vld [vmem:[#allocation5 + $0x120] sm:$0xff] }
 0x69b   : > { %11546 = vmatmul.mubr.msk.f32.gmra.mxu1 %vm5480_vm2, %v15896_v1  ;;  %v6496_v34 = vpop.f32.mrf.mxu0  ;;  %v15978_v6 = vpop.f32.mrf.mxu1  ;;  %10333 = vmatpush1.msra.mxu0 %v9872_v7  ;;  %v9861_v1 = vld [vmem:[#allocation5 + $0x4e8] sm:$0xff] }
 0x69c   : > { %16939 = vst [vmem:[#allocation28_spill] sm:$0xff] %v15978_v6  ;;  %v15981_v44 = vadd.f32 %v6496_v34, %v15899_v24  ;;  %10242 = vmatpush1.msra.mxu1 %v9748_v15  ;;  %10334 = vmatprep.subr.mxu0 %v9869_v4  ;;  %v9737_v7 = vld [vmem:[#allocation5 + $0x108] sm:$0xff]  ;;  %v9860_v6 = vld [vmem:[#allocation5 + $0x4e0] sm:$0xff] }
 0x69d   : > { %v15983_v32 = vpop.f32.mrf.mxu0  ;;  %v6407_v20 = vpop.f32.mrf.mxu1  ;;  %10243 = vmatprep.subr.mxu1 %v9745_v2  ;;  %10335 = vmatpush1.msra.mxu0 %v9868_v27  ;;  %v9736_v15 = vld [vmem:[#allocation5 + $0x100] sm:$0xff]  ;;  %v9857_v4 = vld [vmem:[#allocation5 + $0x4c8] sm:$0xff] }
 0x69e   : > { %v15986_v55 = vadd.f32 %v6407_v20, %v15832_v35  ;;  %10244 = vmatpush1.msra.mxu1 %v9744_v56  ;;  %10336 = vmatprep.subr.mxu0 %v9865_v10  ;;  %v9733_v2 = vld [vmem:[#allocation5 + $0xe8] sm:$0xff]  ;;  %v9856_v27 = vld [vmem:[#allocation5 + $0x4c0] sm:$0xff] }
 0x69f   : > { %v11776_v24 = vpop.f32.mrf.mxu0  ;;  %v15988_v34 = vpop.f32.mrf.mxu1  ;;  %10245 = vmatprep.subr.mxu1 %v9741_v13  ;;  %10337 = vmatpush1.msra.mxu0 %v9864_v52  ;;  %v9732_v56 = vld [vmem:[#allocation5 + $0xe0] sm:$0xff]  ;;  %v9853_v10 = vld [vmem:[#allocation5 + $0x4a8] sm:$0xff] }
 0x6a0   : > { %v15991_v41 = vadd.f32 %v11776_v24, %v15916_v63  ;;  %10246 = vmatpush1.msra.mxu1 %v9740_v60  ;;  %10338 = vmatprep.subr.mxu0 %v9861_v1  ;;  %v9729_v13 = vld [vmem:[#allocation5 + $0xc8] sm:$0xff]  ;;  %v9852_v52 = vld [vmem:[#allocation5 + $0x4a0] sm:$0xff] }
 0x6a1   : > { %v15993_v35 = vpop.f32.mrf.mxu0  ;;  %10247 = vmatprep.subr.mxu1 %v9737_v7  ;;  %10339 = vmatpush1.msra.mxu0 %v9860_v6  ;;  %v9728_v60 = vld [vmem:[#allocation5 + $0xc0] sm:$0xff]  ;;  %v9849_v1 = vld [vmem:[#allocation5 + $0x488] sm:$0xff] }
 0x6a2   : > { %v6567_v20 = vpop.f32.mrf.mxu1  ;;  %10248 = vmatpush1.msra.mxu1 %v9736_v15  ;;  %10340 = vmatprep.subr.mxu0 %v9857_v4  ;;  %v9725_v6 = vld [vmem:[#allocation5 + $0xa8] sm:$0xff]  ;;  %v9848_v15 = vld [vmem:[#allocation5 + $0x480] sm:$0xff] }
 0x6a3   : > { %v15996_v33 = vadd.f32 %v6567_v20, %v15864_v51  ;;  %v11779_v63 = vpop.f32.mrf.mxu0  ;;  %10249 = vmatprep.subr.mxu1 %v9733_v2  ;;  %10341 = vmatpush1.msra.mxu0 %v9856_v27  ;;  %v9724_v51 = vld [vmem:[#allocation5 + $0xa0] sm:$0xff]  ;;  %v9845_v20 = vld [vmem:[#allocation5 + $0x468] sm:$0xff] }
 0x6a4   : > { %v15999_v24 = vadd.f32 %v11779_v63, %v15933_v62  ;;  %v16001_v7 = vpop.f32.mrf.mxu1  ;;  %10250 = vmatpush1.msra.mxu1 %v9732_v56  ;;  %10342 = vmatprep.subr.mxu0 %v9853_v10  ;;  %v9721_v2 = vld [vmem:[#allocation5 + $0x88] sm:$0xff]  ;;  %v9844_v27 = vld [vmem:[#allocation5 + $0x460] sm:$0xff] }
 0x6a5   : > { %v16003_v4 = vpop.f32.mrf.mxu0  ;;  %10251 = vmatprep.subr.mxu1 %v9729_v13  ;;  %10343 = vmatpush1.msra.mxu0 %v9852_v52  ;;  %v9720_v56 = vld [vmem:[#allocation5 + $0x80] sm:$0xff]  ;;  %v9841_v10 = vld [vmem:[#allocation5 + $0x448] sm:$0xff] }
 0x6a6   : > { %v6573_v47 = vpop.f32.mrf.mxu1  ;;  %10252 = vmatpush1.msra.mxu1 %v9728_v60  ;;  %10344 = vmatprep.subr.mxu0 %v9849_v1  ;;  %v9717_v52 = vld [vmem:[#allocation5 + $0x68] sm:$0xff]  ;;  %v9840_v60 = vld [vmem:[#allocation5 + $0x440] sm:$0xff] }
 0x6a7   : > { %v16006_v62 = vadd.f32 %v6573_v47, %v15886_v48  ;;  %v6883_v63 = vpop.f32.mrf.mxu0  ;;  %10253 = vmatprep.subr.mxu1 %v9725_v6  ;;  %10345 = vmatpush1.msra.mxu0 %v9848_v15  ;;  %v9716_v48 = vld [vmem:[#allocation5 + $0x60] sm:$0xff]  ;;  %v9837_v47 = vld [vmem:[#allocation5 + $0x428] sm:$0xff] }
 0x6a8   : > { %v16009_v5 = vadd.f32 %v6883_v63, %v15948_v9  ;;  %v16011_v13 = vpop.f32.mrf.mxu1  ;;  %10254 = vmatpush1.msra.mxu1 %v9724_v51  ;;  %10346 = vmatprep.subr.mxu0 %v9845_v20  ;;  %v9713_v6 = vld [vmem:[#allocation5 + $0x48] sm:$0xff]  ;;  %v9836_v15 = vld [vmem:[#allocation5 + $0x420] sm:$0xff] }
 0x6a9   : > { %v16013_v1 = vpop.f32.mrf.mxu0  ;;  %10255 = vmatprep.subr.mxu1 %v9721_v2  ;;  %10347 = vmatpush1.msra.mxu0 %v9844_v27  ;;  %v9712_v51 = vld [vmem:[#allocation5 + $0x40] sm:$0xff]  ;;  %v9833_v20 = vld [vmem:[#allocation5 + $0x408] sm:$0xff] }
 0x6aa   : > { %v6579_v12 = vpop.f32.mrf.mxu1  ;;  %10256 = vmatpush1.msra.mxu1 %v9720_v56  ;;  %10348 = vmatprep.subr.mxu0 %v9841_v10  ;;  %v9709_v27 = vld [vmem:[#allocation5 + $0x28] sm:$0xff]  ;;  %v9832_v56 = vld [vmem:[#allocation5 + $0x400] sm:$0xff] }
 0x6ab   : > { %v16016_v9 = vadd.f32 %v6579_v12, %v15907_v29  ;;  %v6889_v63 = vpop.f32.mrf.mxu0  ;;  %10257 = vmatprep.subr.mxu1 %v9717_v52  ;;  %10349 = vmatpush1.msra.mxu0 %v9840_v60  ;;  %v9708_v12 = vld [vmem:[#allocation5 + $0x20] sm:$0xff]  ;;  %v9957_v29 = vld [vmem:[#allocation5 + $0x7e8] sm:$0xff] }
 0x6ac   : > { %v16019_v40 = vadd.f32 %v6889_v63, %v15961_v18  ;;  %v16021_v2 = vpop.f32.mrf.mxu1  ;;  %10258 = vmatpush1.msra.mxu1 %v9716_v48  ;;  %10350 = vmatprep.subr.mxu0 %v9837_v47  ;;  %v9705_v52 = vld [vmem:[#allocation5 + $0x8] sm:$0xff]  ;;  %v9956_v60 = vld [vmem:[#allocation5 + $0x7e0] sm:$0xff] }
 0x6ad   : > { %v16023_v10 = vpop.f32.mrf.mxu0  ;;  %10259 = vmatprep.subr.mxu1 %v9713_v6  ;;  %10351 = vmatpush1.msra.mxu0 %v9836_v15  ;;  %v9704_v48 = vld [vmem:[#allocation5] sm:$0xff]  ;;  %v9953_v47 = vld [vmem:[#allocation5 + $0x7c8] sm:$0xff] }
 0x6ae   : > { %16940 = vst [vmem:[#allocation30_spill] sm:$0xff] %v16019_v40  ;;  %16941 = vst [vmem:[#allocation31_spill] sm:$0xff] %v16023_v10  ;;  %v6585_v14 = vpop.f32.mrf.mxu1  ;;  %10260 = vmatpush1.msra.mxu1 %v9712_v51  ;;  %10352 = vmatprep.subr.mxu0 %v9833_v20  ;;  %v9829_v15 = vld [vmem:[#allocation5 + $0x3e8] sm:$0xff]  ;;  %v9952_v51 = vld [vmem:[#allocation5 + $0x7c0] sm:$0xff] }
 0x6af   : > { %v16026_v18 = vadd.f32 %v6585_v14, %v15924_v11  ;;  %v6895_v63 = vpop.f32.mrf.mxu0  ;;  %10261 = vmatprep.subr.mxu1 %v9709_v27  ;;  %10353 = vmatpush1.msra.mxu0 %v9832_v56  ;;  %v9828_v14 = vld [vmem:[#allocation5 + $0x3e0] sm:$0xff]  ;;  %v9949_v11 = vld [vmem:[#allocation5 + $0x7a8] sm:$0xff] }
 0x6b0   : > { %v16029_v40 = vadd.f32 %v6895_v63, %v15974_v3  ;;  %v16031_v6 = vpop.f32.mrf.mxu1  ;;  %10262 = vmatpush1.msra.mxu1 %v9708_v12  ;;  %10354 = vmatprep.subr.mxu0 %v9957_v29  ;;  %v9825_v27 = vld [vmem:[#allocation5 + $0x3c8] sm:$0xff]  ;;  %v9948_v56 = vld [vmem:[#allocation5 + $0x7a0] sm:$0xff]  ;;  %v5944_v12 = vadd.f32 %v15839_v58, %v15686_v59 }
 0x6b1   : > { %v16033_v20 = vpop.f32.mrf.mxu0  ;;  %10263 = vmatprep.subr.mxu1 %v9705_v52  ;;  %10355 = vmatpush2.msra.mxu0 %v9956_v60  ;;  %v9824_v3 = vld [vmem:[#allocation5 + $0x3c0] sm:$0xff]  ;;  %v9945_v63 = vld [vmem:[#allocation5 + $0x788] sm:$0xff] }
 0x6b2   : > { %16942 = vst [vmem:[#allocation36_spill] sm:$0xff] %v16029_v40  ;;  %16943 = vst [vmem:[#allocation49_spill] sm:$0xff] %v16033_v20  ;;  %10264 = vmatpush1.msra.mxu1 %v9704_v48  ;;  %10356 = vmatprep.subr.mxu0 %v9953_v47  ;;  %v9821_v52 = vld [vmem:[#allocation5 + $0x3a8] sm:$0xff]  ;;  %v9944_v60 = vld [vmem:[#allocation5 + $0x780] sm:$0xff] }
 0x6b3   : > { %v6972_v10 = vpop.f32.mrf.mxu1  ;;  %10265 = vmatprep.subr.mxu1 %v9829_v15  ;;  %10357 = vmatpush2.msra.mxu0 %v9952_v51  ;;  %v9820_v47 = vld [vmem:[#allocation5 + $0x3a0] sm:$0xff]  ;;  %v9941_v15 = vld [vmem:[#allocation5 + $0x768] sm:$0xff]  ;;  %v6697_v51 = vadd.f32 %v15988_v34, %v5944_v12 }
 0x6b4   : > { %v16038_v29 = vadd.f32 %v6972_v10, %v15941_v38  ;;  %10266 = vmatpush2.msra.mxu1 %v9828_v14  ;;  %10358 = vmatprep.subr.mxu0 %v9949_v11  ;;  %v9817_v59 = vld [vmem:[#allocation5 + $0x388] sm:$0xff]  ;;  %v9940_v58 = vld [vmem:[#allocation5 + $0x760] sm:$0xff] }
 0x6b5   : > { %v6901_v40 = vpop.f32.mrf.mxu0  ;;  %v16040_v48 = vpop.f32.mrf.mxu1  ;;  %10267 = vmatprep.subr.mxu1 %v9825_v27  ;;  %10359 = vmatpush2.msra.mxu0 %v9948_v56  ;;  %v9816_v14 = vld [vmem:[#allocation5 + $0x380] sm:$0xff]  ;;  %v9937_v11 = vld [vmem:[#allocation5 + $0x748] sm:$0xff] }
 0x6b6   : > { %v16044_v20 = vadd.f32 %v6901_v40, %v15986_v55  ;;  %10268 = vmatpush2.msra.mxu1 %v9824_v3  ;;  %10360 = vmatprep.subr.mxu0 %v9945_v63  ;;  %v9813_v34 = vld [vmem:[#allocation5 + $0x368] sm:$0xff]  ;;  %v9936_v55 = vld [vmem:[#allocation5 + $0x740] sm:$0xff]  ;;  %v6104_v40 = vadd.f32 %v15868_v37, %v15727_v23 }
 0x6b7   : > { %v6903_v38 = vpop.f32.mrf.mxu0  ;;  %v6978_v10 = vpop.f32.mrf.mxu1  ;;  %10269 = vmatprep.subr.mxu1 %v9821_v52  ;;  %10361 = vmatpush2.msra.mxu0 %v9944_v60  ;;  %v9812_v3 = vld [vmem:[#allocation5 + $0x360] sm:$0xff]  ;;  %v9933_v63 = vld [vmem:[#allocation5 + $0x728] sm:$0xff] }
 0x6b8   : > { %v16046_v31 = vadd.f32 %v6903_v38, %v6697_v51  ;;  %v16049_v27 = vadd.f32 %v6978_v10, %v15956_v28  ;;  %10270 = vmatpush2.msra.mxu1 %v9820_v47  ;;  %10362 = vmatprep.subr.mxu0 %v9941_v15  ;;  %v9809_v52 = vld [vmem:[#allocation5 + $0x348] sm:$0xff]  ;;  %v9932_v60 = vld [vmem:[#allocation5 + $0x720] sm:$0xff]  ;;  %v6680_v28 = vadd.f32 %v16001_v7, %v6104_v40 }
 0x6b9   : > { %v16053_v56 = vpop.f32.mrf.mxu1  ;;  %10271 = vmatprep.subr.mxu1 %v9817_v59  ;;  %10363 = vmatpush2.msra.mxu0 %v9940_v58  ;;  %v9808_v15 = vld [vmem:[#allocation5 + $0x340] sm:$0xff]  ;;  %v9929_v23 = vld [vmem:[#allocation5 + $0x708] sm:$0xff]  ;;  %v6033_v40 = vadd.f32 %v15903_v17, %v15667_v45 }
 0x6ba   : > { %v7061_v12 = vpop.f32.mrf.mxu0  ;;  %10272 = vmatpush2.msra.mxu1 %v9816_v14  ;;  %10364 = vmatprep.subr.mxu0 %v9937_v11  ;;  %v9805_v59 = vld [vmem:[#allocation5 + $0x328] sm:$0xff]  ;;  %v9928_v58 = vld [vmem:[#allocation5 + $0x700] sm:$0xff]  ;;  %v6110_v14 = vadd.f32 %v15890_v46, %v15756_v30 }
 0x6bb   : > { %v16057_v47 = vadd.f32 %v7061_v12, %v15996_v33  ;;  %10273 = vmatprep.subr.mxu1 %v9813_v34  ;;  %10365 = vmatpush2.msra.mxu0 %v9936_v55  ;;  %v9804_v7 = vld [vmem:[#allocation5 + $0x320] sm:$0xff]  ;;  %v9925_v33 = vld [vmem:[#allocation5 + $0x6e8] sm:$0xff] }
 0x6bc   : > { %v7063_v37 = vpop.f32.mrf.mxu0  ;;  %v6984_v51 = vpop.f32.mrf.mxu1  ;;  %10274 = vmatpush2.msra.mxu1 %v9812_v3  ;;  %10366 = vmatprep.subr.mxu0 %v9933_v63  ;;  %v9801_v34 = vld [vmem:[#allocation5 + $0x308] sm:$0xff]  ;;  %v9924_v55 = vld [vmem:[#allocation5 + $0x6e0] sm:$0xff]  ;;  %v6687_v12 = vadd.f32 %v16011_v13, %v6110_v14  ;;  %v6116_v13 = vadd.f32 %v15911_v42, %v15772_v19 }
 0x6bd   : > { %v16059_v38 = vadd.f32 %v7063_v37, %v6680_v28  ;;  %v16062_v10 = vadd.f32 %v6984_v51, %v15969_v57  ;;  %10275 = vmatprep.subr.mxu1 %v9809_v52  ;;  %10367 = vmatpush2.msra.mxu0 %v9932_v60  ;;  %v9800_v57 = vld [vmem:[#allocation5 + $0x300] sm:$0xff]  ;;  %v9921_v63 = vld [vmem:[#allocation5 + $0x6c8] sm:$0xff]  ;;  %v6699_v28 = vadd.f32 %v15983_v32, %v6033_v40 }
 0x6be   : > { %v16066_v11 = vpop.f32.mrf.mxu1  ;;  %10276 = vmatpush2.msra.mxu1 %v9808_v15  ;;  %10368 = vmatprep.subr.mxu0 %v9929_v23  ;;  %v9797_v46 = vld [vmem:[#allocation5 + $0x2e8] sm:$0xff]  ;;  %v9920_v60 = vld [vmem:[#allocation5 + $0x6c0] sm:$0xff]  ;;  %v6191_v32 = vadd.f32 %v15920_v36, %v15699_v39  ;;  %v6694_v14 = vadd.f32 %v16021_v2, %v6116_v13  ;;  %v6122_v2 = vadd.f32 %v15928_v43, %v15802_v0 }
 0x6bf   : > { %v7067_v3 = vpop.f32.mrf.mxu0  ;;  %10277 = vmatprep.subr.mxu1 %v9805_v59  ;;  %10369 = vmatpush2.msra.mxu0 %v9928_v58  ;;  %v9796_v17 = vld [vmem:[#allocation5 + $0x2e0] sm:$0xff]  ;;  %v9917_v23 = vld [vmem:[#allocation5 + $0x6a8] sm:$0xff]  ;;  %v6015_v0 = vadd.f32 %v15819_v54, %v15557_v25 }
 0x6c0   : > { %v16072_v52 = vadd.f32 %v7067_v3, %v16006_v62  ;;  %v6990_v30 = vpop.f32.mrf.mxu1  ;;  %10278 = vmatpush2.msra.mxu1 %v9804_v7  ;;  %10370 = vmatprep.subr.mxu0 %v9925_v33  ;;  %v9793_v51 = vld [vmem:[#allocation5 + $0x2c8] sm:$0xff]  ;;  %v9916_v59 = vld [vmem:[#allocation5 + $0x6a0] sm:$0xff]  ;;  %v6681_v40 = vadd.f32 %v15993_v35, %v6191_v32  ;;  %v6201_v35 = vadd.f32 %v15937_v26, %v15734_v53 }
 0x6c1   : > { %v7069_v15 = vpop.f32.mrf.mxu0  ;;  %v16076_v45 = vadd.f32 %v6990_v30, %v15981_v44  ;;  %10279 = vmatprep.subr.mxu1 %v9801_v34  ;;  %10371 = vmatpush2.msra.mxu0 %v9924_v55  ;;  %v9792_v7 = vld [vmem:[#allocation5 + $0x2c0] sm:$0xff]  ;;  %v9913_v33 = vld [vmem:[#allocation5 + $0x688] sm:$0xff]  ;;  %v6701_v43 = vadd.f32 %v16031_v6, %v6122_v2  ;;  %v5926_v26 = vadd.f32 %v15759_v21, %v15600_v16 }
 0x6c2   : > { %v16080_v62 = vadd.f32 %v7069_v15, %v6687_v12  ;;  %v6992_v37 = vpop.f32.mrf.mxu1  ;;  %10280 = vmatpush2.msra.mxu1 %v9800_v57  ;;  %10372 = vmatprep.subr.mxu0 %v9921_v63  ;;  %v9789_v34 = vld [vmem:[#allocation5 + $0x2a8] sm:$0xff]  ;;  %v9912_v55 = vld [vmem:[#allocation5 + $0x680] sm:$0xff]  ;;  %v6695_v13 = vadd.f32 %v16003_v4, %v6201_v35  ;;  %v16946_v35 = vld [vmem:[#allocation35_spill] sm:$0xff] }
 0x6c3   : > { %v7073_v58 = vpop.f32.mrf.mxu0  ;;  %v16084_v44 = vadd.f32 %v6992_v37, %v6699_v28  ;;  %10281 = vmatprep.subr.mxu1 %v9797_v46  ;;  %10373 = vmatpush2.msra.mxu0 %v9920_v60  ;;  %v9788_v3 = vld [vmem:[#allocation5 + $0x2a0] sm:$0xff]  ;;  %v9909_v57 = vld [vmem:[#allocation5 + $0x668] sm:$0xff]  ;;  %v6676_v16 = vadd.f32 %v15952_v49, %v5926_v26 }
 0x6c4   : > { %v16088_v19 = vadd.f32 %v7073_v58, %v16016_v9  ;;  %v11786_v42 = vpop.f32.mrf.mxu1  ;;  %10282 = vmatpush2.msra.mxu1 %v9796_v17  ;;  %10374 = vmatprep.subr.mxu0 %v9917_v23  ;;  %v9785_v12 = vld [vmem:[#allocation5 + $0x288] sm:$0xff]  ;;  %v9908_v30 = vld [vmem:[#allocation5 + $0x660] sm:$0xff] }
 0x6c5   : > { %v7075_v39 = vpop.f32.mrf.mxu0  ;;  %v16092_v36 = vadd.f32 %v11786_v42, %v15991_v41  ;;  %10283 = vmatprep.subr.mxu1 %v9793_v51  ;;  %10375 = vmatpush2.msra.mxu0 %v9916_v59  ;;  %v9784_v60 = vld [vmem:[#allocation5 + $0x280] sm:$0xff]  ;;  %v9905_v28 = vld [vmem:[#allocation5 + $0x648] sm:$0xff] }
 0x6c6   : > { %v16096_v9 = vadd.f32 %v7075_v39, %v6694_v14  ;;  %v7150_v63 = vpop.f32.mrf.mxu1  ;;  %10284 = vmatpush2.msra.mxu1 %v9792_v7  ;;  %10376 = vmatprep.subr.mxu0 %v9913_v33  ;;  %v9781_v23 = vld [vmem:[#allocation5 + $0x268] sm:$0xff]  ;;  %v9904_v53 = vld [vmem:[#allocation5 + $0x640] sm:$0xff]  ;;  %v6021_v33 = vadd.f32 %v15859_v8, %v15602_v61 }
 0x6c7   : > { %v7079_v46 = vpop.f32.mrf.mxu0  ;;  %v16100_v41 = vadd.f32 %v7150_v63, %v6681_v40  ;;  %10285 = vmatprep.subr.mxu1 %v9789_v34  ;;  %10377 = vmatpush2.msra.mxu0 %v9912_v55  ;;  %v9780_v25 = vld [vmem:[#allocation5 + $0x260] sm:$0xff]  ;;  %v9901_v54 = vld [vmem:[#allocation5 + $0x628] sm:$0xff]  ;;  %v7170_v55 = vadd.f32 %v16013_v1, %v6676_v16 }
 0x6c8   : > { %v16106_v15 = vadd.f32 %v7079_v46, %v16026_v18  ;;  %v11789_v17 = vpop.f32.mrf.mxu1  ;;  %10286 = vmatpush2.msra.mxu1 %v9788_v3  ;;  %10378 = vmatprep.subr.mxu0 %v9909_v57  ;;  %v6678_v18 = vadd.f32 %v15945_v50, %v6015_v0  ;;  %v9777_v32 = vld [vmem:[#allocation5 + $0x248] sm:$0xff]  ;;  %v9900_v58 = vld [vmem:[#allocation5 + $0x620] sm:$0xff]  ;;  %v6685_v8 = vadd.f32 %v15958_v22, %v6021_v33  ;;  %v16947_v46 = vld [vmem:[#allocation39_spill] sm:$0xff] }
 0x6c9   : > { %v7081_v37 = vpop.f32.mrf.mxu0  ;;  %v16112_v51 = vadd.f32 %v11789_v17, %v15999_v24  ;;  %10287 = vmatprep.subr.mxu1 %v9785_v12  ;;  %10379 = vmatpush2.msra.mxu0 %v9908_v30  ;;  %v9776_v24 = vld [vmem:[#allocation5 + $0x240] sm:$0xff]  ;;  %v9897_v7 = vld [vmem:[#allocation5 + $0x608] sm:$0xff] }
 0x6ca   : > { %v16115_v6 = vadd.f32 %v7081_v37, %v6701_v43  ;;  %v7160_v59 = vpop.f32.mrf.mxu1  ;;  %10288 = vmatpush2.msra.mxu1 %v9784_v60  ;;  %10380 = vmatprep.subr.mxu0 %v9905_v28  ;;  %v7172_v50 = vadd.f32 %v16040_v48, %v6678_v18  ;;  %v9773_v34 = vld [vmem:[#allocation5 + $0x228] sm:$0xff]  ;;  %v9896_v49 = vld [vmem:[#allocation5 + $0x600] sm:$0xff]  ;;  %v6027_v60 = vadd.f32 %v16947_v46, %v16946_v35 }
 0x6cb   : > { %v7423_v21 = vpop.f32.mrf.mxu0  ;;  %v16118_v4 = vadd.f32 %v7160_v59, %v6695_v13  ;;  %10289 = vmatprep.subr.mxu1 %v9781_v23  ;;  %10381 = vmatpush2.msra.mxu0 %v9904_v53  ;;  %v9772_v3 = vld [vmem:[#allocation5 + $0x220] sm:$0xff]  ;;  %v10149_v61 = vld [vmem:[#allocation5 + $0xde8] sm:$0xff]  ;;  %v7179_v28 = vadd.f32 %v16053_v56, %v6685_v8  ;;  %v16952_v56 = vld [vmem:[#allocation31_spill] sm:$0xff] }
 0x6cc   : > { %v16124_v14 = vadd.f32 %v7423_v21, %v16038_v29  ;;  %v7334_v42 = vpop.f32.mrf.mxu1  ;;  %10290 = vmatpush2.msra.mxu1 %v9780_v25  ;;  %10382 = vmatprep.subr.mxu0 %v9901_v54  ;;  %v9769_v57 = vld [vmem:[#allocation5 + $0x208] sm:$0xff]  ;;  %v16949_v53 = vld [vmem:[#allocation52_spill] sm:$0xff]  ;;  %v16950_v25 = vld [vmem:[#allocation47_spill] sm:$0xff] }
 0x6cd   : > { %v7425_v40 = vpop.f32.mrf.mxu0  ;;  %v16128_v39 = vadd.f32 %v7334_v42, %v16009_v5  ;;  %10291 = vmatprep.subr.mxu1 %v9777_v32  ;;  %10383 = vmatpush2.msra.mxu0 %v9900_v58  ;;  %v16944_v2 = vld [vmem:[#allocation33_spill] sm:$0xff]  ;;  %v16945_v63 = vld [vmem:[#allocation50_spill] sm:$0xff]  ;;  %v6692_v26 = vadd.f32 %v16949_v53, %v6027_v60 }
 0x6ce   : > { %v16131_v48 = vadd.f32 %v7425_v40, %v7172_v50  ;;  %v7336_v29 = vpop.f32.mrf.mxu1  ;;  %10292 = vmatpush2.msra.mxu1 %v9776_v24  ;;  %10384 = vmatprep.subr.mxu0 %v9897_v7  ;;  %v5932_v12 = vadd.f32 %v16945_v63, %v16944_v2  ;;  %v9768_v5 = vld [vmem:[#allocation5 + $0x200] sm:$0xff]  ;;  %v10021_v0 = vld [vmem:[#allocation5 + $0x9e8] sm:$0xff] }
 0x6cf   : > { %v7429_v1 = vpop.f32.mrf.mxu0  ;;  %v7621_v30 = vadd.f32 %v7336_v29, %v7170_v55  ;;  %10293 = vmatprep.subr.mxu1 %v9773_v34  ;;  %10385 = vmatpush2.msra.mxu0 %v9896_v49  ;;  %v16948_v43 = vld [vmem:[#allocation45_spill] sm:$0xff]  ;;  %v16951_v54 = vld [vmem:[#allocation58_spill] sm:$0xff]  ;;  %v7186_v16 = vadd.f32 %v16066_v11, %v6692_v26  ;;  %v16954_v7 = vld [vmem:[#allocation28_spill] sm:$0xff] }
 0x6d0   : > { %v16139_v22 = vadd.f32 %v7429_v1, %v16049_v27  ;;  %10294 = vmatpush2.msra.mxu1 %v9772_v3  ;;  %10500 = vmatprep.subr.mxu0 %v10149_v61  ;;  %v6683_v17 = vadd.f32 %v16948_v43, %v5932_v12  ;;  %v5938_v18 = vadd.f32 %v16951_v54, %v16950_v25  ;;  %v16953_v27 = vld [vmem:[#allocation30_spill] sm:$0xff]  ;;  %v16955_v55 = vld [vmem:[#allocation49_spill] sm:$0xff]  ;;  %v16956_v3 = vld [vmem:[#allocation36_spill] sm:$0xff] }
 0x6d1   : > { %v7431_v23 = vpop.f32.mrf.mxu0  ;;  %10295 = vmatprep.subr.mxu1 %v9769_v57 }
 0x6d2   : > { %v16143_v13 = vadd.f32 %v7431_v23, %v7179_v28  ;;  %v7340_v37 = vpop.f32.mrf.mxu1  ;;  %10296 = vmatpush2.msra.mxu1 %v9768_v5  ;;  %v7177_v59 = vadd.f32 %v16952_v56, %v6683_v17  ;;  %v6690_v33 = vadd.f32 %v16954_v7, %v5938_v18 }
 0x6d3   : > { %v7627_v32 = vadd.f32 %v7340_v37, %v16953_v27  ;;  %v7435_v58 = vpop.f32.mrf.mxu0  ;;  %10411 = vmatprep.subr.mxu1 %v10021_v0 }
 0x6d4   : > { %v16151_v21 = vadd.f32 %v7435_v58, %v16062_v10  ;;  %v7342_v24 = vpop.f32.mrf.mxu1  ;;  %v7184_v40 = vadd.f32 %v16955_v55, %v6690_v33 }
 0x6d5   : > { %v7628_v50 = vadd.f32 %v7342_v24, %v7177_v59  ;;  %v7437_v42 = vpop.f32.mrf.mxu0 }
 0x6d6   : > { %v16154_v34 = vadd.f32 %v7437_v42, %v7186_v16  ;;  %v7346_v49 = vpop.f32.mrf.mxu1 }
 0x6d7   : > { %v7634_v61 = vadd.f32 %v7346_v49, %v16956_v3  ;;  %v7441_v8 = vpop.f32.mrf.mxu0 }
 0x6d8   : > { %v16159_v29 = vadd.f32 %v7441_v8, %v16076_v45  ;;  %v7348_v11 = vpop.f32.mrf.mxu1 }
 0x6d9   : > { %v7635_v57 = vadd.f32 %v7348_v11, %v7184_v40  ;;  %v7443_v10 = vpop.f32.mrf.mxu0 }
 0x6da   : > { %v16162_v2 = vadd.f32 %v7443_v10, %v16084_v44  ;;  %v7352_v63 = vpop.f32.mrf.mxu1 }
 0x6db   : > { %v7641_v12 = vadd.f32 %v7352_v63, %v16044_v20  ;;  %v11796_v1 = vpop.f32.mrf.mxu0 }
 0x6dc   : > { %v16166_v5 = vadd.f32 %v11796_v1, %v16092_v36  ;;  %v7354_v35 = vpop.f32.mrf.mxu1 }
 0x6dd   : > { %v7642_v46 = vadd.f32 %v7354_v35, %v16046_v31  ;;  %v7601_v60 = vpop.f32.mrf.mxu0 }
 0x6de   : > { %v16170_v45 = vadd.f32 %v7601_v60, %v16100_v41  ;;  %v7512_v28 = vpop.f32.mrf.mxu1 }
 0x6df   : > { %v7624_v0 = vadd.f32 %v7512_v28, %v16057_v47 }
 0x6e0   : > { %v11799_v43 = vpop.f32.mrf.mxu0  ;;  %v7514_v44 = vpop.f32.mrf.mxu1 }
 0x6e1   : > { %v16174_v17 = vadd.f32 %v11799_v43, %v16112_v51  ;;  %v7625_v20 = vadd.f32 %v7514_v44, %v16059_v38 }
 0x6e2   : > { %v7611_v23 = vpop.f32.mrf.mxu0  ;;  %v7518_v36 = vpop.f32.mrf.mxu1 }
 0x6e3   : > { %v16178_v53 = vadd.f32 %v7611_v23, %v16118_v4  ;;  %v7631_v31 = vadd.f32 %v7518_v36, %v16072_v52 }
 0x6e4   : > { %v7828_v26 = vpop.f32.mrf.mxu0  ;;  %v7520_v41 = vpop.f32.mrf.mxu1 }
 0x6e5   : > { %v16182_v37 = vadd.f32 %v7828_v26, %v16128_v39  ;;  %v7632_v47 = vadd.f32 %v7520_v41, %v16080_v62 }
 0x6e6   : > { %v7830_v25 = vpop.f32.mrf.mxu0  ;;  %v7524_v54 = vpop.f32.mrf.mxu1 }
 0x6e7   : > { %v16185_v51 = vadd.f32 %v7830_v25, %v7621_v30  ;;  %v7638_v38 = vadd.f32 %v7524_v54, %v16088_v19 }
 0x6e8   : > { %v7834_v18 = vpop.f32.mrf.mxu0  ;;  %v7526_v56 = vpop.f32.mrf.mxu1 }
 0x6e9   : > { %v16188_v59 = vadd.f32 %v7834_v18, %v7627_v32  ;;  %v7639_v4 = vadd.f32 %v7526_v56, %v16096_v9 }
 0x6ea   : > { %v7836_v52 = vpop.f32.mrf.mxu0  ;;  %v7530_v27 = vpop.f32.mrf.mxu1 }
 0x6eb   : > { %v16191_v58 = vadd.f32 %v7836_v52, %v7628_v50  ;;  %v7645_v39 = vadd.f32 %v7530_v27, %v16106_v15 }
 0x6ec   : > { %v7840_v16 = vpop.f32.mrf.mxu0  ;;  %v7532_v62 = vpop.f32.mrf.mxu1 }
 0x6ed   : > { %v16194_v24 = vadd.f32 %v7840_v16, %v7634_v61  ;;  %v7646_v30 = vadd.f32 %v7532_v62, %v16115_v6 }
 0x6ee   : > { %v7842_v7 = vpop.f32.mrf.mxu0  ;;  %v7917_v19 = vpop.f32.mrf.mxu1 }
 0x6ef   : > { %v16197_v33 = vadd.f32 %v7842_v7, %v7635_v57  ;;  %v16200_v32 = vadd.f32 %v7917_v19, %v16124_v14 }
 0x6f0   : > { %v7846_v9 = vpop.f32.mrf.mxu0  ;;  %v7919_v42 = vpop.f32.mrf.mxu1 }
 0x6f1   : > { %v16202_v49 = vadd.f32 %v7846_v9, %v7641_v12  ;;  %v16205_v50 = vadd.f32 %v7919_v42, %v16131_v48 }
 0x6f2   : > { %v7848_v15 = vpop.f32.mrf.mxu0  ;;  %v7923_v55 = vpop.f32.mrf.mxu1 }
 0x6f3   : > { %v16207_v40 = vadd.f32 %v7848_v15, %v7642_v46  ;;  %v16210_v6 = vadd.f32 %v7923_v55, %v16139_v22 }
 0x6f4   : > { %v8006_v3 = vpop.f32.mrf.mxu0  ;;  %v7925_v61 = vpop.f32.mrf.mxu1 }
 0x6f5   : > { %v8118_v8 = vadd.f32 %v8006_v3, %v7624_v0  ;;  %v16213_v14 = vadd.f32 %v7925_v61, %v16143_v13 }
 0x6f6   : > { %v8008_v11 = vpop.f32.mrf.mxu0  ;;  %v7929_v57 = vpop.f32.mrf.mxu1 }
 0x6f7   : > { %v16215_v10 = vadd.f32 %v8008_v11, %v7625_v20  ;;  %v16218_v48 = vadd.f32 %v7929_v57, %v16151_v21 }
 0x6f8   : > { %v8012_v63 = vpop.f32.mrf.mxu0  ;;  %v7931_v12 = vpop.f32.mrf.mxu1 }
 0x6f9   : > { %16957 = vst [vmem:[#allocation51_spill] sm:$0xff] %v16215_v10  ;;  %v8125_v1 = vadd.f32 %v8012_v63, %v7631_v31  ;;  %v16221_v35 = vadd.f32 %v7931_v12, %v16154_v34 }
 0x6fa   : > { %v8014_v22 = vpop.f32.mrf.mxu0  ;;  %v7935_v46 = vpop.f32.mrf.mxu1 }
 0x6fb   : > { %v8126_v60 = vadd.f32 %v8014_v22, %v7632_v47  ;;  %v16224_v28 = vadd.f32 %v7935_v46, %v16159_v29 }
 0x6fc   : > { %v8018_v13 = vpop.f32.mrf.mxu0  ;;  %v7937_v0 = vpop.f32.mrf.mxu1 }
 0x6fd   : > { %v8132_v43 = vadd.f32 %v8018_v13, %v7638_v38  ;;  %v16227_v44 = vadd.f32 %v7937_v0, %v16162_v2 }
 0x6fe   : > { %v8020_v21 = vpop.f32.mrf.mxu0  ;;  %v11806_v20 = vpop.f32.mrf.mxu1 }
 0x6ff   : > { %v8133_v23 = vadd.f32 %v8020_v21, %v7639_v4  ;;  %v8127_v36 = vadd.f32 %v11806_v20, %v16166_v5 }
 0x700   : > { %v8024_v31 = vpop.f32.mrf.mxu0  ;;  %v8095_v34 = vpop.f32.mrf.mxu1 }
 0x701   : > { %v8139_v26 = vadd.f32 %v8024_v31, %v7645_v39  ;;  %v8120_v41 = vadd.f32 %v8095_v34, %v16170_v45 }
 0x702   : > { %v8026_v47 = vpop.f32.mrf.mxu0  ;;  %v11809_v25 = vpop.f32.mrf.mxu1 }
 0x703   : > { %v8140_v29 = vadd.f32 %v8026_v47, %v7646_v30  ;;  %v8141_v54 = vadd.f32 %v11809_v25, %v16174_v17 }
 0x704   : > { %v16232_v18 = vpop.f32.mrf.mxu0  ;;  %v8105_v38 = vpop.f32.mrf.mxu1 }
 0x705   : > { %v8134_v2 = vadd.f32 %v8105_v38, %v16178_v53 }
 0x706   : > { %v16235_v56 = vpop.f32.mrf.mxu0  ;;  %v16237_v4 = vpop.f32.mrf.mxu1 }
 0x708   : > { %v16239_v5 = vpop.f32.mrf.mxu0  ;;  %v16241_v52 = vpop.f32.mrf.mxu1 }
 0x70a   : > { %v16243_v27 = vpop.f32.mrf.mxu0 }
 0x70b   : > { %v16245_v45 = vpop.f32.mrf.mxu1 }
 0x70c   : > { %v16247_v39 = vpop.f32.mrf.mxu0 }
 0x70d   : > { %v16249_v17 = vpop.f32.mrf.mxu1 }
 0x70e   : > { %v16251_v16 = vpop.f32.mrf.mxu0 }
 0x70f   : > { %v16253_v62 = vpop.f32.mrf.mxu1 }
 0x710   : > { %v16255_v53 = vpop.f32.mrf.mxu0 }
 0x711   : > { %v16257_v30 = vpop.f32.mrf.mxu1 }
 0x712   : > { %v16259_v7 = vpop.f32.mrf.mxu0 }
 0x713   : > { %v16261_v19 = vpop.f32.mrf.mxu1 }
 0x714   : > { %v11816_v9 = vpop.f32.mrf.mxu0 }
 0x715   : > { %v16263_v42 = vadd.f32 %v11816_v9, %v8127_v36  ;;  %v16265_v15 = vpop.f32.mrf.mxu1 }
 0x716   : > { %v8589_v55 = vpop.f32.mrf.mxu0 }
 0x717   : > { %16958 = vst [vmem:[#allocation37_spill] sm:$0xff] %v16263_v42  ;;  %v16267_v3 = vadd.f32 %v8589_v55, %v8120_v41  ;;  %v8500_v61 = vpop.f32.mrf.mxu1 }
 0x718   : > { %v8612_v11 = vadd.f32 %v8500_v61, %v8118_v8 }
 0x719   : > { %16959 = vst [vmem:[#allocation38_spill] sm:$0xff] %v16267_v3  ;;  %v11819_v57 = vpop.f32.mrf.mxu0  ;;  %v16269_v63 = vpop.f32.mrf.mxu1 }
 0x71a   : > { %16960 = vst [vmem:[#allocation40_spill] sm:$0xff] %v16269_v63  ;;  %v16271_v12 = vadd.f32 %v11819_v57, %v8141_v54 }
 0x71b   : > { %v8599_v22 = vpop.f32.mrf.mxu0  ;;  %v8506_v46 = vpop.f32.mrf.mxu1 }
 0x71c   : > { %16961 = vst [vmem:[#allocation48_spill] sm:$0xff] %v16271_v12  ;;  %v16273_v13 = vadd.f32 %v8599_v22, %v8134_v2  ;;  %v8619_v0 = vadd.f32 %v8506_v46, %v8125_v1 }
 0x71d   : > { %v8816_v21 = vpop.f32.mrf.mxu0  ;;  %v8508_v20 = vpop.f32.mrf.mxu1 }
 0x71e   : > { %16962 = vst [vmem:[#allocation54_spill] sm:$0xff] %v16273_v13  ;;  %v8620_v36 = vadd.f32 %v8508_v20, %v8126_v60 }
 0x71f   : > { %v8818_v31 = vpop.f32.mrf.mxu0  ;;  %v8512_v34 = vpop.f32.mrf.mxu1 }
 0x720   : > { %v8626_v47 = vadd.f32 %v8512_v34, %v8132_v43 }
 0x721   : > { %v16275_v41 = vpop.f32.mrf.mxu0  ;;  %v8514_v25 = vpop.f32.mrf.mxu1 }
 0x722   : > { %v8627_v8 = vadd.f32 %v8514_v25, %v8133_v23 }
 0x723   : > { %v16277_v38 = vpop.f32.mrf.mxu0  ;;  %v8518_v9 = vpop.f32.mrf.mxu1 }
 0x724   : > { %v8633_v54 = vadd.f32 %v8518_v9, %v8139_v26 }
 0x725   : > { %v16279_v55 = vpop.f32.mrf.mxu0  ;;  %v8520_v61 = vpop.f32.mrf.mxu1 }
 0x726   : > { %v8634_v2 = vadd.f32 %v8520_v61, %v8140_v29 }
 0x727   : > { %v16281_v57 = vpop.f32.mrf.mxu0  ;;  %v8905_v1 = vpop.f32.mrf.mxu1 }
 0x729   : > { %v16283_v22 = vpop.f32.mrf.mxu0  ;;  %v8907_v60 = vpop.f32.mrf.mxu1 }
 0x72a   : > { %16963 = vst [vmem:[#allocation34_spill] sm:$0xff] %v16283_v22 }
 0x72b   : > { %v16285_v46 = vpop.f32.mrf.mxu0  ;;  %v8911_v43 = vpop.f32.mrf.mxu1 }
 0x72d   : > { %v8994_v20 = vpop.f32.mrf.mxu0  ;;  %v8913_v34 = vpop.f32.mrf.mxu1 }
 0x72e   : > { %v16287_v23 = vadd.f32 %v8994_v20, %v8612_v11 }
 0x72f   : > { %v16289_v25 = vpop.f32.mrf.mxu0  ;;  %v8917_v26 = vpop.f32.mrf.mxu1 }
 0x730   : > { %16964 = vst [vmem:[#allocation43_spill] sm:$0xff] %v16287_v23  ;;  %16965 = vst [vmem:[#allocation53_spill] sm:$0xff] %v16289_v25 }
 0x731   : > { %v9000_v9 = vpop.f32.mrf.mxu0  ;;  %v8919_v12 = vpop.f32.mrf.mxu1 }
 0x732   : > { %v16291_v13 = vadd.f32 %v9000_v9, %v8619_v0  ;;  %v8610_v0 = vadd.f32 %v16232_v18, %v16200_v32  ;;  %v8617_v32 = vadd.f32 %v16239_v5, %v16210_v6  ;;  %v8624_v6 = vadd.f32 %v16247_v39, %v16218_v48 }
 0x733   : > { %v9002_v29 = vpop.f32.mrf.mxu0  ;;  %v16293_v61 = vpop.f32.mrf.mxu1  ;;  %v8622_v48 = vadd.f32 %v16253_v62, %v16194_v24 }
 0x734   : > { %16966 = vst [vmem:[#allocation41_spill] sm:$0xff] %v16291_v13  ;;  %v16295_v42 = vadd.f32 %v9002_v29, %v8620_v36 }
 0x735   : > { %v9006_v3 = vpop.f32.mrf.mxu0  ;;  %v16297_v22 = vpop.f32.mrf.mxu1 }
 0x736   : > { %v16299_v63 = vadd.f32 %v9006_v3, %v8626_v47  ;;  %v8611_v3 = vadd.f32 %v16235_v56, %v16205_v50  ;;  %v8608_v47 = vadd.f32 %v16237_v4, %v16182_v37  ;;  %v16325_v56 = vpop.permute.xlu1 %9630  ;;  %v8618_v37 = vadd.f32 %v16243_v27, %v16213_v14 }
 0x737   : > { %v9008_v10 = vpop.f32.mrf.mxu0  ;;  %v16301_v11 = vpop.f32.mrf.mxu1  ;;  %v9111_v4 = vadd.f32 %v8911_v43, %v8617_v32 }
 0x738   : > { %16967 = vst [vmem:[#allocation32_spill] sm:$0xff] %v16299_v63  ;;  %v16303_v20 = vadd.f32 %v9008_v10, %v8627_v8  ;;  %v9104_v63 = vadd.f32 %v8905_v1, %v8610_v0  ;;  %v9102_v18 = vadd.f32 %v8816_v21, %v8608_v47  ;;  %v8615_v0 = vadd.f32 %v16245_v45, %v16188_v59  ;;  %v16348_v43 = vpop.permute.xlu0 %9635  ;;  %v10148_v47 = vld [vmem:[#allocation5 + $0xde0] sm:$0xff] }
 0x739   : > { %v9012_v23 = vpop.f32.mrf.mxu0  ;;  %v16305_v25 = vpop.f32.mrf.mxu1  ;;  %v8616_v21 = vadd.f32 %v16249_v17, %v16191_v58  ;;  %v8625_v59 = vadd.f32 %v16251_v16, %v16221_v35 }
 0x73a   : > { %16968 = vst [vmem:[#allocation42_spill] sm:$0xff] %v16303_v20  ;;  %v16309_v9 = vadd.f32 %v9012_v23, %v8633_v54  ;;  %v9105_v54 = vadd.f32 %v8907_v60, %v8611_v3  ;;  %v9112_v60 = vadd.f32 %v8913_v34, %v8618_v37  ;;  %v9109_v58 = vadd.f32 %v16275_v41, %v8615_v0 }
 0x73b   : > { %v9014_v36 = vpop.f32.mrf.mxu0  ;;  %v16311_v29 = vpop.f32.mrf.mxu1  ;;  %v9110_v17 = vadd.f32 %v16277_v38, %v8616_v21  ;;  %v9119_v35 = vadd.f32 %v8919_v12, %v8625_v59  ;;  %v10145_v12 = vld [vmem:[#allocation5 + $0xdc8] sm:$0xff] }
 0x73c   : > { %16969 = vst [vmem:[#allocation55_spill] sm:$0xff] %v16309_v9  ;;  %v16317_v10 = vadd.f32 %v9014_v36, %v8634_v2  ;;  %v8609_v9 = vadd.f32 %v16241_v52, %v16185_v51  ;;  %v9118_v36 = vadd.f32 %v8917_v26, %v8624_v6  ;;  %v8623_v26 = vadd.f32 %v16257_v30, %v16197_v33  ;;  %v10141_v21 = vld [vmem:[#allocation5 + $0xda8] sm:$0xff] }
 0x73d   : > { %v9399_v8 = vpop.f32.mrf.mxu0  ;;  %v16319_v20 = vpop.f32.mrf.mxu1  ;;  %v9116_v6 = vadd.f32 %v16279_v55, %v8622_v48  ;;  %v10140_v55 = vld [vmem:[#allocation5 + $0xda0] sm:$0xff] }
 0x73e   : > { %v9598_v23 = vadd.f32 %v9399_v8, %v9104_v63  ;;  %v9103_v5 = vadd.f32 %v8818_v31, %v8609_v9 }
 0x73f   : > { %v9401_v13 = vpop.f32.mrf.mxu0  ;;  %v9310_v50 = vpop.f32.mrf.mxu1 }
 0x740   : > { %v9599_v2 = vadd.f32 %v9401_v13, %v9105_v54  ;;  %v9596_v1 = vadd.f32 %v9310_v50, %v9102_v18  ;;  %v16334_v63 = vadd.f32 %v16325_v56, %v9598_v23  ;;  %v8632_v18 = vadd.f32 %v16259_v7, %v16227_v44  ;;  %v10020_v44 = vld [vmem:[#allocation5 + $0x9e0] sm:$0xff] }
 0x741   : > { %v9405_v51 = vpop.f32.mrf.mxu0  ;;  %v9312_v52 = vpop.f32.mrf.mxu1  ;;  %v8631_v7 = vadd.f32 %v16255_v53, %v16224_v28  ;;  %v10017_v53 = vld [vmem:[#allocation5 + $0x9c8] sm:$0xff] }
 0x742   : > { %v16339_v14 = vadd.f32 %v16325_v56, %v9599_v2  ;;  %v9605_v27 = vadd.f32 %v9405_v51, %v9111_v4  ;;  %v16346_v45 = vadd.f32 %v16325_v56, %v9596_v1  ;;  %v9597_v39 = vadd.f32 %v9312_v52, %v9103_v5  ;;  %v10144_v4 = vld [vmem:[#allocation5 + $0xdc0] sm:$0xff]  ;;  %v16373_v2 = vpop.permute.xlu1 %9640 }
 0x743   : > { %v9407_v13 = vpop.f32.mrf.mxu0  ;;  %v9316_v31 = vpop.f32.mrf.mxu1  ;;  %v9678_v16 = vmax.f32 %v16334_v63, 0.0  ;;  %v9117_v5 = vadd.f32 %v16281_v57, %v8623_v26  ;;  %v8630_v57 = vadd.f32 %v16265_v15, %v16207_v40  ;;  %v9125_v48 = vadd.f32 %v16293_v61, %v8631_v7  ;;  %v10013_v40 = vld [vmem:[#allocation5 + $0x9a8] sm:$0xff]  ;;  %v10142_v63 = vld [vmem:[#allocation5 + $0xdb0] sm:$0xff] }
 0x744   : > { %v9679_v34 = vmax.f32 %v16339_v14, 0.0  ;;  %v9606_v9 = vadd.f32 %v9407_v13, %v9112_v60  ;;  %v16355_v24 = vadd.f32 %v16325_v56, %v9597_v39  ;;  %v16358_v8 = vadd.f32 %v16348_v43, %v9605_v27  ;;  %v9783_v14 = vld [vmem:[#allocation5 + $0x278] sm:$0xff] }
 0x745   : > { %v9411_v62 = vpop.f32.mrf.mxu0  ;;  %v9318_v3 = vpop.f32.mrf.mxu1  ;;  %v9603_v38 = vadd.f32 %v9316_v31, %v9109_v58  ;;  %v9676_v54 = vmax.f32 %v16346_v45, 0.0  ;;  %v9126_v60 = vadd.f32 %v16297_v22, %v8632_v18  ;;  %v10016_v58 = vld [vmem:[#allocation5 + $0x9c0] sm:$0xff]  ;;  %v9124_v15 = vadd.f32 %v16285_v46, %v8630_v57  ;;  %v10014_v45 = vld [vmem:[#allocation5 + $0x9b0] sm:$0xff] }
 0x746   : > { %v16361_v41 = vadd.f32 %v16348_v43, %v9606_v9  ;;  %v9604_v32 = vadd.f32 %v9318_v3, %v9110_v17  ;;  %10386 = vmatprep.mubr.f32.mxu0 %v9679_v34  ;;  %v9677_v23 = vmax.f32 %v16355_v24, 0.0  ;;  %v9612_v0 = vadd.f32 %v9411_v62, %v9118_v36  ;;  %v10137_v17 = vld [vmem:[#allocation5 + $0xd88] sm:$0xff]  ;;  %v10136_v3 = vld [vmem:[#allocation5 + $0xd80] sm:$0xff]  ;;  %v9727_v24 = vld [vmem:[#allocation5 + $0xb8] sm:$0xff] }
 0x747   : > { %v9413_v50 = vpop.f32.mrf.mxu0  ;;  %10387 = vmatmul.mubr.f32.vlgmr.msra.gmra.mxu0 %v9678_v16  ;;  %v9322_v37 = vpop.f32.mrf.mxu1  ;;  %v9685_v27 = vmax.f32 %v16358_v8, 0.0  ;;  %v16388_v59 = vadd.f32 %v16348_v43, %v9603_v38  ;;  %v10012_v46 = vld [vmem:[#allocation5 + $0x9a0] sm:$0xff]  ;;  %v10134_v8 = vld [vmem:[#allocation5 + $0xd70] sm:$0xff] }
 0x748   : > { %v9686_v1 = vmax.f32 %v16361_v41, 0.0  ;;  %v16377_v33 = vadd.f32 %v16348_v43, %v9604_v32  ;;  %v9613_v30 = vadd.f32 %v9413_v50, %v9119_v35  ;;  %10501 = vmatpush1.msra.mxu0 %v10148_v47  ;;  %10297 = vmatprep.mubr.f32.mxu1 %v9677_v23  ;;  %v16402_v9 = vadd.f32 %v16373_v2, %v9612_v0  ;;  %v16411_v38 = vpop.permute.xlu0 %9645  ;;  %v16970_v0 = vld [vmem:[#allocation51_spill] sm:$0xff] }
 0x749   : > { %10502 = vmatprep.subr.mxu0 %v10145_v12  ;;  %v9417_v51 = vpop.f32.mrf.mxu0  ;;  %v9324_v52 = vpop.f32.mrf.mxu1  ;;  %10298 = vmatmul.mubr.f32.vlgmr.msra.gmra.mxu1 %v9676_v54  ;;  %v9610_v36 = vadd.f32 %v9322_v37, %v9116_v6  ;;  %v8629_v32 = vadd.f32 %v16261_v19, %v16202_v49  ;;  %v9683_v12 = vmax.f32 %v16388_v59, 0.0  ;;  %v10133_v37 = vld [vmem:[#allocation5 + $0xd68] sm:$0xff]  ;;  %v10006_v59 = vld [vmem:[#allocation5 + $0x970] sm:$0xff]  ;;  %v10067_v41 = vld [vmem:[#allocation5 + $0xb58] sm:$0xff] }
 0x74a   : > { %v16391_v28 = vadd.f32 %v16373_v2, %v9613_v30  ;;  %10503 = vmatpush1.msra.mxu0 %v10144_v4  ;;  %v9684_v22 = vmax.f32 %v16377_v33, 0.0  ;;  %v9611_v39 = vadd.f32 %v9324_v52, %v9117_v5  ;;  %10392 = vmatprep.mubr.f32.mxu0 %v9686_v1  ;;  %v9619_v26 = vadd.f32 %v9417_v51, %v9125_v48  ;;  %v16971_v30 = vld [vmem:[#allocation40_spill] sm:$0xff]  ;;  %v16972_v19 = vld [vmem:[#allocation34_spill] sm:$0xff] }
 0x74b   : > { %10412 = vmatpush1.msra.mxu1 %v10020_v44  ;;  %v9419_v13 = vpop.f32.mrf.mxu0  ;;  %v9328_v31 = vpop.f32.mrf.mxu1  ;;  %10504 = vmatprep.subr.mxu0 %v10141_v21  ;;  %v8613_v49 = vadd.f32 %v16971_v30, %v16970_v0  ;;  %v9123_v44 = vadd.f32 %v16972_v19, %v8629_v32  ;;  %v9692_v7 = vmax.f32 %v16402_v9, 0.0  ;;  %v16428_v6 = vadd.f32 %v16373_v2, %v9610_v36  ;;  %v10009_v5 = vld [vmem:[#allocation5 + $0x988] sm:$0xff]  ;;  %v10132_v51 = vld [vmem:[#allocation5 + $0xd60] sm:$0xff]  ;;  %v9951_v33 = vld [vmem:[#allocation5 + $0x7b8] sm:$0xff] }
 0x74c   : > { %v9620_v35 = vadd.f32 %v9419_v13, %v9126_v60  ;;  %10393 = vmatmul.mubr.f32.gmra.mxu0 %v9685_v27  ;;  %v9693_v61 = vmax.f32 %v16391_v28, 0.0  ;;  %v16409_v62 = vadd.f32 %v16373_v2, %v9611_v39  ;;  %10413 = vmatprep.subr.mxu1 %v10017_v53  ;;  %v10008_v21 = vld [vmem:[#allocation5 + $0x980] sm:$0xff]  ;;  %v10129_v60 = vld [vmem:[#allocation5 + $0xd48] sm:$0xff]  ;;  %v16437_v48 = vadd.f32 %v16411_v38, %v9619_v26  ;;  %v10059_v28 = vld [vmem:[#allocation5 + $0xb18] sm:$0xff] }
 0x74d   : > { %10505 = vmatpush1.msra.mxu0 %v10140_v55  ;;  %v9330_v47 = vpop.f32.mrf.mxu1  ;;  %10414 = vmatpush1.msra.mxu1 %v10016_v58  ;;  %v16973_v55 = vld [vmem:[#allocation53_spill] sm:$0xff]  ;;  %v9617_v39 = vadd.f32 %v9328_v31, %v9123_v44  ;;  %v10126_v9 = vld [vmem:[#allocation5 + $0xd30] sm:$0xff] }
 0x74e   : > { %10506 = vmatprep.subr.mxu0 %v10137_v17  ;;  %v16417_v18 = vadd.f32 %v16411_v38, %v9620_v35  ;;  %10303 = vmatprep.mubr.f32.mxu1 %v9684_v22  ;;  %v9618_v50 = vadd.f32 %v9330_v47, %v9124_v15  ;;  %v9691_v52 = vmax.f32 %v16409_v62, 0.0  ;;  %v9107_v57 = vadd.f32 %v16973_v55, %v8613_v49  ;;  %v10005_v13 = vld [vmem:[#allocation5 + $0x968] sm:$0xff]  ;;  %v10128_v36 = vld [vmem:[#allocation5 + $0xd40] sm:$0xff]  ;;  %v9943_v62 = vld [vmem:[#allocation5 + $0x778] sm:$0xff] }
 0x74f   : > { %10415 = vmatprep.subr.mxu1 %v10013_v40  ;;  %v16421_v4 = vpop.f32.mrf.mxu1  ;;  %10507 = vmatpush1.msra.mxu0 %v10136_v3  ;;  %v9690_v35 = vmax.f32 %v16428_v6, 0.0  ;;  %v10004_v15 = vld [vmem:[#allocation5 + $0x960] sm:$0xff]  ;;  %v10125_v31 = vld [vmem:[#allocation5 + $0xd28] sm:$0xff]  ;;  %v16766_v3 = vmax.f32 %v16437_v48, 0.0  ;;  %v16450_v47 = vadd.f32 %v16411_v38, %v9617_v39  ;;  %v9998_v6 = vld [vmem:[#allocation5 + $0x930] sm:$0xff] }
 0x750   : > { %10304 = vmatmul.mubr.f32.gmra.mxu1 %v9683_v12  ;;  %10398 = vmatprep.mubr.f32.mxu0 %v9693_v61  ;;  %v9700_v58 = vmax.f32 %v16417_v18, 0.0  ;;  %v16443_v17 = vadd.f32 %v16411_v38, %v9618_v50  ;;  %v10001_v32 = vld [vmem:[#allocation5 + $0x948] sm:$0xff]  ;;  %v10124_v26 = vld [vmem:[#allocation5 + $0xd20] sm:$0xff]  ;;  %v10051_v18 = vld [vmem:[#allocation5 + $0xad8] sm:$0xff] }
 0x751   : > { %10416 = vmatpush1.msra.mxu1 %v10012_v46  ;;  %v9490_v53 = vpop.f32.mrf.mxu1  ;;  %10508 = vmatprep.subr.mxu0 %v10133_v37  ;;  %v10000_v50 = vld [vmem:[#allocation5 + $0x940] sm:$0xff]  ;;  %v10121_v37 = vld [vmem:[#allocation5 + $0xd08] sm:$0xff]  ;;  %v9697_v19 = vmax.f32 %v16450_v47, 0.0  ;;  %v9930_v47 = vld [vmem:[#allocation5 + $0x710] sm:$0xff] }
 0x752   : > { %10399 = vmatmul.mubr.f32.gmra.mxu0 %v9692_v7  ;;  %10417 = vmatprep.subr.mxu1 %v10009_v5  ;;  %v9601_v40 = vadd.f32 %v9490_v53, %v9107_v57  ;;  %v9698_v46 = vmax.f32 %v16443_v17, 0.0  ;;  %v9997_v30 = vld [vmem:[#allocation5 + $0x928] sm:$0xff]  ;;  %v10120_v49 = vld [vmem:[#allocation5 + $0xd00] sm:$0xff]  ;;  %v11836_v57 = vpop.f32.mrf.mxu0  ;;  %v9935_v17 = vld [vmem:[#allocation5 + $0x738] sm:$0xff] }
 0x753   : > { %10509 = vmatpush1.msra.mxu0 %v10132_v51  ;;  %10418 = vmatpush1.msra.mxu1 %v10008_v21  ;;  %v9996_v44 = vld [vmem:[#allocation5 + $0x920] sm:$0xff]  ;;  %v10117_v5 = vld [vmem:[#allocation5 + $0xce8] sm:$0xff] }
 0x754   : > { %10510 = vmatprep.subr.mxu0 %v10129_v60  ;;  %10309 = vmatprep.mubr.f32.mxu1 %v9691_v52  ;;  %v16458_v0 = vadd.f32 %v16325_v56, %v9601_v40  ;;  %v9993_v51 = vld [vmem:[#allocation5 + $0x908] sm:$0xff]  ;;  %v10116_v21 = vld [vmem:[#allocation5 + $0xce0] sm:$0xff] }
 0x755   : > { %10419 = vmatprep.subr.mxu1 %v10005_v13  ;;  %10511 = vmatpush1.msra.mxu0 %v10128_v36  ;;  %v9992_v53 = vld [vmem:[#allocation5 + $0x900] sm:$0xff]  ;;  %v10113_v55 = vld [vmem:[#allocation5 + $0xcc8] sm:$0xff] }
 0x756   : > { %10310 = vmatmul.mubr.f32.gmra.mxu1 %v9690_v35  ;;  %10404 = vmatprep.mubr.f32.mxu0 %v9700_v58  ;;  %v9681_v60 = vmax.f32 %v16458_v0, 0.0  ;;  %v9989_v39 = vld [vmem:[#allocation5 + $0x8e8] sm:$0xff]  ;;  %v10112_v13 = vld [vmem:[#allocation5 + $0xcc0] sm:$0xff]  ;;  %v9923_v0 = vld [vmem:[#allocation5 + $0x6d8] sm:$0xff] }
 0x757   : > { %10420 = vmatpush1.msra.mxu1 %v10004_v15  ;;  %10512 = vmatprep.subr.mxu0 %v10125_v31  ;;  %v9988_v36 = vld [vmem:[#allocation5 + $0x8e0] sm:$0xff]  ;;  %v10109_v40 = vld [vmem:[#allocation5 + $0xca8] sm:$0xff] }
 0x758   : > { %10405 = vmatmul.mubr.f32.gmra.mxu0 %v16766_v3  ;;  %10421 = vmatprep.subr.mxu1 %v10001_v32  ;;  %v9985_v15 = vld [vmem:[#allocation5 + $0x8c8] sm:$0xff]  ;;  %v10108_v31 = vld [vmem:[#allocation5 + $0xca0] sm:$0xff]  ;;  %v9706_v3 = vld [vmem:[#allocation5 + $0x10] sm:$0xff] }
 0x759   : > { %10513 = vmatpush1.msra.mxu0 %v10124_v26  ;;  %10422 = vmatpush1.msra.mxu1 %v10000_v50  ;;  %v9984_v32 = vld [vmem:[#allocation5 + $0x8c0] sm:$0xff]  ;;  %v9577_v26 = vpop.f32.mrf.mxu0  ;;  %v10105_v50 = vld [vmem:[#allocation5 + $0xc88] sm:$0xff] }
 0x75a   : > { %10514 = vmatprep.subr.mxu0 %v10121_v37  ;;  %10315 = vmatprep.mubr.f32.mxu1 %v9698_v46  ;;  %v9981_v37 = vld [vmem:[#allocation5 + $0x8a8] sm:$0xff] }
 0x75b   : > { %10423 = vmatprep.subr.mxu1 %v9997_v30  ;;  %10515 = vmatpush1.msra.mxu0 %v10120_v49  ;;  %v16974_v30 = vld [vmem:[#allocation38_spill] sm:$0xff] }
 0x75c   : > { %10316 = vmatmul.mubr.f32.gmra.mxu1 %v9697_v19  ;;  %10516 = vmatprep.subr.mxu0 %v10117_v5  ;;  %v9108_v49 = vadd.f32 %v16305_v25, %v16974_v30  ;;  %v9980_v5 = vld [vmem:[#allocation5 + $0x8a0] sm:$0xff] }
 0x75d   : > { %10424 = vmatpush1.msra.mxu1 %v9996_v44  ;;  %10517 = vmatpush1.msra.mxu0 %v10116_v21  ;;  %v10104_v44 = vld [vmem:[#allocation5 + $0xc80] sm:$0xff]  ;;  %v9977_v21 = vld [vmem:[#allocation5 + $0x888] sm:$0xff] }
 0x75e   : > { %10425 = vmatprep.subr.mxu1 %v9993_v51  ;;  %10518 = vmatprep.subr.mxu0 %v10113_v55  ;;  %v10101_v51 = vld [vmem:[#allocation5 + $0xc68] sm:$0xff]  ;;  %v10100_v55 = vld [vmem:[#allocation5 + $0xc60] sm:$0xff] }
 0x75f   : > { %10426 = vmatpush1.msra.mxu1 %v9992_v53  ;;  %10475 = vmatprep.mubr.f32.mxu1 %v9681_v60  ;;  %v9602_v53 = vadd.f32 %v9577_v26, %v9108_v49  ;;  %v10096_v25 = vld [vmem:[#allocation5 + $0xc40] sm:$0xff]  ;;  %v9969_v26 = vld [vmem:[#allocation5 + $0x848] sm:$0xff] }
 0x760   : > { %10427 = vmatprep.subr.mxu1 %v9989_v39  ;;  %10519 = vmatpush1.msra.mxu0 %v10112_v13  ;;  %v9976_v39 = vld [vmem:[#allocation5 + $0x880] sm:$0xff]  ;;  %v10097_v13 = vld [vmem:[#allocation5 + $0xc48] sm:$0xff] }
 0x761   : > { %10428 = vmatpush1.msra.mxu1 %v9988_v36  ;;  %10520 = vmatprep.subr.mxu0 %v10109_v40  ;;  %v9973_v36 = vld [vmem:[#allocation5 + $0x868] sm:$0xff]  ;;  %v9972_v40 = vld [vmem:[#allocation5 + $0x860] sm:$0xff] }
 0x762   : > { %10429 = vmatprep.subr.mxu1 %v9985_v15  ;;  %10521 = vmatpush1.msra.mxu0 %v10108_v31  ;;  %v16975_v15 = vld [vmem:[#allocation37_spill] sm:$0xff]  ;;  %v11839_v31 = vpop.f32.mrf.mxu0 }
 0x763   : > { %10430 = vmatpush1.msra.mxu1 %v9984_v32  ;;  %10522 = vmatprep.subr.mxu0 %v10105_v50  ;;  %v9115_v30 = vadd.f32 %v16301_v11, %v16975_v15  ;;  %v10093_v32 = vld [vmem:[#allocation5 + $0xc28] sm:$0xff]  ;;  %v16475_v50 = vadd.f32 %v16325_v56, %v9602_v53  ;;  %v9968_v49 = vld [vmem:[#allocation5 + $0x840] sm:$0xff]  ;;  %v9766_v15 = vld [vmem:[#allocation5 + $0x1f0] sm:$0xff] }
 0x764   : > { %10431 = vmatprep.subr.mxu1 %v9981_v37  ;;  %10523 = vmatpush1.msra.mxu0 %v10104_v44  ;;  %v10092_v37 = vld [vmem:[#allocation5 + $0xc20] sm:$0xff] }
 0x765   : > { %10432 = vmatpush1.msra.mxu1 %v9980_v5  ;;  %10524 = vmatprep.subr.mxu0 %v10101_v51  ;;  %v9609_v44 = vadd.f32 %v11836_v57, %v9115_v30  ;;  %v10089_v5 = vld [vmem:[#allocation5 + $0xc08] sm:$0xff]  ;;  %v10088_v11 = vld [vmem:[#allocation5 + $0xc00] sm:$0xff] }
 0x766   : > { %10433 = vmatprep.subr.mxu1 %v9977_v21  ;;  %10525 = vmatpush1.msra.mxu0 %v10100_v55  ;;  %v9965_v51 = vld [vmem:[#allocation5 + $0x828] sm:$0xff]  ;;  %v9587_v21 = vpop.f32.mrf.mxu0  ;;  %v9964_v55 = vld [vmem:[#allocation5 + $0x820] sm:$0xff] }
 0x767   : > { %10434 = vmatpush1.msra.mxu1 %v9976_v39  ;;  %10526 = vmatprep.subr.mxu0 %v10097_v13  ;;  %v16976_v39 = vld [vmem:[#allocation54_spill] sm:$0xff]  ;;  %v16765_v13 = vmax.f32 %v16475_v50, 0.0  ;;  %v9960_v30 = vld [vmem:[#allocation5 + $0x800] sm:$0xff] }
 0x768   : > { %10435 = vmatprep.subr.mxu1 %v9973_v36  ;;  %10527 = vmatpush1.msra.mxu0 %v10096_v25  ;;  %v9122_v53 = vadd.f32 %v16319_v20, %v16976_v39  ;;  %v9767_v36 = vld [vmem:[#allocation5 + $0x1f8] sm:$0xff]  ;;  %v9961_v57 = vld [vmem:[#allocation5 + $0x808] sm:$0xff]  ;;  %v16481_v25 = vadd.f32 %v16348_v43, %v9609_v44  ;;  %v9758_v39 = vld [vmem:[#allocation5 + $0x1b0] sm:$0xff] }
 0x769   : > { %10436 = vmatpush1.msra.mxu1 %v9972_v40  ;;  %10528 = vmatprep.subr.mxu0 %v10093_v32  ;;  %v16977_v40 = vmov 0.0   ;;  %v9763_v20 = vld [vmem:[#allocation5 + $0x1d8] sm:$0xff] }
 0x76a   : > { %10437 = vmatprep.subr.mxu1 %v9969_v26  ;;  %10529 = vmatpush1.msra.mxu0 %v10092_v37  ;;  %v9616_v32 = vadd.f32 %v9587_v21, %v9122_v53  ;;  %v10085_v26 = vld [vmem:[#allocation5 + $0xbe8] sm:$0xff]  ;;  %v9762_v37 = vld [vmem:[#allocation5 + $0x1d0] sm:$0xff]  ;;  %v16978_v44 = vld [vmem:[#allocation48_spill] sm:$0xff] }
 0x76b   : > { %10438 = vmatpush1.msra.mxu1 %v9968_v49  ;;  %10530 = vmatprep.subr.mxu0 %v10089_v5  ;;  %v10084_v49 = vld [vmem:[#allocation5 + $0xbe0] sm:$0xff]  ;;  %v9129_v5 = vadd.f32 %v16311_v29, %v16978_v44  ;;  %v10081_v21 = vld [vmem:[#allocation5 + $0xbc8] sm:$0xff]  ;;  %v9755_v29 = vld [vmem:[#allocation5 + $0x198] sm:$0xff] }
 0x76c   : > { %10439 = vmatprep.subr.mxu1 %v9965_v51  ;;  %10531 = vmatpush1.msra.mxu0 %v10088_v11  ;;  %v16764_v51 = vmax.f32 %v16481_v25, 0.0  ;;  %v9759_v11 = vld [vmem:[#allocation5 + $0x1b8] sm:$0xff]  ;;  %v10080_v53 = vld [vmem:[#allocation5 + $0xbc0] sm:$0xff] }
 0x76d   : > { %10564 = vmatprep.mubr.f32.mxu0 %v16977_v40  ;;  %10440 = vmatpush1.msra.mxu1 %v9964_v55  ;;  %v16490_v55 = vadd.f32 %v16373_v2, %v9616_v32  ;;  %v9747_v44 = vld [vmem:[#allocation5 + $0x158] sm:$0xff] }
 0x76e   : > { %10565 = vmatmul.mubr.f32.vlgmr.msra.gmra.mxu0 %v16765_v13  ;;  %10589 = vmatprep.subr.mxu0 %v9767_v36  ;;  %v9623_v36 = vadd.f32 %v11839_v31, %v9129_v5  ;;  %v10069_v5 = vld [vmem:[#allocation5 + $0xb68] sm:$0xff] }
 0x76f   : > { %10441 = vmatprep.subr.mxu1 %v9961_v57  ;;  %10590 = vmatpush1.msra.mxu0 %v9766_v15  ;;  %v10077_v57 = vld [vmem:[#allocation5 + $0xba8] sm:$0xff]  ;;  %v9754_v15 = vld [vmem:[#allocation5 + $0x190] sm:$0xff]  ;;  %v16763_v32 = vmax.f32 %v16490_v55, 0.0 }
 0x770   : > { %10442 = vmatpush1.msra.mxu1 %v9960_v30  ;;  %10591 = vmatprep.subr.mxu0 %v9763_v20  ;;  %v10076_v30 = vld [vmem:[#allocation5 + $0xba0] sm:$0xff]  ;;  %v9751_v20 = vld [vmem:[#allocation5 + $0x178] sm:$0xff]  ;;  %v16497_v31 = vadd.f32 %v16411_v38, %v9623_v36  ;;  %v10065_v36 = vld [vmem:[#allocation5 + $0xb48] sm:$0xff] }
 0x771   : > { %10443 = vmatprep.subr.mxu1 %v10085_v26  ;;  %10570 = vmatprep.mubr.f32.mxu0 %v16977_v40  ;;  %v10073_v26 = vld [vmem:[#allocation5 + $0xb88] sm:$0xff] }
 0x772   : > { %10592 = vmatpush1.msra.mxu0 %v9762_v37  ;;  %10444 = vmatpush2.msra.mxu1 %v10084_v49  ;;  %v9750_v37 = vld [vmem:[#allocation5 + $0x170] sm:$0xff]  ;;  %v10072_v49 = vld [vmem:[#allocation5 + $0xb80] sm:$0xff] }
 0x773   : > { %10571 = vmatmul.mubr.f32.gmra.mxu0 %v16764_v51  ;;  %10593 = vmatprep.subr.mxu0 %v9759_v11  ;;  %v9746_v11 = vld [vmem:[#allocation5 + $0x150] sm:$0xff] }
 0x774   : > { %10445 = vmatprep.subr.mxu1 %v10081_v21  ;;  %10594 = vmatpush1.msra.mxu0 %v9758_v39  ;;  %v10068_v21 = vld [vmem:[#allocation5 + $0xb60] sm:$0xff]  ;;  %v16762_v39 = vmax.f32 %v16497_v31, 0.0 }
 0x775   : > { %10446 = vmatpush2.msra.mxu1 %v10080_v53  ;;  %10595 = vmatprep.subr.mxu0 %v9755_v29  ;;  %v9743_v53 = vld [vmem:[#allocation5 + $0x138] sm:$0xff]  ;;  %v9742_v29 = vld [vmem:[#allocation5 + $0x130] sm:$0xff] }
 0x776   : > { %10447 = vmatprep.subr.mxu1 %v10077_v57  ;;  %10576 = vmatprep.mubr.f32.mxu0 %v16977_v40  ;;  %v10064_v57 = vld [vmem:[#allocation5 + $0xb40] sm:$0xff] }
 0x777   : > { %10596 = vmatpush1.msra.mxu0 %v9754_v15  ;;  %10448 = vmatpush2.msra.mxu1 %v10076_v30  ;;  %v9739_v15 = vld [vmem:[#allocation5 + $0x118] sm:$0xff]  ;;  %v10061_v30 = vld [vmem:[#allocation5 + $0xb28] sm:$0xff] }
 0x778   : > { %10577 = vmatmul.mubr.f32.gmra.mxu0 %v16763_v32  ;;  %10597 = vmatprep.subr.mxu0 %v9751_v20  ;;  %v9738_v20 = vld [vmem:[#allocation5 + $0x110] sm:$0xff] }
 0x779   : > { %10449 = vmatprep.subr.mxu1 %v10073_v26  ;;  %10598 = vmatpush1.msra.mxu0 %v9750_v37  ;;  %v16506_v26 = vpop.f32.mrf.mxu1  ;;  %v10060_v37 = vld [vmem:[#allocation5 + $0xb20] sm:$0xff]  ;;  %v16979_v32 = vld [vmem:[#allocation43_spill] sm:$0xff] }
 0x77a   : > { %10450 = vmatpush2.msra.mxu1 %v10072_v49  ;;  %10599 = vmatprep.subr.mxu0 %v9747_v44  ;;  %v9735_v49 = vld [vmem:[#allocation5 + $0xf8] sm:$0xff]  ;;  %v10057_v44 = vld [vmem:[#allocation5 + $0xb08] sm:$0xff]  ;;  %v9600_v51 = vadd.f32 %v16421_v4, %v16979_v32 }
 0x77b   : > { %10451 = vmatprep.subr.mxu1 %v10069_v5  ;;  %10582 = vmatprep.mubr.f32.mxu0 %v16977_v40  ;;  %v9734_v5 = vld [vmem:[#allocation5 + $0xf0] sm:$0xff] }
 0x77c   : > { %10600 = vmatpush1.msra.mxu0 %v9746_v11  ;;  %10452 = vmatpush2.msra.mxu1 %v10068_v21  ;;  %v10056_v11 = vld [vmem:[#allocation5 + $0xb00] sm:$0xff]  ;;  %v9731_v21 = vld [vmem:[#allocation5 + $0xd8] sm:$0xff]  ;;  %v16516_v4 = vadd.f32 %v16325_v56, %v9600_v51 }
 0x77d   : > { %10583 = vmatmul.mubr.f32.gmra.mxu0 %v16762_v39  ;;  %10601 = vmatprep.subr.mxu0 %v9743_v53  ;;  %v10053_v53 = vld [vmem:[#allocation5 + $0xae8] sm:$0xff]  ;;  %v9496_v39 = vpop.f32.mrf.mxu1  ;;  %v10024_v56 = vld [vmem:[#allocation5 + $0xa00] sm:$0xff]  ;;  %v9827_v51 = vld [vmem:[#allocation5 + $0x3d8] sm:$0xff] }
 0x77e   : > { %10453 = vmatprep.subr.mxu1 %v10065_v36  ;;  %10602 = vmatpush1.msra.mxu0 %v9742_v29  ;;  %v9730_v36 = vld [vmem:[#allocation5 + $0xd0] sm:$0xff]  ;;  %v10052_v29 = vld [vmem:[#allocation5 + $0xae0] sm:$0xff] }
 0x77f   : > { %10653 = vmatprep.mubr.f32.mxu0 %v9677_v23  ;;  %10454 = vmatpush2.msra.mxu1 %v10064_v57  ;;  %v10049_v23 = vld [vmem:[#allocation5 + $0xac8] sm:$0xff]  ;;  %v9726_v57 = vld [vmem:[#allocation5 + $0xb0] sm:$0xff] }
 0x780   : > { %10603 = vmatprep.subr.mxu0 %v9739_v15  ;;  %10455 = vmatprep.subr.mxu1 %v10061_v30  ;;  %v10048_v15 = vld [vmem:[#allocation5 + $0xac0] sm:$0xff]  ;;  %v9723_v30 = vld [vmem:[#allocation5 + $0x98] sm:$0xff] }
 0x781   : > { %10604 = vmatpush1.msra.mxu0 %v9738_v20  ;;  %10456 = vmatpush2.msra.mxu1 %v10060_v37  ;;  %v10045_v20 = vld [vmem:[#allocation5 + $0xaa8] sm:$0xff]  ;;  %v9722_v37 = vld [vmem:[#allocation5 + $0x90] sm:$0xff] }
 0x782   : > { %10605 = vmatprep.subr.mxu0 %v9735_v49  ;;  %10457 = vmatprep.subr.mxu1 %v10057_v44  ;;  %v16510_v49 = vpop.f32.mrf.mxu1  ;;  %v10044_v44 = vld [vmem:[#allocation5 + $0xaa0] sm:$0xff] }
 0x783   : > { %10606 = vmatpush1.msra.mxu0 %v9734_v5  ;;  %10458 = vmatpush2.msra.mxu1 %v10056_v11  ;;  %v9719_v5 = vld [vmem:[#allocation5 + $0x78] sm:$0xff]  ;;  %v10041_v11 = vld [vmem:[#allocation5 + $0xa88] sm:$0xff] }
 0x784   : > { %10607 = vmatprep.subr.mxu0 %v9731_v21  ;;  %10459 = vmatprep.subr.mxu1 %v10053_v53  ;;  %v9718_v21 = vld [vmem:[#allocation5 + $0x70] sm:$0xff]  ;;  %v10040_v53 = vld [vmem:[#allocation5 + $0xa80] sm:$0xff]  ;;  %v9502_v13 = vpop.f32.mrf.mxu1 }
 0x785   : > { %10608 = vmatpush1.msra.mxu0 %v9730_v36  ;;  %10460 = vmatpush2.msra.mxu1 %v10052_v29  ;;  %v9715_v36 = vld [vmem:[#allocation5 + $0x58] sm:$0xff]  ;;  %v10037_v29 = vld [vmem:[#allocation5 + $0xa68] sm:$0xff] }
 0x786   : > { %10609 = vmatprep.subr.mxu0 %v9727_v24  ;;  %10461 = vmatprep.subr.mxu1 %v10049_v23  ;;  %v9714_v24 = vld [vmem:[#allocation5 + $0x50] sm:$0xff]  ;;  %v10036_v23 = vld [vmem:[#allocation5 + $0xa60] sm:$0xff]  ;;  %v9506_v32 = vpop.f32.mrf.mxu1 }
 0x787   : > { %10610 = vmatpush1.msra.mxu0 %v9726_v57  ;;  %10462 = vmatpush2.msra.mxu1 %v10048_v15  ;;  %v9711_v57 = vld [vmem:[#allocation5 + $0x38] sm:$0xff]  ;;  %v9608_v15 = vadd.f32 %v9496_v39, %v16295_v42  ;;  %v16980_v39 = vld [vmem:[#allocation41_spill] sm:$0xff] }
 0x788   : > { %10611 = vmatprep.subr.mxu0 %v9723_v30  ;;  %10463 = vmatprep.subr.mxu1 %v10045_v20  ;;  %v10033_v30 = vld [vmem:[#allocation5 + $0xa48] sm:$0xff]  ;;  %v9710_v20 = vld [vmem:[#allocation5 + $0x30] sm:$0xff]  ;;  %v9831_v42 = vld [vmem:[#allocation5 + $0x3f8] sm:$0xff] }
 0x789   : > { %10612 = vmatpush1.msra.mxu0 %v9722_v37  ;;  %10464 = vmatpush2.msra.mxu1 %v10044_v44  ;;  %v10032_v37 = vld [vmem:[#allocation5 + $0xa40] sm:$0xff]  ;;  %v9707_v44 = vld [vmem:[#allocation5 + $0x18] sm:$0xff] }
 0x78a   : > { %10613 = vmatprep.subr.mxu0 %v9719_v5  ;;  %10465 = vmatprep.subr.mxu1 %v10041_v11  ;;  %v10029_v5 = vld [vmem:[#allocation5 + $0xa28] sm:$0xff]  ;;  %v10028_v11 = vld [vmem:[#allocation5 + $0xa20] sm:$0xff] }
 0x78b   : > { %10614 = vmatpush1.msra.mxu0 %v9718_v21  ;;  %10466 = vmatpush2.msra.mxu1 %v10040_v53  ;;  %v9607_v21 = vadd.f32 %v16506_v26, %v16980_v39  ;;  %v16521_v53 = vadd.f32 %v16348_v43, %v9608_v15  ;;  %v9895_v26 = vld [vmem:[#allocation5 + $0x5f8] sm:$0xff] }
 0x78c   : > { %10615 = vmatprep.subr.mxu0 %v9715_v36  ;;  %10467 = vmatprep.subr.mxu1 %v10037_v29  ;;  %v10025_v36 = vld [vmem:[#allocation5 + $0xa08] sm:$0xff]  ;;  %v9830_v29 = vld [vmem:[#allocation5 + $0x3f0] sm:$0xff]  ;;  %v9891_v39 = vld [vmem:[#allocation5 + $0x5d8] sm:$0xff] }
 0x78d   : > { %10616 = vmatpush1.msra.mxu0 %v9714_v24  ;;  %10468 = vmatpush2.msra.mxu1 %v10036_v23  ;;  %v16981_v24 = vld [vmem:[#allocation42_spill] sm:$0xff]  ;;  %v16526_v15 = vadd.f32 %v16348_v43, %v9607_v21  ;;  %v9819_v21 = vld [vmem:[#allocation5 + $0x398] sm:$0xff] }
 0x78e   : > { %10617 = vmatprep.subr.mxu0 %v9711_v57  ;;  %10469 = vmatprep.subr.mxu1 %v10033_v30  ;;  %v9615_v23 = vadd.f32 %v9502_v13, %v16981_v24  ;;  %v9826_v57 = vld [vmem:[#allocation5 + $0x3d0] sm:$0xff]  ;;  %v9680_v30 = vmax.f32 %v16516_v4, 0.0  ;;  %v9823_v13 = vld [vmem:[#allocation5 + $0x3b8] sm:$0xff] }
 0x78f   : > { %10618 = vmatpush1.msra.mxu0 %v9710_v20  ;;  %10470 = vmatpush2.msra.mxu1 %v10032_v37  ;;  %v9508_v20 = vpop.f32.mrf.mxu1  ;;  %v9688_v37 = vmax.f32 %v16521_v53, 0.0  ;;  %v9887_v24 = vld [vmem:[#allocation5 + $0x5b8] sm:$0xff]  ;;  %v10198_v4 = vld [vmem:[#allocation8 + $0xf0] sm:$0xff]  ;;  %v16986_v53 = vmax.f32 %v16481_v25, 0.0  ;;  %v10196_v25 = vld [vmem:[#allocation8 + $0xe0] sm:$0xff] }
 0x790   : > { %10619 = vmatprep.subr.mxu0 %v9707_v44  ;;  %10471 = vmatprep.subr.mxu1 %v10029_v5  ;;  %v16982_v44 = vld [vmem:[#allocation32_spill] sm:$0xff]  ;;  %v9622_v43 = vadd.f32 %v9508_v20, %v16317_v10 }
 0x791   : > { %10620 = vmatpush1.msra.mxu0 %v9706_v3  ;;  %10472 = vmatpush2.msra.mxu1 %v10028_v11  ;;  %v9894_v3 = vld [vmem:[#allocation5 + $0x5f0] sm:$0xff]  ;;  %v9614_v5 = vadd.f32 %v16510_v49, %v16982_v44  ;;  %v16532_v11 = vadd.f32 %v16373_v2, %v9615_v23  ;;  %v9815_v10 = vld [vmem:[#allocation5 + $0x378] sm:$0xff] }
 0x792   : > { %10621 = vmatprep.subr.mxu0 %v9831_v42  ;;  %10473 = vmatprep.subr.mxu1 %v10025_v36  ;;  %v9822_v42 = vld [vmem:[#allocation5 + $0x3b0] sm:$0xff] }
 0x793   : > { %10622 = vmatpush2.msra.mxu0 %v9830_v29  ;;  %10474 = vmatpush2.msra.mxu1 %v10024_v56  ;;  %v9890_v36 = vld [vmem:[#allocation5 + $0x5d0] sm:$0xff]  ;;  %v9687_v29 = vmax.f32 %v16526_v15, 0.0  ;;  %v16541_v23 = vadd.f32 %v16373_v2, %v9614_v5  ;;  %v9695_v56 = vmax.f32 %v16532_v11, 0.0  ;;  %v9811_v2 = vld [vmem:[#allocation5 + $0x358] sm:$0xff]  ;;  %v10181_v15 = vld [vmem:[#allocation8 + $0x68] sm:$0xff] }
 0x794   : > { %10623 = vmatprep.subr.mxu0 %v9827_v51  ;;  %10476 = vmatmul.mubr.f32.vlgmr.msra.gmra.mxu1 %v9680_v30  ;;  %v9818_v49 = vld [vmem:[#allocation5 + $0x390] sm:$0xff]  ;;  %v10180_v11 = vld [vmem:[#allocation8 + $0x60] sm:$0xff] }
 0x795   : > { %10624 = vmatpush2.msra.mxu0 %v9826_v57  ;;  %10678 = vmatprep.subr.mxu1 %v9895_v26  ;;  %v9886_v51 = vld [vmem:[#allocation5 + $0x5b0] sm:$0xff]  ;;  %v16546_v26 = vadd.f32 %v16411_v38, %v9622_v43 }
 0x796   : > { %10481 = vmatprep.mubr.f32.mxu1 %v9688_v37  ;;  %10625 = vmatprep.subr.mxu0 %v9823_v13  ;;  %v16983_v57 = vld [vmem:[#allocation55_spill] sm:$0xff] }
 0x797   : > { %10679 = vmatpush1.msra.mxu1 %v9894_v3  ;;  %10626 = vmatpush2.msra.mxu0 %v9822_v42  ;;  %v9621_v20 = vadd.f32 %v9506_v32, %v16983_v57  ;;  %v9814_v13 = vld [vmem:[#allocation5 + $0x370] sm:$0xff]  ;;  %v9883_v3 = vld [vmem:[#allocation5 + $0x598] sm:$0xff]  ;;  %v9694_v32 = vmax.f32 %v16541_v23, 0.0  ;;  %v9702_v43 = vmax.f32 %v16546_v26, 0.0  ;;  %v16988_v23 = vmax.f32 %v16497_v31, 0.0 }
 0x798   : > { %10680 = vmatprep.subr.mxu1 %v9891_v39  ;;  %10627 = vmatprep.subr.mxu0 %v9819_v21  ;;  %v9882_v44 = vld [vmem:[#allocation5 + $0x590] sm:$0xff]  ;;  %v9879_v42 = vld [vmem:[#allocation5 + $0x578] sm:$0xff] }
 0x799   : > { %10681 = vmatpush1.msra.mxu1 %v9890_v36  ;;  %10628 = vmatpush2.msra.mxu0 %v9818_v49  ;;  %v9810_v5 = vld [vmem:[#allocation5 + $0x350] sm:$0xff]  ;;  %v16554_v39 = vadd.f32 %v16411_v38, %v9621_v20  ;;  %v9807_v21 = vld [vmem:[#allocation5 + $0x338] sm:$0xff] }
 0x79a   : > { %10482 = vmatmul.mubr.f32.gmra.mxu1 %v9687_v29  ;;  %10682 = vmatprep.subr.mxu1 %v9887_v24  ;;  %v9878_v36 = vld [vmem:[#allocation5 + $0x570] sm:$0xff]  ;;  %v9875_v24 = vld [vmem:[#allocation5 + $0x558] sm:$0xff] }
 0x79b   : > { %10487 = vmatprep.mubr.f32.mxu1 %v9695_v56  ;;  %10629 = vmatprep.subr.mxu0 %v9815_v10  ;;  %v9806_v49 = vld [vmem:[#allocation5 + $0x330] sm:$0xff]  ;;  %v9803_v10 = vld [vmem:[#allocation5 + $0x318] sm:$0xff]  ;;  %v9701_v57 = vmax.f32 %v16554_v39, 0.0  ;;  %v10177_v39 = vld [vmem:[#allocation8 + $0x48] sm:$0xff] }
 0x79c   : > { %10683 = vmatpush1.msra.mxu1 %v9886_v51  ;;  %10630 = vmatpush2.msra.mxu0 %v9814_v13  ;;  %v9874_v51 = vld [vmem:[#allocation5 + $0x550] sm:$0xff]  ;;  %v9871_v20 = vld [vmem:[#allocation5 + $0x538] sm:$0xff] }
 0x79d   : > { %10684 = vmatprep.subr.mxu1 %v9883_v3  ;;  %10631 = vmatprep.subr.mxu0 %v9811_v2  ;;  %v9802_v38 = vld [vmem:[#allocation5 + $0x310] sm:$0xff]  ;;  %v9799_v13 = vld [vmem:[#allocation5 + $0x2f8] sm:$0xff] }
 0x79e   : > { %10685 = vmatpush1.msra.mxu1 %v9882_v44  ;;  %10632 = vmatpush2.msra.mxu0 %v9810_v5  ;;  %v9870_v3 = vld [vmem:[#allocation5 + $0x530] sm:$0xff]  ;;  %v9867_v44 = vld [vmem:[#allocation5 + $0x518] sm:$0xff] }
 0x79f   : > { %10488 = vmatmul.mubr.f32.gmra.mxu1 %v9694_v32  ;;  %10686 = vmatprep.subr.mxu1 %v9879_v42  ;;  %v9798_v2 = vld [vmem:[#allocation5 + $0x2f0] sm:$0xff]  ;;  %v9795_v5 = vld [vmem:[#allocation5 + $0x2d8] sm:$0xff] }
 0x7a0   : > { %10493 = vmatprep.mubr.f32.mxu1 %v9702_v43  ;;  %10633 = vmatprep.subr.mxu0 %v9807_v21  ;;  %v9866_v42 = vld [vmem:[#allocation5 + $0x510] sm:$0xff] }
 0x7a1   : > { %10687 = vmatpush1.msra.mxu1 %v9878_v36  ;;  %10634 = vmatpush2.msra.mxu0 %v9806_v49  ;;  %v9794_v21 = vld [vmem:[#allocation5 + $0x2d0] sm:$0xff]  ;;  %v9863_v36 = vld [vmem:[#allocation5 + $0x4f8] sm:$0xff] }
 0x7a2   : > { %10688 = vmatprep.subr.mxu1 %v9875_v24  ;;  %10635 = vmatprep.subr.mxu0 %v9803_v10  ;;  %v9791_v49 = vld [vmem:[#allocation5 + $0x2b8] sm:$0xff]  ;;  %v9862_v24 = vld [vmem:[#allocation5 + $0x4f0] sm:$0xff] }
 0x7a3   : > { %10689 = vmatpush1.msra.mxu1 %v9874_v51  ;;  %10636 = vmatpush2.msra.mxu0 %v9802_v38  ;;  %v9790_v10 = vld [vmem:[#allocation5 + $0x2b0] sm:$0xff]  ;;  %v9859_v51 = vld [vmem:[#allocation5 + $0x4d8] sm:$0xff] }
 0x7a4   : > { %10494 = vmatmul.mubr.f32.gmra.mxu1 %v9701_v57  ;;  %10690 = vmatprep.subr.mxu1 %v9871_v20  ;;  %v9787_v38 = vld [vmem:[#allocation5 + $0x298] sm:$0xff]  ;;  %v9858_v20 = vld [vmem:[#allocation5 + $0x4d0] sm:$0xff] }
 0x7a5   : > { %10637 = vmatprep.subr.mxu0 %v9799_v13  ;;  %10691 = vmatpush1.msra.mxu1 %v9870_v3  ;;  %v9786_v13 = vld [vmem:[#allocation5 + $0x290] sm:$0xff]  ;;  %v9855_v3 = vld [vmem:[#allocation5 + $0x4b8] sm:$0xff] }
 0x7a6   : > { %10742 = vmatprep.mubr.f32.mxu1 %v9679_v34  ;;  %10638 = vmatpush2.msra.mxu0 %v9798_v2  ;;  %v9854_v34 = vld [vmem:[#allocation5 + $0x4b0] sm:$0xff] }
 0x7a7   : > { %10692 = vmatprep.subr.mxu1 %v9867_v44  ;;  %10639 = vmatprep.subr.mxu0 %v9795_v5  ;;  %v9782_v2 = vld [vmem:[#allocation5 + $0x270] sm:$0xff]  ;;  %v9851_v44 = vld [vmem:[#allocation5 + $0x498] sm:$0xff] }
 0x7a8   : > { %10693 = vmatpush1.msra.mxu1 %v9866_v42  ;;  %10640 = vmatpush2.msra.mxu0 %v9794_v21  ;;  %v9779_v5 = vld [vmem:[#allocation5 + $0x258] sm:$0xff]  ;;  %v9850_v42 = vld [vmem:[#allocation5 + $0x490] sm:$0xff] }
 0x7a9   : > { %10694 = vmatprep.subr.mxu1 %v9863_v36  ;;  %10641 = vmatprep.subr.mxu0 %v9791_v49  ;;  %v9778_v21 = vld [vmem:[#allocation5 + $0x250] sm:$0xff]  ;;  %v9847_v36 = vld [vmem:[#allocation5 + $0x478] sm:$0xff] }
 0x7aa   : > { %10695 = vmatpush1.msra.mxu1 %v9862_v24  ;;  %10642 = vmatpush2.msra.mxu0 %v9790_v10  ;;  %v9775_v49 = vld [vmem:[#allocation5 + $0x238] sm:$0xff]  ;;  %v9846_v24 = vld [vmem:[#allocation5 + $0x470] sm:$0xff] }
 0x7ab   : > { %10696 = vmatprep.subr.mxu1 %v9859_v51  ;;  %10643 = vmatprep.subr.mxu0 %v9787_v38  ;;  %v9774_v10 = vld [vmem:[#allocation5 + $0x230] sm:$0xff]  ;;  %v9843_v51 = vld [vmem:[#allocation5 + $0x458] sm:$0xff] }
 0x7ac   : > { %10697 = vmatpush1.msra.mxu1 %v9858_v20  ;;  %10644 = vmatpush2.msra.mxu0 %v9786_v13  ;;  %v9771_v38 = vld [vmem:[#allocation5 + $0x218] sm:$0xff]  ;;  %v9842_v20 = vld [vmem:[#allocation5 + $0x450] sm:$0xff] }
 0x7ad   : > { %10698 = vmatprep.subr.mxu1 %v9855_v3  ;;  %10645 = vmatprep.subr.mxu0 %v9783_v14  ;;  %v9770_v13 = vld [vmem:[#allocation5 + $0x210] sm:$0xff]  ;;  %v9839_v3 = vld [vmem:[#allocation5 + $0x438] sm:$0xff] }
 0x7ae   : > { %10699 = vmatpush1.msra.mxu1 %v9854_v34  ;;  %10646 = vmatpush2.msra.mxu0 %v9782_v2  ;;  %v9838_v14 = vld [vmem:[#allocation5 + $0x430] sm:$0xff]  ;;  %v10023_v34 = vld [vmem:[#allocation5 + $0x9f8] sm:$0xff] }
 0x7af   : > { %10700 = vmatprep.subr.mxu1 %v9851_v44  ;;  %10647 = vmatprep.subr.mxu0 %v9779_v5  ;;  %v9835_v2 = vld [vmem:[#allocation5 + $0x418] sm:$0xff]  ;;  %v10022_v44 = vld [vmem:[#allocation5 + $0x9f0] sm:$0xff] }
 0x7b0   : > { %10701 = vmatpush1.msra.mxu1 %v9850_v42  ;;  %10648 = vmatpush2.msra.mxu0 %v9778_v21  ;;  %v9834_v5 = vld [vmem:[#allocation5 + $0x410] sm:$0xff]  ;;  %v10019_v42 = vld [vmem:[#allocation5 + $0x9d8] sm:$0xff] }
 0x7b1   : > { %10702 = vmatprep.subr.mxu1 %v9847_v36  ;;  %10649 = vmatprep.subr.mxu0 %v9775_v49  ;;  %v9959_v21 = vld [vmem:[#allocation5 + $0x7f8] sm:$0xff]  ;;  %v10018_v36 = vld [vmem:[#allocation5 + $0x9d0] sm:$0xff] }
 0x7b2   : > { %10703 = vmatpush1.msra.mxu1 %v9846_v24  ;;  %10650 = vmatpush2.msra.mxu0 %v9774_v10  ;;  %v9958_v49 = vld [vmem:[#allocation5 + $0x7f0] sm:$0xff]  ;;  %v10015_v24 = vld [vmem:[#allocation5 + $0x9b8] sm:$0xff] }
 0x7b3   : > { %10704 = vmatprep.subr.mxu1 %v9843_v51  ;;  %10651 = vmatprep.subr.mxu0 %v9771_v38  ;;  %v9955_v10 = vld [vmem:[#allocation5 + $0x7d8] sm:$0xff]  ;;  %v9950_v38 = vld [vmem:[#allocation5 + $0x7b0] sm:$0xff] }
 0x7b4   : > { %10705 = vmatpush1.msra.mxu1 %v9842_v20  ;;  %10652 = vmatpush2.msra.mxu0 %v9770_v13  ;;  %v10011_v51 = vld [vmem:[#allocation5 + $0x998] sm:$0xff]  ;;  %v10194_v26 = vld [vmem:[#allocation8 + $0xd0] sm:$0xff] }
 0x7b5   : > { %10706 = vmatprep.subr.mxu1 %v9839_v3  ;;  %10654 = vmatmul.mubr.f32.vlgmr.msra.gmra.mxu0 %v9676_v54  ;;  %v9954_v54 = vld [vmem:[#allocation5 + $0x7d0] sm:$0xff]  ;;  %v10007_v20 = vld [vmem:[#allocation5 + $0x978] sm:$0xff] }
 0x7b6   : > { %10707 = vmatpush1.msra.mxu1 %v9838_v14  ;;  %10767 = vmatprep.subr.mxu0 %v10023_v34  ;;  %v9947_v13 = vld [vmem:[#allocation5 + $0x798] sm:$0xff]  ;;  %v9942_v14 = vld [vmem:[#allocation5 + $0x770] sm:$0xff] }
 0x7b7   : > { %10659 = vmatprep.mubr.f32.mxu0 %v9684_v22  ;;  %10708 = vmatprep.subr.mxu1 %v9835_v2  ;;  %v10010_v22 = vld [vmem:[#allocation5 + $0x990] sm:$0xff]  ;;  %v10003_v3 = vld [vmem:[#allocation5 + $0x958] sm:$0xff] }
 0x7b8   : > { %10768 = vmatpush1.msra.mxu0 %v10022_v44  ;;  %10709 = vmatpush1.msra.mxu1 %v9834_v5  ;;  %v9999_v34 = vld [vmem:[#allocation5 + $0x938] sm:$0xff]  ;;  %v9934_v5 = vld [vmem:[#allocation5 + $0x730] sm:$0xff] }
 0x7b9   : > { %10769 = vmatprep.subr.mxu0 %v10019_v42  ;;  %10710 = vmatprep.subr.mxu1 %v9959_v21  ;;  %v9939_v2 = vld [vmem:[#allocation5 + $0x758] sm:$0xff]  ;;  %v10190_v31 = vld [vmem:[#allocation8 + $0xb0] sm:$0xff] }
 0x7ba   : > { %10770 = vmatpush1.msra.mxu0 %v10018_v36  ;;  %10711 = vmatpush2.msra.mxu1 %v9958_v49  ;;  %v9995_v44 = vld [vmem:[#allocation5 + $0x918] sm:$0xff]  ;;  %v9990_v36 = vld [vmem:[#allocation5 + $0x8f0] sm:$0xff] }
 0x7bb   : > { %10660 = vmatmul.mubr.f32.gmra.mxu0 %v9683_v12  ;;  %10771 = vmatprep.subr.mxu0 %v10015_v24  ;;  %v9946_v12 = vld [vmem:[#allocation5 + $0x790] sm:$0xff]  ;;  %v9991_v42 = vld [vmem:[#allocation5 + $0x8f8] sm:$0xff] }
 0x7bc   : > { %10665 = vmatprep.mubr.f32.mxu0 %v9691_v52  ;;  %10712 = vmatprep.subr.mxu1 %v9955_v10  ;;  %v10002_v52 = vld [vmem:[#allocation5 + $0x950] sm:$0xff]  ;;  %v9931_v21 = vld [vmem:[#allocation5 + $0x718] sm:$0xff] }
 0x7bd   : > { %10772 = vmatpush1.msra.mxu0 %v10014_v45  ;;  %10713 = vmatpush2.msra.mxu1 %v9954_v54  ;;  %v9927_v49 = vld [vmem:[#allocation5 + $0x6f8] sm:$0xff]  ;;  %v9986_v24 = vld [vmem:[#allocation5 + $0x8d0] sm:$0xff] }
 0x7be   : > { %10773 = vmatprep.subr.mxu0 %v10011_v51  ;;  %10714 = vmatprep.subr.mxu1 %v9951_v33  ;;  %v9926_v10 = vld [vmem:[#allocation5 + $0x6f0] sm:$0xff]  ;;  %v9983_v45 = vld [vmem:[#allocation5 + $0x8b8] sm:$0xff] }
 0x7bf   : > { %10774 = vmatpush1.msra.mxu0 %v10010_v22  ;;  %10715 = vmatpush2.msra.mxu1 %v9950_v38  ;;  %v9922_v54 = vld [vmem:[#allocation5 + $0x6d0] sm:$0xff]  ;;  %v9979_v51 = vld [vmem:[#allocation5 + $0x898] sm:$0xff] }
 0x7c0   : > { %10666 = vmatmul.mubr.f32.gmra.mxu0 %v9690_v35  ;;  %10775 = vmatprep.subr.mxu0 %v10007_v20  ;;  %v9938_v35 = vld [vmem:[#allocation5 + $0x750] sm:$0xff]  ;;  %v9919_v33 = vld [vmem:[#allocation5 + $0x6b8] sm:$0xff] }
 0x7c1   : > { %10671 = vmatprep.mubr.f32.mxu0 %v9698_v46  ;;  %10716 = vmatprep.subr.mxu1 %v9947_v13  ;;  %v9994_v46 = vld [vmem:[#allocation5 + $0x910] sm:$0xff]  ;;  %v9975_v20 = vld [vmem:[#allocation5 + $0x878] sm:$0xff] }
 0x7c2   : > { %10776 = vmatpush1.msra.mxu0 %v10006_v59  ;;  %10717 = vmatpush2.msra.mxu1 %v9946_v12  ;;  %v9978_v22 = vld [vmem:[#allocation5 + $0x890] sm:$0xff]  ;;  %v9915_v13 = vld [vmem:[#allocation5 + $0x698] sm:$0xff] }
 0x7c3   : > { %10777 = vmatprep.subr.mxu0 %v10003_v3  ;;  %10718 = vmatprep.subr.mxu1 %v9943_v62  ;;  %v9918_v38 = vld [vmem:[#allocation5 + $0x6b0] sm:$0xff]  ;;  %v9971_v3 = vld [vmem:[#allocation5 + $0x858] sm:$0xff] }
 0x7c4   : > { %10778 = vmatpush1.msra.mxu0 %v10002_v52  ;;  %10719 = vmatpush2.msra.mxu1 %v9942_v14  ;;  %v9974_v59 = vld [vmem:[#allocation5 + $0x870] sm:$0xff]  ;;  %v9911_v62 = vld [vmem:[#allocation5 + $0x678] sm:$0xff] }
 0x7c5   : > { %10672 = vmatmul.mubr.f32.gmra.mxu0 %v9697_v19  ;;  %10779 = vmatprep.subr.mxu0 %v9999_v34  ;;  %v9987_v19 = vld [vmem:[#allocation5 + $0x8d8] sm:$0xff]  ;;  %v9914_v12 = vld [vmem:[#allocation5 + $0x690] sm:$0xff] }
 0x7c6   : > { %10720 = vmatprep.subr.mxu1 %v9939_v2  ;;  %10780 = vmatpush1.msra.mxu0 %v9998_v6  ;;  %v9970_v52 = vld [vmem:[#allocation5 + $0x850] sm:$0xff]  ;;  %v9967_v34 = vld [vmem:[#allocation5 + $0x838] sm:$0xff] }
 0x7c7   : > { %10831 = vmatprep.mubr.f32.mxu0 %v9681_v60  ;;  %10721 = vmatpush2.msra.mxu1 %v9938_v35  ;;  %v9982_v60 = vld [vmem:[#allocation5 + $0x8b0] sm:$0xff]  ;;  %v9907_v2 = vld [vmem:[#allocation5 + $0x658] sm:$0xff] }
 0x7c8   : > { %10781 = vmatprep.subr.mxu0 %v9995_v44  ;;  %10722 = vmatprep.subr.mxu1 %v9935_v17  ;;  %v9910_v14 = vld [vmem:[#allocation5 + $0x670] sm:$0xff]  ;;  %v9963_v44 = vld [vmem:[#allocation5 + $0x818] sm:$0xff] }
 0x7c9   : > { %10782 = vmatpush1.msra.mxu0 %v9994_v46  ;;  %10723 = vmatpush2.msra.mxu1 %v9934_v5  ;;  %v9966_v6 = vld [vmem:[#allocation5 + $0x830] sm:$0xff]  ;;  %v9903_v17 = vld [vmem:[#allocation5 + $0x638] sm:$0xff] }
 0x7ca   : > { %10783 = vmatprep.subr.mxu0 %v9991_v42  ;;  %10724 = vmatprep.subr.mxu1 %v9931_v21  ;;  %v9906_v35 = vld [vmem:[#allocation5 + $0x650] sm:$0xff]  ;;  %v10087_v42 = vld [vmem:[#allocation5 + $0xbf8] sm:$0xff] }
 0x7cb   : > { %10784 = vmatpush1.msra.mxu0 %v9990_v36  ;;  %10725 = vmatpush2.msra.mxu1 %v9930_v47  ;;  %v9962_v46 = vld [vmem:[#allocation5 + $0x810] sm:$0xff]  ;;  %v9899_v21 = vld [vmem:[#allocation5 + $0x618] sm:$0xff] }
 0x7cc   : > { %10785 = vmatprep.subr.mxu0 %v9987_v19  ;;  %10726 = vmatprep.subr.mxu1 %v9927_v49  ;;  %v9902_v5 = vld [vmem:[#allocation5 + $0x630] sm:$0xff]  ;;  %v10083_v19 = vld [vmem:[#allocation5 + $0xbd8] sm:$0xff] }
 0x7cd   : > { %10786 = vmatpush1.msra.mxu0 %v9986_v24  ;;  %10727 = vmatpush2.msra.mxu1 %v9926_v10  ;;  %v10086_v36 = vld [vmem:[#allocation5 + $0xbf0] sm:$0xff]  ;;  %v10151_v24 = vld [vmem:[#allocation5 + $0xdf8] sm:$0xff] }
 0x7ce   : > { %10787 = vmatprep.subr.mxu0 %v9983_v45  ;;  %10728 = vmatprep.subr.mxu1 %v9923_v0  ;;  %v9898_v47 = vld [vmem:[#allocation5 + $0x610] sm:$0xff]  ;;  %v10079_v10 = vld [vmem:[#allocation5 + $0xbb8] sm:$0xff] }
 0x7cf   : > { %10788 = vmatpush1.msra.mxu0 %v9982_v60  ;;  %10729 = vmatpush2.msra.mxu1 %v9922_v54  ;;  %v10082_v49 = vld [vmem:[#allocation5 + $0xbd0] sm:$0xff]  ;;  %v10147_v60 = vld [vmem:[#allocation5 + $0xdd8] sm:$0xff] }
 0x7d0   : > { %10789 = vmatprep.subr.mxu0 %v9979_v51  ;;  %10730 = vmatprep.subr.mxu1 %v9919_v33  ;;  %v10150_v45 = vld [vmem:[#allocation5 + $0xdf0] sm:$0xff]  ;;  %v10075_v54 = vld [vmem:[#allocation5 + $0xb98] sm:$0xff] }
 0x7d1   : > { %10790 = vmatpush1.msra.mxu0 %v9978_v22  ;;  %10731 = vmatpush2.msra.mxu1 %v9918_v38  ;;  %v10078_v0 = vld [vmem:[#allocation5 + $0xbb0] sm:$0xff]  ;;  %v10143_v22 = vld [vmem:[#allocation5 + $0xdb8] sm:$0xff] }
 0x7d2   : > { %10791 = vmatprep.subr.mxu0 %v9975_v20  ;;  %10732 = vmatprep.subr.mxu1 %v9915_v13  ;;  %v10146_v51 = vld [vmem:[#allocation5 + $0xdd0] sm:$0xff]  ;;  %v10071_v38 = vld [vmem:[#allocation5 + $0xb78] sm:$0xff] }
 0x7d3   : > { %10792 = vmatpush1.msra.mxu0 %v9974_v59  ;;  %10733 = vmatpush2.msra.mxu1 %v9914_v12  ;;  %v10074_v33 = vld [vmem:[#allocation5 + $0xb90] sm:$0xff]  ;;  %v10139_v20 = vld [vmem:[#allocation5 + $0xd98] sm:$0xff] }
 0x7d4   : > { %10793 = vmatprep.subr.mxu0 %v9971_v3  ;;  %10734 = vmatprep.subr.mxu1 %v9911_v62  ;;  %v10066_v13 = vld [vmem:[#allocation5 + $0xb50] sm:$0xff]  ;;  %v10135_v59 = vld [vmem:[#allocation5 + $0xd78] sm:$0xff] }
 0x7d5   : > { %10794 = vmatpush1.msra.mxu0 %v9970_v52  ;;  %10735 = vmatpush2.msra.mxu1 %v9910_v14  ;;  %v10063_v12 = vld [vmem:[#allocation5 + $0xb38] sm:$0xff]  ;;  %v10058_v62 = vld [vmem:[#allocation5 + $0xb10] sm:$0xff] }
 0x7d6   : > { %10795 = vmatprep.subr.mxu0 %v9967_v34  ;;  %10736 = vmatprep.subr.mxu1 %v9907_v2  ;;  %v10131_v3 = vld [vmem:[#allocation5 + $0xd58] sm:$0xff]  ;;  %v16984_v34 = vmax.f32 %v16437_v48, 0.0 }
 0x7d7   : > { %10796 = vmatpush1.msra.mxu0 %v9966_v6  ;;  %10737 = vmatpush2.msra.mxu1 %v9906_v35  ;;  %v10127_v52 = vld [vmem:[#allocation5 + $0xd38] sm:$0xff]  ;;  %v10050_v6 = vld [vmem:[#allocation5 + $0xad0] sm:$0xff] }
 0x7d8   : > { %10797 = vmatprep.subr.mxu0 %v9963_v44  ;;  %10738 = vmatprep.subr.mxu1 %v9903_v17  ;;  %v10055_v14 = vld [vmem:[#allocation5 + $0xaf8] sm:$0xff]  ;;  %v10118_v17 = vld [vmem:[#allocation5 + $0xcf0] sm:$0xff] }
 0x7d9   : > { %10798 = vmatpush1.msra.mxu0 %v9962_v46  ;;  %10739 = vmatpush2.msra.mxu1 %v9902_v5  ;;  %v10123_v2 = vld [vmem:[#allocation5 + $0xd18] sm:$0xff]  ;;  %v10046_v46 = vld [vmem:[#allocation5 + $0xab0] sm:$0xff] }
 0x7da   : > { %10799 = vmatprep.subr.mxu0 %v10087_v42  ;;  %10740 = vmatprep.subr.mxu1 %v9899_v21  ;;  %v10119_v35 = vld [vmem:[#allocation5 + $0xcf8] sm:$0xff]  ;;  %v10114_v42 = vld [vmem:[#allocation5 + $0xcd0] sm:$0xff] }
 0x7db   : > { %10800 = vmatpush2.msra.mxu0 %v10086_v36  ;;  %10741 = vmatpush2.msra.mxu1 %v9898_v47  ;;  %v10047_v44 = vld [vmem:[#allocation5 + $0xab8] sm:$0xff]  ;;  %v10042_v21 = vld [vmem:[#allocation5 + $0xa90] sm:$0xff] }
 0x7dc   : > { %10801 = vmatprep.subr.mxu0 %v10083_v19  ;;  %10743 = vmatmul.mubr.f32.vlgmr.msra.gmra.mxu1 %v9678_v16  ;;  %v10070_v16 = vld [vmem:[#allocation5 + $0xb70] sm:$0xff]  ;;  %v10115_v5 = vld [vmem:[#allocation5 + $0xcd8] sm:$0xff] }
 0x7dd   : > { %10802 = vmatpush2.msra.mxu0 %v10082_v49  ;;  %10856 = vmatprep.subr.mxu1 %v10151_v24  ;;  %v10043_v48 = vld [vmem:[#allocation5 + $0xa98] sm:$0xff]  ;;  %v10110_v19 = vld [vmem:[#allocation5 + $0xcb0] sm:$0xff] }
 0x7de   : > { %10748 = vmatprep.mubr.f32.mxu1 %v9686_v1  ;;  %10803 = vmatprep.subr.mxu0 %v10079_v10  ;;  %v10138_v1 = vld [vmem:[#allocation5 + $0xd90] sm:$0xff]  ;;  %v10111_v36 = vld [vmem:[#allocation5 + $0xcb8] sm:$0xff] }
 0x7df   : > { %10857 = vmatpush1.msra.mxu1 %v10150_v45  ;;  %10804 = vmatpush2.msra.mxu0 %v10078_v0  ;;  %v10039_v47 = vld [vmem:[#allocation5 + $0xa78] sm:$0xff]  ;;  %v10038_v49 = vld [vmem:[#allocation5 + $0xa70] sm:$0xff] }
 0x7e0   : > { %10858 = vmatprep.subr.mxu1 %v10147_v60  ;;  %10805 = vmatprep.subr.mxu0 %v10075_v54  ;;  %v10107_v24 = vld [vmem:[#allocation5 + $0xc98] sm:$0xff]  ;;  %v10106_v45 = vld [vmem:[#allocation5 + $0xc90] sm:$0xff] }
 0x7e1   : > { %10859 = vmatpush1.msra.mxu1 %v10146_v51  ;;  %10806 = vmatpush2.msra.mxu0 %v10074_v33  ;;  %v10035_v10 = vld [vmem:[#allocation5 + $0xa58] sm:$0xff]  ;;  %v10034_v0 = vld [vmem:[#allocation5 + $0xa50] sm:$0xff] }
 0x7e2   : > { %10749 = vmatmul.mubr.f32.gmra.mxu1 %v9685_v27  ;;  %10860 = vmatprep.subr.mxu1 %v10143_v22  ;;  %v10062_v27 = vld [vmem:[#allocation5 + $0xb30] sm:$0xff]  ;;  %v10103_v60 = vld [vmem:[#allocation5 + $0xc78] sm:$0xff] }
 0x7e3   : > { %10754 = vmatprep.mubr.f32.mxu1 %v9693_v61  ;;  %10807 = vmatprep.subr.mxu0 %v10071_v38  ;;  %v10130_v61 = vld [vmem:[#allocation5 + $0xd50] sm:$0xff]  ;;  %v10031_v54 = vld [vmem:[#allocation5 + $0xa38] sm:$0xff] }
 0x7e4   : > { %10861 = vmatpush1.msra.mxu1 %v10142_v63  ;;  %10808 = vmatpush2.msra.mxu0 %v10070_v16  ;;  %v10102_v51 = vld [vmem:[#allocation5 + $0xc70] sm:$0xff]  ;;  %v10099_v22 = vld [vmem:[#allocation5 + $0xc58] sm:$0xff] }
 0x7e5   : > { %10862 = vmatprep.subr.mxu1 %v10139_v20  ;;  %10809 = vmatprep.subr.mxu0 %v10067_v41  ;;  %v10030_v33 = vld [vmem:[#allocation5 + $0xa30] sm:$0xff]  ;;  %v10027_v38 = vld [vmem:[#allocation5 + $0xa18] sm:$0xff] }
 0x7e6   : > { %10863 = vmatpush1.msra.mxu1 %v10138_v1  ;;  %10810 = vmatpush2.msra.mxu0 %v10066_v13  ;;  %v10098_v63 = vld [vmem:[#allocation5 + $0xc50] sm:$0xff]  ;;  %v10095_v20 = vld [vmem:[#allocation5 + $0xc38] sm:$0xff] }
 0x7e7   : > { %10755 = vmatmul.mubr.f32.gmra.mxu1 %v9692_v7  ;;  %10864 = vmatprep.subr.mxu1 %v10135_v59  ;;  %v10054_v7 = vld [vmem:[#allocation5 + $0xaf0] sm:$0xff]  ;;  %v10091_v1 = vld [vmem:[#allocation5 + $0xc18] sm:$0xff] }
 0x7e8   : > { %10760 = vmatprep.mubr.f32.mxu1 %v9700_v58  ;;  %10811 = vmatprep.subr.mxu0 %v10063_v12  ;;  %v10122_v58 = vld [vmem:[#allocation5 + $0xd10] sm:$0xff]  ;;  %v10199_v59 = vld [vmem:[#allocation8 + $0xf8] sm:$0xff]  ;;  %v16985_v12 = vmax.f32 %v16475_v50, 0.0 }
 0x7e9   : > { %10865 = vmatpush1.msra.mxu1 %v10134_v8  ;;  %10812 = vmatpush2.msra.mxu0 %v10062_v27  ;;  %v10026_v16 = vld [vmem:[#allocation5 + $0xa10] sm:$0xff]  ;;  %v10183_v8 = vld [vmem:[#allocation8 + $0x78] sm:$0xff] }
 0x7ea   : > { %10866 = vmatprep.subr.mxu1 %v10131_v3  ;;  %10813 = vmatprep.subr.mxu0 %v10059_v28  ;;  %v10094_v41 = vld [vmem:[#allocation5 + $0xc30] sm:$0xff]  ;;  %v10175_v27 = vld [vmem:[#allocation8 + $0x38] sm:$0xff]  ;;  %v10189_v28 = vld [vmem:[#allocation8 + $0xa8] sm:$0xff] }
 0x7eb   : > { %10867 = vmatpush1.msra.mxu1 %v10130_v61  ;;  %10814 = vmatpush2.msra.mxu0 %v10058_v62  ;;  %v10090_v13 = vld [vmem:[#allocation5 + $0xc10] sm:$0xff]  ;;  %v10173_v61 = vld [vmem:[#allocation8 + $0x28] sm:$0xff]  ;;  %v10188_v62 = vld [vmem:[#allocation8 + $0xa0] sm:$0xff] }
 0x7ec   : > { %10761 = vmatmul.mubr.f32.gmra.mxu1 %v16984_v34  ;;  %10868 = vmatprep.subr.mxu1 %v10127_v52  ;;  %v10182_v50 = vld [vmem:[#allocation8 + $0x70] sm:$0xff]  ;;  %v10172_v52 = vld [vmem:[#allocation8 + $0x20] sm:$0xff] }
 0x7ed   : > { %10815 = vmatprep.subr.mxu0 %v10055_v14  ;;  %10869 = vmatpush1.msra.mxu1 %v10126_v9  ;;  %v10174_v3 = vld [vmem:[#allocation8 + $0x30] sm:$0xff]  ;;  %v10187_v14 = vld [vmem:[#allocation8 + $0x98] sm:$0xff] }
 0x7ee   : > { %10816 = vmatpush2.msra.mxu0 %v10054_v7  ;;  %10870 = vmatprep.subr.mxu1 %v10123_v2  ;;  %v10171_v9 = vld [vmem:[#allocation8 + $0x18] sm:$0xff]  ;;  %v10186_v7 = vld [vmem:[#allocation8 + $0x90] sm:$0xff]  ;;  %v10185_v2 = vld [vmem:[#allocation8 + $0x88] sm:$0xff] }
 0x7ef   : > { %10817 = vmatprep.subr.mxu0 %v10051_v18  ;;  %10871 = vmatpush1.msra.mxu1 %v10122_v58  ;;  %v10170_v34 = vld [vmem:[#allocation8 + $0x10] sm:$0xff]  ;;  %v10169_v18 = vld [vmem:[#allocation8 + $0x8] sm:$0xff]  ;;  %v10184_v58 = vld [vmem:[#allocation8 + $0x80] sm:$0xff] }
 0x7f0   : > { %10818 = vmatpush2.msra.mxu0 %v10050_v6  ;;  %10872 = vmatprep.subr.mxu1 %v10119_v35  ;;  %v10168_v6 = vld [vmem:[#allocation8] sm:$0xff] }
 0x7f1   : > { %10819 = vmatprep.subr.mxu0 %v10047_v44  ;;  %10873 = vmatpush1.msra.mxu1 %v10118_v17 }
 0x7f2   : > { %10820 = vmatpush2.msra.mxu0 %v10046_v46  ;;  %10874 = vmatprep.subr.mxu1 %v10115_v5 }
 0x7f3   : > { %10821 = vmatprep.subr.mxu0 %v10043_v48  ;;  %10875 = vmatpush1.msra.mxu1 %v10114_v42 }
 0x7f4   : > { %10822 = vmatpush2.msra.mxu0 %v10042_v21  ;;  %10876 = vmatprep.subr.mxu1 %v10111_v36 }
 0x7f5   : > { %10823 = vmatprep.subr.mxu0 %v10039_v47  ;;  %10877 = vmatpush1.msra.mxu1 %v10110_v19  ;;  %v10231_v47 = vld [vmem:[#allocation8 + $0x1f8] sm:$0xff] }
 0x7f6   : > { %10824 = vmatpush2.msra.mxu0 %v10038_v49  ;;  %10878 = vmatprep.subr.mxu1 %v10107_v24  ;;  %v10215_v49 = vld [vmem:[#allocation8 + $0x178] sm:$0xff]  ;;  %v10230_v24 = vld [vmem:[#allocation8 + $0x1f0] sm:$0xff] }
 0x7f7   : > { %10825 = vmatprep.subr.mxu0 %v10035_v10  ;;  %10879 = vmatpush1.msra.mxu1 %v10106_v45  ;;  %v10214_v10 = vld [vmem:[#allocation8 + $0x170] sm:$0xff] }
 0x7f8   : > { %10826 = vmatpush2.msra.mxu0 %v10034_v0  ;;  %10880 = vmatprep.subr.mxu1 %v10103_v60  ;;  %v10229_v0 = vld [vmem:[#allocation8 + $0x1e8] sm:$0xff] }
 0x7f9   : > { %10827 = vmatprep.subr.mxu0 %v10031_v54  ;;  %10881 = vmatpush1.msra.mxu1 %v10102_v51  ;;  %v10213_v54 = vld [vmem:[#allocation8 + $0x168] sm:$0xff]  ;;  %v10228_v51 = vld [vmem:[#allocation8 + $0x1e0] sm:$0xff] }
 0x7fa   : > { %10828 = vmatpush2.msra.mxu0 %v10030_v33  ;;  %10882 = vmatprep.subr.mxu1 %v10099_v22  ;;  %v10212_v33 = vld [vmem:[#allocation8 + $0x160] sm:$0xff] }
 0x7fb   : > { %10829 = vmatprep.subr.mxu0 %v10027_v38  ;;  %10883 = vmatpush1.msra.mxu1 %v10098_v63  ;;  %v10227_v38 = vld [vmem:[#allocation8 + $0x1d8] sm:$0xff] }
 0x7fc   : > { %10830 = vmatpush2.msra.mxu0 %v10026_v16  ;;  %10884 = vmatprep.subr.mxu1 %v10095_v20  ;;  %v10211_v16 = vld [vmem:[#allocation8 + $0x158] sm:$0xff] }
 0x7fd   : > { %10832 = vmatmul.mubr.f32.vlgmr.msra.gmra.mxu0 %v9680_v30  ;;  %10885 = vmatpush1.msra.mxu1 %v10094_v41  ;;  %v10197_v30 = vld [vmem:[#allocation8 + $0xe8] sm:$0xff]  ;;  %v10226_v41 = vld [vmem:[#allocation8 + $0x1d0] sm:$0xff] }
 0x7fe   : > { %10837 = vmatprep.mubr.f32.mxu0 %v9688_v37  ;;  %10886 = vmatprep.subr.mxu1 %v10091_v1  ;;  %v16987_v37 = vmax.f32 %v16490_v55, 0.0  ;;  %v10178_v55 = vld [vmem:[#allocation8 + $0x50] sm:$0xff] }
 0x7ff   : > { %10920 = vmatprep.mubr.f32.mxu1 %v16977_v40  ;;  %10887 = vmatpush1.msra.mxu1 %v10090_v13  ;;  %v10210_v1 = vld [vmem:[#allocation8 + $0x150] sm:$0xff]  ;;  %v10225_v13 = vld [vmem:[#allocation8 + $0x1c8] sm:$0xff] }
 0x800   : > { %10921 = vmatmul.mubr.f32.vlgmr.msra.gmra.mxu1 %v16985_v12  ;;  %11635 = vmatprep.subr.mxu1 %v10199_v59  ;;  %v10209_v12 = vld [vmem:[#allocation8 + $0x148] sm:$0xff] }
 0x801   : > { %10838 = vmatmul.mubr.f32.gmra.mxu0 %v9687_v29  ;;  %10926 = vmatprep.mubr.f32.mxu1 %v16977_v40  ;;  %v10195_v29 = vld [vmem:[#allocation8 + $0xd8] sm:$0xff] }
 0x802   : > { %10843 = vmatprep.mubr.f32.mxu0 %v9695_v56  ;;  %11636 = vmatpush3.msra.mxu1 %v10183_v8  ;;  %v10179_v56 = vld [vmem:[#allocation8 + $0x58] sm:$0xff] }
 0x803   : > { %11637 = vmatprep.subr.mxu1 %v10198_v4  ;;  %11670 = vmatprep.subr.mxu0 %v10231_v47  ;;  %v10224_v4 = vld [vmem:[#allocation8 + $0x1c0] sm:$0xff] }
 0x804   : > { %10927 = vmatmul.mubr.f32.gmra.mxu1 %v16986_v53  ;;  %11671 = vmatpush3.msra.mxu0 %v10215_v49  ;;  %v10208_v53 = vld [vmem:[#allocation8 + $0x140] sm:$0xff] }
 0x805   : > { %10844 = vmatmul.mubr.f32.gmra.mxu0 %v9694_v32  ;;  %10932 = vmatprep.mubr.f32.mxu1 %v16977_v40  ;;  %v10193_v32 = vld [vmem:[#allocation8 + $0xc8] sm:$0xff] }
 0x806   : > { %10849 = vmatprep.mubr.f32.mxu0 %v9702_v43  ;;  %11638 = vmatpush3.msra.mxu1 %v10182_v50  ;;  %v10192_v43 = vld [vmem:[#allocation8 + $0xc0] sm:$0xff]  ;;  %v10223_v50 = vld [vmem:[#allocation8 + $0x1b8] sm:$0xff] }
 0x807   : > { %11639 = vmatprep.subr.mxu1 %v10197_v30  ;;  %v16622_v35 = vpop.f32.mrf.mxu0  ;;  %11672 = vmatprep.subr.mxu0 %v10230_v24  ;;  %v10152_v24 = vld [vmem:[#allocation7] sm:$0xff] }
 0x808   : > { %10933 = vmatmul.mubr.f32.gmra.mxu1 %v16987_v37  ;;  %11673 = vmatpush3.msra.mxu0 %v10214_v10 }
 0x809   : > { %10850 = vmatmul.mubr.f32.gmra.mxu0 %v9701_v57  ;;  %10938 = vmatprep.mubr.f32.mxu1 %v16977_v40  ;;  %v10176_v40 = vld [vmem:[#allocation8 + $0x40] sm:$0xff]  ;;  %v10191_v57 = vld [vmem:[#allocation8 + $0xb8] sm:$0xff]  ;;  %v16624_v44 = vpop.f32.mrf.mxu0  ;;  %v16628_v46 = vpop.f32.mrf.mxu1 }
 0x80a   : > { %11640 = vmatpush3.msra.mxu1 %v10181_v15  ;;  %11674 = vmatprep.subr.mxu0 %v10229_v0  ;;  %v10207_v15 = vld [vmem:[#allocation8 + $0x138] sm:$0xff]  ;;  %v10157_v0 = vld [vmem:[#allocation7 + $0x28] sm:$0xff] }
 0x80b   : > { %11641 = vmatprep.subr.mxu1 %v10196_v25  ;;  %v16632_v48 = vpop.f32.mrf.mxu1  ;;  %11675 = vmatpush3.msra.mxu0 %v10213_v54  ;;  %v10222_v25 = vld [vmem:[#allocation8 + $0x1b0] sm:$0xff] }
 0x80c   : > { %10939 = vmatmul.mubr.f32.gmra.mxu1 %v16988_v23  ;;  %v16626_v17 = vpop.f32.mrf.mxu0  ;;  %11676 = vmatprep.subr.mxu0 %v10228_v51  ;;  %v10221_v23 = vld [vmem:[#allocation8 + $0x1a8] sm:$0xff] }
 0x80d   : > { %11642 = vmatpush3.msra.mxu1 %v10180_v11  ;;  %11677 = vmatpush3.msra.mxu0 %v10212_v33  ;;  %v10153_v33 = vld [vmem:[#allocation7 + $0x8] sm:$0xff] }
 0x80e   : > { %11643 = vmatprep.subr.mxu1 %v10195_v29  ;;  %v16630_v5 = vpop.f32.mrf.mxu0  ;;  %11678 = vmatprep.subr.mxu0 %v10227_v38  ;;  %v10206_v29 = vld [vmem:[#allocation8 + $0x130] sm:$0xff] }
 0x80f   : > { %11644 = vmatpush3.msra.mxu1 %v10179_v56  ;;  %11679 = vmatpush3.msra.mxu0 %v10211_v16 }
 0x810   : > { %11645 = vmatprep.subr.mxu1 %v10194_v26  ;;  %v10305_v21 = vpop.f32.mrf.mxu1  ;;  %11680 = vmatprep.subr.mxu0 %v10226_v41  ;;  %v10205_v26 = vld [vmem:[#allocation8 + $0x128] sm:$0xff] }
 0x811   : > { %11646 = vmatpush3.msra.mxu1 %v10178_v55  ;;  %11681 = vmatpush3.msra.mxu0 %v10210_v1 }
 0x812   : > { %11647 = vmatprep.subr.mxu1 %v10193_v32  ;;  %v16634_v42 = vpop.f32.mrf.mxu0  ;;  %v16638_v19 = vpop.f32.mrf.mxu1  ;;  %11682 = vmatprep.subr.mxu0 %v10225_v13  ;;  %v10220_v32 = vld [vmem:[#allocation8 + $0x1a0] sm:$0xff] }
 0x813   : > { %11648 = vmatpush3.msra.mxu1 %v10177_v39  ;;  %11683 = vmatpush3.msra.mxu0 %v10209_v12  ;;  %v10395_v39 = vadd.f32 %v16626_v17, %v10305_v21  ;;  %v10156_v21 = vld [vmem:[#allocation7 + $0x20] sm:$0xff] }
 0x814   : > { %11649 = vmatprep.subr.mxu1 %v10192_v43  ;;  %v16636_v36 = vpop.f32.mrf.mxu0  ;;  %11684 = vmatprep.subr.mxu0 %v10224_v4  ;;  %v10204_v43 = vld [vmem:[#allocation8 + $0x120] sm:$0xff] }
 0x815   : > { %11650 = vmatpush3.msra.mxu1 %v10176_v40  ;;  %11685 = vmatpush3.msra.mxu0 %v10208_v53 }
 0x816   : > { %11651 = vmatprep.subr.mxu1 %v10191_v57  ;;  %v16642_v60 = vpop.f32.mrf.mxu1  ;;  %11686 = vmatprep.subr.mxu0 %v10223_v50  ;;  %v10219_v57 = vld [vmem:[#allocation8 + $0x198] sm:$0xff]  ;;  %v10164_v50 = vld [vmem:[#allocation7 + $0x60] sm:$0xff] }
 0x817   : > { %11652 = vmatpush3.msra.mxu1 %v10175_v27  ;;  %11687 = vmatpush3.msra.mxu0 %v10207_v15  ;;  %v10389_v27 = vadd.f32 %v16622_v35, %v16628_v46  ;;  %v10216_v35 = vld [vmem:[#allocation8 + $0x180] sm:$0xff] }
 0x818   : > { %11653 = vmatprep.subr.mxu1 %v10190_v31  ;;  %v16640_v45 = vpop.f32.mrf.mxu0  ;;  %v16646_v63 = vpop.f32.mrf.mxu1  ;;  %11688 = vmatprep.subr.mxu0 %v10222_v25  ;;  %v10397_v31 = vadd.f32 %v16630_v5, %v16638_v19 }
 0x819   : > { %11654 = vmatpush3.msra.mxu1 %v10174_v3  ;;  %11689 = vmatpush3.msra.mxu0 %v10206_v29  ;;  %v10403_v5 = vadd.f32 %v16636_v36, %v16646_v63  ;;  %v10165_v29 = vld [vmem:[#allocation7 + $0x68] sm:$0xff] }
 0x81a   : > { %11655 = vmatprep.subr.mxu1 %v10189_v28  ;;  %v16644_v22 = vpop.f32.mrf.mxu0  ;;  %11690 = vmatprep.subr.mxu0 %v10221_v23  ;;  %v10203_v28 = vld [vmem:[#allocation8 + $0x118] sm:$0xff] }
 0x81b   : > { %11656 = vmatpush3.msra.mxu1 %v10173_v61  ;;  %11691 = vmatpush3.msra.mxu0 %v10205_v26  ;;  %v10391_v61 = vadd.f32 %v16624_v44, %v16632_v48  ;;  %v10200_v44 = vld [vmem:[#allocation8 + $0x100] sm:$0xff] }
 0x81c   : > { %11657 = vmatprep.subr.mxu1 %v10188_v62  ;;  %v16650_v59 = vpop.f32.mrf.mxu1  ;;  %11692 = vmatprep.subr.mxu0 %v10220_v32 }
 0x81d   : > { %11658 = vmatpush3.msra.mxu1 %v10172_v52  ;;  %11693 = vmatpush3.msra.mxu0 %v10204_v43  ;;  %v10407_v36 = vadd.f32 %v16640_v45, %v16650_v59 }
 0x81e   : > { %11659 = vmatprep.subr.mxu1 %v10187_v14  ;;  %v16654_v30 = vpop.f32.mrf.mxu1  ;;  %11694 = vmatprep.subr.mxu0 %v10219_v57  ;;  %v10218_v14 = vld [vmem:[#allocation8 + $0x190] sm:$0xff] }
 0x81f   : > { %11660 = vmatpush3.msra.mxu1 %v10171_v9  ;;  %11695 = vmatpush3.msra.mxu0 %v10203_v28  ;;  %v10409_v63 = vadd.f32 %v16644_v22, %v16654_v30 }
 0x820   : > { %11661 = vmatprep.subr.mxu1 %v10186_v7  ;;  %11696 = vmatprep.subr.mxu0 %v10218_v14 }
 0x821   : > { %11662 = vmatpush3.msra.mxu1 %v10170_v34  ;;  %v10202_v34 = vld [vmem:[#allocation8 + $0x110] sm:$0xff] }
 0x822   : > { %11663 = vmatprep.subr.mxu1 %v10185_v2  ;;  %v10401_v2 = vadd.f32 %v16634_v42, %v16642_v60  ;;  %11697 = vmatpush3.msra.mxu0 %v10202_v34  ;;  %v10160_v60 = vld [vmem:[#allocation7 + $0x40] sm:$0xff] }
 0x823   : > { %11664 = vmatpush3.msra.mxu1 %v10169_v18 }
 0x824   : > { %11665 = vmatprep.subr.mxu1 %v10184_v58  ;;  %v10217_v58 = vld [vmem:[#allocation8 + $0x188] sm:$0xff] }
 0x825   : > { %11666 = vmatpush3.msra.mxu1 %v10168_v6  ;;  %v10201_v6 = vld [vmem:[#allocation8 + $0x108] sm:$0xff]  ;;  %11698 = vmatprep.subr.mxu0 %v10217_v58 }
 0x826   : > { %11699 = vmatpush3.msra.mxu0 %v10201_v6 }
 0x827   : > { %11700 = vmatprep.subr.mxu0 %v10216_v35 }
 0x828   : > { %11701 = vmatpush3.msra.mxu0 %v10200_v44 }
 0x82e   : > { %v16648_v20 = vpop.f32.mrf.mxu0 }
 0x830   : > { %v16652_v8 = vpop.f32.mrf.mxu0 }
 0x833   : > { %v10572_v37 = vpop.f32.mrf.mxu0 }
 0x835   : > { %v10574_v55 = vpop.f32.mrf.mxu0 }
 0x838   : > { %v10578_v62 = vpop.f32.mrf.mxu0 }
 0x83a   : > { %v10580_v48 = vpop.f32.mrf.mxu0 }
 0x83d   : > { %v10584_v16 = vpop.f32.mrf.mxu0 }
 0x83f   : > { %v10586_v59 = vpop.f32.mrf.mxu0 }
 0x854   : > { %v10477_v11 = vpop.f32.mrf.mxu1 }
 0x855   : > { %v10478_v9 = vadd.f32 %v10477_v11, %v10389_v27 }
 0x856   : > { %v10479_v56 = vpop.f32.mrf.mxu1 }
 0x857   : > { %v10480_v18 = vadd.f32 %v10479_v56, %v10391_v61  ;;  %v10567_v19 = vadd.f32 %v16648_v20, %v10478_v9  ;;  %v10161_v20 = vld [vmem:[#allocation7 + $0x48] sm:$0xff] }
 0x859   : > { %v10569_v10 = vadd.f32 %v16652_v8, %v10480_v18  ;;  %v10945_v13 = vmul.f32 %v10567_v19, %v10152_v24 }
 0x85a   : > { %v10483_v40 = vpop.f32.mrf.mxu1 }
 0x85b   : > { %v10484_v3 = vadd.f32 %v10483_v40, %v10395_v39  ;;  %v10946_v53 = vmul.f32 %v10569_v10, %v10153_v33 }
 0x85c   : > { %v10485_v52 = vpop.f32.mrf.mxu1 }
 0x85d   : > { %v10486_v7 = vadd.f32 %v10485_v52, %v10397_v31  ;;  %v10573_v17 = vadd.f32 %v10572_v37, %v10484_v3 }
 0x85f   : > { %v10489_v46 = vpop.f32.mrf.mxu1  ;;  %v10575_v49 = vadd.f32 %v10574_v55, %v10486_v7  ;;  %v10949_v38 = vmul.f32 %v10573_v17, %v10156_v21 }
 0x860   : > { %v10490_v47 = vadd.f32 %v10489_v46, %v10401_v2 }
 0x861   : > { %v10491_v42 = vpop.f32.mrf.mxu1  ;;  %v10950_v12 = vmul.f32 %v10575_v49, %v10157_v0  ;;  %v10961_v37 = vadd.f32 %v10949_v38, %v10945_v13 }
 0x862   : > { %v10579_v54 = vadd.f32 %v10578_v62, %v10490_v47  ;;  %v10492_v51 = vadd.f32 %v10491_v42, %v10403_v5 }
 0x863   : > { %v10970_v23 = vadd.f32 %v10950_v12, %v10946_v53 }
 0x864   : > { %v10581_v41 = vadd.f32 %v10580_v48, %v10492_v51  ;;  %v10495_v1 = vpop.f32.mrf.mxu1  ;;  %v10953_v8 = vmul.f32 %v10579_v54, %v10160_v60 }
 0x865   : > { %v10496_v4 = vadd.f32 %v10495_v1, %v10407_v36 }
 0x866   : > { %v10497_v15 = vpop.f32.mrf.mxu1  ;;  %v10954_v25 = vmul.f32 %v10581_v41, %v10161_v20  ;;  %v10962_v56 = vadd.f32 %v10961_v37, %v10953_v8 }
 0x867   : > { %v10585_v11 = vadd.f32 %v10584_v16, %v10496_v4  ;;  %v10498_v45 = vadd.f32 %v10497_v15, %v10409_v63  ;;  %v10158_v15 = vld [vmem:[#allocation7 + $0x30] sm:$0xff] }
 0x868   : > { %v10971_v26 = vadd.f32 %v10970_v23, %v10954_v25 }
 0x869   : > { %v10957_v22 = vmul.f32 %v10585_v11, %v10164_v50  ;;  %v10587_v30 = vadd.f32 %v10586_v59, %v10498_v45  ;;  %v10154_v45 = vld [vmem:[#allocation7 + $0x10] sm:$0xff] }
 0x86b   : > { %v10963_v55 = vadd.f32 %v10962_v56, %v10957_v22  ;;  %v10958_v32 = vmul.f32 %v10587_v30, %v10165_v29  ;;  %v10159_v56 = vld [vmem:[#allocation7 + $0x38] sm:$0xff]  ;;  %v10162_v22 = vld [vmem:[#allocation7 + $0x50] sm:$0xff] }
 0x86d   : > { %v10964_v39 = vrot.slane %v10963_v55, 4  ;;  %v10972_v43 = vadd.f32 %v10971_v26, %v10958_v32 }
 0x86f   : > { %v10965_v40 = vadd.f32 %v10964_v39, %v10963_v55  ;;  %v10973_v57 = vrot.slane %v10972_v43, 4 }
 0x871   : > { %v10966_v27 = vrot.slane %v10965_v40, 2  ;;  %v10974_v31 = vadd.f32 %v10973_v57, %v10972_v43  ;;  %v10155_v57 = vld [vmem:[#allocation7 + $0x18] sm:$0xff] }
 0x873   : > { %v10967_v3 = vadd.f32 %v10966_v27, %v10965_v40  ;;  %v10975_v28 = vrot.slane %v10974_v31, 2  ;;  %v10163_v27 = vld [vmem:[#allocation7 + $0x58] sm:$0xff] }
 0x875   : > { %v10976_v61 = vadd.f32 %v10975_v28, %v10974_v31  ;;  %v10968_v62 = vrot.slane %v10967_v3, 1  ;;  %v10655_v7 = vpop.f32.mrf.mxu0 }
 0x877   : > { %v10977_v52 = vrot.slane %v10976_v61, 1  ;;  %v10969_v9 = vadd.f32 %v10968_v62, %v10967_v3  ;;  %v10657_v34 = vpop.f32.mrf.mxu0 }
 0x879   : > { %v10978_v14 = vadd.f32 %v10977_v52, %v10976_v61 }
 0x87b   : > { %11061 = vmatprep.mubr.f32.mxu1 %v10978_v14  ;;  %v10661_v18 = vpop.f32.mrf.mxu0  ;;  %v10166_v14 = vld [vmem:[#allocation7 + $0x70] sm:$0xff] }
 0x87c   : > { %11062 = vmatmul.mubr.f32.vlgmr.msra.gmra.mxu1 %v10969_v9 }
 0x87d   : > { %v10663_v6 = vpop.f32.mrf.mxu0 }
 0x880   : > { %v10667_v17 = vpop.f32.mrf.mxu0 }
 0x882   : > { %v10669_v44 = vpop.f32.mrf.mxu0 }
 0x885   : > { %v10673_v48 = vpop.f32.mrf.mxu0 }
 0x887   : > { %v10675_v47 = vpop.f32.mrf.mxu0 }
 0x89c   : > { %v10744_v2 = vpop.f32.mrf.mxu1 }
 0x89d   : > { %v10745_v0 = vadd.f32 %v10744_v2, %v10655_v7 }
 0x89e   : > { %v10746_v58 = vpop.f32.mrf.mxu1 }
 0x89f   : > { %v10747_v16 = vadd.f32 %v10746_v58, %v10657_v34  ;;  %v10167_v58 = vld [vmem:[#allocation7 + $0x78] sm:$0xff] }
 0x8a2   : > { %v10750_v35 = vpop.f32.mrf.mxu1 }
 0x8a3   : > { %v10751_v10 = vadd.f32 %v10750_v35, %v10661_v18 }
 0x8a4   : > { %v10752_v46 = vpop.f32.mrf.mxu1 }
 0x8a5   : > { %v10753_v51 = vadd.f32 %v10752_v46, %v10663_v6 }
 0x8a7   : > { %v10756_v5 = vpop.f32.mrf.mxu1 }
 0x8a8   : > { %v10757_v20 = vadd.f32 %v10756_v5, %v10667_v17 }
 0x8a9   : > { %v10758_v21 = vpop.f32.mrf.mxu1 }
 0x8aa   : > { %v10759_v12 = vadd.f32 %v10758_v21, %v10669_v44 }
 0x8ac   : > { %v10762_v19 = vpop.f32.mrf.mxu1 }
 0x8ad   : > { %v10763_v11 = vadd.f32 %v10762_v19, %v10673_v48 }
 0x8ae   : > { %v10764_v42 = vpop.f32.mrf.mxu1 }
 0x8af   : > { %v10765_v23 = vadd.f32 %v10764_v42, %v10675_v47 }
 0x8bd   : > { %v10833_v49 = vpop.f32.mrf.mxu0 }
 0x8be   : > { %v10834_v33 = vadd.f32 %v10833_v49, %v10745_v0 }
 0x8bf   : > { %v10835_v24 = vpop.f32.mrf.mxu0 }
 0x8c0   : > { %v10922_v60 = vpop.f32.mrf.mxu1  ;;  %v10836_v8 = vadd.f32 %v10835_v24, %v10747_v16 }
 0x8c1   : > { %v10839_v54 = vpop.f32.mrf.mxu0  ;;  %v10923_v50 = vadd.f32 %v10922_v60, %v10834_v33 }
 0x8c2   : > { %v10840_v36 = vadd.f32 %v10839_v54, %v10751_v10  ;;  %v10924_v38 = vpop.f32.mrf.mxu1 }
 0x8c3   : > { %v10841_v63 = vpop.f32.mrf.mxu0  ;;  %v10925_v55 = vadd.f32 %v10924_v38, %v10836_v8  ;;  %v10947_v40 = vmul.f32 %v10923_v50, %v10154_v45 }
 0x8c4   : > { %v10842_v41 = vadd.f32 %v10841_v63, %v10753_v51  ;;  %v10928_v1 = vpop.f32.mrf.mxu1 }
 0x8c5   : > { %v10845_v13 = vpop.f32.mrf.mxu0  ;;  %v10929_v4 = vadd.f32 %v10928_v1, %v10840_v36  ;;  %v10948_v7 = vmul.f32 %v10925_v55, %v10155_v57 }
 0x8c6   : > { %v10846_v53 = vadd.f32 %v10845_v13, %v10757_v20  ;;  %v10930_v37 = vpop.f32.mrf.mxu1 }
 0x8c7   : > { %v10847_v25 = vpop.f32.mrf.mxu0  ;;  %v10931_v59 = vadd.f32 %v10930_v37, %v10842_v41  ;;  %v10951_v32 = vmul.f32 %v10929_v4, %v10158_v15  ;;  %v10232_v41 = vld [vmem:[#allocation10] sm:$0x1] }
 0x8c8   : > { %v10848_v29 = vadd.f32 %v10847_v25, %v10759_v12  ;;  %v10934_v30 = vpop.f32.mrf.mxu1 }
 0x8c9   : > { %v10851_v26 = vpop.f32.mrf.mxu0  ;;  %v10935_v39 = vadd.f32 %v10934_v30, %v10846_v53  ;;  %v10952_v28 = vmul.f32 %v10931_v59, %v10159_v56  ;;  %v10979_v34 = vadd.f32 %v10951_v32, %v10947_v40 }
 0x8ca   : > { %v10852_v43 = vadd.f32 %v10851_v26, %v10763_v11  ;;  %v10936_v31 = vpop.f32.mrf.mxu1 }
 0x8cb   : > { %v10853_v3 = vpop.f32.mrf.mxu0  ;;  %v10955_v61 = vmul.f32 %v10935_v39, %v10162_v22  ;;  %v10937_v62 = vadd.f32 %v10936_v31, %v10848_v29  ;;  %v10988_v35 = vadd.f32 %v10952_v28, %v10948_v7 }
 0x8cc   : > { %v10854_v52 = vadd.f32 %v10853_v3, %v10765_v23  ;;  %v10940_v9 = vpop.f32.mrf.mxu1 }
 0x8cd   : > { %v10956_v2 = vmul.f32 %v10937_v62, %v10163_v27  ;;  %v10941_v18 = vadd.f32 %v10940_v9, %v10852_v43  ;;  %v10980_v17 = vadd.f32 %v10979_v34, %v10955_v61 }
 0x8ce   : > { %v10942_v6 = vpop.f32.mrf.mxu1 }
 0x8cf   : > { %v10959_v46 = vmul.f32 %v10941_v18, %v10166_v14  ;;  %v10943_v44 = vadd.f32 %v10942_v6, %v10854_v52  ;;  %v10989_v5 = vadd.f32 %v10988_v35, %v10956_v2 }
 0x8d1   : > { %v10981_v48 = vadd.f32 %v10980_v17, %v10959_v46  ;;  %v10960_v21 = vmul.f32 %v10943_v44, %v10167_v58 }
 0x8d3   : > { %v10982_v47 = vrot.slane %v10981_v48, 4  ;;  %v10990_v19 = vadd.f32 %v10989_v5, %v10960_v21 }
 0x8d5   : > { %v10983_v49 = vadd.f32 %v10982_v47, %v10981_v48  ;;  %v10991_v42 = vrot.slane %v10990_v19, 4 }
 0x8d7   : > { %v10984_v24 = vrot.slane %v10983_v49, 2  ;;  %v10992_v10 = vadd.f32 %v10991_v42, %v10990_v19 }
 0x8d9   : > { %v10985_v0 = vadd.f32 %v10984_v24, %v10983_v49  ;;  %v10993_v60 = vrot.slane %v10992_v10, 2 }
 0x8db   : > { %v10994_v54 = vadd.f32 %v10993_v60, %v10992_v10  ;;  %v10986_v51 = vrot.slane %v10985_v0, 1 }
 0x8dd   : > { %v10995_v36 = vrot.slane %v10994_v54, 1  ;;  %v10987_v38 = vadd.f32 %v10986_v51, %v10985_v0 }
 0x8df   : > { %v10996_v33 = vadd.f32 %v10995_v36, %v10994_v54 }
 0x8e1   : > { %11131 = vmatprep.mubr.f32.mxu0 %v10996_v33 }
 0x8e2   : > { %11132 = vmatmul.mubr.f32.vlgmr.msra.gmra.mxu0 %v10987_v38 }
 0x93c   : > { %v11667_v63 = vpop.f32.mrf.mxu1 }
 0x93e   : > { %v11668_v16 = vpop.f32.mrf.mxu1 }
 0x93f   : > { %v11669_v20 = vadd.f32 %v11668_v16, %v11667_v63 }
 0x941   : > { %v11064_v12 = vadd.f32 %v11669_v20, %v10232_v41 }
 0x9a2   : > { %v11702_v1 = vpop.f32.mrf.mxu0 }
 0x9a4   : > { %v11703_v13 = vpop.f32.mrf.mxu0 }
 0x9a5   : > { %v11704_v8 = vadd.f32 %v11703_v13, %v11702_v1 }
 0x9a7   : > { %v11134_v4 = vadd.f32 %v11704_v8, %v11064_v12 }
 0x9a9   : > { %v11138_v53 = vsel %vm11137_vm10, %v11134_v4, -inf }
 0x9aa   : > { %11139 = vmax.xlane.f32.xlu1 %v11138_v53 }
 0xa33   : > { %v11140_v50 = vpop.xlane.xlu1 %11139 }
 0xa34   : > { %v11141_v15 = vsub.f32 %v11134_v4, %v11140_v50 }
 0xa36   : > { %v11142_v37 = vmul.f32 1.442695, %v11141_v15 }
 0xa38   : > { %11964 = vpow2.f32 %v11142_v37 }
 0xa45   : > { %v11965_v25 = vpop.eup %11964 }
 0xa46   : > { %v11144_v11 = vsel %vm11137_vm10, %v11965_v25, 0.0 }
 0xa47   : > { %11145 = vadd.xlane.f32.xlu0 %v11144_v11 }
 0xad0   : > { %v11146_v45 = vpop.xlane.xlu0 %11145 }
 0xad1   : > { %11966 = vrcp.f32 %v11146_v45 }
 0xade   : > { %v11967_v59 = vpop.eup %11966 }
 0xadf   : > { %v11148_v29 = vmul.f32 %v11967_v59, %v11965_v25 }
 0xae1   : > { %11149 = vst [vmem:[%s475_s29] sm:$0x1] %v11148_v29 }
 0xae2   : > { %12111 = shalt.err (!%p12108_p8)
}
 0xae3   : > { %s12112_s23 = scalar_lea.hbm %s11161_s27, 16  ;;  %s12116_s28 = scalar_lea.hbm %s16719_s12, 32 }
 0xae4   : > { %p12113_p0 = scmp.ne.s32.totalorder %s11161_s27, %s12112_s23  ;;  %p12117_p1 = scmp.lt.s32.totalorder %s11161_s27, %s16719_s12 }
 0xae5   : > { %p12118_p10 = scmp.lt.s32.totalorder %s12116_s28, %s12112_s23 }
 0xae6   : > { %p12114_p11 = pnand %p12113_p0, %p12313_p5 }
 0xae7   : > { %p12119_p9 = por %p12118_p10, %p12117_p1 }
 0xae8   : > { %p12115_p3 = pneg %p12114_p11 }
 0xaea   : > { %p12120_p12 = pnand %p12119_p9, %p12115_p3 }
 0xaec   : > { %12123 = shalt.err (!%p12120_p12)
}
 0xaed   : > { %11860 = dma.vmem_to_hbm [thread:$0]  (%p12313_p5), %s11164_s19, 16, %s11161_s27, %s11151_s14  }
 0xaee PF: > { %s16989_s17 = sld [smem:[#allocation16_spill]]  ;;  %p11892_p13 = scmp.ge.s32.totalorder %s12170_s24, 2 }
 0xaf0   : > { %p11879_p2 = pnand %p11892_p13, %p12317_p6 }
 0xaf2   : > { %p11880_p4 = pneg %p11879_p2 }
 0xaf4   : > { %s11175_s15 = sand.u32 1, %s16989_s17  }
 0xaf5   : > { %s11176_s18 = scalar_lea.sflag [#allocation4], %s11175_s15 }
 0xaf6   : > { %12153 = dma.done.wait (%p11880_p4), %s11176_s18, 16  }
 0xaf7   : > { %12155 = vsyncadd (%p11880_p4), %s11176_s18, 4294967280  ;;  %s16991_s24 = sld [smem:[#allocation18_spill]]  ;;  %s16994_s21 = smov %s12162_s22 }
 0xaf8   : > { %s16992_s25 = sld [smem:[#allocation17_spill]] }
 0xaf9   : > { %s16993_s23 = sld [smem:[#allocation19_spill]] }
 0xafd   : > { %p25_p7 = scmp.ge.s32.totalorder %s16991_s24, 4  }
 0xafe   : > { %s16995_s22 = smov %s16992_s25 }
 0xaff   :  { %27 = sbr.rel (!%p25_p7) target bundleno = 6 (0x6), region = 174 }
 0xb04   :  { %11180 = vsyncpa [#allocation3], 1 }
 0xb05   :  { %11182 = vsyncpa [#allocation3 + $0x1], 1 }
 0xb06   :  { %11183 = vsyncpa [#allocation6], 1 }
 0xb07   :  { %11184 = vsyncpa [#allocation9], 1 }
 0xb08   :  { %11185 = vsyncpa [#allocation4], 1 }
 0xb09   :  { %11187 = vsyncpa [#allocation4 + $0x1], 1 }

</bundles_post_ra>
